<compile_context>
chip_gen: v7x
topology: tpu7x:2x2x1
jax: 0.10.0
libtpu: 0.0.40
codegen_flags: <defaults>
</compile_context>

<pallas_src>
import functools

import jax
import jax.numpy as jnp
import numpy as np
from jax.experimental import pallas as pl
from jax.experimental.pallas import tpu as pltpu

_LANE = 128
_SUBLANE = 8


def _round_up(n, m):
    return (n + m - 1) // m * m


def _erf(x):
    # Abramowitz & Stegun 7.1.26 polynomial erf (|err| < 1.5e-7); uses only exp.
    # TODO(synk): PyTorch nn.GELU() uses exact erf; Mosaic has no native erf.
    a1, a2, a3, a4, a5 = 0.254829592, -0.284496736, 1.421413741, -1.453152027, 1.061405429
    p = 0.3275911
    ax = jnp.abs(x)
    t = 1.0 / (1.0 + p * ax)
    poly = ((((a5 * t + a4) * t + a3) * t + a2) * t + a1) * t
    y = 1.0 - poly * jnp.exp(-ax * ax)
    return jnp.where(x >= 0, y, -y)


def _gelu(x):
    return 0.5 * x * (1.0 + _erf(x * 0.7071067811865476))


def _make_kernel(H2, W2, B, Ci, Co, in_ch, out_ch, pad_rows):
    P = H2 * W2
    R = B * P
    f32 = jnp.float32

    def kernel(x_ref, emb_ref, bmask_ref, w1a_ref, w1b_ref, w2a_ref, w2b_ref,
               gn1_ref, gn2_ref, o_ref, shbuf):
        cmax = shbuf.shape[1]

        # Zero the staging buffer's top/bottom halo once per step: halo reads are
        # masked to zero but must hold finite values.
        shbuf[0:pad_rows, :] = jnp.zeros((pad_rows, cmax), f32)
        shbuf[pad_rows + R:, :] = jnp.zeros((pad_rows, cmax), f32)

        # Precomputed tap-validity masks (1.0 = neighbour in range), each (R, 1):
        #   0: h-1 valid   1: h+1 valid   2: w-1 valid   3: w+1 valid
        mh = {-1: bmask_ref[0], 0: None, 1: bmask_ref[1]}
        mw = {-1: bmask_ref[2], 0: None, 1: bmask_ref[3]}
        tap_mask = {}
        for dh in (-1, 0, 1):
            for dw in (-1, 0, 1):
                m1, m2 = mh[dh], mw[dw]
                if m1 is None:
                    tap_mask[(dh, dw)] = m2
                elif m2 is None:
                    tap_mask[(dh, dw)] = m1
                else:
                    tap_mask[(dh, dw)] = m1 * m2

        # Real-channel lane masks; padded lanes stay exactly 0 end to end.
        ci_mask = (jax.lax.broadcasted_iota(jnp.int32, (1, Ci), 1) < in_ch).astype(f32)
        co_mask = (jax.lax.broadcasted_iota(jnp.int32, (1, Co), 1) < out_ch).astype(f32)

        def conv3x3(a, w_ref):
            # 3x3 "same" conv (padding=1, bias=False) as 9 shifted-tap matmuls.
            cin = a.shape[1]
            shbuf[pad_rows:pad_rows + R, :cin] = a          # one aligned store
            acc = None
            for dh in (-1, 0, 1):
                for dw in (-1, 0, 1):
                    k = (dh + 1) * 3 + (dw + 1)
                    s = dh * W2 + dw
                    if s == 0:
                        tap = a
                    else:
                        tap = shbuf[pad_rows + s:pad_rows + s + R, :cin]
                    m = tap_mask[(dh, dw)]
                    if m is not None:
                        tap = tap * m
                    part = jnp.dot(tap, w_ref[k], preferred_element_type=f32)
                    acc = part if acc is None else acc + part
            return acc

        def group_norm(a, gamma, beta, n_real, cmask):
            # GroupNorm(num_groups=1): per-sample stats over the real C*H2*W2
            # elements (two-pass, padded lanes masked), fused scale/shift.
            inv_cnt = 1.0 / float(P * n_real)
            outs = []
            for b in range(B):
                ab = a[b * P:(b + 1) * P, :]
                mean = jnp.sum(ab) * inv_cnt
                d = (ab - mean) * cmask
                var = jnp.sum(d * d) * inv_cnt
                scale = gamma * jax.lax.rsqrt(var + 1e-5)   # (1, C)
                outs.append(d * scale + beta)
            return outs[0] if B == 1 else jnp.concatenate(outs, axis=0)

        # ---- MaxPool2d(2): max of the 4 pre-split 2x2 taps, samples stacked ----
        pooled = [jnp.maximum(jnp.maximum(x_ref[0, 0, b], x_ref[0, 1, b]),
                              jnp.maximum(x_ref[1, 0, b], x_ref[1, 1, b]))
                  for b in range(B)]
        pooled = pooled[0] if B == 1 else jnp.concatenate(pooled, axis=0)   # (R, Ci)

        # ---- DoubleConv(in_ch, in_ch, residual=True) ----
        h = conv3x3(pooled, w1a_ref)
        h = group_norm(h, gn1_ref[0:1, :], gn1_ref[1:2, :], in_ch, ci_mask)
        h = _gelu(h)
        h = conv3x3(h, w1b_ref)
        h = group_norm(h, gn1_ref[2:3, :], gn1_ref[3:4, :], in_ch, ci_mask)
        act = pooled + h

        # ---- DoubleConv(in_ch, out_ch) ----
        h = conv3x3(act, w2a_ref)
        h = group_norm(h, gn2_ref[0:1, :], gn2_ref[1:2, :], out_ch, co_mask)
        h = _gelu(h)
        h = conv3x3(h, w2b_ref)
        act = group_norm(h, gn2_ref[2:3, :], gn2_ref[3:4, :], out_ch, co_mask)

        # ---- + precomputed Linear(SiLU(t)), broadcast over the P pixels ----
        for b in range(B):
            o_ref[b] = act[b * P:(b + 1) * P, :] + emb_ref[b]

    return kernel


@functools.partial(jax.jit, static_argnums=(3, 4, 5, 6))
def downsample_pallas(x, t, params, in_ch, out_ch, embed_dim, block_batch=None):
    """DownSample(in_ch, out_ch, embed_dim) forward: x (N,C,H,W), t (N,embed_dim)."""
    N, C, H, W = x.shape
    assert C == in_ch and H % 2 == 0 and W % 2 == 0
    assert t.shape == (N, embed_dim)
    H2, W2 = H // 2, W // 2
    P = H2 * W2
    assert P % _SUBLANE == 0
    Ci = _round_up(in_ch, _LANE)     # first DoubleConv runs at in_ch, not max(in,out)
    Co = _round_up(out_ch, _LANE)
    cmax = max(Ci, Co)
    pad_rows = _round_up(W2 + 1, _SUBLANE)

    if block_batch is None:
        # Enough activation rows per grid step to fill the MXU (~>=256) while
        # keeping per-step VMEM modest; must divide N so the grid is exact.
        target = min(N, max(1, -(-256 // P)))
        block_batch = 1
        for b in range(target, 0, -1):
            if N % b == 0:
                block_batch = b
                break
    B = block_batch
    assert N % B == 0
    R = B * P
    f32 = jnp.float32

    # ---- glue: NCHW -> (2, 2, N, P, Ci); channels zero-padded to the lane width ----
    x_nhwc = jnp.transpose(x, (0, 2, 3, 1)).astype(f32)
    x_nhwc = jnp.pad(x_nhwc, ((0, 0), (0, 0), (0, 0), (0, Ci - in_ch)))
    x_r = (x_nhwc.reshape(N, H2, 2, W2, 2, Ci)
                 .transpose(2, 4, 0, 1, 3, 5)
                 .reshape(2, 2, N, P, Ci))

    # ---- Linear(SiLU(t)) precomputed here; the kernel only broadcasts it ----
    tt = t.astype(f32)
    emb = jax.nn.silu(tt) @ params["lin_w"].astype(f32) + params["lin_b"].astype(f32)
    emb_p = jnp.zeros((N, 1, Co), f32).at[:, 0, :out_ch].set(emb)

    # ---- conv weights (HWIO) -> (9, Cin_pad, Cout_pad), zero padded per conv ----
    def pack_conv(w_hwio, ci_p, co_p):
        kh, kw, ci, co = w_hwio.shape
        w = jnp.zeros((kh * kw, ci_p, co_p), f32)
        return w.at[:, :ci, :co].set(w_hwio.reshape(kh * kw, ci, co).astype(f32))

    w1a = pack_conv(params["w1a"], Ci, Ci)
    w1b = pack_conv(params["w1b"], Ci, Ci)
    w2a = pack_conv(params["w2a"], Ci, Co)
    w2b = pack_conv(params["w2b"], Co, Co)

    def pad_vec(v, n):
        return jnp.zeros((n,), f32).at[:v.shape[0]].set(v.astype(f32))

    gn1 = jnp.stack([pad_vec(params["g1a"], Ci), pad_vec(params["b1a"], Ci),
                     pad_vec(params["g1b"], Ci), pad_vec(params["b1b"], Ci)])
    gn2 = jnp.stack([pad_vec(params["g2a"], Co), pad_vec(params["b2a"], Co),
                     pad_vec(params["g2b"], Co), pad_vec(params["b2b"], Co)])

    # ---- compile-time boundary masks for the shifted-tap conv (host numpy) ----
    pp = np.arange(R) % P
    hh, ww = pp // W2, pp % W2
    bmask = jnp.asarray(np.stack([hh >= 1, hh < H2 - 1,
                                  ww >= 1, ww < W2 - 1]).astype(np.float32)[:, :, None])

    kernel = _make_kernel(H2, W2, B, Ci, Co, in_ch, out_ch, pad_rows)

    out = pl.pallas_call(
        kernel,
        out_shape=jax.ShapeDtypeStruct((N, P, Co), f32),
        grid=(N // B,),
        in_specs=[
            pl.BlockSpec((2, 2, B, P, Ci), lambda n: (0, 0, n, 0, 0)),
            pl.BlockSpec((B, 1, Co), lambda n: (n, 0, 0)),
            pl.BlockSpec((4, R, 1), lambda n: (0, 0, 0)),
            pl.BlockSpec((9, Ci, Ci), lambda n: (0, 0, 0)),
            pl.BlockSpec((9, Ci, Ci), lambda n: (0, 0, 0)),
            pl.BlockSpec((9, Ci, Co), lambda n: (0, 0, 0)),
            pl.BlockSpec((9, Co, Co), lambda n: (0, 0, 0)),
            pl.BlockSpec((4, Ci), lambda n: (0, 0)),
            pl.BlockSpec((4, Co), lambda n: (0, 0)),
        ],
        out_specs=pl.BlockSpec((B, P, Co), lambda n: (n, 0, 0)),
        scratch_shapes=[pltpu.VMEM((R + 2 * pad_rows, cmax), jnp.float32)],
        # Batch blocks are independent -> "parallel" lets v7x's 2 cores split them.
        compiler_params=pltpu.CompilerParams(
            dimension_semantics=("parallel",),
            vmem_limit_bytes=32 * 1024 * 1024),
    )(x_r, emb_p, bmask, w1a, w1b, w2a, w2b, gn1, gn2)

    # glue: (N, P, Co) -> NCHW with the real out_ch channels.
    out = out.reshape(N, H2, W2, Co)[..., :out_ch]
    return jnp.transpose(out, (0, 3, 1, 2))


def downsample_reference(x, t, params):
    """Pure-JAX/XLA reference of the PyTorch DownSample.forward (f32)."""
    N, C, H, W = x.shape
    x = x.astype(jnp.float32)
    xp = jnp.max(x.reshape(N, C, H // 2, 2, W // 2, 2), axis=(3, 5))

    def conv3x3(a, w_hwio):
        return jax.lax.conv_general_dilated(
            a, w_hwio.astype(jnp.float32), window_strides=(1, 1),
            padding=((1, 1), (1, 1)),
            dimension_numbers=("NCHW", "HWIO", "NCHW"),
            precision=jax.lax.Precision.HIGHEST)

    def group_norm(a, gamma, beta):
        mean = jnp.mean(a, axis=(1, 2, 3), keepdims=True)
        var = jnp.mean(jnp.square(a - mean), axis=(1, 2, 3), keepdims=True)
        an = (a - mean) * jax.lax.rsqrt(var + 1e-5)
        return an * gamma[None, :, None, None] + beta[None, :, None, None]

    def gelu(a):
        return jax.nn.gelu(a, approximate=False)

    h = xp
    y = group_norm(conv3x3(h, params["w1a"]), params["g1a"], params["b1a"])
    y = gelu(y)
    y = group_norm(conv3x3(y, params["w1b"]), params["g1b"], params["b1b"])
    h = h + y
    y = group_norm(conv3x3(h, params["w2a"]), params["g2a"], params["b2a"])
    y = gelu(y)
    h = group_norm(conv3x3(y, params["w2b"]), params["g2b"], params["b2b"])
    emb = jax.nn.silu(t.astype(jnp.float32)) @ params["lin_w"] + params["lin_b"]
    return h + emb[:, :, None, None]


if __name__ == "__main__":
    N, in_ch, out_ch, H, W, embed_dim = 2, 4, 8, 16, 16, 32
    key = jax.random.PRNGKey(0)
    ks = jax.random.split(key, 16)
    params = {
        "w1a": 0.2 * jax.random.normal(ks[0], (3, 3, in_ch, in_ch), jnp.float32),
        "w1b": 0.2 * jax.random.normal(ks[1], (3, 3, in_ch, in_ch), jnp.float32),
        "w2a": 0.2 * jax.random.normal(ks[2], (3, 3, in_ch, out_ch), jnp.float32),
        "w2b": 0.2 * jax.random.normal(ks[3], (3, 3, out_ch, out_ch), jnp.float32),
        "g1a": 1.0 + 0.1 * jax.random.normal(ks[4], (in_ch,), jnp.float32),
        "b1a": 0.1 * jax.random.normal(ks[5], (in_ch,), jnp.float32),
        "g1b": 1.0 + 0.1 * jax.random.normal(ks[6], (in_ch,), jnp.float32),
        "b1b": 0.1 * jax.random.normal(ks[7], (in_ch,), jnp.float32),
        "g2a": 1.0 + 0.1 * jax.random.normal(ks[8], (out_ch,), jnp.float32),
        "b2a": 0.1 * jax.random.normal(ks[9], (out_ch,), jnp.float32),
        "g2b": 1.0 + 0.1 * jax.random.normal(ks[10], (out_ch,), jnp.float32),
        "b2b": 0.1 * jax.random.normal(ks[11], (out_ch,), jnp.float32),
        "lin_w": 0.2 * jax.random.normal(ks[12], (embed_dim, out_ch), jnp.float32),
        "lin_b": 0.1 * jax.random.normal(ks[13], (out_ch,), jnp.float32),
    }
    x = jax.random.normal(ks[14], (N, in_ch, H, W), jnp.float32)
    t = jax.random.normal(ks[15], (N, embed_dim), jnp.float32)

    y = downsample_pallas(x, t, params, in_ch, out_ch, embed_dim)
    y = jax.block_until_ready(y)
    assert y.shape == (N, out_ch, H // 2, W // 2)
    assert bool(jnp.all(jnp.isfinite(y)))

    # Structural-correctness check against a pure-JAX reference.  Tolerance is
    # loose enough to cover the erf polynomial and TPU matmul-pass rounding,
    # but far below any error a wrong tap/shift/mask/normalization would cause.
    y_ref = downsample_reference(x, t, params)
    err = float(jnp.max(jnp.abs(y - y_ref)))
    assert err < 5e-2, f"kernel/reference mismatch: max abs err = {err}"
    print("KERNEL_OK")
</pallas_src>

<mosaic_0001>
module attributes {stable_mosaic.version = 11 : i64} {
  func.func @kernel(%arg0: i32, %arg1: memref<2x2x2x64x128xf32, #tpu.memory_space<vmem>>, %arg2: memref<2x1x128xf32, #tpu.memory_space<vmem>>, %arg3: memref<4x128x1xf32, #tpu.memory_space<vmem>>, %arg4: memref<9x128x128xf32, #tpu.memory_space<vmem>>, %arg5: memref<9x128x128xf32, #tpu.memory_space<vmem>>, %arg6: memref<9x128x128xf32, #tpu.memory_space<vmem>>, %arg7: memref<9x128x128xf32, #tpu.memory_space<vmem>>, %arg8: memref<4x128xf32, #tpu.memory_space<vmem>>, %arg9: memref<4x128xf32, #tpu.memory_space<vmem>>, %arg10: memref<2x64x128xf32, #tpu.memory_space<vmem>>, %arg11: memref<160x128xf32, #tpu.memory_space<vmem>>) attributes {dimension_semantics = [#tpu.dimension_semantics<parallel>], iteration_bounds = array<i64: 1>, scalar_prefetch = 0 : i64, scratch_operands = 1 : i64, tpu.core_type = #tpu.core_type<tc>, window_params = [{transform_indices = @transform_0, window_bounds = array<i64: 2, 2, 2, 64, 128>}, {transform_indices = @transform_1, window_bounds = array<i64: 2, 1, 128>}, {pipeline_mode = #tpu.pipeline_mode<synchronous>, transform_indices = @transform_2, window_bounds = array<i64: 4, 128, 1>}, {pipeline_mode = #tpu.pipeline_mode<synchronous>, transform_indices = @transform_3, window_bounds = array<i64: 9, 128, 128>}, {pipeline_mode = #tpu.pipeline_mode<synchronous>, transform_indices = @transform_4, window_bounds = array<i64: 9, 128, 128>}, {pipeline_mode = #tpu.pipeline_mode<synchronous>, transform_indices = @transform_5, window_bounds = array<i64: 9, 128, 128>}, {pipeline_mode = #tpu.pipeline_mode<synchronous>, transform_indices = @transform_6, window_bounds = array<i64: 9, 128, 128>}, {pipeline_mode = #tpu.pipeline_mode<synchronous>, transform_indices = @transform_7, window_bounds = array<i64: 4, 128>}, {pipeline_mode = #tpu.pipeline_mode<synchronous>, transform_indices = @transform_8, window_bounds = array<i64: 4, 128>}, {transform_indices = @transform_9, window_bounds = array<i64: 2, 64, 128>}]} {
    %cst = arith.constant 0.000000e+00 : f32
    %0 = vector.broadcast %cst : f32 to vector<16x128xf32>
    %c0 = arith.constant 0 : index
    %c0_0 = arith.constant 0 : index
    %1 = vector.load %arg11[%c0, %c0_0] : memref<160x128xf32, #tpu.memory_space<vmem>>, vector<16x128xf32>
    tpu.vector_store %arg11[%c0, %c0_0], %0 {strides = array<i32>} : memref<160x128xf32, #tpu.memory_space<vmem>>, vector<16x128xf32>,
    %cst_1 = arith.constant 0.000000e+00 : f32
    %2 = vector.broadcast %cst_1 : f32 to vector<16x128xf32>
    %c144 = arith.constant 144 : index
    %c0_2 = arith.constant 0 : index
    %3 = vector.load %arg11[%c144, %c0_2] : memref<160x128xf32, #tpu.memory_space<vmem>>, vector<16x128xf32>
    tpu.vector_store %arg11[%c144, %c0_2], %2 {strides = array<i32>} : memref<160x128xf32, #tpu.memory_space<vmem>>, vector<16x128xf32>,
    %c0_3 = arith.constant 0 : index
    %c0_4 = arith.constant 0 : index
    %c0_5 = arith.constant 0 : index
    %4 = vector.load %arg3[%c0_3, %c0_4, %c0_5] : memref<4x128x1xf32, #tpu.memory_space<vmem>>, vector<1x128x1xf32>
    %5 = vector.shape_cast %4 : vector<1x128x1xf32> to vector<128x1xf32>
    %c1 = arith.constant 1 : index
    %c0_6 = arith.constant 0 : index
    %c0_7 = arith.constant 0 : index
    %6 = vector.load %arg3[%c1, %c0_6, %c0_7] : memref<4x128x1xf32, #tpu.memory_space<vmem>>, vector<1x128x1xf32>
    %7 = vector.shape_cast %6 : vector<1x128x1xf32> to vector<128x1xf32>
    %c2 = arith.constant 2 : index
    %c0_8 = arith.constant 0 : index
    %c0_9 = arith.constant 0 : index
    %8 = vector.load %arg3[%c2, %c0_8, %c0_9] : memref<4x128x1xf32, #tpu.memory_space<vmem>>, vector<1x128x1xf32>
    %9 = vector.shape_cast %8 : vector<1x128x1xf32> to vector<128x1xf32>
    %c3 = arith.constant 3 : index
    %c0_10 = arith.constant 0 : index
    %c0_11 = arith.constant 0 : index
    %10 = vector.load %arg3[%c3, %c0_10, %c0_11] : memref<4x128x1xf32, #tpu.memory_space<vmem>>, vector<1x128x1xf32>
    %11 = vector.shape_cast %10 : vector<1x128x1xf32> to vector<128x1xf32>
    %12 = arith.mulf %5, %9 : vector<128x1xf32>
    %13 = arith.mulf %5, %11 : vector<128x1xf32>
    %14 = arith.mulf %7, %9 : vector<128x1xf32>
    %15 = arith.mulf %7, %11 : vector<128x1xf32>
    %16 = tpu.iota {dimensions = array<i32: 1>} : vector<1x128xi32>
    %c4_i32 = arith.constant 4 : i32
    %17 = vector.broadcast %c4_i32 : i32 to vector<1x128xi32>
    %18 = arith.cmpi slt, %16, %17 : vector<1x128xi32>
    %19 = arith.extui %18 : vector<1x128xi1> to vector<1x128xi32>
    %20 = arith.sitofp %19 : vector<1x128xi32> to vector<1x128xf32>
    %21 = tpu.iota {dimensions = array<i32: 1>} : vector<1x128xi32>
    %c8_i32 = arith.constant 8 : i32
    %22 = vector.broadcast %c8_i32 : i32 to vector<1x128xi32>
    %23 = arith.cmpi slt, %21, %22 : vector<1x128xi32>
    %24 = arith.extui %23 : vector<1x128xi1> to vector<1x128xi32>
    %25 = arith.sitofp %24 : vector<1x128xi32> to vector<1x128xf32>
    %c0_12 = arith.constant 0 : index
    %c0_13 = arith.constant 0 : index
    %c0_14 = arith.constant 0 : index
    %c0_15 = arith.constant 0 : index
    %c0_16 = arith.constant 0 : index
    %26 = vector.load %arg1[%c0_12, %c0_13, %c0_14, %c0_15, %c0_16] : memref<2x2x2x64x128xf32, #tpu.memory_space<vmem>>, vector<1x1x1x64x128xf32>
    %27 = vector.shape_cast %26 : vector<1x1x1x64x128xf32> to vector<64x128xf32>
    %c0_17 = arith.constant 0 : index
    %c1_18 = arith.constant 1 : index
    %c0_19 = arith.constant 0 : index
    %c0_20 = arith.constant 0 : index
    %c0_21 = arith.constant 0 : index
    %28 = vector.load %arg1[%c0_17, %c1_18, %c0_19, %c0_20, %c0_21] : memref<2x2x2x64x128xf32, #tpu.memory_space<vmem>>, vector<1x1x1x64x128xf32>
    %29 = vector.shape_cast %28 : vector<1x1x1x64x128xf32> to vector<64x128xf32>
    %30 = arith.maximumf %27, %29 : vector<64x128xf32>
    %c1_22 = arith.constant 1 : index
    %c0_23 = arith.constant 0 : index
    %c0_24 = arith.constant 0 : index
    %c0_25 = arith.constant 0 : index
    %c0_26 = arith.constant 0 : index
    %31 = vector.load %arg1[%c1_22, %c0_23, %c0_24, %c0_25, %c0_26] : memref<2x2x2x64x128xf32, #tpu.memory_space<vmem>>, vector<1x1x1x64x128xf32>
    %32 = vector.shape_cast %31 : vector<1x1x1x64x128xf32> to vector<64x128xf32>
    %c1_27 = arith.constant 1 : index
    %c1_28 = arith.constant 1 : index
    %c0_29 = arith.constant 0 : index
    %c0_30 = arith.constant 0 : index
    %c0_31 = arith.constant 0 : index
    %33 = vector.load %arg1[%c1_27, %c1_28, %c0_29, %c0_30, %c0_31] : memref<2x2x2x64x128xf32, #tpu.memory_space<vmem>>, vector<1x1x1x64x128xf32>
    %34 = vector.shape_cast %33 : vector<1x1x1x64x128xf32> to vector<64x128xf32>
    %35 = arith.maximumf %32, %34 : vector<64x128xf32>
    %36 = arith.maximumf %30, %35 : vector<64x128xf32>
    %c0_32 = arith.constant 0 : index
    %c0_33 = arith.constant 0 : index
    %c1_34 = arith.constant 1 : index
    %c0_35 = arith.constant 0 : index
    %c0_36 = arith.constant 0 : index
    %37 = vector.load %arg1[%c0_32, %c0_33, %c1_34, %c0_35, %c0_36] : memref<2x2x2x64x128xf32, #tpu.memory_space<vmem>>, vector<1x1x1x64x128xf32>
    %38 = vector.shape_cast %37 : vector<1x1x1x64x128xf32> to vector<64x128xf32>
    %c0_37 = arith.constant 0 : index
    %c1_38 = arith.constant 1 : index
    %c1_39 = arith.constant 1 : index
    %c0_40 = arith.constant 0 : index
    %c0_41 = arith.constant 0 : index
    %39 = vector.load %arg1[%c0_37, %c1_38, %c1_39, %c0_40, %c0_41] : memref<2x2x2x64x128xf32, #tpu.memory_space<vmem>>, vector<1x1x1x64x128xf32>
    %40 = vector.shape_cast %39 : vector<1x1x1x64x128xf32> to vector<64x128xf32>
    %41 = arith.maximumf %38, %40 : vector<64x128xf32>
    %c1_42 = arith.constant 1 : index
    %c0_43 = arith.constant 0 : index
    %c1_44 = arith.constant 1 : index
    %c0_45 = arith.constant 0 : index
    %c0_46 = arith.constant 0 : index
    %42 = vector.load %arg1[%c1_42, %c0_43, %c1_44, %c0_45, %c0_46] : memref<2x2x2x64x128xf32, #tpu.memory_space<vmem>>, vector<1x1x1x64x128xf32>
    %43 = vector.shape_cast %42 : vector<1x1x1x64x128xf32> to vector<64x128xf32>
    %c1_47 = arith.constant 1 : index
    %c1_48 = arith.constant 1 : index
    %c1_49 = arith.constant 1 : index
    %c0_50 = arith.constant 0 : index
    %c0_51 = arith.constant 0 : index
    %44 = vector.load %arg1[%c1_47, %c1_48, %c1_49, %c0_50, %c0_51] : memref<2x2x2x64x128xf32, #tpu.memory_space<vmem>>, vector<1x1x1x64x128xf32>
    %45 = vector.shape_cast %44 : vector<1x1x1x64x128xf32> to vector<64x128xf32>
    %46 = arith.maximumf %43, %45 : vector<64x128xf32>
    %47 = arith.maximumf %41, %46 : vector<64x128xf32>
    %48 = tpu.concatenate %36, %47 in 0 : vector<64x128xf32>, vector<64x128xf32> -> vector<128x128xf32>
    %c16 = arith.constant 16 : index
    %c0_52 = arith.constant 0 : index
    %49 = vector.load %arg11[%c16, %c0_52] : memref<160x128xf32, #tpu.memory_space<vmem>>, vector<128x128xf32>
    tpu.vector_store %arg11[%c16, %c0_52], %48 {strides = array<i32>} : memref<160x128xf32, #tpu.memory_space<vmem>>, vector<128x128xf32>,
    %c7 = arith.constant 7 : index
    %c0_53 = arith.constant 0 : index
    %50 = vector.load %arg11[%c7, %c0_53] : memref<160x128xf32, #tpu.memory_space<vmem>>, vector<128x128xf32>
    %51 = vector.broadcast %12 : vector<128x1xf32> to vector<128x128xf32>
    %52 = arith.mulf %50, %51 : vector<128x128xf32>
    %c0_54 = arith.constant 0 : index
    %c0_55 = arith.constant 0 : index
    %c0_56 = arith.constant 0 : index
    %53 = vector.load %arg4[%c0_54, %c0_55, %c0_56] : memref<9x128x128xf32, #tpu.memory_space<vmem>>, vector<1x128x128xf32>
    %54 = vector.shape_cast %53 : vector<1x128x128xf32> to vector<128x128xf32>
    %cst_57 = arith.constant dense<0.000000e+00> : vector<128x128xf32>
    %55 = tpu.matmul %52, %54, %cst_57 {dimension_numbers = #tpu.dot_dimension_numbers<[1], [0], [0], [1], [0, 0, 1, 1], [], []>} : vector<128x128xf32>, vector<128x128xf32>, vector<128x128xf32> -> vector<128x128xf32>
    %c8 = arith.constant 8 : index
    %c0_58 = arith.constant 0 : index
    %56 = vector.load %arg11[%c8, %c0_58] : memref<160x128xf32, #tpu.memory_space<vmem>>, vector<128x128xf32>
    %57 = vector.broadcast %5 : vector<128x1xf32> to vector<128x128xf32>
    %58 = arith.mulf %56, %57 : vector<128x128xf32>
    %c1_59 = arith.constant 1 : index
    %c0_60 = arith.constant 0 : index
    %c0_61 = arith.constant 0 : index
    %59 = vector.load %arg4[%c1_59, %c0_60, %c0_61] : memref<9x128x128xf32, #tpu.memory_space<vmem>>, vector<1x128x128xf32>
    %60 = vector.shape_cast %59 : vector<1x128x128xf32> to vector<128x128xf32>
    %cst_62 = arith.constant dense<0.000000e+00> : vector<128x128xf32>
    %61 = tpu.matmul %58, %60, %cst_62 {dimension_numbers = #tpu.dot_dimension_numbers<[1], [0], [0], [1], [0, 0, 1, 1], [], []>} : vector<128x128xf32>, vector<128x128xf32>, vector<128x128xf32> -> vector<128x128xf32>
    %62 = arith.addf %55, %61 : vector<128x128xf32>
    %c9 = arith.constant 9 : index
    %c0_63 = arith.constant 0 : index
    %63 = vector.load %arg11[%c9, %c0_63] : memref<160x128xf32, #tpu.memory_space<vmem>>, vector<128x128xf32>
    %64 = vector.broadcast %13 : vector<128x1xf32> to vector<128x128xf32>
    %65 = arith.mulf %63, %64 : vector<128x128xf32>
    %c2_64 = arith.constant 2 : index
    %c0_65 = arith.constant 0 : index
    %c0_66 = arith.constant 0 : index
    %66 = vector.load %arg4[%c2_64, %c0_65, %c0_66] : memref<9x128x128xf32, #tpu.memory_space<vmem>>, vector<1x128x128xf32>
    %67 = vector.shape_cast %66 : vector<1x128x128xf32> to vector<128x128xf32>
    %cst_67 = arith.constant dense<0.000000e+00> : vector<128x128xf32>
    %68 = tpu.matmul %65, %67, %cst_67 {dimension_numbers = #tpu.dot_dimension_numbers<[1], [0], [0], [1], [0, 0, 1, 1], [], []>} : vector<128x128xf32>, vector<128x128xf32>, vector<128x128xf32> -> vector<128x128xf32>
    %69 = arith.addf %62, %68 : vector<128x128xf32>
    %c15 = arith.constant 15 : index
    %c0_68 = arith.constant 0 : index
    %70 = vector.load %arg11[%c15, %c0_68] : memref<160x128xf32, #tpu.memory_space<vmem>>, vector<128x128xf32>
    %71 = vector.broadcast %9 : vector<128x1xf32> to vector<128x128xf32>
    %72 = arith.mulf %70, %71 : vector<128x128xf32>
    %c3_69 = arith.constant 3 : index
    %c0_70 = arith.constant 0 : index
    %c0_71 = arith.constant 0 : index
    %73 = vector.load %arg4[%c3_69, %c0_70, %c0_71] : memref<9x128x128xf32, #tpu.memory_space<vmem>>, vector<1x128x128xf32>
    %74 = vector.shape_cast %73 : vector<1x128x128xf32> to vector<128x128xf32>
    %cst_72 = arith.constant dense<0.000000e+00> : vector<128x128xf32>
    %75 = tpu.matmul %72, %74, %cst_72 {dimension_numbers = #tpu.dot_dimension_numbers<[1], [0], [0], [1], [0, 0, 1, 1], [], []>} : vector<128x128xf32>, vector<128x128xf32>, vector<128x128xf32> -> vector<128x128xf32>
    %76 = arith.addf %69, %75 : vector<128x128xf32>
    %c4 = arith.constant 4 : index
    %c0_73 = arith.constant 0 : index
    %c0_74 = arith.constant 0 : index
    %77 = vector.load %arg4[%c4, %c0_73, %c0_74] : memref<9x128x128xf32, #tpu.memory_space<vmem>>, vector<1x128x128xf32>
    %78 = vector.shape_cast %77 : vector<1x128x128xf32> to vector<128x128xf32>
    %cst_75 = arith.constant dense<0.000000e+00> : vector<128x128xf32>
    %79 = tpu.matmul %48, %78, %cst_75 {dimension_numbers = #tpu.dot_dimension_numbers<[1], [0], [0], [1], [0, 0, 1, 1], [], []>} : vector<128x128xf32>, vector<128x128xf32>, vector<128x128xf32> -> vector<128x128xf32>
    %80 = arith.addf %76, %79 : vector<128x128xf32>
    %c17 = arith.constant 17 : index
    %c0_76 = arith.constant 0 : index
    %81 = vector.load %arg11[%c17, %c0_76] : memref<160x128xf32, #tpu.memory_space<vmem>>, vector<128x128xf32>
    %82 = vector.broadcast %11 : vector<128x1xf32> to vector<128x128xf32>
    %83 = arith.mulf %81, %82 : vector<128x128xf32>
    %c5 = arith.constant 5 : index
    %c0_77 = arith.constant 0 : index
    %c0_78 = arith.constant 0 : index
    %84 = vector.load %arg4[%c5, %c0_77, %c0_78] : memref<9x128x128xf32, #tpu.memory_space<vmem>>, vector<1x128x128xf32>
    %85 = vector.shape_cast %84 : vector<1x128x128xf32> to vector<128x128xf32>
    %cst_79 = arith.constant dense<0.000000e+00> : vector<128x128xf32>
    %86 = tpu.matmul %83, %85, %cst_79 {dimension_numbers = #tpu.dot_dimension_numbers<[1], [0], [0], [1], [0, 0, 1, 1], [], []>} : vector<128x128xf32>, vector<128x128xf32>, vector<128x128xf32> -> vector<128x128xf32>
    %87 = arith.addf %80, %86 : vector<128x128xf32>
    %c23 = arith.constant 23 : index
    %c0_80 = arith.constant 0 : index
    %88 = vector.load %arg11[%c23, %c0_80] : memref<160x128xf32, #tpu.memory_space<vmem>>, vector<128x128xf32>
    %89 = vector.broadcast %14 : vector<128x1xf32> to vector<128x128xf32>
    %90 = arith.mulf %88, %89 : vector<128x128xf32>
    %c6 = arith.constant 6 : index
    %c0_81 = arith.constant 0 : index
    %c0_82 = arith.constant 0 : index
    %91 = vector.load %arg4[%c6, %c0_81, %c0_82] : memref<9x128x128xf32, #tpu.memory_space<vmem>>, vector<1x128x128xf32>
    %92 = vector.shape_cast %91 : vector<1x128x128xf32> to vector<128x128xf32>
    %cst_83 = arith.constant dense<0.000000e+00> : vector<128x128xf32>
    %93 = tpu.matmul %90, %92, %cst_83 {dimension_numbers = #tpu.dot_dimension_numbers<[1], [0], [0], [1], [0, 0, 1, 1], [], []>} : vector<128x128xf32>, vector<128x128xf32>, vector<128x128xf32> -> vector<128x128xf32>
    %94 = arith.addf %87, %93 : vector<128x128xf32>
    %c24 = arith.constant 24 : index
    %c0_84 = arith.constant 0 : index
    %95 = vector.load %arg11[%c24, %c0_84] : memref<160x128xf32, #tpu.memory_space<vmem>>, vector<128x128xf32>
    %96 = vector.broadcast %7 : vector<128x1xf32> to vector<128x128xf32>
    %97 = arith.mulf %95, %96 : vector<128x128xf32>
    %c7_85 = arith.constant 7 : index
    %c0_86 = arith.constant 0 : index
    %c0_87 = arith.constant 0 : index
    %98 = vector.load %arg4[%c7_85, %c0_86, %c0_87] : memref<9x128x128xf32, #tpu.memory_space<vmem>>, vector<1x128x128xf32>
    %99 = vector.shape_cast %98 : vector<1x128x128xf32> to vector<128x128xf32>
    %cst_88 = arith.constant dense<0.000000e+00> : vector<128x128xf32>
    %100 = tpu.matmul %97, %99, %cst_88 {dimension_numbers = #tpu.dot_dimension_numbers<[1], [0], [0], [1], [0, 0, 1, 1], [], []>} : vector<128x128xf32>, vector<128x128xf32>, vector<128x128xf32> -> vector<128x128xf32>
    %101 = arith.addf %94, %100 : vector<128x128xf32>
    %c25 = arith.constant 25 : index
    %c0_89 = arith.constant 0 : index
    %102 = vector.load %arg11[%c25, %c0_89] : memref<160x128xf32, #tpu.memory_space<vmem>>, vector<128x128xf32>
    %103 = vector.broadcast %15 : vector<128x1xf32> to vector<128x128xf32>
    %104 = arith.mulf %102, %103 : vector<128x128xf32>
    %c8_90 = arith.constant 8 : index
    %c0_91 = arith.constant 0 : index
    %c0_92 = arith.constant 0 : index
    %105 = vector.load %arg4[%c8_90, %c0_91, %c0_92] : memref<9x128x128xf32, #tpu.memory_space<vmem>>, vector<1x128x128xf32>
    %106 = vector.shape_cast %105 : vector<1x128x128xf32> to vector<128x128xf32>
    %cst_93 = arith.constant dense<0.000000e+00> : vector<128x128xf32>
    %107 = tpu.matmul %104, %106, %cst_93 {dimension_numbers = #tpu.dot_dimension_numbers<[1], [0], [0], [1], [0, 0, 1, 1], [], []>} : vector<128x128xf32>, vector<128x128xf32>, vector<128x128xf32> -> vector<128x128xf32>
    %108 = arith.addf %101, %107 : vector<128x128xf32>
    %c0_94 = arith.constant 0 : index
    %c0_95 = arith.constant 0 : index
    %109 = vector.load %arg8[%c0_94, %c0_95] : memref<4x128xf32, #tpu.memory_space<vmem>>, vector<1x128xf32>
    %c1_96 = arith.constant 1 : index
    %c0_97 = arith.constant 0 : index
    %110 = vector.load %arg8[%c1_96, %c0_97] : memref<4x128xf32, #tpu.memory_space<vmem>>, vector<1x128xf32>
    %111 = vector.extract_strided_slice %108 {offsets = [0, 0], sizes = [64, 128], strides = [1, 1]} : vector<128x128xf32> to vector<64x128xf32>
    %112 = vector.shape_cast %111 : vector<64x128xf32> to vector<1x64x128xf32>
    %cst_98 = arith.constant dense<0.000000e+00> : vector<1xf32>
    %113 = vector.multi_reduction <add>, %112, %cst_98 [1, 2] : vector<1x64x128xf32> to vector<1xf32>
    %114 = vector.shape_cast %113 : vector<1xf32> to vector<1x1x1xf32>
    %115 = vector.extract %114[0, 0, 0] : f32 from vector<1x1x1xf32>
    %cst_99 = arith.constant 3.906250e-03 : f32
    %116 = arith.mulf %115, %cst_99 : f32
    %117 = vector.broadcast %116 : f32 to vector<64x128xf32>
    %118 = arith.subf %111, %117 : vector<64x128xf32>
    %119 = vector.broadcast %20 : vector<1x128xf32> to vector<64x128xf32>
    %120 = arith.mulf %118, %119 : vector<64x128xf32>
    %121 = arith.mulf %120, %120 : vector<64x128xf32>
    %122 = vector.shape_cast %121 : vector<64x128xf32> to vector<1x64x128xf32>
    %cst_100 = arith.constant dense<0.000000e+00> : vector<1xf32>
    %123 = vector.multi_reduction <add>, %122, %cst_100 [1, 2] : vector<1x64x128xf32> to vector<1xf32>
    %124 = vector.shape_cast %123 : vector<1xf32> to vector<1x1x1xf32>
    %125 = vector.extract %124[0, 0, 0] : f32 from vector<1x1x1xf32>
    %cst_101 = arith.constant 3.906250e-03 : f32
    %126 = arith.mulf %125, %cst_101 : f32
    %cst_102 = arith.constant 9.99999974E-6 : f32
    %127 = arith.addf %126, %cst_102 : f32
    %128 = math.rsqrt %127 : f32
    %129 = vector.broadcast %128 : f32 to vector<1x128xf32>
    %130 = arith.mulf %109, %129 : vector<1x128xf32>
    %131 = vector.broadcast %130 : vector<1x128xf32> to vector<64x128xf32>
    %132 = arith.mulf %120, %131 : vector<64x128xf32>
    %133 = vector.broadcast %110 : vector<1x128xf32> to vector<64x128xf32>
    %134 = arith.addf %132, %133 : vector<64x128xf32>
    %135 = vector.extract_strided_slice %108 {offsets = [64, 0], sizes = [64, 128], strides = [1, 1]} : vector<128x128xf32> to vector<64x128xf32>
    %136 = vector.shape_cast %135 : vector<64x128xf32> to vector<1x64x128xf32>
    %cst_103 = arith.constant dense<0.000000e+00> : vector<1xf32>
    %137 = vector.multi_reduction <add>, %136, %cst_103 [1, 2] : vector<1x64x128xf32> to vector<1xf32>
    %138 = vector.shape_cast %137 : vector<1xf32> to vector<1x1x1xf32>
    %139 = vector.extract %138[0, 0, 0] : f32 from vector<1x1x1xf32>
    %cst_104 = arith.constant 3.906250e-03 : f32
    %140 = arith.mulf %139, %cst_104 : f32
    %141 = vector.broadcast %140 : f32 to vector<64x128xf32>
    %142 = arith.subf %135, %141 : vector<64x128xf32>
    %143 = vector.broadcast %20 : vector<1x128xf32> to vector<64x128xf32>
    %144 = arith.mulf %142, %143 : vector<64x128xf32>
    %145 = arith.mulf %144, %144 : vector<64x128xf32>
    %146 = vector.shape_cast %145 : vector<64x128xf32> to vector<1x64x128xf32>
    %cst_105 = arith.constant dense<0.000000e+00> : vector<1xf32>
    %147 = vector.multi_reduction <add>, %146, %cst_105 [1, 2] : vector<1x64x128xf32> to vector<1xf32>
    %148 = vector.shape_cast %147 : vector<1xf32> to vector<1x1x1xf32>
    %149 = vector.extract %148[0, 0, 0] : f32 from vector<1x1x1xf32>
    %cst_106 = arith.constant 3.906250e-03 : f32
    %150 = arith.mulf %149, %cst_106 : f32
    %cst_107 = arith.constant 9.99999974E-6 : f32
    %151 = arith.addf %150, %cst_107 : f32
    %152 = math.rsqrt %151 : f32
    %153 = vector.broadcast %152 : f32 to vector<1x128xf32>
    %154 = arith.mulf %109, %153 : vector<1x128xf32>
    %155 = vector.broadcast %154 : vector<1x128xf32> to vector<64x128xf32>
    %156 = arith.mulf %144, %155 : vector<64x128xf32>
    %157 = vector.broadcast %110 : vector<1x128xf32> to vector<64x128xf32>
    %158 = arith.addf %156, %157 : vector<64x128xf32>
    %159 = tpu.concatenate %134, %158 in 0 : vector<64x128xf32>, vector<64x128xf32> -> vector<128x128xf32>
    %cst_108 = arith.constant 5.000000e-01 : f32
    %160 = vector.broadcast %cst_108 : f32 to vector<128x128xf32>
    %161 = arith.mulf %160, %159 : vector<128x128xf32>
    %cst_109 = arith.constant 0.707106769 : f32
    %162 = vector.broadcast %cst_109 : f32 to vector<128x128xf32>
    %163 = arith.mulf %159, %162 : vector<128x128xf32>
    %164 = math.absf %163 : vector<128x128xf32>
    %cst_110 = arith.constant 0.327591091 : f32
    %165 = vector.broadcast %cst_110 : f32 to vector<128x128xf32>
    %166 = arith.mulf %165, %164 : vector<128x128xf32>
    %cst_111 = arith.constant 1.000000e+00 : f32
    %167 = vector.broadcast %cst_111 : f32 to vector<128x128xf32>
    %168 = arith.addf %167, %166 : vector<128x128xf32>
    %cst_112 = arith.constant 1.000000e+00 : f32
    %169 = vector.broadcast %cst_112 : f32 to vector<128x128xf32>
    %170 = arith.divf %169, %168 : vector<128x128xf32>
    %cst_113 = arith.constant 1.06140542 : f32
    %171 = vector.broadcast %cst_113 : f32 to vector<128x128xf32>
    %172 = arith.mulf %171, %170 : vector<128x128xf32>
    %cst_114 = arith.constant -1.45315206 : f32
    %173 = vector.broadcast %cst_114 : f32 to vector<128x128xf32>
    %174 = arith.addf %172, %173 : vector<128x128xf32>
    %175 = arith.mulf %174, %170 : vector<128x128xf32>
    %cst_115 = arith.constant 1.42141378 : f32
    %176 = vector.broadcast %cst_115 : f32 to vector<128x128xf32>
    %177 = arith.addf %175, %176 : vector<128x128xf32>
    %178 = arith.mulf %177, %170 : vector<128x128xf32>
    %cst_116 = arith.constant -0.284496725 : f32
    %179 = vector.broadcast %cst_116 : f32 to vector<128x128xf32>
    %180 = arith.addf %178, %179 : vector<128x128xf32>
    %181 = arith.mulf %180, %170 : vector<128x128xf32>
    %cst_117 = arith.constant 0.254829586 : f32
    %182 = vector.broadcast %cst_117 : f32 to vector<128x128xf32>
    %183 = arith.addf %181, %182 : vector<128x128xf32>
    %184 = arith.mulf %183, %170 : vector<128x128xf32>
    %cst_118 = arith.constant 0.000000e+00 : f32
    %185 = vector.broadcast %cst_118 : f32 to vector<128x128xf32>
    %186 = arith.subf %185, %164 : vector<128x128xf32>
    %187 = arith.mulf %186, %164 : vector<128x128xf32>
    %188 = math.exp %187 : vector<128x128xf32>
    %189 = arith.mulf %184, %188 : vector<128x128xf32>
    %cst_119 = arith.constant 1.000000e+00 : f32
    %190 = vector.broadcast %cst_119 : f32 to vector<128x128xf32>
    %191 = arith.subf %190, %189 : vector<128x128xf32>
    %cst_120 = arith.constant 0.000000e+00 : f32
    %192 = vector.broadcast %cst_120 : f32 to vector<128x128xf32>
    %193 = arith.cmpf oge, %163, %192 : vector<128x128xf32>
    %cst_121 = arith.constant 0.000000e+00 : f32
    %194 = vector.broadcast %cst_121 : f32 to vector<128x128xf32>
    %195 = arith.subf %194, %191 : vector<128x128xf32>
    %196 = arith.select %193, %191, %195 : vector<128x128xi1>, vector<128x128xf32>
    %cst_122 = arith.constant 1.000000e+00 : f32
    %197 = vector.broadcast %cst_122 : f32 to vector<128x128xf32>
    %198 = arith.addf %197, %196 : vector<128x128xf32>
    %199 = arith.mulf %161, %198 : vector<128x128xf32>
    %c16_123 = arith.constant 16 : index
    %c0_124 = arith.constant 0 : index
    %200 = vector.load %arg11[%c16_123, %c0_124] : memref<160x128xf32, #tpu.memory_space<vmem>>, vector<128x128xf32>
    tpu.vector_store %arg11[%c16_123, %c0_124], %199 {strides = array<i32>} : memref<160x128xf32, #tpu.memory_space<vmem>>, vector<128x128xf32>,
    %c7_125 = arith.constant 7 : index
    %c0_126 = arith.constant 0 : index
    %201 = vector.load %arg11[%c7_125, %c0_126] : memref<160x128xf32, #tpu.memory_space<vmem>>, vector<128x128xf32>
    %202 = vector.broadcast %12 : vector<128x1xf32> to vector<128x128xf32>
    %203 = arith.mulf %201, %202 : vector<128x128xf32>
    %c0_127 = arith.constant 0 : index
    %c0_128 = arith.constant 0 : index
    %c0_129 = arith.constant 0 : index
    %204 = vector.load %arg5[%c0_127, %c0_128, %c0_129] : memref<9x128x128xf32, #tpu.memory_space<vmem>>, vector<1x128x128xf32>
    %205 = vector.shape_cast %204 : vector<1x128x128xf32> to vector<128x128xf32>
    %cst_130 = arith.constant dense<0.000000e+00> : vector<128x128xf32>
    %206 = tpu.matmul %203, %205, %cst_130 {dimension_numbers = #tpu.dot_dimension_numbers<[1], [0], [0], [1], [0, 0, 1, 1], [], []>} : vector<128x128xf32>, vector<128x128xf32>, vector<128x128xf32> -> vector<128x128xf32>
    %c8_131 = arith.constant 8 : index
    %c0_132 = arith.constant 0 : index
    %207 = vector.load %arg11[%c8_131, %c0_132] : memref<160x128xf32, #tpu.memory_space<vmem>>, vector<128x128xf32>
    %208 = vector.broadcast %5 : vector<128x1xf32> to vector<128x128xf32>
    %209 = arith.mulf %207, %208 : vector<128x128xf32>
    %c1_133 = arith.constant 1 : index
    %c0_134 = arith.constant 0 : index
    %c0_135 = arith.constant 0 : index
    %210 = vector.load %arg5[%c1_133, %c0_134, %c0_135] : memref<9x128x128xf32, #tpu.memory_space<vmem>>, vector<1x128x128xf32>
    %211 = vector.shape_cast %210 : vector<1x128x128xf32> to vector<128x128xf32>
    %cst_136 = arith.constant dense<0.000000e+00> : vector<128x128xf32>
    %212 = tpu.matmul %209, %211, %cst_136 {dimension_numbers = #tpu.dot_dimension_numbers<[1], [0], [0], [1], [0, 0, 1, 1], [], []>} : vector<128x128xf32>, vector<128x128xf32>, vector<128x128xf32> -> vector<128x128xf32>
    %213 = arith.addf %206, %212 : vector<128x128xf32>
    %c9_137 = arith.constant 9 : index
    %c0_138 = arith.constant 0 : index
    %214 = vector.load %arg11[%c9_137, %c0_138] : memref<160x128xf32, #tpu.memory_space<vmem>>, vector<128x128xf32>
    %215 = vector.broadcast %13 : vector<128x1xf32> to vector<128x128xf32>
    %216 = arith.mulf %214, %215 : vector<128x128xf32>
    %c2_139 = arith.constant 2 : index
    %c0_140 = arith.constant 0 : index
    %c0_141 = arith.constant 0 : index
    %217 = vector.load %arg5[%c2_139, %c0_140, %c0_141] : memref<9x128x128xf32, #tpu.memory_space<vmem>>, vector<1x128x128xf32>
    %218 = vector.shape_cast %217 : vector<1x128x128xf32> to vector<128x128xf32>
    %cst_142 = arith.constant dense<0.000000e+00> : vector<128x128xf32>
    %219 = tpu.matmul %216, %218, %cst_142 {dimension_numbers = #tpu.dot_dimension_numbers<[1], [0], [0], [1], [0, 0, 1, 1], [], []>} : vector<128x128xf32>, vector<128x128xf32>, vector<128x128xf32> -> vector<128x128xf32>
    %220 = arith.addf %213, %219 : vector<128x128xf32>
    %c15_143 = arith.constant 15 : index
    %c0_144 = arith.constant 0 : index
    %221 = vector.load %arg11[%c15_143, %c0_144] : memref<160x128xf32, #tpu.memory_space<vmem>>, vector<128x128xf32>
    %222 = vector.broadcast %9 : vector<128x1xf32> to vector<128x128xf32>
    %223 = arith.mulf %221, %222 : vector<128x128xf32>
    %c3_145 = arith.constant 3 : index
    %c0_146 = arith.constant 0 : index
    %c0_147 = arith.constant 0 : index
    %224 = vector.load %arg5[%c3_145, %c0_146, %c0_147] : memref<9x128x128xf32, #tpu.memory_space<vmem>>, vector<1x128x128xf32>
    %225 = vector.shape_cast %224 : vector<1x128x128xf32> to vector<128x128xf32>
    %cst_148 = arith.constant dense<0.000000e+00> : vector<128x128xf32>
    %226 = tpu.matmul %223, %225, %cst_148 {dimension_numbers = #tpu.dot_dimension_numbers<[1], [0], [0], [1], [0, 0, 1, 1], [], []>} : vector<128x128xf32>, vector<128x128xf32>, vector<128x128xf32> -> vector<128x128xf32>
    %227 = arith.addf %220, %226 : vector<128x128xf32>
    %c4_149 = arith.constant 4 : index
    %c0_150 = arith.constant 0 : index
    %c0_151 = arith.constant 0 : index
    %228 = vector.load %arg5[%c4_149, %c0_150, %c0_151] : memref<9x128x128xf32, #tpu.memory_space<vmem>>, vector<1x128x128xf32>
    %229 = vector.shape_cast %228 : vector<1x128x128xf32> to vector<128x128xf32>
    %cst_152 = arith.constant dense<0.000000e+00> : vector<128x128xf32>
    %230 = tpu.matmul %199, %229, %cst_152 {dimension_numbers = #tpu.dot_dimension_numbers<[1], [0], [0], [1], [0, 0, 1, 1], [], []>} : vector<128x128xf32>, vector<128x128xf32>, vector<128x128xf32> -> vector<128x128xf32>
    %231 = arith.addf %227, %230 : vector<128x128xf32>
    %c17_153 = arith.constant 17 : index
    %c0_154 = arith.constant 0 : index
    %232 = vector.load %arg11[%c17_153, %c0_154] : memref<160x128xf32, #tpu.memory_space<vmem>>, vector<128x128xf32>
    %233 = vector.broadcast %11 : vector<128x1xf32> to vector<128x128xf32>
    %234 = arith.mulf %232, %233 : vector<128x128xf32>
    %c5_155 = arith.constant 5 : index
    %c0_156 = arith.constant 0 : index
    %c0_157 = arith.constant 0 : index
    %235 = vector.load %arg5[%c5_155, %c0_156, %c0_157] : memref<9x128x128xf32, #tpu.memory_space<vmem>>, vector<1x128x128xf32>
    %236 = vector.shape_cast %235 : vector<1x128x128xf32> to vector<128x128xf32>
    %cst_158 = arith.constant dense<0.000000e+00> : vector<128x128xf32>
    %237 = tpu.matmul %234, %236, %cst_158 {dimension_numbers = #tpu.dot_dimension_numbers<[1], [0], [0], [1], [0, 0, 1, 1], [], []>} : vector<128x128xf32>, vector<128x128xf32>, vector<128x128xf32> -> vector<128x128xf32>
    %238 = arith.addf %231, %237 : vector<128x128xf32>
    %c23_159 = arith.constant 23 : index
    %c0_160 = arith.constant 0 : index
    %239 = vector.load %arg11[%c23_159, %c0_160] : memref<160x128xf32, #tpu.memory_space<vmem>>, vector<128x128xf32>
    %240 = vector.broadcast %14 : vector<128x1xf32> to vector<128x128xf32>
    %241 = arith.mulf %239, %240 : vector<128x128xf32>
    %c6_161 = arith.constant 6 : index
    %c0_162 = arith.constant 0 : index
    %c0_163 = arith.constant 0 : index
    %242 = vector.load %arg5[%c6_161, %c0_162, %c0_163] : memref<9x128x128xf32, #tpu.memory_space<vmem>>, vector<1x128x128xf32>
    %243 = vector.shape_cast %242 : vector<1x128x128xf32> to vector<128x128xf32>
    %cst_164 = arith.constant dense<0.000000e+00> : vector<128x128xf32>
    %244 = tpu.matmul %241, %243, %cst_164 {dimension_numbers = #tpu.dot_dimension_numbers<[1], [0], [0], [1], [0, 0, 1, 1], [], []>} : vector<128x128xf32>, vector<128x128xf32>, vector<128x128xf32> -> vector<128x128xf32>
    %245 = arith.addf %238, %244 : vector<128x128xf32>
    %c24_165 = arith.constant 24 : index
    %c0_166 = arith.constant 0 : index
    %246 = vector.load %arg11[%c24_165, %c0_166] : memref<160x128xf32, #tpu.memory_space<vmem>>, vector<128x128xf32>
    %247 = vector.broadcast %7 : vector<128x1xf32> to vector<128x128xf32>
    %248 = arith.mulf %246, %247 : vector<128x128xf32>
    %c7_167 = arith.constant 7 : index
    %c0_168 = arith.constant 0 : index
    %c0_169 = arith.constant 0 : index
    %249 = vector.load %arg5[%c7_167, %c0_168, %c0_169] : memref<9x128x128xf32, #tpu.memory_space<vmem>>, vector<1x128x128xf32>
    %250 = vector.shape_cast %249 : vector<1x128x128xf32> to vector<128x128xf32>
    %cst_170 = arith.constant dense<0.000000e+00> : vector<128x128xf32>
    %251 = tpu.matmul %248, %250, %cst_170 {dimension_numbers = #tpu.dot_dimension_numbers<[1], [0], [0], [1], [0, 0, 1, 1], [], []>} : vector<128x128xf32>, vector<128x128xf32>, vector<128x128xf32> -> vector<128x128xf32>
    %252 = arith.addf %245, %251 : vector<128x128xf32>
    %c25_171 = arith.constant 25 : index
    %c0_172 = arith.constant 0 : index
    %253 = vector.load %arg11[%c25_171, %c0_172] : memref<160x128xf32, #tpu.memory_space<vmem>>, vector<128x128xf32>
    %254 = vector.broadcast %15 : vector<128x1xf32> to vector<128x128xf32>
    %255 = arith.mulf %253, %254 : vector<128x128xf32>
    %c8_173 = arith.constant 8 : index
    %c0_174 = arith.constant 0 : index
    %c0_175 = arith.constant 0 : index
    %256 = vector.load %arg5[%c8_173, %c0_174, %c0_175] : memref<9x128x128xf32, #tpu.memory_space<vmem>>, vector<1x128x128xf32>
    %257 = vector.shape_cast %256 : vector<1x128x128xf32> to vector<128x128xf32>
    %cst_176 = arith.constant dense<0.000000e+00> : vector<128x128xf32>
    %258 = tpu.matmul %255, %257, %cst_176 {dimension_numbers = #tpu.dot_dimension_numbers<[1], [0], [0], [1], [0, 0, 1, 1], [], []>} : vector<128x128xf32>, vector<128x128xf32>, vector<128x128xf32> -> vector<128x128xf32>
    %259 = arith.addf %252, %258 : vector<128x128xf32>
    %c2_177 = arith.constant 2 : index
    %c0_178 = arith.constant 0 : index
    %260 = vector.load %arg8[%c2_177, %c0_178] : memref<4x128xf32, #tpu.memory_space<vmem>>, vector<1x128xf32>
    %c3_179 = arith.constant 3 : index
    %c0_180 = arith.constant 0 : index
    %261 = vector.load %arg8[%c3_179, %c0_180] : memref<4x128xf32, #tpu.memory_space<vmem>>, vector<1x128xf32>
    %262 = vector.extract_strided_slice %259 {offsets = [0, 0], sizes = [64, 128], strides = [1, 1]} : vector<128x128xf32> to vector<64x128xf32>
    %263 = vector.shape_cast %262 : vector<64x128xf32> to vector<1x64x128xf32>
    %cst_181 = arith.constant dense<0.000000e+00> : vector<1xf32>
    %264 = vector.multi_reduction <add>, %263, %cst_181 [1, 2] : vector<1x64x128xf32> to vector<1xf32>
    %265 = vector.shape_cast %264 : vector<1xf32> to vector<1x1x1xf32>
    %266 = vector.extract %265[0, 0, 0] : f32 from vector<1x1x1xf32>
    %cst_182 = arith.constant 3.906250e-03 : f32
    %267 = arith.mulf %266, %cst_182 : f32
    %268 = vector.broadcast %267 : f32 to vector<64x128xf32>
    %269 = arith.subf %262, %268 : vector<64x128xf32>
    %270 = vector.broadcast %20 : vector<1x128xf32> to vector<64x128xf32>
    %271 = arith.mulf %269, %270 : vector<64x128xf32>
    %272 = arith.mulf %271, %271 : vector<64x128xf32>
    %273 = vector.shape_cast %272 : vector<64x128xf32> to vector<1x64x128xf32>
    %cst_183 = arith.constant dense<0.000000e+00> : vector<1xf32>
    %274 = vector.multi_reduction <add>, %273, %cst_183 [1, 2] : vector<1x64x128xf32> to vector<1xf32>
    %275 = vector.shape_cast %274 : vector<1xf32> to vector<1x1x1xf32>
    %276 = vector.extract %275[0, 0, 0] : f32 from vector<1x1x1xf32>
    %cst_184 = arith.constant 3.906250e-03 : f32
    %277 = arith.mulf %276, %cst_184 : f32
    %cst_185 = arith.constant 9.99999974E-6 : f32
    %278 = arith.addf %277, %cst_185 : f32
    %279 = math.rsqrt %278 : f32
    %280 = vector.broadcast %279 : f32 to vector<1x128xf32>
    %281 = arith.mulf %260, %280 : vector<1x128xf32>
    %282 = vector.broadcast %281 : vector<1x128xf32> to vector<64x128xf32>
    %283 = arith.mulf %271, %282 : vector<64x128xf32>
    %284 = vector.broadcast %261 : vector<1x128xf32> to vector<64x128xf32>
    %285 = arith.addf %283, %284 : vector<64x128xf32>
    %286 = vector.extract_strided_slice %259 {offsets = [64, 0], sizes = [64, 128], strides = [1, 1]} : vector<128x128xf32> to vector<64x128xf32>
    %287 = vector.shape_cast %286 : vector<64x128xf32> to vector<1x64x128xf32>
    %cst_186 = arith.constant dense<0.000000e+00> : vector<1xf32>
    %288 = vector.multi_reduction <add>, %287, %cst_186 [1, 2] : vector<1x64x128xf32> to vector<1xf32>
    %289 = vector.shape_cast %288 : vector<1xf32> to vector<1x1x1xf32>
    %290 = vector.extract %289[0, 0, 0] : f32 from vector<1x1x1xf32>
    %cst_187 = arith.constant 3.906250e-03 : f32
    %291 = arith.mulf %290, %cst_187 : f32
    %292 = vector.broadcast %291 : f32 to vector<64x128xf32>
    %293 = arith.subf %286, %292 : vector<64x128xf32>
    %294 = vector.broadcast %20 : vector<1x128xf32> to vector<64x128xf32>
    %295 = arith.mulf %293, %294 : vector<64x128xf32>
    %296 = arith.mulf %295, %295 : vector<64x128xf32>
    %297 = vector.shape_cast %296 : vector<64x128xf32> to vector<1x64x128xf32>
    %cst_188 = arith.constant dense<0.000000e+00> : vector<1xf32>
    %298 = vector.multi_reduction <add>, %297, %cst_188 [1, 2] : vector<1x64x128xf32> to vector<1xf32>
    %299 = vector.shape_cast %298 : vector<1xf32> to vector<1x1x1xf32>
    %300 = vector.extract %299[0, 0, 0] : f32 from vector<1x1x1xf32>
    %cst_189 = arith.constant 3.906250e-03 : f32
    %301 = arith.mulf %300, %cst_189 : f32
    %cst_190 = arith.constant 9.99999974E-6 : f32
    %302 = arith.addf %301, %cst_190 : f32
    %303 = math.rsqrt %302 : f32
    %304 = vector.broadcast %303 : f32 to vector<1x128xf32>
    %305 = arith.mulf %260, %304 : vector<1x128xf32>
    %306 = vector.broadcast %305 : vector<1x128xf32> to vector<64x128xf32>
    %307 = arith.mulf %295, %306 : vector<64x128xf32>
    %308 = vector.broadcast %261 : vector<1x128xf32> to vector<64x128xf32>
    %309 = arith.addf %307, %308 : vector<64x128xf32>
    %310 = tpu.concatenate %285, %309 in 0 : vector<64x128xf32>, vector<64x128xf32> -> vector<128x128xf32>
    %311 = arith.addf %48, %310 : vector<128x128xf32>
    %c16_191 = arith.constant 16 : index
    %c0_192 = arith.constant 0 : index
    %312 = vector.load %arg11[%c16_191, %c0_192] : memref<160x128xf32, #tpu.memory_space<vmem>>, vector<128x128xf32>
    tpu.vector_store %arg11[%c16_191, %c0_192], %311 {strides = array<i32>} : memref<160x128xf32, #tpu.memory_space<vmem>>, vector<128x128xf32>,
    %c7_193 = arith.constant 7 : index
    %c0_194 = arith.constant 0 : index
    %313 = vector.load %arg11[%c7_193, %c0_194] : memref<160x128xf32, #tpu.memory_space<vmem>>, vector<128x128xf32>
    %314 = vector.broadcast %12 : vector<128x1xf32> to vector<128x128xf32>
    %315 = arith.mulf %313, %314 : vector<128x128xf32>
    %c0_195 = arith.constant 0 : index
    %c0_196 = arith.constant 0 : index
    %c0_197 = arith.constant 0 : index
    %316 = vector.load %arg6[%c0_195, %c0_196, %c0_197] : memref<9x128x128xf32, #tpu.memory_space<vmem>>, vector<1x128x128xf32>
    %317 = vector.shape_cast %316 : vector<1x128x128xf32> to vector<128x128xf32>
    %cst_198 = arith.constant dense<0.000000e+00> : vector<128x128xf32>
    %318 = tpu.matmul %315, %317, %cst_198 {dimension_numbers = #tpu.dot_dimension_numbers<[1], [0], [0], [1], [0, 0, 1, 1], [], []>} : vector<128x128xf32>, vector<128x128xf32>, vector<128x128xf32> -> vector<128x128xf32>
    %c8_199 = arith.constant 8 : index
    %c0_200 = arith.constant 0 : index
    %319 = vector.load %arg11[%c8_199, %c0_200] : memref<160x128xf32, #tpu.memory_space<vmem>>, vector<128x128xf32>
    %320 = vector.broadcast %5 : vector<128x1xf32> to vector<128x128xf32>
    %321 = arith.mulf %319, %320 : vector<128x128xf32>
    %c1_201 = arith.constant 1 : index
    %c0_202 = arith.constant 0 : index
    %c0_203 = arith.constant 0 : index
    %322 = vector.load %arg6[%c1_201, %c0_202, %c0_203] : memref<9x128x128xf32, #tpu.memory_space<vmem>>, vector<1x128x128xf32>
    %323 = vector.shape_cast %322 : vector<1x128x128xf32> to vector<128x128xf32>
    %cst_204 = arith.constant dense<0.000000e+00> : vector<128x128xf32>
    %324 = tpu.matmul %321, %323, %cst_204 {dimension_numbers = #tpu.dot_dimension_numbers<[1], [0], [0], [1], [0, 0, 1, 1], [], []>} : vector<128x128xf32>, vector<128x128xf32>, vector<128x128xf32> -> vector<128x128xf32>
    %325 = arith.addf %318, %324 : vector<128x128xf32>
    %c9_205 = arith.constant 9 : index
    %c0_206 = arith.constant 0 : index
    %326 = vector.load %arg11[%c9_205, %c0_206] : memref<160x128xf32, #tpu.memory_space<vmem>>, vector<128x128xf32>
    %327 = vector.broadcast %13 : vector<128x1xf32> to vector<128x128xf32>
    %328 = arith.mulf %326, %327 : vector<128x128xf32>
    %c2_207 = arith.constant 2 : index
    %c0_208 = arith.constant 0 : index
    %c0_209 = arith.constant 0 : index
    %329 = vector.load %arg6[%c2_207, %c0_208, %c0_209] : memref<9x128x128xf32, #tpu.memory_space<vmem>>, vector<1x128x128xf32>
    %330 = vector.shape_cast %329 : vector<1x128x128xf32> to vector<128x128xf32>
    %cst_210 = arith.constant dense<0.000000e+00> : vector<128x128xf32>
    %331 = tpu.matmul %328, %330, %cst_210 {dimension_numbers = #tpu.dot_dimension_numbers<[1], [0], [0], [1], [0, 0, 1, 1], [], []>} : vector<128x128xf32>, vector<128x128xf32>, vector<128x128xf32> -> vector<128x128xf32>
    %332 = arith.addf %325, %331 : vector<128x128xf32>
    %c15_211 = arith.constant 15 : index
    %c0_212 = arith.constant 0 : index
    %333 = vector.load %arg11[%c15_211, %c0_212] : memref<160x128xf32, #tpu.memory_space<vmem>>, vector<128x128xf32>
    %334 = vector.broadcast %9 : vector<128x1xf32> to vector<128x128xf32>
    %335 = arith.mulf %333, %334 : vector<128x128xf32>
    %c3_213 = arith.constant 3 : index
    %c0_214 = arith.constant 0 : index
    %c0_215 = arith.constant 0 : index
    %336 = vector.load %arg6[%c3_213, %c0_214, %c0_215] : memref<9x128x128xf32, #tpu.memory_space<vmem>>, vector<1x128x128xf32>
    %337 = vector.shape_cast %336 : vector<1x128x128xf32> to vector<128x128xf32>
    %cst_216 = arith.constant dense<0.000000e+00> : vector<128x128xf32>
    %338 = tpu.matmul %335, %337, %cst_216 {dimension_numbers = #tpu.dot_dimension_numbers<[1], [0], [0], [1], [0, 0, 1, 1], [], []>} : vector<128x128xf32>, vector<128x128xf32>, vector<128x128xf32> -> vector<128x128xf32>
    %339 = arith.addf %332, %338 : vector<128x128xf32>
    %c4_217 = arith.constant 4 : index
    %c0_218 = arith.constant 0 : index
    %c0_219 = arith.constant 0 : index
    %340 = vector.load %arg6[%c4_217, %c0_218, %c0_219] : memref<9x128x128xf32, #tpu.memory_space<vmem>>, vector<1x128x128xf32>
    %341 = vector.shape_cast %340 : vector<1x128x128xf32> to vector<128x128xf32>
    %cst_220 = arith.constant dense<0.000000e+00> : vector<128x128xf32>
    %342 = tpu.matmul %311, %341, %cst_220 {dimension_numbers = #tpu.dot_dimension_numbers<[1], [0], [0], [1], [0, 0, 1, 1], [], []>} : vector<128x128xf32>, vector<128x128xf32>, vector<128x128xf32> -> vector<128x128xf32>
    %343 = arith.addf %339, %342 : vector<128x128xf32>
    %c17_221 = arith.constant 17 : index
    %c0_222 = arith.constant 0 : index
    %344 = vector.load %arg11[%c17_221, %c0_222] : memref<160x128xf32, #tpu.memory_space<vmem>>, vector<128x128xf32>
    %345 = vector.broadcast %11 : vector<128x1xf32> to vector<128x128xf32>
    %346 = arith.mulf %344, %345 : vector<128x128xf32>
    %c5_223 = arith.constant 5 : index
    %c0_224 = arith.constant 0 : index
    %c0_225 = arith.constant 0 : index
    %347 = vector.load %arg6[%c5_223, %c0_224, %c0_225] : memref<9x128x128xf32, #tpu.memory_space<vmem>>, vector<1x128x128xf32>
    %348 = vector.shape_cast %347 : vector<1x128x128xf32> to vector<128x128xf32>
    %cst_226 = arith.constant dense<0.000000e+00> : vector<128x128xf32>
    %349 = tpu.matmul %346, %348, %cst_226 {dimension_numbers = #tpu.dot_dimension_numbers<[1], [0], [0], [1], [0, 0, 1, 1], [], []>} : vector<128x128xf32>, vector<128x128xf32>, vector<128x128xf32> -> vector<128x128xf32>
    %350 = arith.addf %343, %349 : vector<128x128xf32>
    %c23_227 = arith.constant 23 : index
    %c0_228 = arith.constant 0 : index
    %351 = vector.load %arg11[%c23_227, %c0_228] : memref<160x128xf32, #tpu.memory_space<vmem>>, vector<128x128xf32>
    %352 = vector.broadcast %14 : vector<128x1xf32> to vector<128x128xf32>
    %353 = arith.mulf %351, %352 : vector<128x128xf32>
    %c6_229 = arith.constant 6 : index
    %c0_230 = arith.constant 0 : index
    %c0_231 = arith.constant 0 : index
    %354 = vector.load %arg6[%c6_229, %c0_230, %c0_231] : memref<9x128x128xf32, #tpu.memory_space<vmem>>, vector<1x128x128xf32>
    %355 = vector.shape_cast %354 : vector<1x128x128xf32> to vector<128x128xf32>
    %cst_232 = arith.constant dense<0.000000e+00> : vector<128x128xf32>
    %356 = tpu.matmul %353, %355, %cst_232 {dimension_numbers = #tpu.dot_dimension_numbers<[1], [0], [0], [1], [0, 0, 1, 1], [], []>} : vector<128x128xf32>, vector<128x128xf32>, vector<128x128xf32> -> vector<128x128xf32>
    %357 = arith.addf %350, %356 : vector<128x128xf32>
    %c24_233 = arith.constant 24 : index
    %c0_234 = arith.constant 0 : index
    %358 = vector.load %arg11[%c24_233, %c0_234] : memref<160x128xf32, #tpu.memory_space<vmem>>, vector<128x128xf32>
    %359 = vector.broadcast %7 : vector<128x1xf32> to vector<128x128xf32>
    %360 = arith.mulf %358, %359 : vector<128x128xf32>
    %c7_235 = arith.constant 7 : index
    %c0_236 = arith.constant 0 : index
    %c0_237 = arith.constant 0 : index
    %361 = vector.load %arg6[%c7_235, %c0_236, %c0_237] : memref<9x128x128xf32, #tpu.memory_space<vmem>>, vector<1x128x128xf32>
    %362 = vector.shape_cast %361 : vector<1x128x128xf32> to vector<128x128xf32>
    %cst_238 = arith.constant dense<0.000000e+00> : vector<128x128xf32>
    %363 = tpu.matmul %360, %362, %cst_238 {dimension_numbers = #tpu.dot_dimension_numbers<[1], [0], [0], [1], [0, 0, 1, 1], [], []>} : vector<128x128xf32>, vector<128x128xf32>, vector<128x128xf32> -> vector<128x128xf32>
    %364 = arith.addf %357, %363 : vector<128x128xf32>
    %c25_239 = arith.constant 25 : index
    %c0_240 = arith.constant 0 : index
    %365 = vector.load %arg11[%c25_239, %c0_240] : memref<160x128xf32, #tpu.memory_space<vmem>>, vector<128x128xf32>
    %366 = vector.broadcast %15 : vector<128x1xf32> to vector<128x128xf32>
    %367 = arith.mulf %365, %366 : vector<128x128xf32>
    %c8_241 = arith.constant 8 : index
    %c0_242 = arith.constant 0 : index
    %c0_243 = arith.constant 0 : index
    %368 = vector.load %arg6[%c8_241, %c0_242, %c0_243] : memref<9x128x128xf32, #tpu.memory_space<vmem>>, vector<1x128x128xf32>
    %369 = vector.shape_cast %368 : vector<1x128x128xf32> to vector<128x128xf32>
    %cst_244 = arith.constant dense<0.000000e+00> : vector<128x128xf32>
    %370 = tpu.matmul %367, %369, %cst_244 {dimension_numbers = #tpu.dot_dimension_numbers<[1], [0], [0], [1], [0, 0, 1, 1], [], []>} : vector<128x128xf32>, vector<128x128xf32>, vector<128x128xf32> -> vector<128x128xf32>
    %371 = arith.addf %364, %370 : vector<128x128xf32>
    %c0_245 = arith.constant 0 : index
    %c0_246 = arith.constant 0 : index
    %372 = vector.load %arg9[%c0_245, %c0_246] : memref<4x128xf32, #tpu.memory_space<vmem>>, vector<1x128xf32>
    %c1_247 = arith.constant 1 : index
    %c0_248 = arith.constant 0 : index
    %373 = vector.load %arg9[%c1_247, %c0_248] : memref<4x128xf32, #tpu.memory_space<vmem>>, vector<1x128xf32>
    %374 = vector.extract_strided_slice %371 {offsets = [0, 0], sizes = [64, 128], strides = [1, 1]} : vector<128x128xf32> to vector<64x128xf32>
    %375 = vector.shape_cast %374 : vector<64x128xf32> to vector<1x64x128xf32>
    %cst_249 = arith.constant dense<0.000000e+00> : vector<1xf32>
    %376 = vector.multi_reduction <add>, %375, %cst_249 [1, 2] : vector<1x64x128xf32> to vector<1xf32>
    %377 = vector.shape_cast %376 : vector<1xf32> to vector<1x1x1xf32>
    %378 = vector.extract %377[0, 0, 0] : f32 from vector<1x1x1xf32>
    %cst_250 = arith.constant 0.001953125 : f32
    %379 = arith.mulf %378, %cst_250 : f32
    %380 = vector.broadcast %379 : f32 to vector<64x128xf32>
    %381 = arith.subf %374, %380 : vector<64x128xf32>
    %382 = vector.broadcast %25 : vector<1x128xf32> to vector<64x128xf32>
    %383 = arith.mulf %381, %382 : vector<64x128xf32>
    %384 = arith.mulf %383, %383 : vector<64x128xf32>
    %385 = vector.shape_cast %384 : vector<64x128xf32> to vector<1x64x128xf32>
    %cst_251 = arith.constant dense<0.000000e+00> : vector<1xf32>
    %386 = vector.multi_reduction <add>, %385, %cst_251 [1, 2] : vector<1x64x128xf32> to vector<1xf32>
    %387 = vector.shape_cast %386 : vector<1xf32> to vector<1x1x1xf32>
    %388 = vector.extract %387[0, 0, 0] : f32 from vector<1x1x1xf32>
    %cst_252 = arith.constant 0.001953125 : f32
    %389 = arith.mulf %388, %cst_252 : f32
    %cst_253 = arith.constant 9.99999974E-6 : f32
    %390 = arith.addf %389, %cst_253 : f32
    %391 = math.rsqrt %390 : f32
    %392 = vector.broadcast %391 : f32 to vector<1x128xf32>
    %393 = arith.mulf %372, %392 : vector<1x128xf32>
    %394 = vector.broadcast %393 : vector<1x128xf32> to vector<64x128xf32>
    %395 = arith.mulf %383, %394 : vector<64x128xf32>
    %396 = vector.broadcast %373 : vector<1x128xf32> to vector<64x128xf32>
    %397 = arith.addf %395, %396 : vector<64x128xf32>
    %398 = vector.extract_strided_slice %371 {offsets = [64, 0], sizes = [64, 128], strides = [1, 1]} : vector<128x128xf32> to vector<64x128xf32>
    %399 = vector.shape_cast %398 : vector<64x128xf32> to vector<1x64x128xf32>
    %cst_254 = arith.constant dense<0.000000e+00> : vector<1xf32>
    %400 = vector.multi_reduction <add>, %399, %cst_254 [1, 2] : vector<1x64x128xf32> to vector<1xf32>
    %401 = vector.shape_cast %400 : vector<1xf32> to vector<1x1x1xf32>
    %402 = vector.extract %401[0, 0, 0] : f32 from vector<1x1x1xf32>
    %cst_255 = arith.constant 0.001953125 : f32
    %403 = arith.mulf %402, %cst_255 : f32
    %404 = vector.broadcast %403 : f32 to vector<64x128xf32>
    %405 = arith.subf %398, %404 : vector<64x128xf32>
    %406 = vector.broadcast %25 : vector<1x128xf32> to vector<64x128xf32>
    %407 = arith.mulf %405, %406 : vector<64x128xf32>
    %408 = arith.mulf %407, %407 : vector<64x128xf32>
    %409 = vector.shape_cast %408 : vector<64x128xf32> to vector<1x64x128xf32>
    %cst_256 = arith.constant dense<0.000000e+00> : vector<1xf32>
    %410 = vector.multi_reduction <add>, %409, %cst_256 [1, 2] : vector<1x64x128xf32> to vector<1xf32>
    %411 = vector.shape_cast %410 : vector<1xf32> to vector<1x1x1xf32>
    %412 = vector.extract %411[0, 0, 0] : f32 from vector<1x1x1xf32>
    %cst_257 = arith.constant 0.001953125 : f32
    %413 = arith.mulf %412, %cst_257 : f32
    %cst_258 = arith.constant 9.99999974E-6 : f32
    %414 = arith.addf %413, %cst_258 : f32
    %415 = math.rsqrt %414 : f32
    %416 = vector.broadcast %415 : f32 to vector<1x128xf32>
    %417 = arith.mulf %372, %416 : vector<1x128xf32>
    %418 = vector.broadcast %417 : vector<1x128xf32> to vector<64x128xf32>
    %419 = arith.mulf %407, %418 : vector<64x128xf32>
    %420 = vector.broadcast %373 : vector<1x128xf32> to vector<64x128xf32>
    %421 = arith.addf %419, %420 : vector<64x128xf32>
    %422 = tpu.concatenate %397, %421 in 0 : vector<64x128xf32>, vector<64x128xf32> -> vector<128x128xf32>
    %cst_259 = arith.constant 5.000000e-01 : f32
    %423 = vector.broadcast %cst_259 : f32 to vector<128x128xf32>
    %424 = arith.mulf %423, %422 : vector<128x128xf32>
    %cst_260 = arith.constant 0.707106769 : f32
    %425 = vector.broadcast %cst_260 : f32 to vector<128x128xf32>
    %426 = arith.mulf %422, %425 : vector<128x128xf32>
    %427 = math.absf %426 : vector<128x128xf32>
    %cst_261 = arith.constant 0.327591091 : f32
    %428 = vector.broadcast %cst_261 : f32 to vector<128x128xf32>
    %429 = arith.mulf %428, %427 : vector<128x128xf32>
    %cst_262 = arith.constant 1.000000e+00 : f32
    %430 = vector.broadcast %cst_262 : f32 to vector<128x128xf32>
    %431 = arith.addf %430, %429 : vector<128x128xf32>
    %cst_263 = arith.constant 1.000000e+00 : f32
    %432 = vector.broadcast %cst_263 : f32 to vector<128x128xf32>
    %433 = arith.divf %432, %431 : vector<128x128xf32>
    %cst_264 = arith.constant 1.06140542 : f32
    %434 = vector.broadcast %cst_264 : f32 to vector<128x128xf32>
    %435 = arith.mulf %434, %433 : vector<128x128xf32>
    %cst_265 = arith.constant -1.45315206 : f32
    %436 = vector.broadcast %cst_265 : f32 to vector<128x128xf32>
    %437 = arith.addf %435, %436 : vector<128x128xf32>
    %438 = arith.mulf %437, %433 : vector<128x128xf32>
    %cst_266 = arith.constant 1.42141378 : f32
    %439 = vector.broadcast %cst_266 : f32 to vector<128x128xf32>
    %440 = arith.addf %438, %439 : vector<128x128xf32>
    %441 = arith.mulf %440, %433 : vector<128x128xf32>
    %cst_267 = arith.constant -0.284496725 : f32
    %442 = vector.broadcast %cst_267 : f32 to vector<128x128xf32>
    %443 = arith.addf %441, %442 : vector<128x128xf32>
    %444 = arith.mulf %443, %433 : vector<128x128xf32>
    %cst_268 = arith.constant 0.254829586 : f32
    %445 = vector.broadcast %cst_268 : f32 to vector<128x128xf32>
    %446 = arith.addf %444, %445 : vector<128x128xf32>
    %447 = arith.mulf %446, %433 : vector<128x128xf32>
    %cst_269 = arith.constant 0.000000e+00 : f32
    %448 = vector.broadcast %cst_269 : f32 to vector<128x128xf32>
    %449 = arith.subf %448, %427 : vector<128x128xf32>
    %450 = arith.mulf %449, %427 : vector<128x128xf32>
    %451 = math.exp %450 : vector<128x128xf32>
    %452 = arith.mulf %447, %451 : vector<128x128xf32>
    %cst_270 = arith.constant 1.000000e+00 : f32
    %453 = vector.broadcast %cst_270 : f32 to vector<128x128xf32>
    %454 = arith.subf %453, %452 : vector<128x128xf32>
    %cst_271 = arith.constant 0.000000e+00 : f32
    %455 = vector.broadcast %cst_271 : f32 to vector<128x128xf32>
    %456 = arith.cmpf oge, %426, %455 : vector<128x128xf32>
    %cst_272 = arith.constant 0.000000e+00 : f32
    %457 = vector.broadcast %cst_272 : f32 to vector<128x128xf32>
    %458 = arith.subf %457, %454 : vector<128x128xf32>
    %459 = arith.select %456, %454, %458 : vector<128x128xi1>, vector<128x128xf32>
    %cst_273 = arith.constant 1.000000e+00 : f32
    %460 = vector.broadcast %cst_273 : f32 to vector<128x128xf32>
    %461 = arith.addf %460, %459 : vector<128x128xf32>
    %462 = arith.mulf %424, %461 : vector<128x128xf32>
    %c16_274 = arith.constant 16 : index
    %c0_275 = arith.constant 0 : index
    %463 = vector.load %arg11[%c16_274, %c0_275] : memref<160x128xf32, #tpu.memory_space<vmem>>, vector<128x128xf32>
    tpu.vector_store %arg11[%c16_274, %c0_275], %462 {strides = array<i32>} : memref<160x128xf32, #tpu.memory_space<vmem>>, vector<128x128xf32>,
    %c7_276 = arith.constant 7 : index
    %c0_277 = arith.constant 0 : index
    %464 = vector.load %arg11[%c7_276, %c0_277] : memref<160x128xf32, #tpu.memory_space<vmem>>, vector<128x128xf32>
    %465 = vector.broadcast %12 : vector<128x1xf32> to vector<128x128xf32>
    %466 = arith.mulf %464, %465 : vector<128x128xf32>
    %c0_278 = arith.constant 0 : index
    %c0_279 = arith.constant 0 : index
    %c0_280 = arith.constant 0 : index
    %467 = vector.load %arg7[%c0_278, %c0_279, %c0_280] : memref<9x128x128xf32, #tpu.memory_space<vmem>>, vector<1x128x128xf32>
    %468 = vector.shape_cast %467 : vector<1x128x128xf32> to vector<128x128xf32>
    %cst_281 = arith.constant dense<0.000000e+00> : vector<128x128xf32>
    %469 = tpu.matmul %466, %468, %cst_281 {dimension_numbers = #tpu.dot_dimension_numbers<[1], [0], [0], [1], [0, 0, 1, 1], [], []>} : vector<128x128xf32>, vector<128x128xf32>, vector<128x128xf32> -> vector<128x128xf32>
    %c8_282 = arith.constant 8 : index
    %c0_283 = arith.constant 0 : index
    %470 = vector.load %arg11[%c8_282, %c0_283] : memref<160x128xf32, #tpu.memory_space<vmem>>, vector<128x128xf32>
    %471 = vector.broadcast %5 : vector<128x1xf32> to vector<128x128xf32>
    %472 = arith.mulf %470, %471 : vector<128x128xf32>
    %c1_284 = arith.constant 1 : index
    %c0_285 = arith.constant 0 : index
    %c0_286 = arith.constant 0 : index
    %473 = vector.load %arg7[%c1_284, %c0_285, %c0_286] : memref<9x128x128xf32, #tpu.memory_space<vmem>>, vector<1x128x128xf32>
    %474 = vector.shape_cast %473 : vector<1x128x128xf32> to vector<128x128xf32>
    %cst_287 = arith.constant dense<0.000000e+00> : vector<128x128xf32>
    %475 = tpu.matmul %472, %474, %cst_287 {dimension_numbers = #tpu.dot_dimension_numbers<[1], [0], [0], [1], [0, 0, 1, 1], [], []>} : vector<128x128xf32>, vector<128x128xf32>, vector<128x128xf32> -> vector<128x128xf32>
    %476 = arith.addf %469, %475 : vector<128x128xf32>
    %c9_288 = arith.constant 9 : index
    %c0_289 = arith.constant 0 : index
    %477 = vector.load %arg11[%c9_288, %c0_289] : memref<160x128xf32, #tpu.memory_space<vmem>>, vector<128x128xf32>
    %478 = vector.broadcast %13 : vector<128x1xf32> to vector<128x128xf32>
    %479 = arith.mulf %477, %478 : vector<128x128xf32>
    %c2_290 = arith.constant 2 : index
    %c0_291 = arith.constant 0 : index
    %c0_292 = arith.constant 0 : index
    %480 = vector.load %arg7[%c2_290, %c0_291, %c0_292] : memref<9x128x128xf32, #tpu.memory_space<vmem>>, vector<1x128x128xf32>
    %481 = vector.shape_cast %480 : vector<1x128x128xf32> to vector<128x128xf32>
    %cst_293 = arith.constant dense<0.000000e+00> : vector<128x128xf32>
    %482 = tpu.matmul %479, %481, %cst_293 {dimension_numbers = #tpu.dot_dimension_numbers<[1], [0], [0], [1], [0, 0, 1, 1], [], []>} : vector<128x128xf32>, vector<128x128xf32>, vector<128x128xf32> -> vector<128x128xf32>
    %483 = arith.addf %476, %482 : vector<128x128xf32>
    %c15_294 = arith.constant 15 : index
    %c0_295 = arith.constant 0 : index
    %484 = vector.load %arg11[%c15_294, %c0_295] : memref<160x128xf32, #tpu.memory_space<vmem>>, vector<128x128xf32>
    %485 = vector.broadcast %9 : vector<128x1xf32> to vector<128x128xf32>
    %486 = arith.mulf %484, %485 : vector<128x128xf32>
    %c3_296 = arith.constant 3 : index
    %c0_297 = arith.constant 0 : index
    %c0_298 = arith.constant 0 : index
    %487 = vector.load %arg7[%c3_296, %c0_297, %c0_298] : memref<9x128x128xf32, #tpu.memory_space<vmem>>, vector<1x128x128xf32>
    %488 = vector.shape_cast %487 : vector<1x128x128xf32> to vector<128x128xf32>
    %cst_299 = arith.constant dense<0.000000e+00> : vector<128x128xf32>
    %489 = tpu.matmul %486, %488, %cst_299 {dimension_numbers = #tpu.dot_dimension_numbers<[1], [0], [0], [1], [0, 0, 1, 1], [], []>} : vector<128x128xf32>, vector<128x128xf32>, vector<128x128xf32> -> vector<128x128xf32>
    %490 = arith.addf %483, %489 : vector<128x128xf32>
    %c4_300 = arith.constant 4 : index
    %c0_301 = arith.constant 0 : index
    %c0_302 = arith.constant 0 : index
    %491 = vector.load %arg7[%c4_300, %c0_301, %c0_302] : memref<9x128x128xf32, #tpu.memory_space<vmem>>, vector<1x128x128xf32>
    %492 = vector.shape_cast %491 : vector<1x128x128xf32> to vector<128x128xf32>
    %cst_303 = arith.constant dense<0.000000e+00> : vector<128x128xf32>
    %493 = tpu.matmul %462, %492, %cst_303 {dimension_numbers = #tpu.dot_dimension_numbers<[1], [0], [0], [1], [0, 0, 1, 1], [], []>} : vector<128x128xf32>, vector<128x128xf32>, vector<128x128xf32> -> vector<128x128xf32>
    %494 = arith.addf %490, %493 : vector<128x128xf32>
    %c17_304 = arith.constant 17 : index
    %c0_305 = arith.constant 0 : index
    %495 = vector.load %arg11[%c17_304, %c0_305] : memref<160x128xf32, #tpu.memory_space<vmem>>, vector<128x128xf32>
    %496 = vector.broadcast %11 : vector<128x1xf32> to vector<128x128xf32>
    %497 = arith.mulf %495, %496 : vector<128x128xf32>
    %c5_306 = arith.constant 5 : index
    %c0_307 = arith.constant 0 : index
    %c0_308 = arith.constant 0 : index
    %498 = vector.load %arg7[%c5_306, %c0_307, %c0_308] : memref<9x128x128xf32, #tpu.memory_space<vmem>>, vector<1x128x128xf32>
    %499 = vector.shape_cast %498 : vector<1x128x128xf32> to vector<128x128xf32>
    %cst_309 = arith.constant dense<0.000000e+00> : vector<128x128xf32>
    %500 = tpu.matmul %497, %499, %cst_309 {dimension_numbers = #tpu.dot_dimension_numbers<[1], [0], [0], [1], [0, 0, 1, 1], [], []>} : vector<128x128xf32>, vector<128x128xf32>, vector<128x128xf32> -> vector<128x128xf32>
    %501 = arith.addf %494, %500 : vector<128x128xf32>
    %c23_310 = arith.constant 23 : index
    %c0_311 = arith.constant 0 : index
    %502 = vector.load %arg11[%c23_310, %c0_311] : memref<160x128xf32, #tpu.memory_space<vmem>>, vector<128x128xf32>
    %503 = vector.broadcast %14 : vector<128x1xf32> to vector<128x128xf32>
    %504 = arith.mulf %502, %503 : vector<128x128xf32>
    %c6_312 = arith.constant 6 : index
    %c0_313 = arith.constant 0 : index
    %c0_314 = arith.constant 0 : index
    %505 = vector.load %arg7[%c6_312, %c0_313, %c0_314] : memref<9x128x128xf32, #tpu.memory_space<vmem>>, vector<1x128x128xf32>
    %506 = vector.shape_cast %505 : vector<1x128x128xf32> to vector<128x128xf32>
    %cst_315 = arith.constant dense<0.000000e+00> : vector<128x128xf32>
    %507 = tpu.matmul %504, %506, %cst_315 {dimension_numbers = #tpu.dot_dimension_numbers<[1], [0], [0], [1], [0, 0, 1, 1], [], []>} : vector<128x128xf32>, vector<128x128xf32>, vector<128x128xf32> -> vector<128x128xf32>
    %508 = arith.addf %501, %507 : vector<128x128xf32>
    %c24_316 = arith.constant 24 : index
    %c0_317 = arith.constant 0 : index
    %509 = vector.load %arg11[%c24_316, %c0_317] : memref<160x128xf32, #tpu.memory_space<vmem>>, vector<128x128xf32>
    %510 = vector.broadcast %7 : vector<128x1xf32> to vector<128x128xf32>
    %511 = arith.mulf %509, %510 : vector<128x128xf32>
    %c7_318 = arith.constant 7 : index
    %c0_319 = arith.constant 0 : index
    %c0_320 = arith.constant 0 : index
    %512 = vector.load %arg7[%c7_318, %c0_319, %c0_320] : memref<9x128x128xf32, #tpu.memory_space<vmem>>, vector<1x128x128xf32>
    %513 = vector.shape_cast %512 : vector<1x128x128xf32> to vector<128x128xf32>
    %cst_321 = arith.constant dense<0.000000e+00> : vector<128x128xf32>
    %514 = tpu.matmul %511, %513, %cst_321 {dimension_numbers = #tpu.dot_dimension_numbers<[1], [0], [0], [1], [0, 0, 1, 1], [], []>} : vector<128x128xf32>, vector<128x128xf32>, vector<128x128xf32> -> vector<128x128xf32>
    %515 = arith.addf %508, %514 : vector<128x128xf32>
    %c25_322 = arith.constant 25 : index
    %c0_323 = arith.constant 0 : index
    %516 = vector.load %arg11[%c25_322, %c0_323] : memref<160x128xf32, #tpu.memory_space<vmem>>, vector<128x128xf32>
    %517 = vector.broadcast %15 : vector<128x1xf32> to vector<128x128xf32>
    %518 = arith.mulf %516, %517 : vector<128x128xf32>
    %c8_324 = arith.constant 8 : index
    %c0_325 = arith.constant 0 : index
    %c0_326 = arith.constant 0 : index
    %519 = vector.load %arg7[%c8_324, %c0_325, %c0_326] : memref<9x128x128xf32, #tpu.memory_space<vmem>>, vector<1x128x128xf32>
    %520 = vector.shape_cast %519 : vector<1x128x128xf32> to vector<128x128xf32>
    %cst_327 = arith.constant dense<0.000000e+00> : vector<128x128xf32>
    %521 = tpu.matmul %518, %520, %cst_327 {dimension_numbers = #tpu.dot_dimension_numbers<[1], [0], [0], [1], [0, 0, 1, 1], [], []>} : vector<128x128xf32>, vector<128x128xf32>, vector<128x128xf32> -> vector<128x128xf32>
    %522 = arith.addf %515, %521 : vector<128x128xf32>
    %c2_328 = arith.constant 2 : index
    %c0_329 = arith.constant 0 : index
    %523 = vector.load %arg9[%c2_328, %c0_329] : memref<4x128xf32, #tpu.memory_space<vmem>>, vector<1x128xf32>
    %c3_330 = arith.constant 3 : index
    %c0_331 = arith.constant 0 : index
    %524 = vector.load %arg9[%c3_330, %c0_331] : memref<4x128xf32, #tpu.memory_space<vmem>>, vector<1x128xf32>
    %525 = vector.extract_strided_slice %522 {offsets = [0, 0], sizes = [64, 128], strides = [1, 1]} : vector<128x128xf32> to vector<64x128xf32>
    %526 = vector.shape_cast %525 : vector<64x128xf32> to vector<1x64x128xf32>
    %cst_332 = arith.constant dense<0.000000e+00> : vector<1xf32>
    %527 = vector.multi_reduction <add>, %526, %cst_332 [1, 2] : vector<1x64x128xf32> to vector<1xf32>
    %528 = vector.shape_cast %527 : vector<1xf32> to vector<1x1x1xf32>
    %529 = vector.extract %528[0, 0, 0] : f32 from vector<1x1x1xf32>
    %cst_333 = arith.constant 0.001953125 : f32
    %530 = arith.mulf %529, %cst_333 : f32
    %531 = vector.broadcast %530 : f32 to vector<64x128xf32>
    %532 = arith.subf %525, %531 : vector<64x128xf32>
    %533 = vector.broadcast %25 : vector<1x128xf32> to vector<64x128xf32>
    %534 = arith.mulf %532, %533 : vector<64x128xf32>
    %535 = arith.mulf %534, %534 : vector<64x128xf32>
    %536 = vector.shape_cast %535 : vector<64x128xf32> to vector<1x64x128xf32>
    %cst_334 = arith.constant dense<0.000000e+00> : vector<1xf32>
    %537 = vector.multi_reduction <add>, %536, %cst_334 [1, 2] : vector<1x64x128xf32> to vector<1xf32>
    %538 = vector.shape_cast %537 : vector<1xf32> to vector<1x1x1xf32>
    %539 = vector.extract %538[0, 0, 0] : f32 from vector<1x1x1xf32>
    %cst_335 = arith.constant 0.001953125 : f32
    %540 = arith.mulf %539, %cst_335 : f32
    %cst_336 = arith.constant 9.99999974E-6 : f32
    %541 = arith.addf %540, %cst_336 : f32
    %542 = math.rsqrt %541 : f32
    %543 = vector.broadcast %542 : f32 to vector<1x128xf32>
    %544 = arith.mulf %523, %543 : vector<1x128xf32>
    %545 = vector.broadcast %544 : vector<1x128xf32> to vector<64x128xf32>
    %546 = arith.mulf %534, %545 : vector<64x128xf32>
    %547 = vector.broadcast %524 : vector<1x128xf32> to vector<64x128xf32>
    %548 = arith.addf %546, %547 : vector<64x128xf32>
    %549 = vector.extract_strided_slice %522 {offsets = [64, 0], sizes = [64, 128], strides = [1, 1]} : vector<128x128xf32> to vector<64x128xf32>
    %550 = vector.shape_cast %549 : vector<64x128xf32> to vector<1x64x128xf32>
    %cst_337 = arith.constant dense<0.000000e+00> : vector<1xf32>
    %551 = vector.multi_reduction <add>, %550, %cst_337 [1, 2] : vector<1x64x128xf32> to vector<1xf32>
    %552 = vector.shape_cast %551 : vector<1xf32> to vector<1x1x1xf32>
    %553 = vector.extract %552[0, 0, 0] : f32 from vector<1x1x1xf32>
    %cst_338 = arith.constant 0.001953125 : f32
    %554 = arith.mulf %553, %cst_338 : f32
    %555 = vector.broadcast %554 : f32 to vector<64x128xf32>
    %556 = arith.subf %549, %555 : vector<64x128xf32>
    %557 = vector.broadcast %25 : vector<1x128xf32> to vector<64x128xf32>
    %558 = arith.mulf %556, %557 : vector<64x128xf32>
    %559 = arith.mulf %558, %558 : vector<64x128xf32>
    %560 = vector.shape_cast %559 : vector<64x128xf32> to vector<1x64x128xf32>
    %cst_339 = arith.constant dense<0.000000e+00> : vector<1xf32>
    %561 = vector.multi_reduction <add>, %560, %cst_339 [1, 2] : vector<1x64x128xf32> to vector<1xf32>
    %562 = vector.shape_cast %561 : vector<1xf32> to vector<1x1x1xf32>
    %563 = vector.extract %562[0, 0, 0] : f32 from vector<1x1x1xf32>
    %cst_340 = arith.constant 0.001953125 : f32
    %564 = arith.mulf %563, %cst_340 : f32
    %cst_341 = arith.constant 9.99999974E-6 : f32
    %565 = arith.addf %564, %cst_341 : f32
    %566 = math.rsqrt %565 : f32
    %567 = vector.broadcast %566 : f32 to vector<1x128xf32>
    %568 = arith.mulf %523, %567 : vector<1x128xf32>
    %569 = vector.broadcast %568 : vector<1x128xf32> to vector<64x128xf32>
    %570 = arith.mulf %558, %569 : vector<64x128xf32>
    %571 = vector.broadcast %524 : vector<1x128xf32> to vector<64x128xf32>
    %572 = arith.addf %570, %571 : vector<64x128xf32>
    %573 = tpu.concatenate %548, %572 in 0 : vector<64x128xf32>, vector<64x128xf32> -> vector<128x128xf32>
    %574 = vector.extract_strided_slice %573 {offsets = [0, 0], sizes = [64, 128], strides = [1, 1]} : vector<128x128xf32> to vector<64x128xf32>
    %c0_342 = arith.constant 0 : index
    %c0_343 = arith.constant 0 : index
    %c0_344 = arith.constant 0 : index
    %575 = vector.load %arg2[%c0_342, %c0_343, %c0_344] : memref<2x1x128xf32, #tpu.memory_space<vmem>>, vector<1x1x128xf32>
    %576 = vector.shape_cast %575 : vector<1x1x128xf32> to vector<1x128xf32>
    %577 = vector.broadcast %576 : vector<1x128xf32> to vector<64x128xf32>
    %578 = arith.addf %574, %577 : vector<64x128xf32>
    %c0_345 = arith.constant 0 : index
    %c0_346 = arith.constant 0 : index
    %c0_347 = arith.constant 0 : index
    %579 = vector.load %arg10[%c0_345, %c0_346, %c0_347] : memref<2x64x128xf32, #tpu.memory_space<vmem>>, vector<1x64x128xf32>
    %580 = vector.shape_cast %579 : vector<1x64x128xf32> to vector<64x128xf32>
    %581 = vector.shape_cast %578 : vector<64x128xf32> to vector<1x64x128xf32>
    tpu.vector_store %arg10[%c0_345, %c0_346, %c0_347], %581 {strides = array<i32>} : memref<2x64x128xf32, #tpu.memory_space<vmem>>, vector<1x64x128xf32>,
    %582 = vector.extract_strided_slice %573 {offsets = [64, 0], sizes = [64, 128], strides = [1, 1]} : vector<128x128xf32> to vector<64x128xf32>
    %c1_348 = arith.constant 1 : index
    %c0_349 = arith.constant 0 : index
    %c0_350 = arith.constant 0 : index
    %583 = vector.load %arg2[%c1_348, %c0_349, %c0_350] : memref<2x1x128xf32, #tpu.memory_space<vmem>>, vector<1x1x128xf32>
    %584 = vector.shape_cast %583 : vector<1x1x128xf32> to vector<1x128xf32>
    %585 = vector.broadcast %584 : vector<1x128xf32> to vector<64x128xf32>
    %586 = arith.addf %582, %585 : vector<64x128xf32>
    %c1_351 = arith.constant 1 : index
    %c0_352 = arith.constant 0 : index
    %c0_353 = arith.constant 0 : index
    %587 = vector.load %arg10[%c1_351, %c0_352, %c0_353] : memref<2x64x128xf32, #tpu.memory_space<vmem>>, vector<1x64x128xf32>
    %588 = vector.shape_cast %587 : vector<1x64x128xf32> to vector<64x128xf32>
    %589 = vector.shape_cast %586 : vector<64x128xf32> to vector<1x64x128xf32>
    tpu.vector_store %arg10[%c1_351, %c0_352, %c0_353], %589 {strides = array<i32>} : memref<2x64x128xf32, #tpu.memory_space<vmem>>, vector<1x64x128xf32>,
    return
  }
  func.func @transform_0(%arg0: i32) -> (i32, i32, i32, i32, i32) {
    %c0_i32 = arith.constant 0 : i32
    %c0_i32_0 = arith.constant 0 : i32
    %c0_i32_1 = arith.constant 0 : i32
    %c0_i32_2 = arith.constant 0 : i32
    %c0_i32_3 = arith.constant 0 : i32
    return %c0_i32, %c0_i32_0, %arg0, %c0_i32_1, %c0_i32_2 : i32, i32, i32, i32, i32
  }
  func.func @transform_1(%arg0: i32) -> (i32, i32, i32) {
    %c0_i32 = arith.constant 0 : i32
    %c0_i32_0 = arith.constant 0 : i32
    %c0_i32_1 = arith.constant 0 : i32
    return %arg0, %c0_i32, %c0_i32_0 : i32, i32, i32
  }
  func.func @transform_2(%arg0: i32) -> (i32, i32, i32) {
    %c0_i32 = arith.constant 0 : i32
    %c0_i32_0 = arith.constant 0 : i32
    %c0_i32_1 = arith.constant 0 : i32
    %c0_i32_2 = arith.constant 0 : i32
    return %c0_i32, %c0_i32_0, %c0_i32_1 : i32, i32, i32
  }
  func.func @transform_3(%arg0: i32) -> (i32, i32, i32) {
    %c0_i32 = arith.constant 0 : i32
    %c0_i32_0 = arith.constant 0 : i32
    %c0_i32_1 = arith.constant 0 : i32
    %c0_i32_2 = arith.constant 0 : i32
    return %c0_i32, %c0_i32_0, %c0_i32_1 : i32, i32, i32
  }
  func.func @transform_4(%arg0: i32) -> (i32, i32, i32) {
    %c0_i32 = arith.constant 0 : i32
    %c0_i32_0 = arith.constant 0 : i32
    %c0_i32_1 = arith.constant 0 : i32
    %c0_i32_2 = arith.constant 0 : i32
    return %c0_i32, %c0_i32_0, %c0_i32_1 : i32, i32, i32
  }
  func.func @transform_5(%arg0: i32) -> (i32, i32, i32) {
    %c0_i32 = arith.constant 0 : i32
    %c0_i32_0 = arith.constant 0 : i32
    %c0_i32_1 = arith.constant 0 : i32
    %c0_i32_2 = arith.constant 0 : i32
    return %c0_i32, %c0_i32_0, %c0_i32_1 : i32, i32, i32
  }
  func.func @transform_6(%arg0: i32) -> (i32, i32, i32) {
    %c0_i32 = arith.constant 0 : i32
    %c0_i32_0 = arith.constant 0 : i32
    %c0_i32_1 = arith.constant 0 : i32
    %c0_i32_2 = arith.constant 0 : i32
    return %c0_i32, %c0_i32_0, %c0_i32_1 : i32, i32, i32
  }
  func.func @transform_7(%arg0: i32) -> (i32, i32) {
    %c0_i32 = arith.constant 0 : i32
    %c0_i32_0 = arith.constant 0 : i32
    %c0_i32_1 = arith.constant 0 : i32
    return %c0_i32, %c0_i32_0 : i32, i32
  }
  func.func @transform_8(%arg0: i32) -> (i32, i32) {
    %c0_i32 = arith.constant 0 : i32
    %c0_i32_0 = arith.constant 0 : i32
    %c0_i32_1 = arith.constant 0 : i32
    return %c0_i32, %c0_i32_0 : i32, i32
  }
  func.func @transform_9(%arg0: i32) -> (i32, i32, i32) {
    %c0_i32 = arith.constant 0 : i32
    %c0_i32_0 = arith.constant 0 : i32
    %c0_i32_1 = arith.constant 0 : i32
    return %arg0, %c0_i32, %c0_i32_0 : i32, i32, i32
  }
}

</mosaic_0001>

<bundles_post_ra>
// kernel: downsample_pallas.1
= control target key start
LH: loop header
LB: loop body
LE: loop exit
PB: predicated region body
PF: predicated region fallthrough
CT: control target
= control target key end

     0   :  { %v15633_v0 = vmov 0   ;;  %v15634_v3 = vmov 0.0   ;;  %s21103_s2 = inlined_call_operand.vmem [shape: f32[4,128,1], index: 2, kind: input, shape index: {}]   ;;  %s21104_s3 = inlined_call_operand.vmem [shape: f32[9,128,128], index: 3, kind: input, shape index: {}]   ;;  %s21105_s0 = inlined_call_operand.vmem [shape: f32[2,2,2,64,128], index: 0, kind: input, shape index: {}]   ;;  %s21106_s4 = inlined_call_operand.vmem [shape: f32[9,128,128], index: 4, kind: input, shape index: {}]   ;;  %s21107_s7 = inlined_call_operand.vmem [shape: f32[4,128], index: 7, kind: input, shape index: {}]   ;;  %s21108_s5 = inlined_call_operand.vmem [shape: f32[9,128,128], index: 5, kind: input, shape index: {}]   ;;  %s21109_s6 = inlined_call_operand.vmem [shape: f32[9,128,128], index: 6, kind: input, shape index: {}]   ;;  %s21110_s8 = inlined_call_operand.vmem [shape: f32[4,128], index: 8, kind: input, shape index: {}]   ;;  %s21111_s1 = inlined_call_operand.vmem [shape: f32[2,1,128], index: 1, kind: input, shape index: {}]   ;;  %s21112_s9 = inlined_call_operand.vmem [shape: f32[2,64,128], index: 9, kind: output, shape index: {}]  }
   0x1   :  { %15450 = vset.pattern.permute.xlu1 %v15633_v0  ;;  %15449 = vset.pattern.permute.xlu0 %v15633_v0  ;;  %v15688_v1 = vld [vmem:[%s21103_s2 + $0x10] sm:$0xff]  ;;  %v15693_v2 = vld [vmem:[%s21103_s2] sm:$0xff]  ;;  %33 = vst [vmem:[#allocation2 + $0x8] sm:$0xff] %v15634_v3  ;;  %32 = vst [vmem:[#allocation2] sm:$0xff] %v15634_v3 }
   0x2   :  { %466 = vperm.xlu1 %15450, %v15688_v1   ;;  %456 = vperm.xlu0 %15449, %v15693_v2   ;;  %34 = vst [vmem:[#allocation2 + $0x90] sm:$0xff] %v15634_v3  ;;  %35 = vst [vmem:[#allocation2 + $0x98] sm:$0xff] %v15634_v3  ;;  %v15700_v4 = vld [vmem:[%s21103_s2 + $0x18] sm:$0xff]  ;;  %v15705_v5 = vld [vmem:[%s21103_s2 + $0x8] sm:$0xff] }
   0x3   :  { %v15712_v6 = vld [vmem:[%s21103_s2 + $0x28] sm:$0xff]  ;;  %v15717_v7 = vld [vmem:[%s21103_s2 + $0x20] sm:$0xff]  ;;  %v15724_v8 = vld [vmem:[%s21103_s2 + $0x38] sm:$0xff] }
   0x4   :  { %v15729_v9 = vld [vmem:[%s21103_s2 + $0x30] sm:$0xff]  ;;  %v15736_v10 = vld [vmem:[%s21103_s2 + $0x48] sm:$0xff]  ;;  %v15741_v11 = vld [vmem:[%s21103_s2 + $0x40] sm:$0xff] }
   0x5   :  { %v10040_v12 = vld [vmem:[%s21104_s3 + $0x80] sm:$0xff]  ;;  %v10041_v13 = vld [vmem:[%s21104_s3 + $0x88] sm:$0xff]  ;;  %v10042_v14 = vld [vmem:[%s21104_s3 + $0x90] sm:$0xff] }
   0x6   :  { %471 = vperm.xlu1 %15450, %v15700_v4   ;;  %461 = vperm.xlu0 %15449, %v15705_v5   ;;  %v13735_v15 = vpack.c.bf16 %v10041_v13, %v10040_v12  ;;  %v10043_v16 = vld [vmem:[%s21104_s3 + $0x98] sm:$0xff]  ;;  %v15765_v18 = vld [vmem:[%s21103_s2 + $0x50] sm:$0xff]  ;;  %v10044_v20 = vld [vmem:[%s21104_s3 + $0xa0] sm:$0xff] }
   0x7   :  { %v15760_v17 = vld [vmem:[%s21103_s2 + $0x58] sm:$0xff]  ;;  %v13739_v19 = vpack.c.bf16 %v10043_v16, %v10042_v14  ;;  %v10045_v21 = vld [vmem:[%s21104_s3 + $0xa8] sm:$0xff]  ;;  %v15783_v23 = vld [vmem:[%s21103_s2 + $0x60] sm:$0xff] }
   0x8   :  { %13736 = vmatprep.subr.bf16.mxu0 %v13735_v15  ;;  %v15776_v22 = vld [vmem:[%s21103_s2 + $0x68] sm:$0xff]  ;;  %v10046_v24 = vld [vmem:[%s21104_s3 + $0xb0] sm:$0xff]  ;;  %v10047_v25 = vld [vmem:[%s21104_s3 + $0xb8] sm:$0xff]  ;;  %v13743_v26 = vpack.c.bf16 %v10045_v21, %v10044_v20 }
   0x9   :  { %13738 = vmatpush3.bf16.msra.mxu0 %v13735_v15  ;;  %v175_v27 = vld [vmem:[%s21105_s0] sm:$0xff]  ;;  %v176_v32 = vld [vmem:[%s21105_s0 + $0x8] sm:$0xff]  ;;  %v15812_v34 = vld [vmem:[%s21103_s2 + $0x78] sm:$0xff]  ;;  %v13747_v47 = vpack.c.bf16 %v10047_v25, %v10046_v24 }
   0xa   :  { %481 = vperm.xlu1 %15450, %v15712_v6   ;;  %476 = vperm.xlu0 %15449, %v15717_v7   ;;  %v9984_v28 = vld [vmem:[%s21105_s0 + $0x80] sm:$0xff]  ;;  %v9985_v33 = vld [vmem:[%s21105_s0 + $0x88] sm:$0xff]  ;;  %v15817_v35 = vld [vmem:[%s21103_s2 + $0x70] sm:$0xff] }
   0xb   :  { %13740 = vmatprep.subr.bf16.mxu0 %v13739_v19  ;;  %v9992_v29 = vld [vmem:[%s21105_s0 + $0x100] sm:$0xff]  ;;  %v192_v30 = vmax.f32 %v175_v27, %v9984_v28  ;;  %v15822_v36 = vld [vmem:[%s21103_s2 + $0x108] sm:$0xff]  ;;  %v193_v39 = vmax.f32 %v176_v32, %v9985_v33  ;;  %v177_v45 = vld [vmem:[%s21105_s0 + $0x10] sm:$0xff] }
   0xc   :  { %v10000_v31 = vld [vmem:[%s21105_s0 + $0x180] sm:$0xff]  ;;  %v9993_v40 = vld [vmem:[%s21105_s0 + $0x108] sm:$0xff]  ;;  %v9986_v46 = vld [vmem:[%s21105_s0 + $0x90] sm:$0xff]  ;;  %v104_v63 = vmul.f32 %v15822_v36, %v15705_v5 }
   0xd   :  { %v15827_v37 = vld [vmem:[%s21103_s2 + $0x100] sm:$0xff]  ;;  %13742 = vmatpush3.bf16.msra.mxu0 %v13739_v19  ;;  %v218_v38 = vmax.f32 %v9992_v29, %v10000_v31  ;;  %v10001_v41 = vld [vmem:[%s21105_s0 + $0x188] sm:$0xff]  ;;  %v194_v49 = vmax.f32 %v177_v45, %v9986_v46  ;;  %v9994_v50 = vld [vmem:[%s21105_s0 + $0x110] sm:$0xff] }
   0xe   :  { %491 = vperm.xlu1 %15450, %v15724_v8   ;;  %486 = vperm.xlu0 %15449, %v15729_v9   ;;  %v10048_v42 = vld [vmem:[%s21104_s3 + $0xc0] sm:$0xff]  ;;  %v10049_v43 = vld [vmem:[%s21104_s3 + $0xc8] sm:$0xff]  ;;  %v219_v44 = vmax.f32 %v9993_v40, %v10001_v41  ;;  %v10002_v51 = vld [vmem:[%s21105_s0 + $0x190] sm:$0xff]  ;;  %v103_v0 = vmul.f32 %v15827_v37, %v15693_v2 }
   0xf   :  { %13744 = vmatprep.subr.bf16.mxu0 %v13743_v26  ;;  %v15849_v48 = vmax.f32 %v192_v30, %v218_v38  ;;  %v178_v52 = vld [vmem:[%s21105_s0 + $0x18] sm:$0xff]  ;;  %v220_v54 = vmax.f32 %v9994_v50, %v10002_v51  ;;  %v15879_v59 = vld [vmem:[%s21103_s2 + $0x110] sm:$0xff]  ;;  %v179_v62 = vld [vmem:[%s21105_s0 + $0x20] sm:$0xff]  ;;  %v13751_v15 = vpack.c.bf16 %v10049_v43, %v10048_v42 }
  0x10   :  { %v15860_v53 = vmax.f32 %v193_v39, %v219_v44  ;;  %v9987_v55 = vld [vmem:[%s21105_s0 + $0x98] sm:$0xff]  ;;  %v9988_v12 = vld [vmem:[%s21105_s0 + $0xa0] sm:$0xff]  ;;  %v180_v21 = vld [vmem:[%s21105_s0 + $0x28] sm:$0xff]  ;;  %v105_v42 = vmul.f32 %v15879_v59, %v15688_v1 }
  0x11   :  { %v9995_v56 = vld [vmem:[%s21105_s0 + $0x118] sm:$0xff]  ;;  %13746 = vmatpush3.bf16.msra.mxu0 %v13743_v26  ;;  %294 = vst [vmem:[#allocation2 + $0x10] sm:$0xff] %v15849_v48  ;;  %v195_v60 = vmax.f32 %v178_v52, %v9987_v55  ;;  %v15892_v3 = vmax.f32 %v194_v49, %v220_v54  ;;  %v9996_v13 = vld [vmem:[%s21105_s0 + $0x120] sm:$0xff]  ;;  %v196_v19 = vmax.f32 %v179_v62, %v9988_v12  ;;  %v9989_v24 = vld [vmem:[%s21105_s0 + $0xa8] sm:$0xff] }
  0x12   :  { %501 = vperm.xlu1 %15450, %v15736_v10   ;;  %496 = vperm.xlu0 %15449, %v15741_v11   ;;  %v10003_v57 = vld [vmem:[%s21105_s0 + $0x198] sm:$0xff]  ;;  %295 = vst [vmem:[#allocation2 + $0x18] sm:$0xff] %v15860_v53  ;;  %v10004_v14 = vld [vmem:[%s21105_s0 + $0x1a0] sm:$0xff]  ;;  %v9997_v25 = vld [vmem:[%s21105_s0 + $0x128] sm:$0xff]  ;;  %v197_v29 = vmax.f32 %v180_v21, %v9989_v24 }
  0x13   :  { %v15874_v58 = vld [vmem:[%s21103_s2 + $0x118] sm:$0xff]  ;;  %v221_v61 = vmax.f32 %v9995_v56, %v10003_v57  ;;  %13748 = vmatprep.subr.bf16.mxu0 %v13747_v47  ;;  %v222_v20 = vmax.f32 %v9996_v13, %v10004_v14  ;;  %v15917_v26 = vld [vmem:[%s21103_s2 + $0x128] sm:$0xff]  ;;  %v10050_v27 = vld [vmem:[%s21104_s3 + $0xd0] sm:$0xff]  ;;  %296 = vst [vmem:[#allocation2 + $0x20] sm:$0xff] %v15892_v3 }
  0x14   :  { %v10051_v28 = vld [vmem:[%s21104_s3 + $0xd8] sm:$0xff]  ;;  %v10005_v30 = vld [vmem:[%s21105_s0 + $0x1a8] sm:$0xff]  ;;  %v15932_v31 = vld [vmem:[%s21103_s2 + $0x120] sm:$0xff]  ;;  %v106_v41 = vmul.f32 %v15874_v58, %v15700_v4  ;;  %v108_v62 = vmul.f32 %v15917_v26, %v15712_v6 }
  0x15   :  { %v15903_v16 = vmax.f32 %v195_v60, %v221_v61  ;;  %13750 = vmatpush3.bf16.msra.mxu0 %v13747_v47  ;;  %v15935_v32 = vmax.f32 %v196_v19, %v222_v20  ;;  %v223_v33 = vmax.f32 %v9997_v25, %v10005_v30  ;;  %v181_v38 = vld [vmem:[%s21105_s0 + $0x30] sm:$0xff]  ;;  %v182_v45 = vld [vmem:[%s21105_s0 + $0x38] sm:$0xff]  ;;  %v13755_v47 = vpack.c.bf16 %v10051_v28, %v10050_v27  ;;  %v10052_v49 = vld [vmem:[%s21104_s3 + $0xe0] sm:$0xff] }
  0x16   :  { %511 = vperm.xlu1 %15450, %v15760_v17   ;;  %506 = vperm.xlu0 %15449, %v15765_v18   ;;  %v9990_v39 = vld [vmem:[%s21105_s0 + $0xb0] sm:$0xff]  ;;  %v9991_v46 = vld [vmem:[%s21105_s0 + $0xb8] sm:$0xff]  ;;  %v10053_v56 = vld [vmem:[%s21104_s3 + $0xe8] sm:$0xff] }
  0x17   :  { %297 = vst [vmem:[#allocation2 + $0x28] sm:$0xff] %v15903_v16  ;;  %v9998_v40 = vld [vmem:[%s21105_s0 + $0x130] sm:$0xff]  ;;  %v198_v43 = vmax.f32 %v181_v38, %v9990_v39  ;;  %13752 = vmatprep.subr.bf16.mxu0 %v13751_v15  ;;  %298 = vst [vmem:[#allocation2 + $0x30] sm:$0xff] %v15935_v32  ;;  %v15963_v50 = vmax.f32 %v197_v29, %v223_v33  ;;  %v199_v52 = vmax.f32 %v182_v45, %v9991_v46  ;;  %v9999_v54 = vld [vmem:[%s21105_s0 + $0x138] sm:$0xff] }
  0x18   :  { %v10006_v44 = vld [vmem:[%s21105_s0 + $0x1b0] sm:$0xff]  ;;  %v10007_v55 = vld [vmem:[%s21105_s0 + $0x1b8] sm:$0xff]  ;;  %v10008_v60 = vld [vmem:[%s21105_s0 + $0x40] sm:$0xff]  ;;  %v13759_v29 = vpack.c.bf16 %v10053_v56, %v10052_v49 }
  0x19   :  { %v224_v51 = vmax.f32 %v9998_v40, %v10006_v44  ;;  %v225_v57 = vmax.f32 %v9999_v54, %v10007_v55  ;;  %v10016_v61 = vld [vmem:[%s21105_s0 + $0xc0] sm:$0xff]  ;;  %13754 = vmatpush3.bf16.msra.mxu0 %v13751_v15  ;;  %299 = vst [vmem:[#allocation2 + $0x38] sm:$0xff] %v15963_v50  ;;  %v10009_v20 = vld [vmem:[%s21105_s0 + $0x48] sm:$0xff]  ;;  %v107_v15 = vmul.f32 %v15932_v31, %v15717_v7  ;;  %v10054_v30 = vld [vmem:[%s21104_s3 + $0xf0] sm:$0xff] }
  0x1a   :  { %521 = vperm.xlu1 %15450, %v15776_v22   ;;  %516 = vperm.xlu0 %15449, %v15783_v23   ;;  %v252_v13 = vmax.f32 %v10008_v60, %v10016_v61  ;;  %v10024_v14 = vld [vmem:[%s21105_s0 + $0x140] sm:$0xff]  ;;  %v10017_v25 = vld [vmem:[%s21105_s0 + $0xc8] sm:$0xff]  ;;  %v10055_v33 = vld [vmem:[%s21104_s3 + $0xf8] sm:$0xff] }
  0x1b   :  { %v15993_v12 = vmax.f32 %v198_v43, %v224_v51  ;;  %v10032_v19 = vld [vmem:[%s21105_s0 + $0x1c0] sm:$0xff]  ;;  %v16006_v21 = vmax.f32 %v199_v52, %v225_v57  ;;  %v10025_v27 = vld [vmem:[%s21105_s0 + $0x148] sm:$0xff]  ;;  %13756 = vmatprep.subr.bf16.mxu0 %v13755_v47  ;;  %v253_v38 = vmax.f32 %v10009_v20, %v10017_v25  ;;  %v10010_v40 = vld [vmem:[%s21105_s0 + $0x50] sm:$0xff] }
  0x1c   :  { %v278_v24 = vmax.f32 %v10024_v14, %v10032_v19  ;;  %v10033_v28 = vld [vmem:[%s21105_s0 + $0x1c8] sm:$0xff]  ;;  %v10018_v43 = vld [vmem:[%s21105_s0 + $0xd0] sm:$0xff]  ;;  %v10011_v52 = vld [vmem:[%s21105_s0 + $0x58] sm:$0xff] }
  0x1d   :  { %300 = vst [vmem:[#allocation2 + $0x40] sm:$0xff] %v15993_v12  ;;  %v279_v39 = vmax.f32 %v10025_v27, %v10033_v28  ;;  %301 = vst [vmem:[#allocation2 + $0x48] sm:$0xff] %v16006_v21  ;;  %v10026_v44 = vld [vmem:[%s21105_s0 + $0x150] sm:$0xff]  ;;  %13758 = vmatpush3.bf16.msra.mxu0 %v13755_v47  ;;  %v254_v49 = vmax.f32 %v10010_v40, %v10018_v43  ;;  %v10019_v54 = vld [vmem:[%s21105_s0 + $0xd8] sm:$0xff] }
  0x1e   :  { %531 = vperm.xlu1 %15450, %v15812_v34   ;;  %526 = vperm.xlu0 %15449, %v15817_v35   ;;  %v10034_v45 = vld [vmem:[%s21105_s0 + $0x1d0] sm:$0xff]  ;;  %v10027_v55 = vld [vmem:[%s21105_s0 + $0x158] sm:$0xff]  ;;  %v16062_v57 = vld [vmem:[%s21103_s2 + $0x140] sm:$0xff]  ;;  %v255_v61 = vmax.f32 %v10011_v52, %v10019_v54 }
  0x1f   :  { %v16044_v46 = vmax.f32 %v253_v38, %v279_v39  ;;  %v280_v51 = vmax.f32 %v10026_v44, %v10034_v45  ;;  %v422_v60 = vld [vmem:[%s21104_s3] sm:$0xff]  ;;  %13760 = vmatprep.subr.bf16.mxu0 %v13759_v29  ;;  %v423_v25 = vld [vmem:[%s21104_s3 + $0x8] sm:$0xff]  ;;  %v16111_v45 = vld [vmem:[%s21103_s2 + $0x158] sm:$0xff] }
  0x20   :  { %v10012_v20 = vld [vmem:[%s21105_s0 + $0x60] sm:$0xff]  ;;  %v10021_v40 = vld [vmem:[%s21105_s0 + $0xe8] sm:$0xff]  ;;  %v16116_v52 = vld [vmem:[%s21103_s2 + $0x150] sm:$0xff]  ;;  %v16118_v54 = vpack.c.bf16 %v423_v25, %v422_v60 }
  0x21   :  { %303 = vst [vmem:[#allocation2 + $0x58] sm:$0xff] %v16044_v46  ;;  %v16072_v14 = vmax.f32 %v254_v49, %v280_v51  ;;  %v10036_v28 = vld [vmem:[%s21105_s0 + $0x1e0] sm:$0xff]  ;;  %13762 = vmatpush3.bf16.msra.mxu0 %v13759_v29  ;;  %v10029_v43 = vld [vmem:[%s21105_s0 + $0x168] sm:$0xff]  ;;  %v111_v29 = vmul.f32 %v16062_v57, %v15741_v11  ;;  %v10030_v60 = vld [vmem:[%s21105_s0 + $0x170] sm:$0xff] }
  0x22   :  { %333 = vperm.xlu1 %15450, %v104_v63   ;;  %328 = vperm.xlu0 %15449, %v103_v0   ;;  %v15985_v63 = vld [vmem:[%s21103_s2 + $0x138] sm:$0xff]  ;;  %v15990_v0 = vld [vmem:[%s21103_s2 + $0x130] sm:$0xff]  ;;  %v10037_v44 = vld [vmem:[%s21105_s0 + $0x1e8] sm:$0xff] }
  0x23   :  { %v110_v47 = vmul.f32 %v15985_v63, %v15724_v8  ;;  %v109_v56 = vmul.f32 %v15990_v0, %v15729_v9  ;;  %304 = vst [vmem:[#allocation2 + $0x60] sm:$0xff] %v16072_v14  ;;  %v283_v51 = vmax.f32 %v10029_v43, %v10037_v44  ;;  %v16146_v25 = vld [vmem:[%s21103_s2 + $0x168] sm:$0xff] }
  0x24   :  { %v16178_v44 = vld [vmem:[%s21103_s2 + $0x188] sm:$0xff] }
  0x26   :  { %343 = vperm.xlu1 %15450, %v106_v41   ;;  %338 = vperm.xlu0 %15449, %v105_v42   ;;  %v16030_v41 = vld [vmem:[%s21103_s2 + $0x148] sm:$0xff]  ;;  %v16033_v42 = vmax.f32 %v252_v13, %v278_v24  ;;  %v13763_v13 = vpack.c.bf16 %v10055_v33, %v10054_v30  ;;  %v10028_v24 = vld [vmem:[%s21105_s0 + $0x160] sm:$0xff] }
  0x27   :  { %v10013_v30 = vld [vmem:[%s21105_s0 + $0x68] sm:$0xff]  ;;  %v112_v33 = vmul.f32 %v16030_v41, %v15736_v10  ;;  %v282_v39 = vmax.f32 %v10028_v24, %v10036_v28  ;;  %v113_v24 = vmul.f32 %v16116_v52, %v15765_v18  ;;  %v116_v28 = vmul.f32 %v16146_v25, %v15776_v22 }
  0x28   :  { %302 = vst [vmem:[#allocation2 + $0x50] sm:$0xff] %v16033_v42  ;;  %v257_v49 = vmax.f32 %v10013_v30, %v10021_v40  ;;  %13764 = vmatprep.subr.bf16.mxu0 %v13763_v13 }
  0x29   :  { %13766 = vmatpush3.bf16.msra.mxu0 %v13763_v13  ;;  %v16151_v13 = vld [vmem:[%s21103_s2 + $0x160] sm:$0xff] }
  0x2a   :  { %353 = vperm.xlu1 %15450, %v108_v62   ;;  %348 = vperm.xlu0 %15449, %v107_v15   ;;  %v10035_v62 = vld [vmem:[%s21105_s0 + $0x1d8] sm:$0xff]  ;;  %v10020_v15 = vld [vmem:[%s21105_s0 + $0xe0] sm:$0xff]  ;;  %v115_v30 = vmul.f32 %v16151_v13, %v15783_v23 }
  0x2b   :  { %v281_v19 = vmax.f32 %v10027_v55, %v10035_v62  ;;  %v256_v27 = vmax.f32 %v10012_v20, %v10020_v15  ;;  %v114_v15 = vmul.f32 %v16111_v45, %v15760_v17  ;;  %13768 = vmatprep.subr.bf16.mxu0 %v16118_v54 }
  0x2d   :  { %v16095_v38 = vmax.f32 %v255_v61, %v281_v19  ;;  %v16121_v55 = vmax.f32 %v256_v27, %v282_v39  ;;  %v16129_v61 = vmax.f32 %v257_v49, %v283_v51  ;;  %v10038_v19 = vld [vmem:[%s21105_s0 + $0x1f0] sm:$0xff]  ;;  %v120_v49 = vmul.f32 %v16178_v44, %v15705_v5 }
  0x2e   :  { %363 = vperm.xlu1 %15450, %v110_v47   ;;  %358 = vperm.xlu0 %15449, %v109_v56   ;;  %v10014_v47 = vld [vmem:[%s21105_s0 + $0x70] sm:$0xff]  ;;  %v284_v20 = vmax.f32 %v10030_v60, %v10038_v19  ;;  %v16211_v60 = vld [vmem:[%s21103_s2 + $0x1a0] sm:$0xff] }
  0x2f   :  { %305 = vst [vmem:[#allocation2 + $0x68] sm:$0xff] %v16095_v38  ;;  %v10022_v56 = vld [vmem:[%s21105_s0 + $0xf0] sm:$0xff]  ;;  %306 = vst [vmem:[#allocation2 + $0x70] sm:$0xff] %v16121_v55 }
  0x30   :  { %v258_v62 = vmax.f32 %v10014_v47, %v10022_v56  ;;  %307 = vst [vmem:[#allocation2 + $0x78] sm:$0xff] %v16129_v61  ;;  %v16169_v39 = vld [vmem:[%s21103_s2 + $0x170] sm:$0xff]  ;;  %v16192_v47 = vld [vmem:[%s21103_s2 + $0x198] sm:$0xff] }
  0x31   :  { %v117_v43 = vmul.f32 %v16169_v39, %v15817_v35  ;;  %v16197_v56 = vld [vmem:[%s21103_s2 + $0x190] sm:$0xff] }
  0x32   :  { %373 = vperm.xlu1 %15450, %v112_v33   ;;  %368 = vperm.xlu0 %15449, %v111_v29   ;;  %v16154_v27 = vmax.f32 %v258_v62, %v284_v20  ;;  %v16164_v33 = vld [vmem:[%s21103_s2 + $0x178] sm:$0xff]  ;;  %v16183_v29 = vld [vmem:[%s21103_s2 + $0x180] sm:$0xff]  ;;  %v122_v62 = vmul.f32 %v16192_v47, %v15700_v4  ;;  %v121_v5 = vmul.f32 %v16197_v56, %v15688_v1  ;;  %v16225_v20 = vld [vmem:[%s21103_s2 + $0x1b0] sm:$0xff] }
  0x33   :  { %v118_v40 = vmul.f32 %v16164_v33, %v15812_v34  ;;  %v119_v51 = vmul.f32 %v16183_v29, %v15693_v2  ;;  %v16206_v2 = vld [vmem:[%s21103_s2 + $0x1a8] sm:$0xff]  ;;  %v123_v4 = vmul.f32 %v16211_v60, %v15717_v7  ;;  %v16220_v1 = vld [vmem:[%s21103_s2 + $0x1b8] sm:$0xff] }
  0x34   :  { %308 = vst [vmem:[#allocation2 + $0x80] sm:$0xff] %v16154_v27  ;;  %v124_v19 = vmul.f32 %v16206_v2, %v15712_v6  ;;  %v125_v6 = vmul.f32 %v16225_v20, %v15729_v9  ;;  %v16234_v7 = vld [vmem:[%s21103_s2 + $0x1c8] sm:$0xff]  ;;  %v16248_v9 = vld [vmem:[%s21103_s2 + $0x1d8] sm:$0xff] }
  0x36   :  { %383 = vperm.xlu1 %15450, %v114_v15   ;;  %378 = vperm.xlu0 %15449, %v113_v24   ;;  %v126_v15 = vmul.f32 %v16220_v1, %v15724_v8  ;;  %v16239_v24 = vld [vmem:[%s21103_s2 + $0x1c0] sm:$0xff] }
  0x37   :  { %v127_v8 = vmul.f32 %v16239_v24, %v15741_v11  ;;  %v16262_v11 = vld [vmem:[%s21103_s2 + $0x1e8] sm:$0xff] }
  0x3a   :  { %393 = vperm.xlu1 %15450, %v116_v28   ;;  %388 = vperm.xlu0 %15449, %v115_v30   ;;  %v128_v28 = vmul.f32 %v16234_v7, %v15736_v10  ;;  %v16253_v30 = vld [vmem:[%s21103_s2 + $0x1d0] sm:$0xff] }
  0x3b   :  { %v129_v10 = vmul.f32 %v16253_v30, %v15765_v18  ;;  %v10031_v18 = vld [vmem:[%s21105_s0 + $0x178] sm:$0xff] }
  0x3e   :  { %403 = vperm.xlu1 %15450, %v118_v40   ;;  %398 = vperm.xlu0 %15449, %v117_v43   ;;  %v130_v40 = vmul.f32 %v16248_v9, %v15760_v17  ;;  %v10015_v43 = vld [vmem:[%s21105_s0 + $0x78] sm:$0xff]  ;;  %v16273_v17 = vld [vmem:[%s21103_s2 + $0x1e0] sm:$0xff] }
  0x42   :  { %880 = vperm.xlu1 %15450, %v120_v49   ;;  %875 = vperm.xlu0 %15449, %v119_v51   ;;  %v10023_v49 = vld [vmem:[%s21105_s0 + $0xf8] sm:$0xff] }
  0x43   :  { %v259_v51 = vmax.f32 %v10015_v43, %v10023_v49 }
  0x46   :  { %890 = vperm.xlu1 %15450, %v122_v62   ;;  %885 = vperm.xlu0 %15449, %v121_v5   ;;  %v10039_v62 = vld [vmem:[%s21105_s0 + $0x1f8] sm:$0xff] }
  0x47   :  { %v285_v5 = vmax.f32 %v10031_v18, %v10039_v62 }
  0x4a   :  { %900 = vperm.xlu1 %15450, %v124_v19   ;;  %895 = vperm.xlu0 %15449, %v123_v4   ;;  %v132_v19 = vmul.f32 %v16262_v11, %v15776_v22  ;;  %v131_v4 = vmul.f32 %v16273_v17, %v15783_v23 }
  0x4e   :  { %910 = vperm.xlu1 %15450, %v126_v15   ;;  %905 = vperm.xlu0 %15449, %v125_v6   ;;  %v293_v15 = vmax.f32 %v259_v51, %v285_v5  ;;  %v16288_v6 = vld [vmem:[%s21103_s2 + $0x1f8] sm:$0xff]  ;;  %v426_v5 = vld [vmem:[%s21104_s3 + $0x20] sm:$0xff] }
  0x4f   :  { %v134_v22 = vmul.f32 %v16288_v6, %v15812_v34 }
  0x50   :  { %309 = vst [vmem:[#allocation2 + $0x88] sm:$0xff] %v293_v15 }
  0x52   :  { %920 = vperm.xlu1 %15450, %v128_v28   ;;  %915 = vperm.xlu0 %15449, %v127_v8   ;;  %v16293_v28 = vld [vmem:[%s21103_s2 + $0x1f0] sm:$0xff] }
  0x53   :  { %v133_v23 = vmul.f32 %v16293_v28, %v15817_v35 }
  0x56   :  { %930 = vperm.xlu1 %15450, %v130_v40   ;;  %925 = vperm.xlu0 %15449, %v129_v10   ;;  %v424_v40 = vld [vmem:[%s21104_s3 + $0x10] sm:$0xff]  ;;  %v425_v10 = vld [vmem:[%s21104_s3 + $0x18] sm:$0xff] }
  0x57   :  { %v13771_v62 = vpack.c.bf16 %v425_v10, %v424_v40 }
  0x5a   :  { %940 = vperm.xlu1 %15450, %v132_v19   ;;  %935 = vperm.xlu0 %15449, %v131_v4   ;;  %v427_v19 = vld [vmem:[%s21104_s3 + $0x28] sm:$0xff] }
  0x5e   :  { %950 = vperm.xlu1 %15450, %v134_v22   ;;  %945 = vperm.xlu0 %15449, %v133_v23   ;;  %v13775_v22 = vpack.c.bf16 %v427_v19, %v426_v5  ;;  %v429_v23 = vld [vmem:[%s21104_s3 + $0x38] sm:$0xff] }
  0x62   :  { %1170 = vperm.xlu1 %15450, %v15822_v36   ;;  %1165 = vperm.xlu0 %15449, %v15827_v37  }
  0x66   :  { %1180 = vperm.xlu1 %15450, %v15874_v58   ;;  %1175 = vperm.xlu0 %15449, %v15879_v59  }
  0x6a   :  { %1190 = vperm.xlu1 %15450, %v15917_v26   ;;  %1185 = vperm.xlu0 %15449, %v15932_v31  }
  0x6e   :  { %1200 = vperm.xlu1 %15450, %v15985_v63   ;;  %1195 = vperm.xlu0 %15449, %v15990_v0  }
  0x72   :  { %1210 = vperm.xlu1 %15450, %v16030_v41   ;;  %1205 = vperm.xlu0 %15449, %v16062_v57  }
  0x76   :  { %1220 = vperm.xlu1 %15450, %v16111_v45   ;;  %1215 = vperm.xlu0 %15449, %v16116_v52  }
  0x7a   :  { %1230 = vperm.xlu1 %15450, %v16146_v25   ;;  %1225 = vperm.xlu0 %15449, %v16151_v13  }
  0x7e   :  { %1240 = vperm.xlu1 %15450, %v16164_v33   ;;  %1235 = vperm.xlu0 %15449, %v16169_v39  }
  0x81   :  { %v16315_v34 = vpop.permute.xlu1 %466  ;;  %v16317_v35 = vpop.permute.xlu0 %456 }
  0x82   :  { %21430 = vst [vmem:[#allocation3_spill] sm:$0xff] %v16315_v34  ;;  %21431 = vst [vmem:[#allocation4_spill] sm:$0xff] %v16317_v35  ;;  %1638 = vperm.xlu1 %15450, %v16178_v44   ;;  %1633 = vperm.xlu0 %15449, %v16183_v29   ;;  %v534_v8 = vmul.f32 0.0, %v16317_v35  ;;  %v536_v51 = vmul.f32 %v16315_v34, %v15860_v53  ;;  %v16670_v34 = vld [vmem:[#allocation2 + $0x77] sm:$0xff] }
  0x83   :  { %v10079_v35 = vld [vmem:[%s21104_s3 + $0x1b8] sm:$0xff] }
  0x84   :  { %11751 = vmatprep.mubr.f32.mxu0 %v534_v8  ;;  %12255 = vmatprep.mubr.f32.mxu1 %v534_v8 }
  0x85   :  { %v16328_v43 = vpop.permute.xlu1 %471  ;;  %v16330_v49 = vpop.permute.xlu0 %461 }
  0x86   :  { %21432 = vst [vmem:[#allocation5_spill] sm:$0xff] %v16328_v43  ;;  %21433 = vst [vmem:[#allocation6_spill] sm:$0xff] %v16330_v49  ;;  %1648 = vperm.xlu1 %15450, %v16192_v47   ;;  %1643 = vperm.xlu0 %15449, %v16197_v56   ;;  %v535_v18 = vmul.f32 %v16330_v49, %v15849_v48  ;;  %v537_v48 = vmul.f32 %v16328_v43, %v15892_v3  ;;  %v16668_v43 = vld [vmem:[#allocation2 + $0x6f] sm:$0xff] }
  0x88   :  { %11752 = vmatmul.mubr.f32.vlgmr.msra.gmra.mrb[0].mxu0 %v535_v18  ;;  %v431_v18 = vld [vmem:[%s21104_s3 + $0x48] sm:$0xff] }
  0x89   :  { %13770 = vmatpush3.bf16.msra.mxu0 %v16118_v54  ;;  %v16345_v53 = vpop.permute.xlu1 %481  ;;  %v16347_v4 = vpop.permute.xlu0 %476  ;;  %11754 = vmatprep.mubr.f32.mxu0 %v536_v51  ;;  %v428_v54 = vld [vmem:[%s21104_s3 + $0x30] sm:$0xff]  ;;  %v430_v51 = vld [vmem:[%s21104_s3 + $0x40] sm:$0xff] }
  0x8a   :  { %21434 = vst [vmem:[#allocation7_spill] sm:$0xff] %v16345_v53  ;;  %21435 = vst [vmem:[#allocation8_spill] sm:$0xff] %v16347_v4  ;;  %1658 = vperm.xlu1 %15450, %v16206_v2   ;;  %1653 = vperm.xlu0 %15449, %v16211_v60   ;;  %v538_v15 = vmul.f32 %v16347_v4, %v15903_v16  ;;  %v539_v3 = vmul.f32 %v16345_v53, %v15935_v32  ;;  %v16641_v53 = vld [vmem:[#allocation2 + $0x5f] sm:$0xff] }
  0x8b   :  { %13772 = vmatprep.subr.bf16.mxu0 %v13771_v62  ;;  %v13779_v10 = vpack.c.bf16 %v429_v23, %v428_v54  ;;  %v13783_v19 = vpack.c.bf16 %v431_v18, %v430_v51  ;;  %v16422_v18 = vld [vmem:[%s21103_s2 + $0x88] sm:$0xff] }
  0x8c   :  { %11755 = vmatmul.mubr.f32.gmra.mrb[2].mxu0 %v537_v48  ;;  %v432_v48 = vld [vmem:[%s21104_s3 + $0x50] sm:$0xff] }
  0x8d   :  { %13774 = vmatpush3.bf16.msra.mxu0 %v13771_v62  ;;  %v16361_v8 = vpop.permute.xlu1 %491  ;;  %v16363_v40 = vpop.permute.xlu0 %486  ;;  %11757 = vmatprep.mubr.f32.mxu0 %v538_v15  ;;  %v433_v15 = vld [vmem:[%s21104_s3 + $0x58] sm:$0xff] }
  0x8e   :  { %21436 = vst [vmem:[#allocation9_spill] sm:$0xff] %v16361_v8  ;;  %21437 = vst [vmem:[#allocation10_spill] sm:$0xff] %v16363_v40  ;;  %1668 = vperm.xlu1 %15450, %v16220_v1   ;;  %1663 = vperm.xlu0 %15449, %v16225_v20   ;;  %v540_v16 = vmul.f32 %v16363_v40, %v15963_v50  ;;  %v541_v32 = vmul.f32 %v16361_v8, %v15993_v12  ;;  %v16609_v8 = vld [vmem:[#allocation2 + $0x4f] sm:$0xff] }
  0x8f   :  { %13776 = vmatprep.subr.bf16.mxu0 %v13775_v22  ;;  %v13787_v23 = vpack.c.bf16 %v433_v15, %v432_v48  ;;  %v136_v15 = vmul.f32 %v15822_v36, %v16422_v18 }
  0x90   :  { %11758 = vmatmul.mubr.f32.gmra.mrb[4].mxu0 %v539_v3  ;;  %v434_v3 = vld [vmem:[%s21104_s3 + $0x60] sm:$0xff] }
  0x91   :  { %13778 = vmatpush3.bf16.msra.mxu0 %v13775_v22  ;;  %v16377_v62 = vpop.permute.xlu1 %501  ;;  %v16379_v5 = vpop.permute.xlu0 %496  ;;  %11760 = vmatprep.mubr.f32.mxu0 %v540_v16  ;;  %v435_v16 = vld [vmem:[%s21104_s3 + $0x68] sm:$0xff] }
  0x92   :  { %21438 = vst [vmem:[#allocation11_spill] sm:$0xff] %v16377_v62  ;;  %21439 = vst [vmem:[#allocation12_spill] sm:$0xff] %v16379_v5  ;;  %1678 = vperm.xlu1 %15450, %v16234_v7   ;;  %1673 = vperm.xlu0 %15449, %v16239_v24   ;;  %v542_v50 = vmul.f32 %v16379_v5, %v16006_v21  ;;  %v543_v12 = vmul.f32 %v16377_v62, %v16033_v42  ;;  %v16577_v62 = vld [vmem:[#allocation2 + $0x3f] sm:$0xff] }
  0x93   :  { %13780 = vmatprep.subr.bf16.mxu0 %v13779_v10 }
  0x94   :  { %11761 = vmatmul.mubr.f32.gmra.mrb[6].mxu0 %v541_v32  ;;  %v13791_v32 = vpack.c.bf16 %v435_v16, %v434_v3  ;;  %v16452_v3 = vld [vmem:[%s21103_s2 + $0x98] sm:$0xff]  ;;  %v310_v16 = vld [vmem:[#allocation2 + $0x7] sm:$0xff] }
  0x95   :  { %13782 = vmatpush3.bf16.msra.mxu0 %v13779_v10  ;;  %v16393_v22 = vpop.permute.xlu1 %511  ;;  %v16395_v54 = vpop.permute.xlu0 %506  ;;  %11763 = vmatprep.mubr.f32.mxu0 %v542_v50  ;;  %v16427_v50 = vld [vmem:[%s21103_s2 + $0x80] sm:$0xff] }
  0x96   :  { %21440 = vst [vmem:[#allocation13_spill] sm:$0xff] %v16393_v22  ;;  %21441 = vst [vmem:[#allocation14_spill] sm:$0xff] %v16395_v54  ;;  %1688 = vperm.xlu1 %15450, %v16248_v9   ;;  %1683 = vperm.xlu0 %15449, %v16253_v30   ;;  %v544_v21 = vmul.f32 %v16395_v54, %v16044_v46  ;;  %v545_v42 = vmul.f32 %v16393_v22, %v16072_v14  ;;  %v436_v14 = vld [vmem:[%s21104_s3 + $0x70] sm:$0xff] }
  0x97   :  { %13784 = vmatprep.subr.bf16.mxu0 %v13783_v19  ;;  %v16545_v22 = vld [vmem:[#allocation2 + $0x2f] sm:$0xff] }
  0x98   :  { %11764 = vmatmul.mubr.f32.gmra.mrb[8].mxu0 %v543_v12 }
  0x99   :  { %13786 = vmatpush3.bf16.msra.mxu0 %v13783_v19  ;;  %v16409_v10 = vpop.permute.xlu1 %521  ;;  %v16411_v51 = vpop.permute.xlu0 %516  ;;  %11766 = vmatprep.mubr.f32.mxu0 %v544_v21 }
  0x9a   :  { %21442 = vst [vmem:[#allocation15_spill] sm:$0xff] %v16409_v10  ;;  %21443 = vst [vmem:[#allocation16_spill] sm:$0xff] %v16411_v51  ;;  %1698 = vperm.xlu1 %15450, %v16262_v11   ;;  %1693 = vperm.xlu0 %15449, %v16273_v17   ;;  %v546_v46 = vmul.f32 %v16411_v51, %v16095_v38  ;;  %v437_v38 = vld [vmem:[%s21104_s3 + $0x78] sm:$0xff]  ;;  %v547_v12 = vmul.f32 %v16409_v10, %v16121_v55  ;;  %v10056_v55 = vld [vmem:[%s21104_s3 + $0x100] sm:$0xff] }
  0x9b   :  { %13788 = vmatprep.subr.bf16.mxu0 %v13787_v23  ;;  %v13795_v36 = vpack.c.bf16 %v437_v38, %v436_v14  ;;  %v138_v14 = vmul.f32 %v15874_v58, %v16452_v3  ;;  %v16481_v10 = vld [vmem:[#allocation2 + $0xf] sm:$0xff]  ;;  %v16483_v58 = vld [vmem:[#allocation2 + $0x17] sm:$0xff] }
  0x9c   :  { %11767 = vmatmul.mubr.f32.gmra.mrb[10].mxu0 %v545_v42  ;;  %v16457_v42 = vld [vmem:[%s21103_s2 + $0x90] sm:$0xff] }
  0x9d   :  { %13790 = vmatpush3.bf16.msra.mxu0 %v13787_v23  ;;  %v16435_v19 = vpop.permute.xlu1 %531  ;;  %v16437_v48 = vpop.permute.xlu0 %526  ;;  %11769 = vmatprep.mubr.f32.mxu0 %v546_v46  ;;  %v135_v23 = vmul.f32 %v15827_v37, %v16427_v50  ;;  %v10057_v37 = vld [vmem:[%s21104_s3 + $0x108] sm:$0xff] }
  0x9e   :  { %21444 = vst [vmem:[#allocation17_spill] sm:$0xff] %v16435_v19  ;;  %21445 = vst [vmem:[#allocation18_spill] sm:$0xff] %v16437_v48  ;;  %1708 = vperm.xlu1 %15450, %v16288_v6   ;;  %1703 = vperm.xlu0 %15449, %v16293_v28   ;;  %v548_v21 = vmul.f32 %v16437_v48, %v16129_v61  ;;  %v549_v38 = vmul.f32 %v16435_v19, %v16154_v27  ;;  %v16488_v27 = vld [vmem:[%s21103_s2 + $0xa0] sm:$0xff] }
  0x9f   :  { %13792 = vmatprep.subr.bf16.mxu0 %v13791_v32  ;;  %v137_v48 = vmul.f32 %v15879_v59, %v16457_v42  ;;  %v10058_v59 = vld [vmem:[%s21104_s3 + $0x110] sm:$0xff]  ;;  %v16513_v19 = vld [vmem:[#allocation2 + $0x1f] sm:$0xff] }
  0xa0   :  { %11770 = vmatmul.mubr.f32.gmra.mrb[12].mxu0 %v547_v12 }
  0xa1   :  { %13794 = vmatpush3.bf16.msra.mxu0 %v13791_v32  ;;  %v16465_v61 = vpop.permute.xlu1 %333  ;;  %v16467_v46 = vpop.permute.xlu0 %328  ;;  %11772 = vmatprep.mubr.f32.mxu0 %v548_v21  ;;  %v16479_v32 = vld [vmem:[%s21103_s2 + $0xa8] sm:$0xff]  ;;  %v13799_v21 = vpack.c.bf16 %v10057_v37, %v10056_v55 }
  0xa2   :  { %21446 = vst [vmem:[#allocation19_spill] sm:$0xff] %v16465_v61  ;;  %21447 = vst [vmem:[#allocation20_spill] sm:$0xff] %v16467_v46  ;;  %1928 = vperm.xlu1 %15450, %v136_v15   ;;  %1923 = vperm.xlu0 %15449, %v135_v23   ;;  %v406_v12 = vmul.f32 %v16467_v46, %v310_v16  ;;  %v10059_v15 = vld [vmem:[%s21104_s3 + $0x118] sm:$0xff]  ;;  %v140_v55 = vmul.f32 %v15917_v26, %v16479_v32  ;;  %v16515_v26 = vld [vmem:[#allocation2 + $0x27] sm:$0xff] }
  0xa3   :  { %13796 = vmatprep.subr.bf16.mxu0 %v13795_v36  ;;  %v407_v37 = vmul.f32 %v16465_v61, %v16481_v10  ;;  %v139_v46 = vmul.f32 %v15932_v31, %v16488_v27  ;;  %v10060_v31 = vld [vmem:[%s21104_s3 + $0x120] sm:$0xff] }
  0xa4   :  { %11773 = vmatmul.mubr.f32.gmra.mrb[14].mxu0 %v549_v38 }
  0xa5   :  { %13798 = vmatpush3.bf16.msra.mxu0 %v13795_v36  ;;  %v16496_v23 = vpop.permute.xlu1 %343  ;;  %v16498_v16 = vpop.permute.xlu0 %338  ;;  %11807 = vmatprep.mubr.f32.mxu0 %v406_v12  ;;  %v16511_v36 = vld [vmem:[%s21103_s2 + $0xb8] sm:$0xff]  ;;  %v13803_v12 = vpack.c.bf16 %v10059_v15, %v10058_v59 }
  0xa6   :  { %21448 = vst [vmem:[#allocation21_spill] sm:$0xff] %v16496_v23  ;;  %21449 = vst [vmem:[#allocation22_spill] sm:$0xff] %v16498_v16  ;;  %1938 = vperm.xlu1 %15450, %v138_v14   ;;  %1933 = vperm.xlu0 %15449, %v137_v48   ;;  %v408_v38 = vmul.f32 %v16498_v16, %v16483_v58  ;;  %v16520_v48 = vld [vmem:[%s21103_s2 + $0xb0] sm:$0xff]  ;;  %v10061_v14 = vld [vmem:[%s21104_s3 + $0x128] sm:$0xff]  ;;  %v142_v16 = vmul.f32 %v15985_v63, %v16511_v36 }
  0xa7   :  { %13800 = vmatprep.subr.bf16.mxu0 %v13799_v21  ;;  %v141_v51 = vmul.f32 %v15990_v0, %v16520_v48  ;;  %v16547_v63 = vld [vmem:[#allocation2 + $0x37] sm:$0xff] }
  0xa8   :  { %11808 = vmatmul.mubr.f32.vlgmr.msra.gmra.mrb[0].mxu0 %v407_v37  ;;  %v409_v37 = vmul.f32 %v16496_v23, %v16513_v19  ;;  %v10062_v0 = vld [vmem:[%s21104_s3 + $0x130] sm:$0xff] }
  0xa9   :  { %13802 = vmatpush3.bf16.msra.mxu0 %v13799_v21  ;;  %v16528_v59 = vpop.permute.xlu1 %353  ;;  %v16530_v15 = vpop.permute.xlu0 %348  ;;  %11810 = vmatprep.mubr.f32.mxu0 %v408_v38  ;;  %v16543_v21 = vld [vmem:[%s21103_s2 + $0xc8] sm:$0xff]  ;;  %v13807_v38 = vpack.c.bf16 %v10061_v14, %v10060_v31 }
  0xaa   :  { %21450 = vst [vmem:[#allocation23_spill] sm:$0xff] %v16528_v59  ;;  %21451 = vst [vmem:[#allocation24_spill] sm:$0xff] %v16530_v15  ;;  %1948 = vperm.xlu1 %15450, %v140_v55   ;;  %1943 = vperm.xlu0 %15449, %v139_v46   ;;  %v410_v61 = vmul.f32 %v16530_v15, %v16515_v26  ;;  %v16552_v46 = vld [vmem:[%s21103_s2 + $0xc0] sm:$0xff]  ;;  %v10063_v55 = vld [vmem:[%s21104_s3 + $0x138] sm:$0xff]  ;;  %v144_v15 = vmul.f32 %v16030_v41, %v16543_v21 }
  0xab   :  { %13804 = vmatprep.subr.bf16.mxu0 %v13803_v12  ;;  %v143_v54 = vmul.f32 %v16062_v57, %v16552_v46  ;;  %v16579_v41 = vld [vmem:[#allocation2 + $0x47] sm:$0xff] }
  0xac   :  { %11811 = vmatmul.mubr.f32.gmra.mrb[2].mxu0 %v409_v37  ;;  %v411_v37 = vmul.f32 %v16528_v59, %v16545_v22  ;;  %v10064_v57 = vld [vmem:[%s21104_s3 + $0x140] sm:$0xff] }
  0xad   :  { %13806 = vmatpush3.bf16.msra.mxu0 %v13803_v12  ;;  %v16560_v31 = vpop.permute.xlu1 %363  ;;  %v16562_v14 = vpop.permute.xlu0 %358  ;;  %11813 = vmatprep.mubr.f32.mxu0 %v410_v61  ;;  %v16575_v12 = vld [vmem:[%s21103_s2 + $0xd8] sm:$0xff]  ;;  %v13811_v61 = vpack.c.bf16 %v10063_v55, %v10062_v0 }
  0xae   :  { %21452 = vst [vmem:[#allocation25_spill] sm:$0xff] %v16560_v31  ;;  %21453 = vst [vmem:[#allocation26_spill] sm:$0xff] %v16562_v14  ;;  %1958 = vperm.xlu1 %15450, %v142_v16   ;;  %1953 = vperm.xlu0 %15449, %v141_v51   ;;  %v412_v23 = vmul.f32 %v16562_v14, %v16547_v63  ;;  %v16584_v51 = vld [vmem:[%s21103_s2 + $0xd0] sm:$0xff]  ;;  %v10065_v16 = vld [vmem:[%s21104_s3 + $0x148] sm:$0xff]  ;;  %v146_v14 = vmul.f32 %v16111_v45, %v16575_v12 }
  0xaf   :  { %13808 = vmatprep.subr.bf16.mxu0 %v13807_v38  ;;  %v145_v5 = vmul.f32 %v16116_v52, %v16584_v51  ;;  %v16611_v45 = vld [vmem:[#allocation2 + $0x57] sm:$0xff] }
  0xb0   :  { %11814 = vmatmul.mubr.f32.gmra.mrb[4].mxu0 %v411_v37  ;;  %v413_v37 = vmul.f32 %v16560_v31, %v16577_v62  ;;  %v10066_v52 = vld [vmem:[%s21104_s3 + $0x150] sm:$0xff] }
  0xb1   :  { %13810 = vmatpush3.bf16.msra.mxu0 %v13807_v38  ;;  %v16592_v0 = vpop.permute.xlu1 %373  ;;  %v16594_v55 = vpop.permute.xlu0 %368  ;;  %11816 = vmatprep.mubr.f32.mxu0 %v412_v23  ;;  %v16607_v38 = vld [vmem:[%s21103_s2 + $0xe8] sm:$0xff]  ;;  %v13815_v23 = vpack.c.bf16 %v10065_v16, %v10064_v57 }
  0xb2   :  { %21454 = vst [vmem:[#allocation27_spill] sm:$0xff] %v16592_v0  ;;  %21455 = vst [vmem:[#allocation28_spill] sm:$0xff] %v16594_v55  ;;  %1968 = vperm.xlu1 %15450, %v144_v15   ;;  %1963 = vperm.xlu0 %15449, %v143_v54   ;;  %v414_v59 = vmul.f32 %v16594_v55, %v16579_v41  ;;  %v16616_v54 = vld [vmem:[%s21103_s2 + $0xe0] sm:$0xff]  ;;  %v10067_v15 = vld [vmem:[%s21104_s3 + $0x158] sm:$0xff]  ;;  %v148_v55 = vmul.f32 %v16146_v25, %v16607_v38 }
  0xb3   :  { %13812 = vmatprep.subr.bf16.mxu0 %v13811_v61  ;;  %v147_v40 = vmul.f32 %v16151_v13, %v16616_v54  ;;  %v16643_v25 = vld [vmem:[#allocation2 + $0x67] sm:$0xff] }
  0xb4   :  { %11817 = vmatmul.mubr.f32.gmra.mrb[6].mxu0 %v413_v37  ;;  %v415_v37 = vmul.f32 %v16592_v0, %v16609_v8  ;;  %v10068_v13 = vld [vmem:[%s21104_s3 + $0x160] sm:$0xff] }
  0xb5   :  { %13814 = vmatpush3.bf16.msra.mxu0 %v13811_v61  ;;  %v16624_v57 = vpop.permute.xlu1 %383  ;;  %v16626_v16 = vpop.permute.xlu0 %378  ;;  %11819 = vmatprep.mubr.f32.mxu0 %v414_v59  ;;  %v16639_v61 = vld [vmem:[%s21103_s2 + $0xf8] sm:$0xff]  ;;  %v13819_v59 = vpack.c.bf16 %v10067_v15, %v10066_v52 }
  0xb6   :  { %21456 = vst [vmem:[#allocation29_spill] sm:$0xff] %v16624_v57  ;;  %21457 = vst [vmem:[#allocation30_spill] sm:$0xff] %v16626_v16  ;;  %1978 = vperm.xlu1 %15450, %v146_v14   ;;  %1973 = vperm.xlu0 %15449, %v145_v5   ;;  %v416_v31 = vmul.f32 %v16626_v16, %v16611_v45  ;;  %v16648_v5 = vld [vmem:[%s21103_s2 + $0xf0] sm:$0xff]  ;;  %v10069_v14 = vld [vmem:[%s21104_s3 + $0x168] sm:$0xff]  ;;  %v150_v16 = vmul.f32 %v16164_v33, %v16639_v61 }
  0xb7   :  { %13816 = vmatprep.subr.bf16.mxu0 %v13815_v23  ;;  %v149_v4 = vmul.f32 %v16169_v39, %v16648_v5  ;;  %v10070_v33 = vld [vmem:[%s21104_s3 + $0x170] sm:$0xff] }
  0xb8   :  { %11820 = vmatmul.mubr.f32.gmra.mrb[8].mxu0 %v415_v37  ;;  %v417_v37 = vmul.f32 %v16624_v57, %v16641_v53 }
  0xb9   :  { %13818 = vmatpush3.bf16.msra.mxu0 %v13815_v23  ;;  %v16656_v52 = vpop.permute.xlu1 %393  ;;  %v16658_v15 = vpop.permute.xlu0 %388  ;;  %11822 = vmatprep.mubr.f32.mxu0 %v416_v31  ;;  %v13823_v23 = vpack.c.bf16 %v10069_v14, %v10068_v13 }
  0xba   :  { %21458 = vst [vmem:[#allocation31_spill] sm:$0xff] %v16656_v52  ;;  %21459 = vst [vmem:[#allocation32_spill] sm:$0xff] %v16658_v15  ;;  %1988 = vperm.xlu1 %15450, %v148_v55   ;;  %1983 = vperm.xlu0 %15449, %v147_v40   ;;  %v418_v0 = vmul.f32 %v16658_v15, %v16643_v25  ;;  %v10071_v40 = vld [vmem:[%s21104_s3 + $0x178] sm:$0xff]  ;;  %v419_v39 = vmul.f32 %v16656_v52, %v16668_v43  ;;  %v857_v15 = vld [vmem:[#allocation2 + $0x9] sm:$0xff] }
  0xbb   :  { %13820 = vmatprep.subr.bf16.mxu0 %v13819_v59  ;;  %v13827_v14 = vpack.c.bf16 %v10071_v40, %v10070_v33  ;;  %v16705_v52 = vld [vmem:[#allocation2 + $0x19] sm:$0xff] }
  0xbc   :  { %11823 = vmatmul.mubr.f32.gmra.mrb[10].mxu0 %v417_v37  ;;  %v16686_v37 = vld [vmem:[#allocation2 + $0x7f] sm:$0xff] }
  0xbd   :  { %13822 = vmatpush3.bf16.msra.mxu0 %v13819_v59  ;;  %v16678_v31 = vpop.permute.xlu1 %403  ;;  %v16680_v55 = vpop.permute.xlu0 %398  ;;  %11825 = vmatprep.mubr.f32.mxu0 %v418_v0  ;;  %v10072_v59 = vld [vmem:[%s21104_s3 + $0x180] sm:$0xff] }
  0xbe   :  { %21460 = vst [vmem:[#allocation33_spill] sm:$0xff] %v16678_v31  ;;  %21461 = vst [vmem:[#allocation34_spill] sm:$0xff] %v16680_v55  ;;  %1998 = vperm.xlu1 %15450, %v150_v16   ;;  %1993 = vperm.xlu0 %15449, %v149_v4   ;;  %v420_v13 = vmul.f32 %v16680_v55, %v16670_v34  ;;  %v10073_v4 = vld [vmem:[%s21104_s3 + $0x188] sm:$0xff]  ;;  %v421_v33 = vmul.f32 %v16678_v31, %v16686_v37 }
  0xbf   :  { %13824 = vmatprep.subr.bf16.mxu0 %v13823_v23  ;;  %v13831_v55 = vpack.c.bf16 %v10073_v4, %v10072_v59 }
  0xc0   :  { %11826 = vmatmul.mubr.f32.gmra.mrb[12].mxu0 %v419_v39  ;;  %v16703_v39 = vld [vmem:[#allocation2 + $0x11] sm:$0xff] }
  0xc1   :  { %13826 = vmatpush3.bf16.msra.mxu0 %v13823_v23  ;;  %v16694_v0 = vpop.permute.xlu1 %880  ;;  %v16696_v16 = vpop.permute.xlu0 %875  ;;  %11828 = vmatprep.mubr.f32.mxu0 %v420_v13  ;;  %v10074_v23 = vld [vmem:[%s21104_s3 + $0x190] sm:$0xff]  ;;  %v10075_v13 = vld [vmem:[%s21104_s3 + $0x198] sm:$0xff] }
  0xc2   :  { %21462 = vst [vmem:[#allocation35_spill] sm:$0xff] %v16694_v0  ;;  %21463 = vst [vmem:[#allocation36_spill] sm:$0xff] %v16696_v16  ;;  %2218 = vperm.xlu1 %15450, %v16422_v18   ;;  %2213 = vperm.xlu0 %15449, %v16427_v50   ;;  %v953_v40 = vmul.f32 %v16696_v16, %v857_v15  ;;  %v954_v15 = vmul.f32 %v16694_v0, %v16703_v39  ;;  %v10077_v0 = vld [vmem:[%s21104_s3 + $0x1a8] sm:$0xff] }
  0xc3   :  { %13828 = vmatprep.subr.bf16.mxu0 %v13827_v14  ;;  %v13835_v4 = vpack.c.bf16 %v10075_v13, %v10074_v23 }
  0xc4   :  { %11829 = vmatmul.mubr.f32.gmra.mrb[14].mxu0 %v421_v33  ;;  %v16723_v33 = vld [vmem:[#allocation2 + $0x21] sm:$0xff] }
  0xc5   :  { %13830 = vmatpush3.bf16.msra.mxu0 %v13827_v14  ;;  %v16713_v57 = vpop.permute.xlu1 %890  ;;  %v16715_v31 = vpop.permute.xlu0 %885  ;;  %11863 = vmatprep.mubr.f32.mxu0 %v953_v40  ;;  %21466 = vst [vmem:[#allocation39_spill] sm:$0xff] %v16723_v33  ;;  %v16725_v14 = vld [vmem:[#allocation2 + $0x29] sm:$0xff]  ;;  %v10076_v40 = vld [vmem:[%s21104_s3 + $0x1a0] sm:$0xff] }
  0xc6   :  { %21464 = vst [vmem:[#allocation37_spill] sm:$0xff] %v16713_v57  ;;  %21465 = vst [vmem:[#allocation38_spill] sm:$0xff] %v16715_v31  ;;  %2228 = vperm.xlu1 %15450, %v16452_v3   ;;  %2223 = vperm.xlu0 %15449, %v16457_v42   ;;  %v955_v59 = vmul.f32 %v16715_v31, %v16705_v52  ;;  %v956_v23 = vmul.f32 %v16713_v57, %v16723_v33  ;;  %v16743_v31 = vld [vmem:[#allocation2 + $0x31] sm:$0xff] }
  0xc7   :  { %13832 = vmatprep.subr.bf16.mxu0 %v13831_v55  ;;  %21467 = vst [vmem:[#allocation40_spill] sm:$0xff] %v16725_v14  ;;  %21470 = vst [vmem:[#allocation43_spill] sm:$0xff] %v16743_v31 }
  0xc8   :  { %11864 = vmatmul.mubr.f32.vlgmr.msra.gmra.mrb[0].mxu0 %v954_v15  ;;  %v13839_v15 = vpack.c.bf16 %v10077_v0, %v10076_v40 }
  0xc9   :  { %13834 = vmatpush3.bf16.msra.mxu0 %v13831_v55  ;;  %v16733_v16 = vpop.permute.xlu1 %900  ;;  %v16735_v49 = vpop.permute.xlu0 %895  ;;  %11866 = vmatprep.mubr.f32.mxu0 %v955_v59  ;;  %v16745_v55 = vld [vmem:[#allocation2 + $0x39] sm:$0xff]  ;;  %v10078_v59 = vld [vmem:[%s21104_s3 + $0x1b0] sm:$0xff] }
  0xca   :  { %21468 = vst [vmem:[#allocation41_spill] sm:$0xff] %v16733_v16  ;;  %21469 = vst [vmem:[#allocation42_spill] sm:$0xff] %v16735_v49  ;;  %2238 = vperm.xlu1 %15450, %v16479_v32   ;;  %2233 = vperm.xlu0 %15449, %v16488_v27   ;;  %v957_v13 = vmul.f32 %v16735_v49, %v16725_v14  ;;  %v958_v0 = vmul.f32 %v16733_v16, %v16743_v31  ;;  %v16763_v49 = vld [vmem:[#allocation2 + $0x41] sm:$0xff] }
  0xcb   :  { %13836 = vmatprep.subr.bf16.mxu0 %v13835_v4  ;;  %21471 = vst [vmem:[#allocation44_spill] sm:$0xff] %v16745_v55  ;;  %21474 = vst [vmem:[#allocation47_spill] sm:$0xff] %v16763_v49  ;;  %v10081_v14 = vld [vmem:[%s21104_s3 + $0x1c8] sm:$0xff] }
  0xcc   :  { %11867 = vmatmul.mubr.f32.gmra.mrb[2].mxu0 %v956_v23  ;;  %v13843_v23 = vpack.c.bf16 %v10079_v35, %v10078_v59 }
  0xcd   :  { %13838 = vmatpush3.bf16.msra.mxu0 %v13835_v4  ;;  %v16753_v57 = vpop.permute.xlu1 %910  ;;  %v16755_v33 = vpop.permute.xlu0 %905  ;;  %11869 = vmatprep.mubr.f32.mxu0 %v957_v13  ;;  %v16765_v4 = vld [vmem:[#allocation2 + $0x49] sm:$0xff]  ;;  %v10080_v13 = vld [vmem:[%s21104_s3 + $0x1c0] sm:$0xff] }
  0xce   :  { %21472 = vst [vmem:[#allocation45_spill] sm:$0xff] %v16753_v57  ;;  %21473 = vst [vmem:[#allocation46_spill] sm:$0xff] %v16755_v33  ;;  %2248 = vperm.xlu1 %15450, %v16511_v36   ;;  %2243 = vperm.xlu0 %15449, %v16520_v48   ;;  %v959_v40 = vmul.f32 %v16755_v33, %v16745_v55  ;;  %v960_v35 = vmul.f32 %v16753_v57, %v16763_v49  ;;  %v16783_v33 = vld [vmem:[#allocation2 + $0x51] sm:$0xff] }
  0xcf   :  { %13840 = vmatprep.subr.bf16.mxu0 %v13839_v15  ;;  %21475 = vst [vmem:[#allocation48_spill] sm:$0xff] %v16765_v4  ;;  %21478 = vst [vmem:[#allocation51_spill] sm:$0xff] %v16783_v33  ;;  %v10083_v55 = vld [vmem:[%s21104_s3 + $0x1d8] sm:$0xff] }
  0xd0   :  { %11870 = vmatmul.mubr.f32.gmra.mrb[4].mxu0 %v958_v0  ;;  %v13847_v0 = vpack.c.bf16 %v10081_v14, %v10080_v13 }
  0xd1   :  { %13842 = vmatpush3.bf16.msra.mxu0 %v13839_v15  ;;  %v16773_v16 = vpop.permute.xlu1 %920  ;;  %v16775_v31 = vpop.permute.xlu0 %915  ;;  %11872 = vmatprep.mubr.f32.mxu0 %v959_v40  ;;  %v16785_v15 = vld [vmem:[#allocation2 + $0x59] sm:$0xff]  ;;  %v10082_v40 = vld [vmem:[%s21104_s3 + $0x1d0] sm:$0xff] }
  0xd2   :  { %21476 = vst [vmem:[#allocation49_spill] sm:$0xff] %v16773_v16  ;;  %21477 = vst [vmem:[#allocation50_spill] sm:$0xff] %v16775_v31  ;;  %2258 = vperm.xlu1 %15450, %v16543_v21   ;;  %2253 = vperm.xlu0 %15449, %v16552_v46   ;;  %v961_v59 = vmul.f32 %v16775_v31, %v16765_v4  ;;  %v962_v14 = vmul.f32 %v16773_v16, %v16783_v33  ;;  %v16803_v31 = vld [vmem:[#allocation2 + $0x61] sm:$0xff] }
  0xd3   :  { %13844 = vmatprep.subr.bf16.mxu0 %v13843_v23  ;;  %21479 = vst [vmem:[#allocation52_spill] sm:$0xff] %v16785_v15  ;;  %21482 = vst [vmem:[#allocation55_spill] sm:$0xff] %v16803_v31  ;;  %v10085_v4 = vld [vmem:[%s21104_s3 + $0x1e8] sm:$0xff] }
  0xd4   :  { %11873 = vmatmul.mubr.f32.gmra.mrb[6].mxu0 %v960_v35  ;;  %v13851_v35 = vpack.c.bf16 %v10083_v55, %v10082_v40 }
  0xd5   :  { %13846 = vmatpush3.bf16.msra.mxu0 %v13843_v23  ;;  %v16793_v57 = vpop.permute.xlu1 %930  ;;  %v16795_v49 = vpop.permute.xlu0 %925  ;;  %11875 = vmatprep.mubr.f32.mxu0 %v961_v59  ;;  %v16805_v23 = vld [vmem:[#allocation2 + $0x69] sm:$0xff]  ;;  %v10084_v59 = vld [vmem:[%s21104_s3 + $0x1e0] sm:$0xff] }
  0xd6   :  { %21480 = vst [vmem:[#allocation53_spill] sm:$0xff] %v16793_v57  ;;  %21481 = vst [vmem:[#allocation54_spill] sm:$0xff] %v16795_v49  ;;  %2268 = vperm.xlu1 %15450, %v16575_v12   ;;  %2263 = vperm.xlu0 %15449, %v16584_v51   ;;  %v963_v13 = vmul.f32 %v16795_v49, %v16785_v15  ;;  %v964_v55 = vmul.f32 %v16793_v57, %v16803_v31  ;;  %v16823_v49 = vld [vmem:[#allocation2 + $0x71] sm:$0xff] }
  0xd7   :  { %13848 = vmatprep.subr.bf16.mxu0 %v13847_v0  ;;  %21483 = vst [vmem:[#allocation56_spill] sm:$0xff] %v16805_v23  ;;  %v10087_v15 = vld [vmem:[%s21104_s3 + $0x1f8] sm:$0xff] }
  0xd8   :  { %11876 = vmatmul.mubr.f32.gmra.mrb[8].mxu0 %v962_v14  ;;  %v13855_v14 = vpack.c.bf16 %v10085_v4, %v10084_v59  ;;  %v152_v4 = vmul.f32 %v16178_v44, %v16422_v18  ;;  %v10088_v44 = vld [vmem:[%s21104_s3 + $0x200] sm:$0xff]  ;;  %v10089_v18 = vld [vmem:[%s21104_s3 + $0x208] sm:$0xff] }
  0xd9   :  { %13850 = vmatpush3.bf16.msra.mxu0 %v13847_v0  ;;  %v16813_v16 = vpop.permute.xlu1 %940  ;;  %v16815_v33 = vpop.permute.xlu0 %935  ;;  %11878 = vmatprep.mubr.f32.mxu0 %v963_v13  ;;  %v16825_v0 = vld [vmem:[#allocation2 + $0x79] sm:$0xff]  ;;  %v10086_v13 = vld [vmem:[%s21104_s3 + $0x1f0] sm:$0xff] }
  0xda   :  { %21484 = vst [vmem:[#allocation57_spill] sm:$0xff] %v16813_v16  ;;  %21485 = vst [vmem:[#allocation58_spill] sm:$0xff] %v16815_v33  ;;  %2278 = vperm.xlu1 %15450, %v16607_v38   ;;  %2273 = vperm.xlu0 %15449, %v16616_v54   ;;  %v965_v40 = vmul.f32 %v16815_v33, %v16805_v23  ;;  %v966_v59 = vmul.f32 %v16813_v16, %v16823_v49  ;;  %v16847_v23 = vld [vmem:[#allocation2 + $0x81] sm:$0xff] }
  0xdb   :  { %13852 = vmatprep.subr.bf16.mxu0 %v13851_v35  ;;  %v13859_v33 = vpack.c.bf16 %v10087_v15, %v10086_v13  ;;  %v153_v13 = vmul.f32 %v16197_v56, %v16457_v42  ;;  %v156_v56 = vmul.f32 %v16206_v2, %v16479_v32  ;;  %v10093_v2 = vld [vmem:[%s21104_s3 + $0x228] sm:$0xff] }
  0xdc   :  { %11879 = vmatmul.mubr.f32.gmra.mrb[10].mxu0 %v964_v55 }
  0xdd   :  { %13854 = vmatpush3.bf16.msra.mxu0 %v13851_v35  ;;  %v16833_v57 = vpop.permute.xlu1 %950  ;;  %v16835_v31 = vpop.permute.xlu0 %945  ;;  %11881 = vmatprep.mubr.f32.mxu0 %v965_v40  ;;  %v151_v35 = vmul.f32 %v16183_v29, %v16427_v50  ;;  %v154_v29 = vmul.f32 %v16192_v47, %v16452_v3  ;;  %v10091_v47 = vld [vmem:[%s21104_s3 + $0x218] sm:$0xff] }
  0xde   :  { %21486 = vst [vmem:[#allocation59_spill] sm:$0xff] %v16833_v57  ;;  %21487 = vst [vmem:[#allocation60_spill] sm:$0xff] %v16835_v31  ;;  %2288 = vperm.xlu1 %15450, %v16639_v61   ;;  %2283 = vperm.xlu0 %15449, %v16648_v5   ;;  %v967_v55 = vmul.f32 %v16835_v31, %v16825_v0  ;;  %v968_v50 = vmul.f32 %v16833_v57, %v16847_v23 }
  0xdf   :  { %13856 = vmatprep.subr.bf16.mxu0 %v13855_v14 }
  0xe0   :  { %11882 = vmatmul.mubr.f32.gmra.mrb[12].mxu0 %v966_v59  ;;  %v10090_v59 = vld [vmem:[%s21104_s3 + $0x210] sm:$0xff] }
  0xe1   :  { %13858 = vmatpush3.bf16.msra.mxu0 %v13855_v14  ;;  %v16855_v40 = vpop.permute.xlu1 %1170  ;;  %v16857_v31 = vpop.permute.xlu0 %1165  ;;  %11884 = vmatprep.mubr.f32.mxu0 %v967_v55  ;;  %v13863_v14 = vpack.c.bf16 %v10089_v18, %v10088_v44  ;;  %v155_v55 = vmul.f32 %v16211_v60, %v16488_v27  ;;  %v158_v60 = vmul.f32 %v16220_v1, %v16511_v36  ;;  %v10095_v1 = vld [vmem:[%s21104_s3 + $0x238] sm:$0xff] }
  0xe2   :  { %21488 = vst [vmem:[#allocation61_spill] sm:$0xff] %v16855_v40  ;;  %21489 = vst [vmem:[#allocation62_spill] sm:$0xff] %v16857_v31  ;;  %2508 = vperm.xlu1 %15450, %v152_v4   ;;  %2503 = vperm.xlu0 %15449, %v151_v35   ;;  %v1243_v15 = vmul.f32 %v16857_v31, %v16481_v10  ;;  %v1244_v10 = vmul.f32 %v16855_v40, %v16483_v58  ;;  %v10092_v35 = vld [vmem:[%s21104_s3 + $0x220] sm:$0xff] }
  0xe3   :  { %13860 = vmatprep.subr.bf16.mxu0 %v13859_v33  ;;  %v157_v44 = vmul.f32 %v16225_v20, %v16520_v48  ;;  %v13871_v18 = vpack.c.bf16 %v10093_v2, %v10092_v35  ;;  %v160_v20 = vmul.f32 %v16234_v7, %v16543_v21  ;;  %v10097_v7 = vld [vmem:[%s21104_s3 + $0x248] sm:$0xff]  ;;  %v10102_v35 = vld [vmem:[%s21104_s3 + $0x270] sm:$0xff] }
  0xe4   :  { %11885 = vmatmul.mubr.f32.gmra.mrb[14].mxu0 %v968_v50  ;;  %v159_v50 = vmul.f32 %v16239_v24, %v16552_v46  ;;  %v162_v24 = vmul.f32 %v16248_v9, %v16575_v12  ;;  %v10099_v9 = vld [vmem:[%s21104_s3 + $0x258] sm:$0xff]  ;;  %v16989_v2 = vld [vmem:[#allocation2 + $0x87] sm:$0xff] }
  0xe5   :  { %13862 = vmatpush3.bf16.msra.mxu0 %v13859_v33  ;;  %v16873_v3 = vpop.permute.xlu1 %1180  ;;  %v16875_v4 = vpop.permute.xlu0 %1175  ;;  %11919 = vmatprep.mubr.f32.mxu0 %v1243_v15  ;;  %v13867_v33 = vpack.c.bf16 %v10091_v47, %v10090_v59  ;;  %v10098_v47 = vld [vmem:[%s21104_s3 + $0x250] sm:$0xff] }
  0xe6   :  { %21490 = vst [vmem:[#allocation63_spill] sm:$0xff] %v16873_v3  ;;  %21491 = vst [vmem:[#allocation64_spill] sm:$0xff] %v16875_v4  ;;  %2518 = vperm.xlu1 %15450, %v154_v29   ;;  %2513 = vperm.xlu0 %15449, %v153_v13   ;;  %v1245_v42 = vmul.f32 %v16875_v4, %v16513_v19  ;;  %v1246_v19 = vmul.f32 %v16873_v3, %v16515_v26  ;;  %v10094_v29 = vld [vmem:[%s21104_s3 + $0x230] sm:$0xff]  ;;  %v10096_v13 = vld [vmem:[%s21104_s3 + $0x240] sm:$0xff] }
  0xe7   :  { %13864 = vmatprep.subr.bf16.mxu0 %v13863_v14  ;;  %v13875_v15 = vpack.c.bf16 %v10095_v1, %v10094_v29  ;;  %v13879_v59 = vpack.c.bf16 %v10097_v7, %v10096_v13  ;;  %v10107_v29 = vld [vmem:[%s21104_s3 + $0x298] sm:$0xff] }
  0xe8   :  { %11920 = vmatmul.mubr.f32.vlgmr.msra.gmra.mrb[0].mxu0 %v1244_v10  ;;  %v13883_v10 = vpack.c.bf16 %v10099_v9, %v10098_v47  ;;  %v17022_v13 = vld [vmem:[#allocation2 + $0x18] sm:$0xff]  ;;  %v17038_v47 = vld [vmem:[#allocation2 + $0x28] sm:$0xff] }
  0xe9   :  { %13866 = vmatpush3.bf16.msra.mxu0 %v13863_v14  ;;  %v16891_v32 = vpop.permute.xlu1 %1190  ;;  %v16893_v58 = vpop.permute.xlu0 %1185  ;;  %11922 = vmatprep.mubr.f32.mxu0 %v1245_v42  ;;  %v161_v14 = vmul.f32 %v16253_v30, %v16584_v51  ;;  %v164_v30 = vmul.f32 %v16262_v11, %v16607_v38  ;;  %v10100_v42 = vld [vmem:[%s21104_s3 + $0x260] sm:$0xff]  ;;  %v10101_v11 = vld [vmem:[%s21104_s3 + $0x268] sm:$0xff]  ;;  %21509 = vst [vmem:[#allocation82_spill] sm:$0xff] %v17022_v13  ;;  %21513 = vst [vmem:[#allocation86_spill] sm:$0xff] %v17038_v47 }
  0xea   :  { %21492 = vst [vmem:[#allocation65_spill] sm:$0xff] %v16891_v32  ;;  %21493 = vst [vmem:[#allocation66_spill] sm:$0xff] %v16893_v58  ;;  %2528 = vperm.xlu1 %15450, %v156_v56   ;;  %2523 = vperm.xlu0 %15449, %v155_v55   ;;  %v1247_v27 = vmul.f32 %v16893_v58, %v16545_v22  ;;  %v1248_v22 = vmul.f32 %v16891_v32, %v16547_v63 }
  0xeb   :  { %13868 = vmatprep.subr.bf16.mxu0 %v13867_v33  ;;  %v163_v56 = vmul.f32 %v16273_v17, %v16616_v54  ;;  %v166_v17 = vmul.f32 %v16288_v6, %v16639_v61  ;;  %v165_v55 = vmul.f32 %v16293_v28, %v16648_v5  ;;  %v10103_v6 = vld [vmem:[%s21104_s3 + $0x278] sm:$0xff] }
  0xec   :  { %11923 = vmatmul.mubr.f32.gmra.mrb[2].mxu0 %v1246_v19  ;;  %v13891_v5 = vpack.c.bf16 %v10103_v6, %v10102_v35  ;;  %v10105_v19 = vld [vmem:[%s21104_s3 + $0x288] sm:$0xff] }
  0xed   :  { %13870 = vmatpush3.bf16.msra.mxu0 %v13867_v33  ;;  %v16909_v36 = vpop.permute.xlu1 %1200  ;;  %v16911_v26 = vpop.permute.xlu0 %1195  ;;  %11925 = vmatprep.mubr.f32.mxu0 %v1247_v27  ;;  %v13887_v33 = vpack.c.bf16 %v10101_v11, %v10100_v42  ;;  %v17054_v42 = vld [vmem:[#allocation2 + $0x38] sm:$0xff]  ;;  %v17070_v35 = vld [vmem:[#allocation2 + $0x48] sm:$0xff] }
  0xee   :  { %21494 = vst [vmem:[#allocation67_spill] sm:$0xff] %v16909_v36  ;;  %21495 = vst [vmem:[#allocation68_spill] sm:$0xff] %v16911_v26  ;;  %2538 = vperm.xlu1 %15450, %v158_v60   ;;  %2533 = vperm.xlu0 %15449, %v157_v44   ;;  %v1249_v48 = vmul.f32 %v16911_v26, %v16577_v62  ;;  %v1250_v62 = vmul.f32 %v16909_v36, %v16579_v41  ;;  %v10104_v60 = vld [vmem:[%s21104_s3 + $0x280] sm:$0xff] }
  0xef   :  { %13872 = vmatprep.subr.bf16.mxu0 %v13871_v18  ;;  %v13895_v44 = vpack.c.bf16 %v10105_v19, %v10104_v60  ;;  %21517 = vst [vmem:[#allocation90_spill] sm:$0xff] %v17054_v42  ;;  %21521 = vst [vmem:[#allocation94_spill] sm:$0xff] %v17070_v35  ;;  %v10116_v60 = vld [vmem:[%s21104_s3 + $0x2e0] sm:$0xff]  ;;  %v10117_v19 = vld [vmem:[%s21104_s3 + $0x2e8] sm:$0xff] }
  0xf0   :  { %11926 = vmatmul.mubr.f32.gmra.mrb[4].mxu0 %v1248_v22  ;;  %v17013_v22 = vld [vmem:[#allocation2 + $0x10] sm:$0xff] }
  0xf1   :  { %13874 = vmatpush3.bf16.msra.mxu0 %v13871_v18  ;;  %v16927_v21 = vpop.permute.xlu1 %1210  ;;  %v16929_v63 = vpop.permute.xlu0 %1205  ;;  %11928 = vmatprep.mubr.f32.mxu0 %v1249_v48  ;;  %v10106_v18 = vld [vmem:[%s21104_s3 + $0x290] sm:$0xff]  ;;  %21508 = vst [vmem:[#allocation81_spill] sm:$0xff] %v17013_v22 }
  0xf2   :  { %21496 = vst [vmem:[#allocation69_spill] sm:$0xff] %v16927_v21  ;;  %21497 = vst [vmem:[#allocation70_spill] sm:$0xff] %v16929_v63  ;;  %2548 = vperm.xlu1 %15450, %v160_v20   ;;  %2543 = vperm.xlu0 %15449, %v159_v50   ;;  %v1251_v46 = vmul.f32 %v16929_v63, %v16609_v8  ;;  %v1252_v8 = vmul.f32 %v16927_v21, %v16611_v45  ;;  %v10108_v50 = vld [vmem:[%s21104_s3 + $0x2a0] sm:$0xff] }
  0xf3   :  { %13876 = vmatprep.subr.bf16.mxu0 %v13875_v15  ;;  %v13899_v48 = vpack.c.bf16 %v10107_v29, %v10106_v18  ;;  %v17093_v29 = vld [vmem:[#allocation2 + $0x60] sm:$0xff] }
  0xf4   :  { %11929 = vmatmul.mubr.f32.gmra.mrb[6].mxu0 %v1250_v62  ;;  %v17029_v62 = vld [vmem:[#allocation2 + $0x20] sm:$0xff]  ;;  %21528 = vst [vmem:[#allocation101_spill] sm:$0xff] %v17093_v29 }
  0xf5   :  { %13878 = vmatpush3.bf16.msra.mxu0 %v13875_v15  ;;  %v16945_v12 = vpop.permute.xlu1 %1220  ;;  %v16947_v41 = vpop.permute.xlu0 %1215  ;;  %11931 = vmatprep.mubr.f32.mxu0 %v1251_v46  ;;  %v10109_v15 = vld [vmem:[%s21104_s3 + $0x2a8] sm:$0xff]  ;;  %21512 = vst [vmem:[#allocation85_spill] sm:$0xff] %v17029_v62 }
  0xf6   :  { %21498 = vst [vmem:[#allocation71_spill] sm:$0xff] %v16945_v12  ;;  %21499 = vst [vmem:[#allocation72_spill] sm:$0xff] %v16947_v41  ;;  %2558 = vperm.xlu1 %15450, %v162_v24   ;;  %2553 = vperm.xlu0 %15449, %v161_v14   ;;  %v1253_v51 = vmul.f32 %v16947_v41, %v16641_v53  ;;  %v1254_v53 = vmul.f32 %v16945_v12, %v16643_v25  ;;  %v10110_v14 = vld [vmem:[%s21104_s3 + $0x2b0] sm:$0xff] }
  0xf7   :  { %13880 = vmatprep.subr.bf16.mxu0 %v13879_v59  ;;  %v13903_v46 = vpack.c.bf16 %v10109_v15, %v10108_v50  ;;  %v10118_v50 = vld [vmem:[%s21104_s3 + $0x2f0] sm:$0xff]  ;;  %v10119_v15 = vld [vmem:[%s21104_s3 + $0x2f8] sm:$0xff] }
  0xf8   :  { %11932 = vmatmul.mubr.f32.gmra.mrb[8].mxu0 %v1252_v8  ;;  %v17045_v8 = vld [vmem:[#allocation2 + $0x30] sm:$0xff] }
  0xf9   :  { %13882 = vmatpush3.bf16.msra.mxu0 %v13879_v59  ;;  %v16963_v38 = vpop.permute.xlu1 %1230  ;;  %v16965_v45 = vpop.permute.xlu0 %1225  ;;  %11934 = vmatprep.mubr.f32.mxu0 %v1253_v51  ;;  %v10111_v59 = vld [vmem:[%s21104_s3 + $0x2b8] sm:$0xff]  ;;  %21516 = vst [vmem:[#allocation89_spill] sm:$0xff] %v17045_v8 }
  0xfa   :  { %21500 = vst [vmem:[#allocation73_spill] sm:$0xff] %v16963_v38  ;;  %21501 = vst [vmem:[#allocation74_spill] sm:$0xff] %v16965_v45  ;;  %2568 = vperm.xlu1 %15450, %v164_v30   ;;  %2563 = vperm.xlu0 %15449, %v163_v56   ;;  %v1255_v54 = vmul.f32 %v16965_v45, %v16668_v43  ;;  %v1256_v28 = vmul.f32 %v16963_v38, %v16670_v34  ;;  %v10112_v56 = vld [vmem:[%s21104_s3 + $0x2c0] sm:$0xff] }
  0xfb   :  { %13884 = vmatprep.subr.bf16.mxu0 %v13883_v10  ;;  %v13907_v51 = vpack.c.bf16 %v10111_v59, %v10110_v14 }
  0xfc   :  { %11935 = vmatmul.mubr.f32.gmra.mrb[10].mxu0 %v1254_v53  ;;  %v17061_v53 = vld [vmem:[#allocation2 + $0x40] sm:$0xff] }
  0xfd   :  { %13886 = vmatpush3.bf16.msra.mxu0 %v13883_v10  ;;  %v16981_v61 = vpop.permute.xlu1 %1240  ;;  %v16983_v25 = vpop.permute.xlu0 %1235  ;;  %11937 = vmatprep.mubr.f32.mxu0 %v1255_v54  ;;  %v10113_v10 = vld [vmem:[%s21104_s3 + $0x2c8] sm:$0xff]  ;;  %21520 = vst [vmem:[#allocation93_spill] sm:$0xff] %v17061_v53 }
  0xfe   :  { %21502 = vst [vmem:[#allocation75_spill] sm:$0xff] %v16981_v61  ;;  %21503 = vst [vmem:[#allocation76_spill] sm:$0xff] %v16983_v25  ;;  %2578 = vperm.xlu1 %15450, %v166_v17   ;;  %2573 = vperm.xlu0 %15449, %v165_v55   ;;  %v1257_v43 = vmul.f32 %v16983_v25, %v16686_v37  ;;  %v1258_v37 = vmul.f32 %v16981_v61, %v16989_v2  ;;  %v10114_v55 = vld [vmem:[%s21104_s3 + $0x2d0] sm:$0xff] }
  0xff   :  { %13888 = vmatprep.subr.bf16.mxu0 %v13887_v33  ;;  %v13911_v54 = vpack.c.bf16 %v10113_v10, %v10112_v56  ;;  %v13923_v56 = vpack.c.bf16 %v10119_v15, %v10118_v50  ;;  %v10120_v10 = vld [vmem:[%s21104_s3 + $0x300] sm:$0xff]  ;;  %v10122_v15 = vld [vmem:[%s21104_s3 + $0x310] sm:$0xff] }
 0x100   :  { %11938 = vmatmul.mubr.f32.gmra.mrb[12].mxu0 %v1256_v28 }
 0x101   :  { %13890 = vmatpush3.bf16.msra.mxu0 %v13887_v33  ;;  %v16997_v27 = vpop.permute.xlu1 %1638  ;;  %v16999_v34 = vpop.permute.xlu0 %1633  ;;  %11940 = vmatprep.mubr.f32.mxu0 %v1257_v43  ;;  %v10115_v33 = vld [vmem:[%s21104_s3 + $0x2d8] sm:$0xff]  ;;  %v17077_v43 = vld [vmem:[#allocation2 + $0x50] sm:$0xff] }
 0x102   :  { %21504 = vst [vmem:[#allocation77_spill] sm:$0xff] %v16997_v27  ;;  %21505 = vst [vmem:[#allocation78_spill] sm:$0xff] %v16999_v34  ;;  %13892 = vmatprep.subr.bf16.mxu0 %v13891_v5  ;;  %v1711_v50 = vmul.f32 %v16999_v34, %v16703_v39  ;;  %v1712_v39 = vmul.f32 %v16997_v27, %v16705_v52  ;;  %v21543_v52 = vld [vmem:[#allocation40_spill] sm:$0xff] }
 0x103   :  { %21524 = vst [vmem:[#allocation97_spill] sm:$0xff] %v17077_v43 }
 0x104   :  { %11941 = vmatmul.mubr.f32.gmra.mrb[14].mxu0 %v1258_v37  ;;  %v17086_v37 = vld [vmem:[#allocation2 + $0x58] sm:$0xff] }
 0x105   :  { %13894 = vmatpush3.bf16.msra.mxu0 %v13891_v5  ;;  %v17009_v1 = vpop.permute.xlu1 %1648  ;;  %v17011_v20 = vpop.permute.xlu0 %1643  ;;  %11975 = vmatprep.mubr.f32.mxu0 %v17013_v22  ;;  %v13915_v5 = vpack.c.bf16 %v10115_v33, %v10114_v55  ;;  %21525 = vst [vmem:[#allocation98_spill] sm:$0xff] %v17086_v37  ;;  %v17118_v55 = vld [vmem:[#allocation2 + $0x78] sm:$0xff]  ;;  %v10134_v22 = vld [vmem:[%s21104_s3 + $0x370] sm:$0xff] }
 0x106   :  { %21506 = vst [vmem:[#allocation79_spill] sm:$0xff] %v17009_v1  ;;  %21507 = vst [vmem:[#allocation80_spill] sm:$0xff] %v17011_v20  ;;  %13896 = vmatprep.subr.bf16.mxu0 %v13895_v44 }
 0x107   :  { %21533 = vst [vmem:[#allocation106_spill] sm:$0xff] %v17118_v55 }
 0x108   :  { %11976 = vmatmul.mubr.f32.vlgmr.msra.gmra.mrb[0].mxu0 %v17022_v13  ;;  %v10132_v13 = vld [vmem:[%s21104_s3 + $0x360] sm:$0xff] }
 0x109   :  { %13898 = vmatpush3.bf16.msra.mxu0 %v13895_v44  ;;  %v17025_v7 = vpop.permute.xlu1 %1658  ;;  %v17027_v24 = vpop.permute.xlu0 %1653  ;;  %11978 = vmatprep.mubr.f32.mxu0 %v17029_v62 }
 0x10a   :  { %21510 = vst [vmem:[#allocation83_spill] sm:$0xff] %v17025_v7  ;;  %21511 = vst [vmem:[#allocation84_spill] sm:$0xff] %v17027_v24  ;;  %13900 = vmatprep.subr.bf16.mxu0 %v13899_v48 }
 0x10c   :  { %11979 = vmatmul.mubr.f32.gmra.mrb[2].mxu0 %v17038_v47  ;;  %v10130_v47 = vld [vmem:[%s21104_s3 + $0x350] sm:$0xff] }
 0x10d   :  { %13902 = vmatpush3.bf16.msra.mxu0 %v13899_v48  ;;  %v17041_v9 = vpop.permute.xlu1 %1668  ;;  %v17043_v30 = vpop.permute.xlu0 %1663  ;;  %11981 = vmatprep.mubr.f32.mxu0 %v17045_v8  ;;  %v13919_v48 = vpack.c.bf16 %v10117_v19, %v10116_v60  ;;  %v17125_v60 = vld [vmem:[#allocation2 + $0x80] sm:$0xff] }
 0x10e   :  { %21514 = vst [vmem:[#allocation87_spill] sm:$0xff] %v17041_v9  ;;  %21515 = vst [vmem:[#allocation88_spill] sm:$0xff] %v17043_v30  ;;  %13904 = vmatprep.subr.bf16.mxu0 %v13903_v46 }
 0x10f   :  { %21536 = vst [vmem:[#allocation109_spill] sm:$0xff] %v17125_v60 }
 0x110   :  { %11982 = vmatmul.mubr.f32.gmra.mrb[4].mxu0 %v17054_v42  ;;  %v10128_v42 = vld [vmem:[%s21104_s3 + $0x340] sm:$0xff] }
 0x111   :  { %13906 = vmatpush3.bf16.msra.mxu0 %v13903_v46  ;;  %v17057_v11 = vpop.permute.xlu1 %1678  ;;  %v17059_v17 = vpop.permute.xlu0 %1673  ;;  %11984 = vmatprep.mubr.f32.mxu0 %v17061_v53  ;;  %v17102_v46 = vld [vmem:[#allocation2 + $0x68] sm:$0xff] }
 0x112   :  { %21518 = vst [vmem:[#allocation91_spill] sm:$0xff] %v17057_v11  ;;  %21519 = vst [vmem:[#allocation92_spill] sm:$0xff] %v17059_v17  ;;  %13908 = vmatprep.subr.bf16.mxu0 %v13907_v51 }
 0x113   :  { %21529 = vst [vmem:[#allocation102_spill] sm:$0xff] %v17102_v46 }
 0x114   :  { %11985 = vmatmul.mubr.f32.gmra.mrb[6].mxu0 %v17070_v35  ;;  %v10126_v35 = vld [vmem:[%s21104_s3 + $0x330] sm:$0xff] }
 0x115   :  { %13910 = vmatpush3.bf16.msra.mxu0 %v13907_v51  ;;  %v17073_v6 = vpop.permute.xlu1 %1688  ;;  %v17075_v28 = vpop.permute.xlu0 %1683  ;;  %11987 = vmatprep.mubr.f32.mxu0 %v17077_v43  ;;  %v17109_v51 = vld [vmem:[#allocation2 + $0x70] sm:$0xff] }
 0x116   :  { %21522 = vst [vmem:[#allocation95_spill] sm:$0xff] %v17073_v6  ;;  %21523 = vst [vmem:[#allocation96_spill] sm:$0xff] %v17075_v28  ;;  %13912 = vmatprep.subr.bf16.mxu0 %v13911_v54 }
 0x117   :  { %21532 = vst [vmem:[#allocation105_spill] sm:$0xff] %v17109_v51 }
 0x118   :  { %11988 = vmatmul.mubr.f32.gmra.mrb[8].mxu0 %v17086_v37 }
 0x119   :  { %13914 = vmatpush3.bf16.msra.mxu0 %v13911_v54  ;;  %v17089_v44 = vpop.permute.xlu1 %1698  ;;  %v17091_v18 = vpop.permute.xlu0 %1693  ;;  %11990 = vmatprep.mubr.f32.mxu0 %v17093_v29  ;;  %v10121_v54 = vld [vmem:[%s21104_s3 + $0x308] sm:$0xff]  ;;  %v10124_v29 = vld [vmem:[%s21104_s3 + $0x320] sm:$0xff] }
 0x11a   :  { %21526 = vst [vmem:[#allocation99_spill] sm:$0xff] %v17089_v44  ;;  %21527 = vst [vmem:[#allocation100_spill] sm:$0xff] %v17091_v18  ;;  %13916 = vmatprep.subr.bf16.mxu0 %v13915_v5  ;;  %v13927_v19 = vpack.c.bf16 %v10121_v54, %v10120_v10  ;;  %v21540_v54 = vld [vmem:[#allocation39_spill] sm:$0xff] }
 0x11c   :  { %11991 = vmatmul.mubr.f32.gmra.mrb[10].mxu0 %v17102_v46  ;;  %v1713_v46 = vmul.f32 %v17011_v20, %v21540_v54  ;;  %v21544_v54 = vld [vmem:[#allocation43_spill] sm:$0xff] }
 0x11d   :  { %13918 = vmatpush3.bf16.msra.mxu0 %v13915_v5  ;;  %v17105_v14 = vpop.permute.xlu1 %1708  ;;  %v17107_v59 = vpop.permute.xlu0 %1703  ;;  %11993 = vmatprep.mubr.f32.mxu0 %v17109_v51  ;;  %v1715_v43 = vmul.f32 %v17027_v24, %v21544_v54  ;;  %v21548_v54 = vld [vmem:[#allocation47_spill] sm:$0xff] }
 0x11e   :  { %21530 = vst [vmem:[#allocation103_spill] sm:$0xff] %v17105_v14  ;;  %21531 = vst [vmem:[#allocation104_spill] sm:$0xff] %v17107_v59  ;;  %13920 = vmatprep.subr.bf16.mxu0 %v13919_v48  ;;  %v1717_v53 = vmul.f32 %v17043_v30, %v21548_v54  ;;  %v21552_v54 = vld [vmem:[#allocation51_spill] sm:$0xff] }
 0x11f   :  { %v1719_v8 = vmul.f32 %v17059_v17, %v21552_v54  ;;  %v21556_v54 = vld [vmem:[#allocation55_spill] sm:$0xff] }
 0x120   :  { %11994 = vmatmul.mubr.f32.gmra.mrb[12].mxu0 %v17118_v55  ;;  %v17136_v55 = vld [vmem:[#allocation2 + $0x88] sm:$0xff]  ;;  %v1721_v62 = vmul.f32 %v17075_v28, %v21556_v54  ;;  %v1723_v54 = vmul.f32 %v17091_v18, %v16823_v49  ;;  %v1725_v49 = vmul.f32 %v17107_v59, %v16847_v23  ;;  %v10138_v59 = vld [vmem:[%s21104_s3 + $0x390] sm:$0xff] }
 0x121   :  { %13922 = vmatpush3.bf16.msra.mxu0 %v13919_v48  ;;  %v17121_v33 = vpop.permute.xlu1 %1928  ;;  %v17123_v5 = vpop.permute.xlu0 %1923  ;;  %11996 = vmatprep.mubr.f32.mxu0 %v17125_v60  ;;  %v10123_v48 = vld [vmem:[%s21104_s3 + $0x318] sm:$0xff]  ;;  %21537 = vst [vmem:[#allocation110_spill] sm:$0xff] %v17136_v55 }
 0x122   :  { %21534 = vst [vmem:[#allocation107_spill] sm:$0xff] %v17121_v33  ;;  %21535 = vst [vmem:[#allocation108_spill] sm:$0xff] %v17123_v5  ;;  %13924 = vmatprep.subr.bf16.mxu0 %v13923_v56  ;;  %v13931_v10 = vpack.c.bf16 %v10123_v48, %v10122_v15  ;;  %v1714_v15 = vmul.f32 %v17009_v1, %v21543_v52 }
 0x124   :  { %11997 = vmatmul.mubr.f32.gmra.mrb[14].mxu0 %v17136_v55 }
 0x125   :  { %13926 = vmatpush3.bf16.msra.mxu0 %v13923_v56  ;;  %v17139_v51 = vpop.permute.xlu1 %1938  ;;  %v17141_v60 = vpop.permute.xlu0 %1933  ;;  %12031 = vmatprep.mubr.f32.mxu0 %v1711_v50  ;;  %v10125_v56 = vld [vmem:[%s21104_s3 + $0x328] sm:$0xff] }
 0x126   :  { %21538 = vst [vmem:[#allocation111_spill] sm:$0xff] %v17139_v51  ;;  %21539 = vst [vmem:[#allocation112_spill] sm:$0xff] %v17141_v60  ;;  %13928 = vmatprep.subr.bf16.mxu0 %v13927_v19  ;;  %v13935_v48 = vpack.c.bf16 %v10125_v56, %v10124_v29  ;;  %v21547_v29 = vld [vmem:[#allocation44_spill] sm:$0xff] }
 0x127   :  { %v1716_v56 = vmul.f32 %v17025_v7, %v21547_v29 }
 0x128   :  { %12032 = vmatmul.mubr.f32.vlgmr.msra.gmra.mrb[0].mxu0 %v1712_v39 }
 0x129   :  { %13930 = vmatpush3.bf16.msra.mxu0 %v13927_v19  ;;  %v17153_v37 = vpop.permute.xlu1 %1948  ;;  %v17155_v50 = vpop.permute.xlu0 %1943  ;;  %12034 = vmatprep.mubr.f32.mxu0 %v1713_v46  ;;  %v10127_v19 = vld [vmem:[%s21104_s3 + $0x338] sm:$0xff] }
 0x12a   :  { %21541 = vst [vmem:[#allocation39_spill] sm:$0xff] %v17153_v37  ;;  %21542 = vst [vmem:[#allocation113_spill] sm:$0xff] %v17155_v50  ;;  %13932 = vmatprep.subr.bf16.mxu0 %v13931_v10  ;;  %v13939_v52 = vpack.c.bf16 %v10127_v19, %v10126_v35  ;;  %v21551_v35 = vld [vmem:[#allocation48_spill] sm:$0xff] }
 0x12b   :  { %v1718_v19 = vmul.f32 %v17041_v9, %v21551_v35 }
 0x12c   :  { %12035 = vmatmul.mubr.f32.gmra.mrb[2].mxu0 %v1714_v15 }
 0x12d   :  { %13934 = vmatpush3.bf16.msra.mxu0 %v13931_v10  ;;  %v17167_v39 = vpop.permute.xlu1 %1958  ;;  %v17169_v46 = vpop.permute.xlu0 %1953  ;;  %12037 = vmatprep.mubr.f32.mxu0 %v1715_v43  ;;  %v10129_v10 = vld [vmem:[%s21104_s3 + $0x348] sm:$0xff] }
 0x12e   :  { %21545 = vst [vmem:[#allocation40_spill] sm:$0xff] %v17167_v39  ;;  %21546 = vst [vmem:[#allocation43_spill] sm:$0xff] %v17169_v46  ;;  %13936 = vmatprep.subr.bf16.mxu0 %v13935_v48  ;;  %v13943_v29 = vpack.c.bf16 %v10129_v10, %v10128_v42  ;;  %v21555_v42 = vld [vmem:[#allocation52_spill] sm:$0xff] }
 0x12f   :  { %v1720_v10 = vmul.f32 %v17057_v11, %v21555_v42 }
 0x130   :  { %12038 = vmatmul.mubr.f32.gmra.mrb[4].mxu0 %v1716_v56 }
 0x131   :  { %13938 = vmatpush3.bf16.msra.mxu0 %v13935_v48  ;;  %v17181_v15 = vpop.permute.xlu1 %1968  ;;  %v17183_v43 = vpop.permute.xlu0 %1963  ;;  %12040 = vmatprep.mubr.f32.mxu0 %v1717_v53  ;;  %v10131_v48 = vld [vmem:[%s21104_s3 + $0x358] sm:$0xff] }
 0x132   :  { %21549 = vst [vmem:[#allocation44_spill] sm:$0xff] %v17181_v15  ;;  %21550 = vst [vmem:[#allocation47_spill] sm:$0xff] %v17183_v43  ;;  %13940 = vmatprep.subr.bf16.mxu0 %v13939_v52  ;;  %v13947_v35 = vpack.c.bf16 %v10131_v48, %v10130_v47  ;;  %v21559_v47 = vld [vmem:[#allocation56_spill] sm:$0xff] }
 0x133   :  { %v1722_v48 = vmul.f32 %v17073_v6, %v21559_v47  ;;  %v17231_v47 = vld [vmem:[#allocation2 + $0x89] sm:$0xff] }
 0x134   :  { %12041 = vmatmul.mubr.f32.gmra.mrb[6].mxu0 %v1718_v19  ;;  %v1726_v23 = vmul.f32 %v17105_v14, %v17231_v47 }
 0x135   :  { %13942 = vmatpush3.bf16.msra.mxu0 %v13939_v52  ;;  %v17195_v56 = vpop.permute.xlu1 %1978  ;;  %v17197_v53 = vpop.permute.xlu0 %1973  ;;  %12043 = vmatprep.mubr.f32.mxu0 %v1719_v8  ;;  %v10133_v52 = vld [vmem:[%s21104_s3 + $0x368] sm:$0xff] }
 0x136   :  { %21553 = vst [vmem:[#allocation48_spill] sm:$0xff] %v17195_v56  ;;  %21554 = vst [vmem:[#allocation51_spill] sm:$0xff] %v17197_v53  ;;  %13944 = vmatprep.subr.bf16.mxu0 %v13943_v29  ;;  %v13951_v42 = vpack.c.bf16 %v10133_v52, %v10132_v13  ;;  %v1724_v13 = vmul.f32 %v17089_v44, %v16825_v0  ;;  %v15611_v44 = vld [vmem:[#allocation2 + $0x1f] sm:$0xff] }
 0x137   :  { %v2002_v14 = vmul.f32 %v15611_v44, %v17121_v33 }
 0x138   :  { %12044 = vmatmul.mubr.f32.gmra.mrb[8].mxu0 %v1720_v10 }
 0x139   :  { %13946 = vmatpush3.bf16.msra.mxu0 %v13943_v29  ;;  %v17209_v19 = vpop.permute.xlu1 %1988  ;;  %v17211_v8 = vpop.permute.xlu0 %1983  ;;  %12046 = vmatprep.mubr.f32.mxu0 %v1721_v62  ;;  %v10135_v29 = vld [vmem:[%s21104_s3 + $0x378] sm:$0xff] }
 0x13a   :  { %21557 = vst [vmem:[#allocation52_spill] sm:$0xff] %v17209_v19  ;;  %21558 = vst [vmem:[#allocation55_spill] sm:$0xff] %v17211_v8  ;;  %13948 = vmatprep.subr.bf16.mxu0 %v13947_v35  ;;  %v13955_v62 = vpack.c.bf16 %v10135_v29, %v10134_v22 }
 0x13c   :  { %12047 = vmatmul.mubr.f32.gmra.mrb[10].mxu0 %v1722_v48  ;;  %v10136_v48 = vld [vmem:[%s21104_s3 + $0x380] sm:$0xff] }
 0x13d   :  { %13950 = vmatpush3.bf16.msra.mxu0 %v13947_v35  ;;  %v17223_v10 = vpop.permute.xlu0 %1993  ;;  %12049 = vmatprep.mubr.f32.mxu0 %v1723_v54  ;;  %v17227_v52 = vpop.permute.xlu1 %1998  ;;  %v10137_v35 = vld [vmem:[%s21104_s3 + $0x388] sm:$0xff]  ;;  %v1905_v54 = vld [vmem:[#allocation2 + $0x17] sm:$0xff] }
 0x13e   :  { %21560 = vst [vmem:[#allocation56_spill] sm:$0xff] %v17223_v10  ;;  %13952 = vmatprep.subr.bf16.mxu0 %v13951_v42  ;;  %21561 = vst [vmem:[#allocation114_spill] sm:$0xff] %v17227_v52  ;;  %v13959_v22 = vpack.c.bf16 %v10137_v35, %v10136_v48  ;;  %v2001_v29 = vmul.f32 %v17123_v5, %v1905_v54  ;;  %v1908_v54 = vld [vmem:[#allocation2 + $0x2f] sm:$0xff]  ;;  %v10140_v5 = vld [vmem:[%s21104_s3 + $0x3a0] sm:$0xff] }
 0x13f   :  { %v2004_v44 = vmul.f32 %v17139_v51, %v1908_v54 }
 0x140   :  { %12050 = vmatmul.mubr.f32.gmra.mrb[12].mxu0 %v1724_v13  ;;  %v10139_v13 = vld [vmem:[%s21104_s3 + $0x398] sm:$0xff] }
 0x141   :  { %13954 = vmatpush3.bf16.msra.mxu0 %v13951_v42  ;;  %12052 = vmatprep.mubr.f32.mxu0 %v1725_v49  ;;  %v17239_v0 = vpop.permute.xlu0 %2213  ;;  %v1907_v42 = vld [vmem:[#allocation2 + $0x27] sm:$0xff]  ;;  %v17250_v49 = vpop.permute.xlu1 %2218  ;;  %v13963_v48 = vpack.c.bf16 %v10139_v13, %v10138_v59 }
 0x142   :  { %21562 = vst [vmem:[#allocation115_spill] sm:$0xff] %v17239_v0  ;;  %13956 = vmatprep.subr.bf16.mxu0 %v13955_v62  ;;  %21563 = vst [vmem:[#allocation116_spill] sm:$0xff] %v17250_v49  ;;  %v2003_v35 = vmul.f32 %v17141_v60, %v1907_v42  ;;  %v1910_v42 = vld [vmem:[#allocation2 + $0x3f] sm:$0xff]  ;;  %v10142_v60 = vld [vmem:[%s21104_s3 + $0x3b0] sm:$0xff] }
 0x144   :  { %12053 = vmatmul.mubr.f32.gmra.mrb[14].mxu0 %v1726_v23  ;;  %v10141_v23 = vld [vmem:[%s21104_s3 + $0x3a8] sm:$0xff] }
 0x145   :  { %13958 = vmatpush3.bf16.msra.mxu0 %v13955_v62  ;;  %12087 = vmatprep.mubr.f32.mxu0 %v2001_v29  ;;  %v17260_v18 = vpop.permute.xlu0 %2223  ;;  %v1909_v62 = vld [vmem:[#allocation2 + $0x37] sm:$0xff]  ;;  %v13967_v59 = vpack.c.bf16 %v10141_v23, %v10140_v5  ;;  %v17263_v29 = vpop.permute.xlu1 %2228  ;;  %v2006_v5 = vmul.f32 %v17153_v37, %v1910_v42 }
 0x146   :  { %13960 = vmatprep.subr.bf16.mxu0 %v13959_v22  ;;  %21564 = vst [vmem:[#allocation117_spill] sm:$0xff] %v17260_v18  ;;  %21565 = vst [vmem:[#allocation118_spill] sm:$0xff] %v17263_v29  ;;  %v2005_v13 = vmul.f32 %v17155_v50, %v1909_v62  ;;  %v1912_v62 = vld [vmem:[#allocation2 + $0x4f] sm:$0xff]  ;;  %v10144_v50 = vld [vmem:[%s21104_s3 + $0x3c0] sm:$0xff] }
 0x148   :  { %12088 = vmatmul.mubr.f32.vlgmr.msra.gmra.mrb[0].mxu0 %v2002_v14  ;;  %v10143_v14 = vld [vmem:[%s21104_s3 + $0x3b8] sm:$0xff] }
 0x149   :  { %13962 = vmatpush3.bf16.msra.mxu0 %v13959_v22  ;;  %12090 = vmatprep.mubr.f32.mxu0 %v2003_v35  ;;  %v1911_v22 = vld [vmem:[#allocation2 + $0x47] sm:$0xff]  ;;  %v17272_v35 = vpop.permute.xlu0 %2233  ;;  %v13971_v54 = vpack.c.bf16 %v10143_v14, %v10142_v60  ;;  %v2008_v60 = vmul.f32 %v17167_v39, %v1912_v62 }
 0x14a   :  { %13964 = vmatprep.subr.bf16.mxu0 %v13963_v48  ;;  %21566 = vst [vmem:[#allocation119_spill] sm:$0xff] %v17272_v35  ;;  %v2007_v23 = vmul.f32 %v17169_v46, %v1911_v22  ;;  %v1914_v22 = vld [vmem:[#allocation2 + $0x5f] sm:$0xff]  ;;  %v10146_v46 = vld [vmem:[%s21104_s3 + $0x3d0] sm:$0xff] }
 0x14c   :  { %12091 = vmatmul.mubr.f32.gmra.mrb[2].mxu0 %v2004_v44  ;;  %v10145_v44 = vld [vmem:[%s21104_s3 + $0x3c8] sm:$0xff] }
 0x14d   :  { %13966 = vmatpush3.bf16.msra.mxu0 %v13963_v48  ;;  %12093 = vmatprep.mubr.f32.mxu0 %v2005_v13  ;;  %v1913_v48 = vld [vmem:[#allocation2 + $0x57] sm:$0xff]  ;;  %v17282_v13 = vpop.permute.xlu1 %2238  ;;  %v13975_v42 = vpack.c.bf16 %v10145_v44, %v10144_v50  ;;  %v17292_v37 = vpop.permute.xlu0 %2243  ;;  %v2010_v50 = vmul.f32 %v17181_v15, %v1914_v22 }
 0x14e   :  { %13968 = vmatprep.subr.bf16.mxu0 %v13967_v59  ;;  %21567 = vst [vmem:[#allocation120_spill] sm:$0xff] %v17282_v13  ;;  %v2009_v14 = vmul.f32 %v17183_v43, %v1913_v48  ;;  %21568 = vst [vmem:[#allocation121_spill] sm:$0xff] %v17292_v37  ;;  %v1916_v48 = vld [vmem:[#allocation2 + $0x6f] sm:$0xff]  ;;  %v10148_v43 = vld [vmem:[%s21104_s3 + $0x3e0] sm:$0xff] }
 0x150   :  { %12094 = vmatmul.mubr.f32.gmra.mrb[4].mxu0 %v2006_v5  ;;  %v10147_v5 = vld [vmem:[%s21104_s3 + $0x3d8] sm:$0xff] }
 0x151   :  { %13970 = vmatpush3.bf16.msra.mxu0 %v13967_v59  ;;  %12096 = vmatprep.mubr.f32.mxu0 %v2007_v23  ;;  %v1915_v59 = vld [vmem:[#allocation2 + $0x67] sm:$0xff]  ;;  %v13979_v23 = vpack.c.bf16 %v10147_v5, %v10146_v46  ;;  %v17295_v62 = vpop.permute.xlu1 %2248  ;;  %v2012_v46 = vmul.f32 %v17195_v56, %v1916_v48  ;;  %v2015_v48 = vmul.f32 %v17223_v10, %v16989_v2  ;;  %v10154_v10 = vld [vmem:[%s21104_s3 + $0x410] sm:$0xff] }
 0x152   :  { %13972 = vmatprep.subr.bf16.mxu0 %v13971_v54  ;;  %21569 = vst [vmem:[#allocation122_spill] sm:$0xff] %v17295_v62  ;;  %v2011_v44 = vmul.f32 %v17197_v53, %v1915_v59  ;;  %v1918_v59 = vld [vmem:[#allocation2 + $0x7f] sm:$0xff]  ;;  %v10150_v53 = vld [vmem:[%s21104_s3 + $0x3f0] sm:$0xff] }
 0x153   :  { %v2196_v2 = vld [vmem:[#allocation2 + $0x20] sm:$0xff] }
 0x154   :  { %12097 = vmatmul.mubr.f32.gmra.mrb[6].mxu0 %v2008_v60  ;;  %v10149_v60 = vld [vmem:[%s21104_s3 + $0x3e8] sm:$0xff] }
 0x155   :  { %13974 = vmatpush3.bf16.msra.mxu0 %v13971_v54  ;;  %12099 = vmatprep.mubr.f32.mxu0 %v2009_v14  ;;  %v1917_v54 = vld [vmem:[#allocation2 + $0x77] sm:$0xff]  ;;  %v17304_v14 = vpop.permute.xlu0 %2253  ;;  %v13983_v22 = vpack.c.bf16 %v10149_v60, %v10148_v43  ;;  %v1920_v60 = vld [vmem:[#allocation2 + $0x8f] sm:$0xff] }
 0x156   :  { %13976 = vmatprep.subr.bf16.mxu0 %v13975_v42  ;;  %21570 = vst [vmem:[#allocation123_spill] sm:$0xff] %v17304_v14  ;;  %v2013_v5 = vmul.f32 %v17211_v8, %v1917_v54  ;;  %v10152_v54 = vld [vmem:[%s21104_s3 + $0x400] sm:$0xff] }
 0x158   :  { %12100 = vmatmul.mubr.f32.gmra.mrb[8].mxu0 %v2010_v50  ;;  %v10151_v50 = vld [vmem:[%s21104_s3 + $0x3f8] sm:$0xff] }
 0x159   :  { %13978 = vmatpush3.bf16.msra.mxu0 %v13975_v42  ;;  %12102 = vmatprep.mubr.f32.mxu0 %v2011_v44  ;;  %v17314_v42 = vpop.permute.xlu1 %2258  ;;  %v2014_v44 = vmul.f32 %v17209_v19, %v1918_v59  ;;  %v13987_v43 = vpack.c.bf16 %v10151_v50, %v10150_v53  ;;  %v17325_v8 = vpop.permute.xlu0 %2263  ;;  %v2016_v53 = vmul.f32 %v17227_v52, %v1920_v60 }
 0x15a   :  { %13980 = vmatprep.subr.bf16.mxu0 %v13979_v23  ;;  %21571 = vst [vmem:[#allocation124_spill] sm:$0xff] %v17314_v42  ;;  %21572 = vst [vmem:[#allocation125_spill] sm:$0xff] %v17325_v8 }
 0x15c   :  { %12103 = vmatmul.mubr.f32.gmra.mrb[10].mxu0 %v2012_v46  ;;  %v10153_v46 = vld [vmem:[%s21104_s3 + $0x408] sm:$0xff] }
 0x15d   :  { %13982 = vmatpush3.bf16.msra.mxu0 %v13979_v23  ;;  %12105 = vmatprep.mubr.f32.mxu0 %v2013_v5  ;;  %v2195_v23 = vld [vmem:[#allocation2 + $0x18] sm:$0xff]  ;;  %v13991_v5 = vpack.c.bf16 %v10153_v46, %v10152_v54  ;;  %v17328_v59 = vpop.permute.xlu1 %2268  ;;  %v17338_v60 = vpop.permute.xlu0 %2273 }
 0x15e   :  { %13984 = vmatprep.subr.bf16.mxu0 %v13983_v22  ;;  %21573 = vst [vmem:[#allocation126_spill] sm:$0xff] %v17328_v59  ;;  %v2291_v50 = vmul.f32 %v17239_v0, %v2195_v23  ;;  %21574 = vst [vmem:[#allocation127_spill] sm:$0xff] %v17338_v60  ;;  %v2198_v23 = vld [vmem:[#allocation2 + $0x30] sm:$0xff]  ;;  %v10156_v0 = vld [vmem:[%s21104_s3 + $0x420] sm:$0xff] }
 0x160   :  { %12106 = vmatmul.mubr.f32.gmra.mrb[12].mxu0 %v2014_v44  ;;  %v10155_v44 = vld [vmem:[%s21104_s3 + $0x418] sm:$0xff] }
 0x161   :  { %13986 = vmatpush3.bf16.msra.mxu0 %v13983_v22  ;;  %12108 = vmatprep.mubr.f32.mxu0 %v2015_v48  ;;  %v2197_v22 = vld [vmem:[#allocation2 + $0x28] sm:$0xff]  ;;  %v2292_v48 = vmul.f32 %v17250_v49, %v2196_v2  ;;  %v13995_v54 = vpack.c.bf16 %v10155_v44, %v10154_v10  ;;  %v2294_v10 = vmul.f32 %v17263_v29, %v2198_v23  ;;  %v17357_v49 = vpop.permute.xlu0 %2283 }
 0x162   :  { %13988 = vmatprep.subr.bf16.mxu0 %v13987_v43  ;;  %v2293_v46 = vmul.f32 %v17260_v18, %v2197_v22  ;;  %v2200_v22 = vld [vmem:[#allocation2 + $0x40] sm:$0xff]  ;;  %v10158_v18 = vld [vmem:[%s21104_s3 + $0x430] sm:$0xff]  ;;  %21576 = vst [vmem:[#allocation129_spill] sm:$0xff] %v17357_v49 }
 0x164   :  { %12109 = vmatmul.mubr.f32.gmra.mrb[14].mxu0 %v2016_v53  ;;  %v10157_v53 = vld [vmem:[%s21104_s3 + $0x428] sm:$0xff] }
 0x165   :  { %13990 = vmatpush3.bf16.msra.mxu0 %v13987_v43  ;;  %12143 = vmatprep.mubr.f32.mxu0 %v2291_v50  ;;  %v2199_v43 = vld [vmem:[#allocation2 + $0x38] sm:$0xff]  ;;  %v17347_v50 = vpop.permute.xlu1 %2278  ;;  %v13999_v2 = vpack.c.bf16 %v10157_v53, %v10156_v0  ;;  %v2296_v0 = vmul.f32 %v17282_v13, %v2200_v22 }
 0x166   :  { %13992 = vmatprep.subr.bf16.mxu0 %v13991_v5  ;;  %21575 = vst [vmem:[#allocation128_spill] sm:$0xff] %v17347_v50  ;;  %v2295_v44 = vmul.f32 %v17272_v35, %v2199_v43  ;;  %v2202_v43 = vld [vmem:[#allocation2 + $0x50] sm:$0xff]  ;;  %v10160_v35 = vld [vmem:[%s21104_s3 + $0x440] sm:$0xff] }
 0x168   :  { %12144 = vmatmul.mubr.f32.vlgmr.msra.gmra.mrb[0].mxu0 %v2292_v48  ;;  %v10159_v48 = vld [vmem:[%s21104_s3 + $0x438] sm:$0xff] }
 0x169   :  { %13994 = vmatpush3.bf16.msra.mxu0 %v13991_v5  ;;  %12146 = vmatprep.mubr.f32.mxu0 %v2293_v46  ;;  %v2201_v5 = vld [vmem:[#allocation2 + $0x48] sm:$0xff]  ;;  %v14003_v46 = vpack.c.bf16 %v10159_v48, %v10158_v18  ;;  %v17360_v23 = vpop.permute.xlu1 %2288  ;;  %v2298_v18 = vmul.f32 %v17295_v62, %v2202_v43 }
 0x16a   :  { %13996 = vmatprep.subr.bf16.mxu0 %v13995_v54  ;;  %21577 = vst [vmem:[#allocation130_spill] sm:$0xff] %v17360_v23  ;;  %v2297_v53 = vmul.f32 %v17292_v37, %v2201_v5  ;;  %v2204_v5 = vld [vmem:[#allocation2 + $0x60] sm:$0xff]  ;;  %v10162_v37 = vld [vmem:[%s21104_s3 + $0x450] sm:$0xff] }
 0x16c   :  { %12147 = vmatmul.mubr.f32.gmra.mrb[2].mxu0 %v2294_v10  ;;  %v10161_v10 = vld [vmem:[%s21104_s3 + $0x448] sm:$0xff] }
 0x16d   :  { %13998 = vmatpush3.bf16.msra.mxu0 %v13995_v54  ;;  %12149 = vmatprep.mubr.f32.mxu0 %v2295_v44  ;;  %v2203_v54 = vld [vmem:[#allocation2 + $0x58] sm:$0xff]  ;;  %v17369_v44 = vpop.permute.xlu0 %2503  ;;  %v14007_v22 = vpack.c.bf16 %v10161_v10, %v10160_v35  ;;  %v2300_v35 = vmul.f32 %v17314_v42, %v2204_v5 }
 0x16e   :  { %14000 = vmatprep.subr.bf16.mxu0 %v13999_v2  ;;  %21578 = vst [vmem:[#allocation131_spill] sm:$0xff] %v17369_v44  ;;  %v2299_v48 = vmul.f32 %v17304_v14, %v2203_v54  ;;  %v2206_v54 = vld [vmem:[#allocation2 + $0x70] sm:$0xff]  ;;  %v10164_v14 = vld [vmem:[%s21104_s3 + $0x460] sm:$0xff] }
 0x170   :  { %12150 = vmatmul.mubr.f32.gmra.mrb[4].mxu0 %v2296_v0  ;;  %v10163_v0 = vld [vmem:[%s21104_s3 + $0x458] sm:$0xff] }
 0x171   :  { %14002 = vmatpush3.bf16.msra.mxu0 %v13999_v2  ;;  %12152 = vmatprep.mubr.f32.mxu0 %v2297_v53  ;;  %v2205_v2 = vld [vmem:[#allocation2 + $0x68] sm:$0xff]  ;;  %v17379_v53 = vpop.permute.xlu1 %2508  ;;  %v14011_v43 = vpack.c.bf16 %v10163_v0, %v10162_v37  ;;  %v17389_v62 = vpop.permute.xlu0 %2513  ;;  %v2302_v37 = vmul.f32 %v17328_v59, %v2206_v54  ;;  %v2305_v54 = vmul.f32 %v17136_v55, %v17357_v49  ;;  %v2489_v55 = vld [vmem:[#allocation2 + $0x39] sm:$0xff] }
 0x172   :  { %14004 = vmatprep.subr.bf16.mxu0 %v14003_v46  ;;  %21579 = vst [vmem:[#allocation132_spill] sm:$0xff] %v17379_v53  ;;  %v2301_v10 = vmul.f32 %v17325_v8, %v2205_v2  ;;  %21580 = vst [vmem:[#allocation133_spill] sm:$0xff] %v17389_v62  ;;  %v2208_v2 = vld [vmem:[#allocation2 + $0x80] sm:$0xff]  ;;  %v10166_v8 = vld [vmem:[%s21104_s3 + $0x470] sm:$0xff] }
 0x174   :  { %12153 = vmatmul.mubr.f32.gmra.mrb[6].mxu0 %v2298_v18  ;;  %v10165_v18 = vld [vmem:[%s21104_s3 + $0x468] sm:$0xff] }
 0x175   :  { %14006 = vmatpush3.bf16.msra.mxu0 %v14003_v46  ;;  %12155 = vmatprep.mubr.f32.mxu0 %v2299_v48  ;;  %v2207_v46 = vld [vmem:[#allocation2 + $0x78] sm:$0xff]  ;;  %v14015_v48 = vpack.c.bf16 %v10165_v18, %v10164_v14  ;;  %v17392_v5 = vpop.permute.xlu1 %2518  ;;  %v2304_v14 = vmul.f32 %v17347_v50, %v2208_v2  ;;  %v15613_v2 = vld [vmem:[#allocation2 + $0x21] sm:$0xff] }
 0x176   :  { %14008 = vmatprep.subr.bf16.mxu0 %v14007_v22  ;;  %21581 = vst [vmem:[#allocation134_spill] sm:$0xff] %v17392_v5  ;;  %v2303_v0 = vmul.f32 %v17338_v60, %v2207_v46  ;;  %v2485_v18 = vld [vmem:[#allocation2 + $0x19] sm:$0xff]  ;;  %v17408_v60 = vld [vmem:[#allocation2 + $0x8] sm:$0xff] }
 0x178   :  { %12156 = vmatmul.mubr.f32.gmra.mrb[8].mxu0 %v2300_v35  ;;  %v10167_v35 = vld [vmem:[%s21104_s3 + $0x478] sm:$0xff] }
 0x179   :  { %14010 = vmatpush3.bf16.msra.mxu0 %v14007_v22  ;;  %12158 = vmatprep.mubr.f32.mxu0 %v2301_v10  ;;  %v17401_v22 = vpop.permute.xlu0 %2523  ;;  %v14019_v10 = vpack.c.bf16 %v10167_v35, %v10166_v8  ;;  %v17406_v46 = vpop.permute.xlu1 %2528  ;;  %v2487_v8 = vld [vmem:[#allocation2 + $0x29] sm:$0xff]  ;;  %v2582_v35 = vmul.f32 %v15613_v2, %v17379_v53 }
 0x17a   :  { %14012 = vmatprep.subr.bf16.mxu0 %v14011_v43  ;;  %21582 = vst [vmem:[#allocation135_spill] sm:$0xff] %v17401_v22  ;;  %21583 = vst [vmem:[#allocation136_spill] sm:$0xff] %v17406_v46 }
 0x17c   :  { %12159 = vmatmul.mubr.f32.gmra.mrb[10].mxu0 %v2302_v37  ;;  %v2581_v37 = vmul.f32 %v17369_v44, %v2485_v18  ;;  %v2490_v44 = vld [vmem:[#allocation2 + $0x41] sm:$0xff] }
 0x17d   :  { %14014 = vmatpush3.bf16.msra.mxu0 %v14011_v43  ;;  %12161 = vmatprep.mubr.f32.mxu0 %v2303_v0  ;;  %v2306_v43 = vmul.f32 %v17408_v60, %v17360_v23  ;;  %v17413_v0 = vpop.permute.xlu0 %2533  ;;  %v2586_v2 = vmul.f32 %v17406_v46, %v2490_v44 }
 0x17e   :  { %14016 = vmatprep.subr.bf16.mxu0 %v14015_v48  ;;  %21584 = vst [vmem:[#allocation137_spill] sm:$0xff] %v17413_v0 }
 0x180   :  { %12162 = vmatmul.mubr.f32.gmra.mrb[12].mxu0 %v2304_v14  ;;  %v17416_v14 = vpop.permute.xlu1 %2538 }
 0x181   :  { %14018 = vmatpush3.bf16.msra.mxu0 %v14015_v48  ;;  %12164 = vmatprep.mubr.f32.mxu0 %v2305_v54  ;;  %21585 = vst [vmem:[#allocation138_spill] sm:$0xff] %v17416_v14  ;;  %v2583_v48 = vmul.f32 %v17389_v62, %v2487_v8  ;;  %v2488_v54 = vld [vmem:[#allocation2 + $0x31] sm:$0xff]  ;;  %v17419_v23 = vpop.permute.xlu0 %2543 }
 0x182   :  { %14020 = vmatprep.subr.bf16.mxu0 %v14019_v10  ;;  %21586 = vst [vmem:[#allocation139_spill] sm:$0xff] %v17419_v23  ;;  %v2584_v18 = vmul.f32 %v17392_v5, %v2488_v54  ;;  %v2492_v62 = vld [vmem:[#allocation2 + $0x51] sm:$0xff] }
 0x183   :  { %v2588_v54 = vmul.f32 %v17416_v14, %v2492_v62 }
 0x184   :  { %12165 = vmatmul.mubr.f32.gmra.mrb[14].mxu0 %v2306_v43  ;;  %v2585_v43 = vmul.f32 %v17401_v22, %v2489_v55  ;;  %v2495_v22 = vld [vmem:[#allocation2 + $0x69] sm:$0xff] }
 0x185   :  { %14022 = vmatpush3.bf16.msra.mxu0 %v14019_v10  ;;  %12199 = vmatprep.mubr.f32.mxu0 %v2581_v37  ;;  %v2491_v10 = vld [vmem:[#allocation2 + $0x49] sm:$0xff]  ;;  %v17423_v37 = vpop.permute.xlu1 %2548 }
 0x186   :  { %21587 = vst [vmem:[#allocation140_spill] sm:$0xff] %v17423_v37  ;;  %v2587_v8 = vmul.f32 %v17413_v0, %v2491_v10  ;;  %v2496_v0 = vld [vmem:[#allocation2 + $0x71] sm:$0xff] }
 0x188   :  { %12200 = vmatmul.mubr.f32.vlgmr.msra.gmra.mrb[0].mxu0 %v2582_v35  ;;  %v17427_v35 = vpop.permute.xlu0 %2553 }
 0x189   :  { %12202 = vmatprep.mubr.f32.mxu0 %v2583_v48  ;;  %21588 = vst [vmem:[#allocation141_spill] sm:$0xff] %v17427_v35  ;;  %v2493_v48 = vld [vmem:[#allocation2 + $0x59] sm:$0xff]  ;;  %v17430_v5 = vpop.permute.xlu1 %2558  ;;  %v2591_v10 = vmul.f32 %v17427_v35, %v2495_v22 }
 0x18a   :  { %21589 = vst [vmem:[#allocation142_spill] sm:$0xff] %v17430_v5  ;;  %v2589_v55 = vmul.f32 %v17419_v23, %v2493_v48  ;;  %v2592_v62 = vmul.f32 %v17430_v5, %v2496_v0  ;;  %v2498_v23 = vld [vmem:[#allocation2 + $0x81] sm:$0xff] }
 0x18b   :  { %v21594_v0 = vld [vmem:[#allocation4_spill] sm:$0xff] }
 0x18c   :  { %12203 = vmatmul.mubr.f32.gmra.mrb[2].mxu0 %v2584_v18  ;;  %v2494_v18 = vld [vmem:[#allocation2 + $0x61] sm:$0xff] }
 0x18d   :  { %12205 = vmatprep.mubr.f32.mxu0 %v2585_v43  ;;  %v17433_v43 = vpop.permute.xlu0 %2563  ;;  %v2590_v44 = vmul.f32 %v17423_v37, %v2494_v18 }
 0x18e   :  { %21590 = vst [vmem:[#allocation143_spill] sm:$0xff] %v17433_v43 }
 0x190   :  { %12206 = vmatmul.mubr.f32.gmra.mrb[4].mxu0 %v2586_v2  ;;  %v2497_v2 = vld [vmem:[#allocation2 + $0x79] sm:$0xff] }
 0x191   :  { %12208 = vmatprep.mubr.f32.mxu0 %v2587_v8  ;;  %v17437_v8 = vpop.permute.xlu1 %2568  ;;  %v2593_v48 = vmul.f32 %v17433_v43, %v2497_v2  ;;  %v5496_v2 = vmul.f32 %v17408_v60, %v21594_v0 }
 0x192   :  { %21591 = vst [vmem:[#allocation144_spill] sm:$0xff] %v17437_v8 }
 0x194   :  { %12209 = vmatmul.mubr.f32.gmra.mrb[6].mxu0 %v2588_v54  ;;  %v17441_v54 = vpop.permute.xlu0 %2573 }
 0x195   :  { %12211 = vmatprep.mubr.f32.mxu0 %v2589_v55  ;;  %21592 = vst [vmem:[#allocation145_spill] sm:$0xff] %v17441_v54  ;;  %v2594_v55 = vmul.f32 %v17437_v8, %v2498_v23  ;;  %v17444_v18 = vpop.permute.xlu1 %2578  ;;  %v2595_v22 = vmul.f32 %v17441_v54, %v17231_v47 }
 0x196   :  { %21593 = vst [vmem:[#allocation146_spill] sm:$0xff] %v17444_v18 }
 0x198   :  { %12212 = vmatmul.mubr.f32.gmra.mrb[8].mxu0 %v2590_v44  ;;  %v2500_v44 = vld [vmem:[#allocation2 + $0x91] sm:$0xff] }
 0x199   :  { %12214 = vmatprep.mubr.f32.mxu0 %v2591_v10  ;;  %v2596_v10 = vmul.f32 %v17444_v18, %v2500_v44 }
 0x19c   :  { %12215 = vmatmul.mubr.f32.gmra.mrb[10].mxu0 %v2592_v62 }
 0x19d   :  { %12217 = vmatprep.mubr.f32.mxu0 %v2593_v48 }
 0x1a0   :  { %12218 = vmatmul.mubr.f32.gmra.mrb[12].mxu0 %v2594_v55 }
 0x1a1   :  { %12220 = vmatprep.mubr.f32.mxu0 %v2595_v22 }
 0x1a4   :  { %12221 = vmatmul.mubr.f32.gmra.mrb[14].mxu0 %v2596_v10 }
 0x1a5   :  { %12759 = vmatprep.mubr.f32.mxu0 %v5496_v2 }
 0x25b   :  { %v12201_v43 = vpop.f32.mrb[0].mxu0 }
 0x25c   :  { %v2680_v62 = vpop.f32.mrb[1].mxu0 }
 0x25d   :  { %v2777_v48 = vadd.f32 %v12201_v43, %v2680_v62 }
 0x25f   :  { %v12204_v5 = vpop.f32.mrb[2].mxu0 }
 0x260   :  { %v2690_v23 = vpop.f32.mrb[3].mxu0 }
 0x261   :  { %v2778_v8 = vadd.f32 %v2777_v48, %v2690_v23 }
 0x263   :  { %v12207_v35 = vpop.f32.mrb[4].mxu0  ;;  %v2779_v37 = vadd.f32 %v12204_v5, %v2778_v8 }
 0x264   :  { %v2700_v14 = vpop.f32.mrb[5].mxu0 }
 0x265   :  { %v2780_v47 = vadd.f32 %v2779_v37, %v2700_v14 }
 0x267   :  { %v12210_v54 = vpop.f32.mrb[6].mxu0  ;;  %v2781_v55 = vadd.f32 %v12207_v35, %v2780_v47 }
 0x268   :  { %v2710_v22 = vpop.f32.mrb[7].mxu0 }
 0x269   :  { %v2782_v46 = vadd.f32 %v2781_v55, %v2710_v22 }
 0x26b   :  { %v2783_v44 = vadd.f32 %v12210_v54, %v2782_v46  ;;  %v17451_v18 = vpop.f32.mrb[8].mxu0 }
 0x26c   :  { %v17453_v0 = vpop.f32.mrb[9].mxu0 }
 0x26d   :  { %v2866_v10 = vadd.f32 %v17451_v18, %v17453_v0  ;;  %2784 = vadd.xlane.f32.xlu0 %v2783_v44 }
 0x26f   :  { %v17457_v2 = vpop.f32.mrb[10].mxu0 }
 0x270   :  { %v17459_v48 = vpop.f32.mrb[11].mxu0 }
 0x271   :  { %v2867_v8 = vadd.f32 %v2866_v10, %v17459_v48 }
 0x273   :  { %v17462_v37 = vpop.f32.mrb[12].mxu0  ;;  %v2868_v47 = vadd.f32 %v17457_v2, %v2867_v8 }
 0x274   :  { %v17465_v55 = vpop.f32.mrb[13].mxu0 }
 0x275   :  { %v2869_v46 = vadd.f32 %v2868_v47, %v17465_v55  ;;  %v21327_v47 = vlaneseq }
 0x277   :  { %v17468_v53 = vpop.f32.mrb[14].mxu0  ;;  %v2870_v49 = vadd.f32 %v17462_v37, %v2869_v46  ;;  %v17476_v56 = vand.u32 127, %v21327_v47 }
 0x278   :  { %v17471_v50 = vpop.f32.mrb[15].mxu0 }
 0x279   :  { %v2871_v44 = vadd.f32 %v2870_v49, %v17471_v50  ;;  %21595 = vst [vmem:[#allocation147_spill] sm:$0xff] %v17476_v56  ;;  %vm169_vm0 = vcmp.lt.s32.totalorder %v17476_v56, 4 }
 0x27a   :  { %v17480_v49 = vsel %vm169_vm0, 1.0, %v17408_v60 }
 0x27b   :  { %v2872_v59 = vadd.f32 %v17468_v53, %v2871_v44 }
 0x27d   :  { %2873 = vadd.xlane.f32.xlu0 %v2872_v59 }
 0x2fa   :  { %v2785_v10 = vpop.xlane.xlu0 %2784 }
 0x2fb   :  { %v2786_v42 = vrot.slane %v2785_v10, 4 }
 0x2fd   :  { %v2787_v13 = vadd.f32 %v2786_v42, %v2785_v10 }
 0x2ff   :  { %v2788_v29 = vrot.slane %v2787_v13, 2 }
 0x301   :  { %v2789_v8 = vadd.f32 %v2788_v29, %v2787_v13 }
 0x303   :  { %v2790_v52 = vrot.slane %v2789_v8, 1 }
 0x305   :  { %v2791_v19 = vadd.f32 %v2790_v52, %v2789_v8 }
 0x307   :  { %15399 = vpush %v2791_v19 }
 0x30a   :  { %v2874_v33 = vpop.xlane.xlu0 %2873 }
 0x338   :  { %s15400_s3 = spop %15399 }
 0x339   :  { %s2793_s27 = smul.f32 0.00390625, %s15400_s3 }
 0x33b   :  { %v2794_v59 = vstv %s2793_s27 }
 0x33c   :  { %v2795_v46 = vsub.f32 %v2680_v62, %v2794_v59  ;;  %v2796_v44 = vsub.f32 %v12201_v43, %v2794_v59  ;;  %v2797_v42 = vsub.f32 %v2690_v23, %v2794_v59  ;;  %v2798_v10 = vsub.f32 %v12204_v5, %v2794_v59 }
 0x33d   :  { %v2799_v52 = vsub.f32 %v2700_v14, %v2794_v59  ;;  %v2800_v8 = vsub.f32 %v12207_v35, %v2794_v59  ;;  %v2801_v43 = vsub.f32 %v2710_v22, %v2794_v59 }
 0x33e   :  { %v17483_v29 = vmul.f32 %v17480_v49, %v2795_v46  ;;  %v17486_v19 = vmul.f32 %v17480_v49, %v2796_v44  ;;  %v17489_v13 = vmul.f32 %v17480_v49, %v2797_v42  ;;  %v17492_v47 = vmul.f32 %v17480_v49, %v2798_v10 }
 0x33f   :  { %v17499_v62 = vmul.f32 %v17480_v49, %v2799_v52  ;;  %v2802_v46 = vsub.f32 %v12210_v54, %v2794_v59  ;;  %v17504_v35 = vmul.f32 %v17480_v49, %v2800_v8  ;;  %v17509_v10 = vmul.f32 %v17480_v49, %v2801_v43 }
 0x340   :  { %v2811_v60 = vmul.f32 %v17483_v29, %v17483_v29  ;;  %v2812_v5 = vmul.f32 %v17486_v19, %v17486_v19  ;;  %v2813_v14 = vmul.f32 %v17489_v13, %v17489_v13  ;;  %v2814_v44 = vmul.f32 %v17492_v47, %v17492_v47 }
 0x341   :  { %v2815_v22 = vmul.f32 %v17499_v62, %v17499_v62  ;;  %v17514_v56 = vmul.f32 %v17480_v49, %v2802_v46  ;;  %v2816_v54 = vmul.f32 %v17504_v35, %v17504_v35  ;;  %v2817_v8 = vmul.f32 %v17509_v10, %v17509_v10 }
 0x342   :  { %v2819_v23 = vadd.f32 %v2812_v5, %v2811_v60 }
 0x343   :  { %v2818_v5 = vmul.f32 %v17514_v56, %v17514_v56 }
 0x344   :  { %v2820_v42 = vadd.f32 %v2819_v23, %v2813_v14 }
 0x346   :  { %v2821_v52 = vadd.f32 %v2820_v42, %v2814_v44 }
 0x348   :  { %v2822_v59 = vadd.f32 %v2821_v52, %v2815_v22  ;;  %v2875_v22 = vrot.slane %v2874_v33, 4 }
 0x34a   :  { %v2823_v60 = vadd.f32 %v2822_v59, %v2816_v54  ;;  %v2876_v52 = vadd.f32 %v2875_v22, %v2874_v33  ;;  %v10171_v33 = vld [vmem:[%s21106_s4 + $0x90] sm:$0xff] }
 0x34b   :  { %v10175_v22 = vld [vmem:[%s21106_s4 + $0xb0] sm:$0xff] }
 0x34c   :  { %v2824_v43 = vadd.f32 %v2823_v60, %v2817_v8  ;;  %v2877_v54 = vrot.slane %v2876_v52, 2 }
 0x34e   :  { %v2825_v14 = vadd.f32 %v2824_v43, %v2818_v5  ;;  %v2878_v8 = vadd.f32 %v2877_v54, %v2876_v52  ;;  %v10176_v52 = vld [vmem:[%s21106_s4 + $0xb8] sm:$0xff] }
 0x34f   :  { %v14035_v54 = vpack.c.bf16 %v10176_v52, %v10175_v22  ;;  %v17574_v22 = vld [vmem:[%s21107_s7] sm:$0x1] }
 0x350   :  { %2826 = vadd.xlane.f32.xlu1 %v2825_v14  ;;  %v2879_v60 = vrot.slane %v2878_v8, 1  ;;  %v10172_v14 = vld [vmem:[%s21106_s4 + $0x98] sm:$0xff] }
 0x352   :  { %v2880_v43 = vadd.f32 %v2879_v60, %v2878_v8  ;;  %v10178_v8 = vld [vmem:[%s21106_s4 + $0xc8] sm:$0xff] }
 0x3dd   :  { %v2827_v23 = vpop.xlane.xlu1 %2826 }
 0x3de   :  { %v2828_v15 = vrot.slane %v2827_v23, 4 }
 0x3e0   :  { %v2829_v44 = vadd.f32 %v2828_v15, %v2827_v23  ;;  %v14027_v23 = vpack.c.bf16 %v10172_v14, %v10171_v33  ;;  %v10182_v33 = vld [vmem:[%s21106_s4 + $0xe8] sm:$0xff]  ;;  %v10183_v14 = vld [vmem:[%s21106_s4 + $0xf0] sm:$0xff] }
 0x3e2   :  { %v2830_v42 = vrot.slane %v2829_v44, 2 }
 0x3e4   :  { %v2831_v46 = vadd.f32 %v2830_v42, %v2829_v44  ;;  %v10173_v44 = vld [vmem:[%s21106_s4 + $0xa0] sm:$0xff]  ;;  %v10174_v42 = vld [vmem:[%s21106_s4 + $0xa8] sm:$0xff] }
 0x3e6   :  { %v2832_v39 = vrot.slane %v2831_v46, 1 }
 0x3e8   :  { %v2833_v51 = vadd.f32 %v2832_v39, %v2831_v46  ;;  %v10169_v39 = vld [vmem:[%s21106_s4 + $0x80] sm:$0xff]  ;;  %v14031_v46 = vpack.c.bf16 %v10174_v42, %v10173_v44  ;;  %v21596_v42 = vlaneseq }
 0x3ea   :  { %15401 = vpush %v2833_v51  ;;  %v10170_v51 = vld [vmem:[%s21106_s4 + $0x88] sm:$0xff] }
 0x3eb   :  { %v14023_v15 = vpack.c.bf16 %v10170_v51, %v10169_v39  ;;  %v10181_v51 = vld [vmem:[%s21106_s4 + $0xe0] sm:$0xff] }
 0x3ed   :  { %14024 = vmatprep.subr.bf16.mxu1 %v14023_v15 }
 0x3ee   :  { %14026 = vmatpush3.bf16.msra.mxu1 %v14023_v15  ;;  %v14047_v15 = vpack.c.bf16 %v10182_v33, %v10181_v51 }
 0x3ef   :  { %14028 = vmatprep.subr.bf16.mxu1 %v14027_v23 }
 0x3f2   :  { %14030 = vmatpush3.bf16.msra.mxu1 %v14027_v23  ;;  %v10184_v23 = vld [vmem:[%s21106_s4 + $0xf8] sm:$0xff] }
 0x3f3   :  { %14032 = vmatprep.subr.bf16.mxu1 %v14031_v46  ;;  %v14051_v44 = vpack.c.bf16 %v10184_v23, %v10183_v14 }
 0x3f6   :  { %14034 = vmatpush3.bf16.msra.mxu1 %v14031_v46  ;;  %v2843_v46 = vshrl.u32 %v21596_v42, 7 }
 0x3f7   :  { %14036 = vmatprep.subr.bf16.mxu1 %v14035_v54 }
 0x3f8   :  { %v17576_v52 = vsub.s32 0, %v2843_v46 }
 0x3fa   :  { %14038 = vmatpush3.bf16.msra.mxu1 %v14035_v54  ;;  %21597 = vst [vmem:[#allocation148_spill] sm:$0xff] %v17576_v52 }
 0x41b   :  { %s15402_s28 = spop %15401 }
 0x41c   :  { %s2835_s29 = smul.f32 0.00390625, %s15402_s28 }
 0x41e   :  { %s2836_s30 = sadd.f32 1e-05, %s2835_s29 }
 0x420   :  { %v2837_v59 = vstv %s2836_s30 }
 0x421   :  { %15451 = vrsqrt.f32 %v2837_v59  ;;  %v10177_v59 = vld [vmem:[%s21106_s4 + $0xc0] sm:$0xff] }
 0x422   :  { %v14039_v60 = vpack.c.bf16 %v10178_v8, %v10177_v59 }
 0x424   :  { %14040 = vmatprep.subr.bf16.mxu1 %v14039_v60 }
 0x425   :  { %14042 = vmatpush3.bf16.msra.mxu1 %v14039_v60  ;;  %v17583_v60 = vld [vmem:[%s21107_s7 + $0x1] ss:$0 sm:$0xff] }
 0x426   :  { %21598 = vst [vmem:[#allocation149_spill] sm:$0xff] %v17583_v60 }
 0x42b   :  { %v15452_v5 = vpop.eup %15451 }
 0x42c   :  { %15403 = vpush %v15452_v5  ;;  %v10179_v5 = vld [vmem:[%s21106_s4 + $0xd0] sm:$0xff] }
 0x42d   :  { %15405 = vpush %v2880_v43  ;;  %v10180_v43 = vld [vmem:[%s21106_s4 + $0xd8] sm:$0xff] }
 0x42e   :  { %v14043_v39 = vpack.c.bf16 %v10180_v43, %v10179_v5 }
 0x430   :  { %14044 = vmatprep.subr.bf16.mxu1 %v14043_v39 }
 0x431   :  { %14046 = vmatpush3.bf16.msra.mxu1 %v14043_v39 }
 0x432   :  { %14048 = vmatprep.subr.bf16.mxu1 %v14047_v15 }
 0x435   :  { %14050 = vmatpush3.bf16.msra.mxu1 %v14047_v15 }
 0x436   :  { %14052 = vmatprep.subr.bf16.mxu1 %v14051_v44 }
 0x439   :  { %14054 = vmatpush3.bf16.msra.mxu1 %v14051_v44 }
 0x45d   :  { %s15404_s18 = spop %15403 }
 0x45e   :  { %v2840_v54 = vstv %s15404_s18  ;;  %s15406_s21 = spop %15405 }
 0x45f   :  { %v2841_v59 = vmul.f32 %v2840_v54, %v17574_v22  ;;  %s2882_s22 = smul.f32 0.00390625, %s15406_s21 }
 0x461   :  { %v2845_v8 = vrot.slane %v2841_v59, %v17576_v52 }
 0x463   :  { %v2846_v5 = vmul.f32 %v2845_v8, %v17483_v29  ;;  %v2847_v43 = vmul.f32 %v2845_v8, %v17486_v19  ;;  %v2848_v39 = vmul.f32 %v2845_v8, %v17489_v13  ;;  %v2849_v51 = vmul.f32 %v2845_v8, %v17492_v47 }
 0x464   :  { %v2850_v33 = vmul.f32 %v2845_v8, %v17499_v62  ;;  %v2851_v15 = vmul.f32 %v2845_v8, %v17504_v35  ;;  %v2852_v14 = vmul.f32 %v2845_v8, %v17509_v10  ;;  %v2853_v23 = vmul.f32 %v2845_v8, %v17514_v56 }
 0x465   :  { %v2858_v44 = vadd.f32 %v17583_v60, %v2846_v5  ;;  %v2859_v42 = vadd.f32 %v17583_v60, %v2847_v43  ;;  %v17596_v29 = vadd.f32 %v17583_v60, %v2848_v39  ;;  %v17599_v19 = vadd.f32 %v17583_v60, %v2849_v51 }
 0x466   :  { %v17602_v47 = vadd.f32 %v17583_v60, %v2850_v33  ;;  %v17605_v13 = vadd.f32 %v17583_v60, %v2851_v15  ;;  %v17608_v62 = vadd.f32 %v17583_v60, %v2852_v14  ;;  %v17611_v56 = vadd.f32 %v17583_v60, %v2853_v23 }
 0x467   :  { %v17613_v35 = vmul.f32 0.70710677, %v2858_v44  ;;  %v17615_v10 = vmul.f32 0.70710677, %v2859_v42  ;;  %v17618_v46 = vmul.f32 0.70710677, %v17596_v29  ;;  %v17636_v51 = vstv %s2882_s22 }
 0x468   :  { %v17621_v54 = vmul.f32 0.70710677, %v17599_v19  ;;  %v17624_v59 = vmul.f32 0.70710677, %v17602_v47  ;;  %v17627_v8 = vmul.f32 0.70710677, %v17605_v13  ;;  %v2884_v30 = vsub.f32 %v17453_v0, %v17636_v51 }
 0x469   :  { %v17630_v5 = vmul.f32 0.70710677, %v17608_v62  ;;  %v17633_v43 = vmul.f32 0.70710677, %v17611_v56  ;;  %v2983_v39 = vand.u32 2147483647, %v17613_v35  ;;  %v2885_v20 = vsub.f32 %v17451_v18, %v17636_v51 }
 0x46a   :  { %v2984_v33 = vand.u32 2147483647, %v17615_v10  ;;  %v2985_v15 = vand.u32 2147483647, %v17618_v46  ;;  %v2986_v14 = vand.u32 2147483647, %v17621_v54  ;;  %v2886_v61 = vsub.f32 %v17459_v48, %v17636_v51 }
 0x46b   :  { %v2987_v23 = vand.u32 2147483647, %v17624_v59  ;;  %v2988_v6 = vand.u32 2147483647, %v17627_v8  ;;  %v2989_v28 = vand.u32 2147483647, %v17630_v5 }
 0x46c   :  { %v2990_v11 = vand.u32 2147483647, %v17633_v43  ;;  %v2999_v17 = vmul.f32 0.3275911, %v2983_v39  ;;  %v3000_v9 = vmul.f32 0.3275911, %v2984_v33 }
 0x46d   :  { %v3001_v7 = vmul.f32 0.3275911, %v2985_v15  ;;  %v3002_v24 = vmul.f32 0.3275911, %v2986_v14  ;;  %v3003_v1 = vmul.f32 0.3275911, %v2987_v23 }
 0x46e   :  { %v3004_v27 = vmul.f32 0.3275911, %v2988_v6  ;;  %v3005_v34 = vmul.f32 0.3275911, %v2989_v28  ;;  %v3006_v38 = vmul.f32 0.3275911, %v2990_v11 }
 0x46f   :  { %v3015_v45 = vadd.f32 1.0, %v2999_v17  ;;  %v3016_v12 = vadd.f32 1.0, %v3000_v9  ;;  %v3017_v41 = vadd.f32 1.0, %v3001_v7  ;;  %v17653_v21 = vmul.f32 0.5, %v2858_v44 }
 0x470   :  { %v3018_v0 = vadd.f32 1.0, %v3002_v24  ;;  %v3019_v63 = vadd.f32 1.0, %v3003_v1  ;;  %v3020_v36 = vadd.f32 1.0, %v3004_v27  ;;  %v3207_v26 = vsub.f32 0.0, %v2983_v39 }
 0x471   :  { %15453 = vrcp.f32 %v3015_v45  ;;  %v3208_v18 = vsub.f32 0.0, %v2984_v33  ;;  %v3209_v32 = vsub.f32 0.0, %v2985_v15  ;;  %v3021_v58 = vadd.f32 1.0, %v3005_v34 }
 0x472   :  { %15455 = vrcp.f32 %v3016_v12  ;;  %v3210_v3 = vsub.f32 0.0, %v2986_v14  ;;  %v3211_v48 = vsub.f32 0.0, %v2987_v23  ;;  %v3022_v4 = vadd.f32 1.0, %v3006_v38 }
 0x473   :  { %15457 = vrcp.f32 %v3017_v41  ;;  %v3212_v25 = vsub.f32 0.0, %v2988_v6  ;;  %v3223_v40 = vmul.f32 %v3207_v26, %v2983_v39  ;;  %v3213_v9 = vsub.f32 0.0, %v2989_v28 }
 0x474   :  { %15459 = vrcp.f32 %v3018_v0  ;;  %v3224_v7 = vmul.f32 %v3208_v18, %v2984_v33  ;;  %v3225_v17 = vmul.f32 %v3209_v32, %v2985_v15  ;;  %v17655_v44 = vmul.f32 0.5, %v2859_v42 }
 0x475   :  { %15461 = vrcp.f32 %v3019_v63  ;;  %v3214_v27 = vsub.f32 0.0, %v2990_v11  ;;  %v3226_v45 = vmul.f32 %v3210_v3, %v2986_v14  ;;  %v17658_v1 = vmul.f32 0.5, %v17596_v29 }
 0x476   :  { %15463 = vrcp.f32 %v3020_v36  ;;  %v3227_v12 = vmul.f32 %v3211_v48, %v2987_v23  ;;  %v3239_v34 = vmul.f32 1.442695, %v3223_v40  ;;  %v17661_v38 = vmul.f32 0.5, %v17599_v19 }
 0x477   :  { %15465 = vrcp.f32 %v3021_v58  ;;  %v3228_v26 = vmul.f32 %v3212_v25, %v2988_v6  ;;  %v3241_v41 = vmul.f32 1.442695, %v3224_v7  ;;  %v17664_v24 = vmul.f32 0.5, %v17602_v47 }
 0x478   :  { %15467 = vrcp.f32 %v3022_v4  ;;  %v3229_v32 = vmul.f32 %v3213_v9, %v2989_v28  ;;  %v3243_v63 = vmul.f32 1.442695, %v3225_v17  ;;  %v17667_v3 = vmul.f32 0.5, %v17605_v13 }
 0x479   :  { %v17670_v42 = vmul.f32 0.5, %v17608_v62  ;;  %v3230_v36 = vmul.f32 %v3214_v27, %v2990_v11  ;;  %v3245_v40 = vmul.f32 1.442695, %v3226_v45  ;;  %15469 = vpow2.f32 %v3239_v34 }
 0x47a   :  { %v3247_v29 = vmul.f32 1.442695, %v3227_v12  ;;  %v17673_v58 = vmul.f32 %v17480_v49, %v2884_v30  ;;  %v17676_v25 = vmul.f32 %v17480_v49, %v2885_v20  ;;  %15471 = vpow2.f32 %v3241_v41 }
 0x47b   :  { %v17678_v6 = vpop.eup %15453  ;;  %v3249_v4 = vmul.f32 1.442695, %v3228_v26  ;;  %15473 = vpow2.f32 %v3243_v63  ;;  %v3251_v30 = vmul.f32 1.442695, %v3229_v32  ;;  %v17688_v13 = vmul.f32 %v17480_v49, %v2886_v61 }
 0x47c   :  { %21599 = vst [vmem:[#allocation150_spill] sm:$0xff] %v17673_v58  ;;  %21600 = vst [vmem:[#allocation151_spill] sm:$0xff] %v17676_v25  ;;  %v17684_v11 = vpop.eup %15455  ;;  %v3063_v47 = vmul.f32 1.0614054, %v17678_v6  ;;  %15475 = vpow2.f32 %v3245_v40  ;;  %v3253_v39 = vmul.f32 1.442695, %v3230_v36  ;;  %v21601_v33 = vsub.f32 %v17457_v2, %v17636_v51 }
 0x47d   :  { %v17690_v20 = vpop.eup %15457  ;;  %v3064_v62 = vmul.f32 1.0614054, %v17684_v11  ;;  %15477 = vpow2.f32 %v3247_v29  ;;  %v17704_v61 = vmul.f32 %v17673_v58, %v17673_v58  ;;  %v17711_v2 = vmul.f32 %v17676_v25, %v17676_v25 }
 0x47e   :  { %v17697_v15 = vmul.f32 %v17480_v49, %v21601_v33  ;;  %v17699_v14 = vpop.eup %15459  ;;  %v3065_v23 = vmul.f32 1.0614054, %v17690_v20  ;;  %v3079_v0 = vadd.f32 -1.4531521, %v3063_v47  ;;  %15479 = vpow2.f32 %v3249_v4 }
 0x47f   :  { %v17706_v18 = vpop.eup %15461  ;;  %v3066_v48 = vmul.f32 1.0614054, %v17699_v14  ;;  %v3080_v9 = vadd.f32 -1.4531521, %v3064_v62  ;;  %15481 = vpow2.f32 %v3251_v30  ;;  %vm3303_vm1 = vcmp.ge.f32.partialorder %v17613_v35, 0.0 }
 0x480   :  { %v17713_v7 = vpop.eup %15463  ;;  %v3067_v17 = vmul.f32 1.0614054, %v17706_v18  ;;  %v3081_v27 = vadd.f32 -1.4531521, %v3065_v23  ;;  %v3095_v45 = vmul.f32 %v17678_v6, %v3079_v0  ;;  %15483 = vpow2.f32 %v3253_v39 }
 0x481   :  { %v17717_v12 = vpop.eup %15465  ;;  %v3068_v34 = vmul.f32 1.0614054, %v17713_v7  ;;  %v3082_v26 = vadd.f32 -1.4531521, %v3066_v48  ;;  %v3096_v41 = vmul.f32 %v17684_v11, %v3080_v9  ;;  %vm3304_vm2 = vcmp.ge.f32.partialorder %v17615_v10, 0.0 }
 0x482   :  { %v17721_v32 = vpop.eup %15467  ;;  %v3069_v63 = vmul.f32 1.0614054, %v17717_v12  ;;  %v3083_v36 = vadd.f32 -1.4531521, %v3067_v17  ;;  %v3097_v40 = vmul.f32 %v17690_v20, %v3081_v27  ;;  %v3111_v29 = vadd.f32 1.4214138, %v3095_v45 }
 0x483   :  { %v3070_v4 = vmul.f32 1.0614054, %v17721_v32  ;;  %v3084_v47 = vadd.f32 -1.4531521, %v3068_v34  ;;  %v3098_v30 = vmul.f32 %v17699_v14, %v3082_v26  ;;  %v3112_v62 = vadd.f32 1.4214138, %v3096_v41  ;;  %v15470_v33 = vpop.eup %15469 }
 0x484   :  { %v3085_v23 = vadd.f32 -1.4531521, %v3069_v63  ;;  %v3099_v0 = vmul.f32 %v17706_v18, %v3083_v36  ;;  %v3113_v48 = vadd.f32 1.4214138, %v3097_v40  ;;  %v3127_v39 = vmul.f32 %v17678_v6, %v3111_v29  ;;  %v15472_v9 = vpop.eup %15471 }
 0x485   :  { %v3086_v19 = vadd.f32 -1.4531521, %v3070_v4  ;;  %v3100_v17 = vmul.f32 %v17713_v7, %v3084_v47  ;;  %v3114_v28 = vadd.f32 1.4214138, %v3098_v30  ;;  %v3128_v27 = vmul.f32 %v17684_v11, %v3112_v62  ;;  %v15474_v45 = vpop.eup %15473 }
 0x486   :  { %v3101_v34 = vmul.f32 %v17717_v12, %v3085_v23  ;;  %v3115_v31 = vadd.f32 1.4214138, %v3099_v0  ;;  %v3129_v26 = vmul.f32 %v17690_v20, %v3113_v48  ;;  %v3143_v41 = vadd.f32 -0.28449672, %v3127_v39  ;;  %v15476_v63 = vpop.eup %15475 }
 0x487   :  { %v3102_v36 = vmul.f32 %v17721_v32, %v3086_v19  ;;  %v3116_v40 = vadd.f32 1.4214138, %v3100_v17  ;;  %v3130_v29 = vmul.f32 %v17699_v14, %v3114_v28  ;;  %v3144_v57 = vadd.f32 -0.28449672, %v3128_v27  ;;  %v15478_v4 = vpop.eup %15477 }
 0x488   :  { %v3117_v16 = vadd.f32 1.4214138, %v3101_v34  ;;  %v3131_v47 = vmul.f32 %v17706_v18, %v3115_v31  ;;  %v3145_v30 = vadd.f32 -0.28449672, %v3129_v26  ;;  %v3159_v62 = vmul.f32 %v17678_v6, %v3143_v41  ;;  %v15480_v60 = vpop.eup %15479 }
 0x489   :  { %v3118_v23 = vadd.f32 1.4214138, %v3102_v36  ;;  %v3132_v0 = vmul.f32 %v17713_v7, %v3116_v40  ;;  %v3146_v48 = vadd.f32 -0.28449672, %v3130_v29  ;;  %v3160_v39 = vmul.f32 %v17684_v11, %v3144_v57  ;;  %v15482_v25 = vpop.eup %15481 }
 0x48a   :  { %v3133_v19 = vmul.f32 %v17717_v12, %v3117_v16  ;;  %v3147_v17 = vadd.f32 -0.28449672, %v3131_v47  ;;  %v3161_v28 = vmul.f32 %v17690_v20, %v3145_v30  ;;  %v3175_v27 = vadd.f32 0.2548296, %v3159_v62  ;;  %v15484_v34 = vpop.eup %15483 }
 0x48b   :  { %v3134_v31 = vmul.f32 %v17721_v32, %v3118_v23  ;;  %v3148_v26 = vadd.f32 -0.28449672, %v3132_v0  ;;  %v3162_v41 = vmul.f32 %v17699_v14, %v3146_v48  ;;  %v3176_v58 = vadd.f32 0.2548296, %v3160_v39 }
 0x48c   :  { %v3149_v36 = vadd.f32 -0.28449672, %v3133_v19  ;;  %v3163_v40 = vmul.f32 %v17706_v18, %v3147_v17  ;;  %v3177_v57 = vadd.f32 0.2548296, %v3161_v28  ;;  %v3191_v29 = vmul.f32 %v17678_v6, %v3175_v27 }
 0x48d   :  { %v3150_v16 = vadd.f32 -0.28449672, %v3134_v31  ;;  %v3164_v47 = vmul.f32 %v17713_v7, %v3148_v26  ;;  %v3178_v30 = vadd.f32 0.2548296, %v3162_v41  ;;  %v3192_v62 = vmul.f32 %v17684_v11, %v3176_v58 }
 0x48e   :  { %vm3305_vm3 = vcmp.ge.f32.partialorder %v17618_v46, 0.0  ;;  %v3165_v23 = vmul.f32 %v17717_v12, %v3149_v36  ;;  %v3179_v0 = vadd.f32 0.2548296, %v3163_v40  ;;  %v3193_v48 = vmul.f32 %v17690_v20, %v3177_v57 }
 0x48f   :  { %v3271_v39 = vmul.f32 %v15470_v33, %v3191_v29  ;;  %vm3306_vm4 = vcmp.ge.f32.partialorder %v17621_v54, 0.0  ;;  %v3166_v6 = vmul.f32 %v17721_v32, %v3150_v16  ;;  %v3180_v19 = vadd.f32 0.2548296, %v3164_v47 }
 0x490   :  { %v3194_v17 = vmul.f32 %v17699_v14, %v3178_v30  ;;  %v3272_v28 = vmul.f32 %v15472_v9, %v3192_v62  ;;  %vm3307_vm5 = vcmp.ge.f32.partialorder %v17624_v59, 0.0  ;;  %v3181_v27 = vadd.f32 0.2548296, %v3165_v23 }
 0x491   :  { %v3195_v58 = vmul.f32 %v17706_v18, %v3179_v0  ;;  %v3273_v11 = vmul.f32 %v15474_v45, %v3193_v48  ;;  %v3287_v31 = vsub.f32 1.0, %v3271_v39  ;;  %vm3308_vm6 = vcmp.ge.f32.partialorder %v17627_v8, 0.0 }
 0x492   :  { %v3182_v26 = vadd.f32 0.2548296, %v3166_v6  ;;  %v3196_v20 = vmul.f32 %v17713_v7, %v3180_v19  ;;  %v3274_v33 = vmul.f32 %v15476_v63, %v3194_v17  ;;  %v3288_v41 = vsub.f32 1.0, %v3272_v28 }
 0x493   :  { %vm3309_vm7 = vcmp.ge.f32.partialorder %v17630_v5, 0.0  ;;  %v3197_v36 = vmul.f32 %v17717_v12, %v3181_v27  ;;  %v3275_v14 = vmul.f32 %v15478_v4, %v3195_v58  ;;  %v3289_v9 = vsub.f32 1.0, %v3273_v11 }
 0x494   :  { %vm3310_vm8 = vcmp.ge.f32.partialorder %v17633_v43, 0.0  ;;  %v3319_v40 = vsub.f32 0.0, %v3287_v31  ;;  %v3198_v18 = vmul.f32 %v17721_v32, %v3182_v26  ;;  %v3276_v45 = vmul.f32 %v15480_v60, %v3196_v20 }
 0x495   :  { %v3290_v57 = vsub.f32 1.0, %v3274_v33  ;;  %v3320_v29 = vsub.f32 0.0, %v3288_v41  ;;  %v3277_v16 = vmul.f32 %v15482_v25, %v3197_v36  ;;  %v3291_v47 = vsub.f32 1.0, %v3275_v14  ;;  %v21604_v36 = vld [vmem:[#allocation3_spill] sm:$0xff] }
 0x496   :  { %v3321_v30 = vsub.f32 0.0, %v3289_v9  ;;  %v3335_v7 = vsel %vm3303_vm1, %v3287_v31, %v3319_v40  ;;  %v3278_v63 = vmul.f32 %v15484_v34, %v3198_v18  ;;  %v3292_v62 = vsub.f32 1.0, %v3276_v45 }
 0x497   :  { %v3322_v23 = vsub.f32 0.0, %v3290_v57  ;;  %v3336_v12 = vsel %vm3304_vm2, %v3288_v41, %v3320_v29  ;;  %v3293_v4 = vsub.f32 1.0, %v3277_v16  ;;  %v3323_v0 = vsub.f32 0.0, %v3291_v47  ;;  %v21603_v41 = vld [vmem:[#allocation6_spill] sm:$0xff]  ;;  %v21607_v16 = vld [vmem:[#allocation8_spill] sm:$0xff] }
 0x498   :  { %v3337_v32 = vsel %vm3305_vm3, %v3289_v9, %v3321_v30  ;;  %v3351_v60 = vadd.f32 1.0, %v3335_v7  ;;  %v3294_v48 = vsub.f32 1.0, %v3278_v63  ;;  %v3324_v39 = vsub.f32 0.0, %v3292_v62  ;;  %v21608_v63 = vld [vmem:[#allocation7_spill] sm:$0xff] }
 0x499   :  { %v3338_v25 = vsel %vm3306_vm4, %v3290_v57, %v3322_v23  ;;  %v3352_v6 = vadd.f32 1.0, %v3336_v12  ;;  %v3325_v35 = vsub.f32 0.0, %v3293_v4  ;;  %v3339_v34 = vsel %vm3307_vm5, %v3291_v47, %v3323_v0 }
 0x49a   :  { %v3353_v19 = vadd.f32 1.0, %v3337_v32  ;;  %v3354_v17 = vadd.f32 1.0, %v3338_v25  ;;  %v3326_v10 = vsub.f32 0.0, %v3294_v48  ;;  %v3340_v28 = vsel %vm3308_vm6, %v3292_v62, %v3324_v39  ;;  %v21611_v39 = vld [vmem:[#allocation12_spill] sm:$0xff] }
 0x49b   :  { %v3355_v27 = vadd.f32 1.0, %v3339_v34  ;;  %v3367_v46 = vmul.f32 %v3351_v60, %v17653_v21  ;;  %v3341_v58 = vsel %vm3309_vm7, %v3293_v4, %v3325_v35  ;;  %v3356_v11 = vadd.f32 1.0, %v3340_v28  ;;  %v21609_v4 = vld [vmem:[#allocation10_spill] sm:$0xff]  ;;  %v21610_v60 = vld [vmem:[#allocation9_spill] sm:$0xff] }
 0x49c   :  { %v3368_v54 = vmul.f32 %v3352_v6, %v17655_v44  ;;  %v3369_v31 = vmul.f32 %v3353_v19, %v17658_v1  ;;  %v3342_v59 = vsel %vm3310_vm8, %v3294_v48, %v3326_v10  ;;  %v3357_v26 = vadd.f32 1.0, %v3341_v58 }
 0x49d   :  { %v3370_v20 = vmul.f32 %v3354_v17, %v17661_v38  ;;  %v3371_v8 = vmul.f32 %v3355_v27, %v17664_v24  ;;  %3383 = vst [vmem:[#allocation2 + $0x10] sm:$0xff] %v3367_v46  ;;  %v2958_v33 = vmul.f32 0.5, %v17611_v56  ;;  %v3358_v21 = vadd.f32 1.0, %v3342_v59  ;;  %v3431_v27 = vld [vmem:[%s21106_s4] sm:$0xff] }
 0x49e   :  { %v3372_v5 = vmul.f32 %v3356_v11, %v17667_v3  ;;  %3384 = vst [vmem:[#allocation2 + $0x18] sm:$0xff] %v3368_v54  ;;  %3385 = vst [vmem:[#allocation2 + $0x20] sm:$0xff] %v3369_v31  ;;  %v2890_v44 = vsub.f32 %v17471_v50, %v17636_v51  ;;  %v3373_v1 = vmul.f32 %v3357_v26, %v17670_v42  ;;  %v3433_v11 = vld [vmem:[%s21106_s4 + $0x10] sm:$0xff]  ;;  %v3435_v26 = vld [vmem:[%s21106_s4 + $0x20] sm:$0xff] }
 0x49f   :  { %3386 = vst [vmem:[#allocation2 + $0x28] sm:$0xff] %v3370_v20  ;;  %3387 = vst [vmem:[#allocation2 + $0x30] sm:$0xff] %v3371_v8  ;;  %v21602_v43 = vsub.f32 %v17465_v55, %v17636_v51  ;;  %v2902_v56 = vmul.f32 %v17688_v13, %v17688_v13  ;;  %v2908_v24 = vadd.f32 %v17711_v2, %v17704_v61 }
 0x4a0   :  { %v3374_v3 = vmul.f32 %v3358_v21, %v2958_v33  ;;  %3388 = vst [vmem:[#allocation2 + $0x38] sm:$0xff] %v3372_v5  ;;  %v3464_v50 = vmul.f32 %v3367_v46, %v21603_v41  ;;  %v3465_v42 = vmul.f32 %v3368_v54, %v21604_v36  ;;  %3389 = vst [vmem:[#allocation2 + $0x40] sm:$0xff] %v3373_v1  ;;  %v3432_v46 = vld [vmem:[%s21106_s4 + $0x8] sm:$0xff]  ;;  %v3434_v54 = vld [vmem:[%s21106_s4 + $0x18] sm:$0xff] }
 0x4a1   :  { %v17793_v38 = vmul.f32 %v17480_v49, %v21602_v43  ;;  %v2891_v14 = vsub.f32 %v17468_v53, %v17636_v51  ;;  %v21605_v55 = vsub.f32 %v17462_v37, %v17636_v51  ;;  %v2903_v40 = vmul.f32 %v17697_v15, %v17697_v15  ;;  %v21606_v53 = vld [vmem:[#allocation5_spill] sm:$0xff]  ;;  %v3438_v21 = vld [vmem:[%s21106_s4 + $0x38] sm:$0xff] }
 0x4a2   :  { %v2909_v61 = vadd.f32 %v2908_v24, %v2902_v56  ;;  %3390 = vst [vmem:[#allocation2 + $0x48] sm:$0xff] %v3374_v3  ;;  %12256 = vmatmul.mubr.f32.vlgmr.msra.gmra.mrb[0].mxu1 %v3464_v50  ;;  %v17812_v2 = vmul.f32 %v17480_v49, %v2890_v44  ;;  %v3466_v57 = vmul.f32 %v3369_v31, %v21606_v53  ;;  %v3439_v44 = vld [vmem:[%s21106_s4 + $0x40] sm:$0xff]  ;;  %v3441_v56 = vld [vmem:[%s21106_s4 + $0x50] sm:$0xff]  ;;  %v3442_v24 = vld [vmem:[%s21106_s4 + $0x58] sm:$0xff] }
 0x4a3   :  { %v17807_v9 = vmul.f32 %v17480_v49, %v21605_v55  ;;  %v2904_v18 = vmul.f32 %v17793_v38, %v17793_v38  ;;  %12258 = vmatprep.mubr.f32.mxu1 %v3465_v42  ;;  %v17818_v37 = vmul.f32 %v17480_v49, %v2891_v14  ;;  %v3467_v47 = vmul.f32 %v3370_v20, %v21607_v16  ;;  %v3436_v20 = vld [vmem:[%s21106_s4 + $0x28] sm:$0xff]  ;;  %v3443_v42 = vld [vmem:[%s21106_s4 + $0x60] sm:$0xff] }
 0x4a4   :  { %v2910_v45 = vadd.f32 %v2909_v61, %v2903_v40  ;;  %v2906_v30 = vmul.f32 %v17812_v2, %v17812_v2  ;;  %v3468_v62 = vmul.f32 %v3371_v8, %v21608_v63  ;;  %v3469_v0 = vmul.f32 %v3372_v5, %v21609_v4  ;;  %v3437_v8 = vld [vmem:[%s21106_s4 + $0x30] sm:$0xff]  ;;  %v3444_v14 = vld [vmem:[%s21106_s4 + $0x68] sm:$0xff]  ;;  %v3446_v61 = vld [vmem:[%s21106_s4 + $0x78] sm:$0xff] }
 0x4a5   :  { %v2905_v51 = vmul.f32 %v17807_v9, %v17807_v9  ;;  %v2907_v23 = vmul.f32 %v17818_v37, %v17818_v37  ;;  %v3470_v48 = vmul.f32 %v3373_v1, %v21610_v60  ;;  %v3471_v25 = vmul.f32 %v3374_v3, %v21611_v39  ;;  %v3440_v1 = vld [vmem:[%s21106_s4 + $0x48] sm:$0xff]  ;;  %v3445_v40 = vld [vmem:[%s21106_s4 + $0x70] sm:$0xff] }
 0x4a6   :  { %v2911_v29 = vadd.f32 %v2910_v45, %v2904_v18  ;;  %12259 = vmatmul.mubr.f32.gmra.mrb[2].mxu1 %v3466_v57  ;;  %v14055_v58 = vpack.c.bf16 %v3432_v46, %v3431_v27  ;;  %v14059_v31 = vpack.c.bf16 %v3434_v54, %v3433_v11  ;;  %v14063_v33 = vpack.c.bf16 %v3436_v20, %v3435_v26  ;;  %v10185_v45 = vld [vmem:[%s21106_s4 + $0x100] sm:$0xff]  ;;  %v10186_v57 = vld [vmem:[%s21106_s4 + $0x108] sm:$0xff] }
 0x4a7   :  { %12261 = vmatprep.mubr.f32.mxu1 %v3467_v47  ;;  %v14067_v5 = vpack.c.bf16 %v3438_v21, %v3437_v8  ;;  %v14071_v43 = vpack.c.bf16 %v3440_v1, %v3439_v44  ;;  %v14075_v50 = vpack.c.bf16 %v3442_v24, %v3441_v56  ;;  %v14079_v55 = vpack.c.bf16 %v3444_v14, %v3443_v42 }
 0x4a8   :  { %v2912_v7 = vadd.f32 %v2911_v29, %v2905_v51  ;;  %14056 = vmatprep.subr.bf16.mxu1 %v14055_v58  ;;  %v14083_v18 = vpack.c.bf16 %v3446_v61, %v3445_v40  ;;  %v17885_v51 = vpack.c.bf16 %v10186_v57, %v10185_v45 }
 0x4a9   :  { %14058 = vmatpush3.bf16.msra.mxu1 %v14055_v58 }
 0x4aa   :  { %v2913_v12 = vadd.f32 %v2912_v7, %v2906_v30  ;;  %12262 = vmatmul.mubr.f32.gmra.mrb[4].mxu1 %v3468_v62  ;;  %14060 = vmatprep.subr.bf16.mxu1 %v14059_v31  ;;  %v21612_v7 = vld [vmem:[#allocation150_spill] sm:$0xff] }
 0x4ab   :  { %12264 = vmatprep.mubr.f32.mxu1 %v3469_v0 }
 0x4ac   :  { %v2914_v32 = vadd.f32 %v2913_v12, %v2907_v23  ;;  %v21613_v23 = vld [vmem:[#allocation151_spill] sm:$0xff] }
 0x4ad   :  { %14062 = vmatpush3.bf16.msra.mxu1 %v14059_v31 }
 0x4ae   :  { %2915 = vadd.xlane.f32.xlu0 %v2914_v32  ;;  %12265 = vmatmul.mubr.f32.gmra.mrb[6].mxu1 %v3470_v48 }
 0x4af   :  { %12267 = vmatprep.mubr.f32.mxu1 %v3471_v25  ;;  %14064 = vmatprep.subr.bf16.mxu1 %v14063_v33 }
 0x4b1   :  { %14066 = vmatpush3.bf16.msra.mxu1 %v14063_v33 }
 0x4b2   :  { %14068 = vmatprep.subr.bf16.mxu1 %v14067_v5 }
 0x4b5   :  { %14070 = vmatpush3.bf16.msra.mxu1 %v14067_v5 }
 0x4b6   :  { %14072 = vmatprep.subr.bf16.mxu1 %v14071_v43 }
 0x4b9   :  { %14074 = vmatpush3.bf16.msra.mxu1 %v14071_v43 }
 0x4ba   :  { %14076 = vmatprep.subr.bf16.mxu1 %v14075_v50 }
 0x4bd   :  { %14078 = vmatpush3.bf16.msra.mxu1 %v14075_v50 }
 0x4be   :  { %14080 = vmatprep.subr.bf16.mxu1 %v14079_v55 }
 0x4c1   :  { %14082 = vmatpush3.bf16.msra.mxu1 %v14079_v55 }
 0x4c2   :  { %14084 = vmatprep.subr.bf16.mxu1 %v14083_v18 }
 0x4c5   :  { %14086 = vmatpush3.bf16.msra.mxu1 %v14083_v18 }
 0x4c6   :  { %14088 = vmatprep.subr.bf16.mxu1 %v17885_v51 }
 0x53b   :  { %v2916_v6 = vpop.xlane.xlu0 %2915 }
 0x53c   :  { %v2917_v35 = vrot.slane %v2916_v6, 4 }
 0x53e   :  { %v2918_v34 = vadd.f32 %v2917_v35, %v2916_v6 }
 0x540   :  { %v2919_v19 = vrot.slane %v2918_v34, 2 }
 0x542   :  { %v2920_v17 = vadd.f32 %v2919_v19, %v2918_v34  ;;  %v21614_v34 = vld [vmem:[#allocation149_spill] sm:$0xff] }
 0x544   :  { %v2921_v10 = vrot.slane %v2920_v17, 1 }
 0x546   :  { %v2922_v28 = vadd.f32 %v2921_v10, %v2920_v17 }
 0x548   :  { %15407 = vpush %v2922_v28 }
 0x579   :  { %s15408_s3 = spop %15407 }
 0x57a   :  { %s2924_s27 = smul.f32 0.00390625, %s15408_s3 }
 0x57c   :  { %s2925_s28 = sadd.f32 1e-05, %s2924_s27 }
 0x57e   :  { %v2926_v59 = vstv %s2925_s28 }
 0x57f   :  { %15485 = vrsqrt.f32 %v2926_v59 }
 0x589   :  { %v15486_v3 = vpop.eup %15485 }
 0x58a   :  { %15409 = vpush %v15486_v3 }
 0x5bb   :  { %s15410_s16 = spop %15409 }
 0x5bc   :  { %v2929_v29 = vstv %s15410_s16 }
 0x5bd   :  { %v2930_v47 = vmul.f32 %v2929_v29, %v17574_v22 }
 0x5bf   :  { %v2934_v30 = vrot.slane %v2930_v47, %v17576_v52 }
 0x5c1   :  { %v2935_v62 = vmul.f32 %v2934_v30, %v21612_v7  ;;  %v2936_v12 = vmul.f32 %v2934_v30, %v21613_v23  ;;  %v2937_v0 = vmul.f32 %v2934_v30, %v17688_v13  ;;  %v2938_v32 = vmul.f32 %v2934_v30, %v17697_v15 }
 0x5c2   :  { %v2939_v48 = vmul.f32 %v2934_v30, %v17793_v38  ;;  %v2940_v25 = vmul.f32 %v2934_v30, %v17807_v9  ;;  %v2941_v6 = vmul.f32 %v2934_v30, %v17812_v2  ;;  %v2942_v35 = vmul.f32 %v2934_v30, %v17818_v37 }
 0x5c3   :  { %v17899_v22 = vadd.f32 %v21614_v34, %v2935_v62  ;;  %v17902_v19 = vadd.f32 %v21614_v34, %v2936_v12  ;;  %v17905_v17 = vadd.f32 %v21614_v34, %v2937_v0  ;;  %v17908_v13 = vadd.f32 %v21614_v34, %v2938_v32 }
 0x5c4   :  { %v17911_v15 = vadd.f32 %v21614_v34, %v2939_v48  ;;  %v17914_v38 = vadd.f32 %v21614_v34, %v2940_v25  ;;  %v17917_v9 = vadd.f32 %v21614_v34, %v2941_v6  ;;  %v17920_v2 = vadd.f32 %v21614_v34, %v2942_v35 }
 0x5c5   :  { %v17923_v37 = vmul.f32 0.70710677, %v17899_v22  ;;  %v17926_v10 = vmul.f32 0.70710677, %v17902_v19  ;;  %v17929_v28 = vmul.f32 0.70710677, %v17905_v17 }
 0x5c6   :  { %v17932_v27 = vmul.f32 0.70710677, %v17908_v13  ;;  %v17935_v46 = vmul.f32 0.70710677, %v17911_v15  ;;  %v17938_v58 = vmul.f32 0.70710677, %v17914_v38 }
 0x5c7   :  { %v17941_v11 = vmul.f32 0.70710677, %v17917_v9  ;;  %v17944_v54 = vmul.f32 0.70710677, %v17920_v2  ;;  %v2991_v31 = vand.u32 2147483647, %v17923_v37 }
 0x5c8   :  { %v2992_v59 = vand.u32 2147483647, %v17926_v10  ;;  %v2993_v26 = vand.u32 2147483647, %v17929_v28  ;;  %v2994_v20 = vand.u32 2147483647, %v17932_v27 }
 0x5c9   :  { %v2995_v8 = vand.u32 2147483647, %v17935_v46  ;;  %v2996_v33 = vand.u32 2147483647, %v17938_v58  ;;  %v2997_v21 = vand.u32 2147483647, %v17941_v11 }
 0x5ca   :  { %v2998_v5 = vand.u32 2147483647, %v17944_v54  ;;  %v3007_v44 = vmul.f32 0.3275911, %v2991_v31  ;;  %v3008_v1 = vmul.f32 0.3275911, %v2992_v59 }
 0x5cb   :  { %v3009_v43 = vmul.f32 0.3275911, %v2993_v26  ;;  %v3010_v56 = vmul.f32 0.3275911, %v2994_v20  ;;  %v3011_v24 = vmul.f32 0.3275911, %v2995_v8 }
 0x5cc   :  { %v3012_v3 = vmul.f32 0.3275911, %v2996_v33  ;;  %v3013_v50 = vmul.f32 0.3275911, %v2997_v21  ;;  %v3014_v42 = vmul.f32 0.3275911, %v2998_v5 }
 0x5cd   :  { %v3023_v14 = vadd.f32 1.0, %v3007_v44  ;;  %v3024_v55 = vadd.f32 1.0, %v3008_v1  ;;  %v3025_v40 = vadd.f32 1.0, %v3009_v43  ;;  %v3026_v61 = vadd.f32 1.0, %v3010_v56 }
 0x5ce   :  { %v3027_v18 = vadd.f32 1.0, %v3011_v24  ;;  %v3028_v45 = vadd.f32 1.0, %v3012_v3  ;;  %v3215_v57 = vsub.f32 0.0, %v2991_v31  ;;  %v3216_v29 = vsub.f32 0.0, %v2992_v59 }
 0x5cf   :  { %15487 = vrcp.f32 %v3023_v14  ;;  %v3217_v47 = vsub.f32 0.0, %v2993_v26  ;;  %v3029_v30 = vadd.f32 1.0, %v3013_v50  ;;  %v3218_v7 = vsub.f32 0.0, %v2994_v20 }
 0x5d0   :  { %15489 = vrcp.f32 %v3024_v55  ;;  %v3219_v62 = vsub.f32 0.0, %v2995_v8  ;;  %v3030_v23 = vadd.f32 1.0, %v3014_v42  ;;  %v3220_v12 = vsub.f32 0.0, %v2996_v33 }
 0x5d1   :  { %15491 = vrcp.f32 %v3025_v40  ;;  %v3231_v0 = vmul.f32 %v3215_v57, %v2991_v31  ;;  %v3221_v32 = vsub.f32 0.0, %v2997_v21  ;;  %v3232_v48 = vmul.f32 %v3216_v29, %v2992_v59 }
 0x5d2   :  { %15493 = vrcp.f32 %v3026_v61  ;;  %v3233_v25 = vmul.f32 %v3217_v47, %v2993_v26  ;;  %v3222_v6 = vsub.f32 0.0, %v2998_v5  ;;  %v3234_v35 = vmul.f32 %v3218_v7, %v2994_v20 }
 0x5d3   :  { %15495 = vrcp.f32 %v3027_v18  ;;  %v3235_v34 = vmul.f32 %v3219_v62, %v2995_v8  ;;  %v3255_v44 = vmul.f32 1.442695, %v3231_v0  ;;  %v3236_v1 = vmul.f32 %v3220_v12, %v2996_v33 }
 0x5d4   :  { %15497 = vrcp.f32 %v3028_v45  ;;  %v3257_v43 = vmul.f32 1.442695, %v3232_v48  ;;  %v3237_v56 = vmul.f32 %v3221_v32, %v2997_v21  ;;  %v3259_v24 = vmul.f32 1.442695, %v3233_v25 }
 0x5d5   :  { %15499 = vrcp.f32 %v3029_v30  ;;  %v3238_v3 = vmul.f32 %v3222_v6, %v2998_v5  ;;  %v3261_v50 = vmul.f32 1.442695, %v3234_v35  ;;  %v17955_v31 = vmul.f32 0.5, %v17899_v22 }
 0x5d6   :  { %15501 = vrcp.f32 %v3030_v23  ;;  %v17958_v59 = vmul.f32 0.5, %v17902_v19  ;;  %v3263_v26 = vmul.f32 1.442695, %v3235_v34  ;;  %v17963_v8 = vmul.f32 0.5, %v17905_v17 }
 0x5d7   :  { %15503 = vpow2.f32 %v3255_v44  ;;  %v17966_v33 = vmul.f32 0.5, %v17908_v13  ;;  %v3265_v21 = vmul.f32 1.442695, %v3236_v1  ;;  %v17971_v22 = vmul.f32 0.5, %v17911_v15 }
 0x5d8   :  { %15505 = vpow2.f32 %v3257_v43  ;;  %v3267_v42 = vmul.f32 1.442695, %v3237_v56  ;;  %v17977_v55 = vmul.f32 0.5, %v17914_v38  ;;  %v3269_v13 = vmul.f32 1.442695, %v3238_v3 }
 0x5d9   :  { %v17960_v20 = vpop.eup %15487  ;;  %15507 = vpow2.f32 %v3259_v24  ;;  %v17983_v61 = vmul.f32 0.5, %v17917_v9  ;;  %v17989_v57 = vmul.f32 0.5, %v17920_v2  ;;  %vm3311_vm9 = vcmp.ge.f32.partialorder %v17923_v37, 0.0 }
 0x5da   :  { %v17968_v5 = vpop.eup %15489  ;;  %v3071_v19 = vmul.f32 1.0614054, %v17960_v20  ;;  %15509 = vpow2.f32 %v3261_v50  ;;  %vm3312_vm10 = vcmp.ge.f32.partialorder %v17926_v10, 0.0  ;;  %vm3313_vm11 = vcmp.ge.f32.partialorder %v17929_v28, 0.0 }
 0x5db   :  { %v17974_v14 = vpop.eup %15491  ;;  %v3072_v17 = vmul.f32 1.0614054, %v17968_v5  ;;  %15511 = vpow2.f32 %v3263_v26  ;;  %vm3314_vm12 = vcmp.ge.f32.partialorder %v17932_v27, 0.0  ;;  %vm3315_vm13 = vcmp.ge.f32.partialorder %v17935_v46, 0.0 }
 0x5dc   :  { %v17980_v40 = vpop.eup %15493  ;;  %v3073_v15 = vmul.f32 1.0614054, %v17974_v14  ;;  %v3087_v18 = vadd.f32 -1.4531521, %v3071_v19  ;;  %15513 = vpow2.f32 %v3265_v21  ;;  %vm3316_vm14 = vcmp.ge.f32.partialorder %v17938_v58, 0.0 }
 0x5dd   :  { %v17986_v45 = vpop.eup %15495  ;;  %v3074_v38 = vmul.f32 1.0614054, %v17980_v40  ;;  %v3088_v29 = vadd.f32 -1.4531521, %v3072_v17  ;;  %15515 = vpow2.f32 %v3267_v42  ;;  %vm3317_vm15 = vcmp.ge.f32.partialorder %v17941_v11, 0.0 }
 0x5de   :  { %v17992_v47 = vpop.eup %15497  ;;  %v3075_v30 = vmul.f32 1.0614054, %v17986_v45  ;;  %v3089_v7 = vadd.f32 -1.4531521, %v3073_v15  ;;  %v3103_v9 = vmul.f32 %v17960_v20, %v3087_v18  ;;  %15517 = vpow2.f32 %v3269_v13 }
 0x5df   :  { %v17996_v62 = vpop.eup %15499  ;;  %v3076_v23 = vmul.f32 1.0614054, %v17992_v47  ;;  %v3090_v12 = vadd.f32 -1.4531521, %v3074_v38  ;;  %v3104_v2 = vmul.f32 %v17968_v5, %v3088_v29  ;;  %vm3318_vm0 = vcmp.ge.f32.partialorder %v17944_v54, 0.0 }
 0x5e0   :  { %v18000_v0 = vpop.eup %15501  ;;  %v3077_v32 = vmul.f32 1.0614054, %v17996_v62  ;;  %v3091_v48 = vadd.f32 -1.4531521, %v3075_v30  ;;  %v3105_v25 = vmul.f32 %v17974_v14, %v3089_v7  ;;  %v3119_v6 = vadd.f32 1.4214138, %v3103_v9 }
 0x5e1   :  { %v3078_v35 = vmul.f32 1.0614054, %v18000_v0  ;;  %v3092_v34 = vadd.f32 -1.4531521, %v3076_v23  ;;  %v3106_v44 = vmul.f32 %v17980_v40, %v3090_v12  ;;  %v3120_v1 = vadd.f32 1.4214138, %v3104_v2  ;;  %v15504_v43 = vpop.eup %15503 }
 0x5e2   :  { %v3093_v56 = vadd.f32 -1.4531521, %v3077_v32  ;;  %v3107_v24 = vmul.f32 %v17986_v45, %v3091_v48  ;;  %v3121_v3 = vadd.f32 1.4214138, %v3105_v25  ;;  %v3135_v50 = vmul.f32 %v17960_v20, %v3119_v6  ;;  %v15506_v26 = vpop.eup %15505 }
 0x5e3   :  { %v3094_v21 = vadd.f32 -1.4531521, %v3078_v35  ;;  %v3108_v19 = vmul.f32 %v17992_v47, %v3092_v34  ;;  %v3122_v42 = vadd.f32 1.4214138, %v3106_v44  ;;  %v3136_v17 = vmul.f32 %v17968_v5, %v3120_v1  ;;  %v15508_v13 = vpop.eup %15507 }
 0x5e4   :  { %v3109_v15 = vmul.f32 %v17996_v62, %v3093_v56  ;;  %v3123_v18 = vadd.f32 1.4214138, %v3107_v24  ;;  %v3137_v38 = vmul.f32 %v17974_v14, %v3121_v3  ;;  %v3151_v29 = vadd.f32 -0.28449672, %v3135_v50  ;;  %v15510_v30 = vpop.eup %15509 }
 0x5e5   :  { %v3110_v7 = vmul.f32 %v18000_v0, %v3094_v21  ;;  %v3124_v9 = vadd.f32 1.4214138, %v3108_v19  ;;  %v3138_v23 = vmul.f32 %v17980_v40, %v3122_v42  ;;  %v3152_v12 = vadd.f32 -0.28449672, %v3136_v17  ;;  %v15512_v2 = vpop.eup %15511 }
 0x5e6   :  { %v3125_v32 = vadd.f32 1.4214138, %v3109_v15  ;;  %v3139_v48 = vmul.f32 %v17986_v45, %v3123_v18  ;;  %v3153_v25 = vadd.f32 -0.28449672, %v3137_v38  ;;  %v3167_v6 = vmul.f32 %v17960_v20, %v3151_v29  ;;  %v15514_v35 = vpop.eup %15513 }
 0x5e7   :  { %v3126_v34 = vadd.f32 1.4214138, %v3110_v7  ;;  %v3140_v44 = vmul.f32 %v17992_v47, %v3124_v9  ;;  %v3154_v1 = vadd.f32 -0.28449672, %v3138_v23  ;;  %v3168_v56 = vmul.f32 %v17968_v5, %v3152_v12  ;;  %v15516_v24 = vpop.eup %15515 }
 0x5e8   :  { %v3141_v3 = vmul.f32 %v17996_v62, %v3125_v32  ;;  %v3155_v50 = vadd.f32 -0.28449672, %v3139_v48  ;;  %v3169_v21 = vmul.f32 %v17974_v14, %v3153_v25  ;;  %v3183_v19 = vadd.f32 0.2548296, %v3167_v6  ;;  %v15518_v42 = vpop.eup %15517 }
 0x5e9   :  { %v3142_v17 = vmul.f32 %v18000_v0, %v3126_v34  ;;  %v3156_v15 = vadd.f32 -0.28449672, %v3140_v44  ;;  %v3170_v18 = vmul.f32 %v17980_v40, %v3154_v1  ;;  %v3184_v38 = vadd.f32 0.2548296, %v3168_v56 }
 0x5ea   :  { %v3157_v29 = vadd.f32 -0.28449672, %v3141_v3  ;;  %v3171_v7 = vmul.f32 %v17986_v45, %v3155_v50  ;;  %v3185_v9 = vadd.f32 0.2548296, %v3169_v21  ;;  %v3199_v23 = vmul.f32 %v17960_v20, %v3183_v19 }
 0x5eb   :  { %v3158_v12 = vadd.f32 -0.28449672, %v3142_v17  ;;  %v3172_v32 = vmul.f32 %v17992_v47, %v3156_v15  ;;  %v3186_v48 = vadd.f32 0.2548296, %v3170_v18  ;;  %v3200_v25 = vmul.f32 %v17968_v5, %v3184_v38 }
 0x5ec   :  { %v3173_v6 = vmul.f32 %v17996_v62, %v3157_v29  ;;  %v3187_v34 = vadd.f32 0.2548296, %v3171_v7  ;;  %v3201_v44 = vmul.f32 %v17974_v14, %v3185_v9  ;;  %v3279_v1 = vmul.f32 %v15504_v43, %v3199_v23 }
 0x5ed   :  { %v3174_v20 = vmul.f32 %v18000_v0, %v3158_v12  ;;  %v3188_v56 = vadd.f32 0.2548296, %v3172_v32  ;;  %v3202_v3 = vmul.f32 %v17980_v40, %v3186_v48  ;;  %v3280_v50 = vmul.f32 %v15506_v26, %v3200_v25 }
 0x5ee   :  { %v3189_v21 = vadd.f32 0.2548296, %v3173_v6  ;;  %v3203_v5 = vmul.f32 %v17986_v45, %v3187_v34  ;;  %v3281_v19 = vmul.f32 %v15508_v13, %v3201_v44  ;;  %v3295_v17 = vsub.f32 1.0, %v3279_v1 }
 0x5ef   :  { %v3190_v15 = vadd.f32 0.2548296, %v3174_v20  ;;  %v3204_v14 = vmul.f32 %v17992_v47, %v3188_v56  ;;  %v3282_v43 = vmul.f32 %v15510_v30, %v3202_v3  ;;  %v3296_v18 = vsub.f32 1.0, %v3280_v50 }
 0x5f0   :  { %v3205_v38 = vmul.f32 %v17996_v62, %v3189_v21  ;;  %v3283_v40 = vmul.f32 %v15512_v2, %v3203_v5  ;;  %v3297_v26 = vsub.f32 1.0, %v3281_v19  ;;  %v3327_v29 = vsub.f32 0.0, %v3295_v17 }
 0x5f1   :  { %v3206_v45 = vmul.f32 %v18000_v0, %v3190_v15  ;;  %v3284_v13 = vmul.f32 %v15514_v35, %v3204_v14  ;;  %v3298_v7 = vsub.f32 1.0, %v3282_v43  ;;  %v3328_v9 = vsub.f32 0.0, %v3296_v18 }
 0x5f2   :  { %v3285_v23 = vmul.f32 %v15516_v24, %v3205_v38  ;;  %v3299_v12 = vsub.f32 1.0, %v3283_v40  ;;  %v3329_v32 = vsub.f32 0.0, %v3297_v26  ;;  %v3343_v47 = vsel %vm3311_vm9, %v3295_v17, %v3327_v29  ;;  %v21619_v38 = vld [vmem:[#allocation15_spill] sm:$0xff]  ;;  %v21620_v40 = vld [vmem:[#allocation18_spill] sm:$0xff] }
 0x5f3   :  { %v3286_v30 = vmul.f32 %v15518_v42, %v3206_v45  ;;  %v3300_v48 = vsub.f32 1.0, %v3284_v13  ;;  %v3330_v25 = vsub.f32 0.0, %v3298_v7  ;;  %v3344_v62 = vsel %vm3312_vm10, %v3296_v18, %v3328_v9  ;;  %v3399_v29 = vld [vmem:[#allocation2 + $0x7] sm:$0xff]  ;;  %v21621_v45 = vld [vmem:[#allocation17_spill] sm:$0xff] }
 0x5f4   :  { %v3301_v2 = vsub.f32 1.0, %v3285_v23  ;;  %v3331_v6 = vsub.f32 0.0, %v3299_v12  ;;  %v3345_v0 = vsel %vm3313_vm11, %v3297_v26, %v3329_v32  ;;  %v3359_v35 = vadd.f32 1.0, %v3343_v47  ;;  %v18105_v23 = vld [vmem:[#allocation2 + $0xf] sm:$0xff]  ;;  %v10188_v32 = vld [vmem:[%s21106_s4 + $0x118] sm:$0xff] }
 0x5f5   :  { %v3302_v34 = vsub.f32 1.0, %v3286_v30  ;;  %v3332_v44 = vsub.f32 0.0, %v3300_v48  ;;  %v3346_v24 = vsel %vm3314_vm12, %v3298_v7, %v3330_v25  ;;  %v3360_v1 = vadd.f32 1.0, %v3344_v62  ;;  %v21622_v7 = vld [vmem:[#allocation20_spill] sm:$0xff]  ;;  %v18113_v47 = vld [vmem:[#allocation2 + $0x17] sm:$0xff]  ;;  %v21623_v30 = vld [vmem:[#allocation19_spill] sm:$0xff] }
 0x5f6   :  { %v3333_v37 = vsub.f32 0.0, %v3301_v2  ;;  %v3347_v42 = vsel %vm3315_vm13, %v3299_v12, %v3331_v6  ;;  %v3361_v20 = vadd.f32 1.0, %v3345_v0  ;;  %v3362_v56 = vadd.f32 1.0, %v3346_v24  ;;  %v10187_v12 = vld [vmem:[%s21106_s4 + $0x110] sm:$0xff]  ;;  %v21624_v62 = vld [vmem:[#allocation22_spill] sm:$0xff]  ;;  %v10189_v0 = vld [vmem:[%s21106_s4 + $0x120] sm:$0xff] }
 0x5f7   :  { %v3334_v10 = vsub.f32 0.0, %v3302_v34  ;;  %v3348_v3 = vsel %vm3316_vm14, %v3300_v48, %v3332_v44  ;;  %v3363_v50 = vadd.f32 1.0, %v3347_v42  ;;  %v18055_v28 = vmul.f32 %v3359_v35, %v17955_v31  ;;  %v18119_v6 = vld [vmem:[#allocation2 + $0x1f] sm:$0xff]  ;;  %v10190_v35 = vld [vmem:[%s21106_s4 + $0x128] sm:$0xff]  ;;  %v21625_v44 = vld [vmem:[#allocation21_spill] sm:$0xff] }
 0x5f8   :  { %v3349_v21 = vsel %vm3317_vm15, %v3301_v2, %v3333_v37  ;;  %v3364_v27 = vadd.f32 1.0, %v3348_v3  ;;  %v18060_v5 = vmul.f32 %v3360_v1, %v17958_v59  ;;  %v18063_v46 = vmul.f32 %v3361_v20, %v17963_v8  ;;  %v21615_v59 = vld [vmem:[#allocation11_spill] sm:$0xff]  ;;  %v21616_v8 = vld [vmem:[#allocation14_spill] sm:$0xff]  ;;  %v21626_v37 = vld [vmem:[#allocation24_spill] sm:$0xff] }
 0x5f9   :  { %v3350_v19 = vsel %vm3318_vm0, %v3302_v34, %v3334_v10  ;;  %v3365_v17 = vadd.f32 1.0, %v3349_v21  ;;  %v18068_v58 = vmul.f32 %v3362_v56, %v17966_v33  ;;  %v18071_v31 = vmul.f32 %v3363_v50, %v17971_v22  ;;  %3391 = vst [vmem:[#allocation2 + $0x50] sm:$0xff] %v18055_v28  ;;  %v18127_v34 = vld [vmem:[#allocation2 + $0x27] sm:$0xff]  ;;  %v18134_v20 = vld [vmem:[#allocation2 + $0x2f] sm:$0xff]  ;;  %v10192_v10 = vld [vmem:[%s21106_s4 + $0x138] sm:$0xff] }
 0x5fa   :  { %v3366_v11 = vadd.f32 1.0, %v3350_v19  ;;  %v18075_v15 = vmul.f32 %v3364_v27, %v17977_v55  ;;  %3392 = vst [vmem:[#allocation2 + $0x58] sm:$0xff] %v18060_v5  ;;  %3393 = vst [vmem:[#allocation2 + $0x60] sm:$0xff] %v18063_v46  ;;  %v3472_v54 = vmul.f32 %v18055_v28, %v21615_v59  ;;  %v3473_v33 = vmul.f32 %v18060_v5, %v21616_v8  ;;  %v21617_v55 = vld [vmem:[#allocation13_spill] sm:$0xff]  ;;  %v21627_v3 = vld [vmem:[#allocation23_spill] sm:$0xff] }
 0x5fb   :  { %v18084_v14 = vmul.f32 %v3365_v17, %v17983_v61  ;;  %3394 = vst [vmem:[#allocation2 + $0x68] sm:$0xff] %v18068_v58  ;;  %3395 = vst [vmem:[#allocation2 + $0x70] sm:$0xff] %v18071_v31  ;;  %v3474_v43 = vmul.f32 %v18063_v46, %v21617_v55  ;;  %v21618_v61 = vld [vmem:[#allocation16_spill] sm:$0xff]  ;;  %v3415_v9 = vmul.f32 %v3399_v29, %v21622_v7  ;;  %v10191_v56 = vld [vmem:[%s21106_s4 + $0x130] sm:$0xff] }
 0x5fc   :  { %v18089_v22 = vmul.f32 %v3366_v11, %v17989_v57  ;;  %3396 = vst [vmem:[#allocation2 + $0x78] sm:$0xff] %v18075_v15  ;;  %12268 = vmatmul.mubr.f32.gmra.mrb[8].mxu1 %v3472_v54  ;;  %v3475_v18 = vmul.f32 %v18068_v58, %v21618_v61  ;;  %v3476_v57 = vmul.f32 %v18071_v31, %v21619_v38  ;;  %v21628_v27 = vld [vmem:[#allocation26_spill] sm:$0xff]  ;;  %v10193_v11 = vld [vmem:[%s21106_s4 + $0x140] sm:$0xff]  ;;  %v10194_v54 = vld [vmem:[%s21106_s4 + $0x148] sm:$0xff] }
 0x5fd   :  { %3397 = vst [vmem:[#allocation2 + $0x80] sm:$0xff] %v18084_v14  ;;  %12270 = vmatprep.mubr.f32.mxu1 %v3473_v33  ;;  %v3477_v26 = vmul.f32 %v18075_v15, %v21620_v40  ;;  %v3478_v13 = vmul.f32 %v18084_v14, %v21621_v45  ;;  %v3416_v48 = vmul.f32 %v18105_v23, %v21623_v30  ;;  %v18148_v17 = vld [vmem:[#allocation2 + $0x3f] sm:$0xff]  ;;  %v18156_v33 = vld [vmem:[#allocation2 + $0x47] sm:$0xff]  ;;  %v10215_v45 = vld [vmem:[%s21106_s4 + $0x1f0] sm:$0xff] }
 0x5fe   :  { %3398 = vst [vmem:[#allocation2 + $0x88] sm:$0xff] %v18089_v22  ;;  %v14091_v25 = vpack.c.bf16 %v10188_v32, %v10187_v12  ;;  %v3417_v2 = vmul.f32 %v18113_v47, %v21624_v62  ;;  %v3418_v24 = vmul.f32 %v18119_v6, %v21625_v44  ;;  %v14095_v1 = vpack.c.bf16 %v10190_v35, %v10189_v0  ;;  %v10196_v12 = vld [vmem:[%s21106_s4 + $0x158] sm:$0xff]  ;;  %v10211_v44 = vld [vmem:[%s21106_s4 + $0x1d0] sm:$0xff]  ;;  %v10213_v30 = vld [vmem:[%s21106_s4 + $0x1e0] sm:$0xff] }
 0x5ff   :  { %v3419_v42 = vmul.f32 %v18127_v34, %v21626_v37  ;;  %v3420_v50 = vmul.f32 %v18134_v20, %v21627_v3  ;;  %v14099_v21 = vpack.c.bf16 %v10192_v10, %v10191_v56  ;;  %v21632_v0 = vld [vmem:[#allocation30_spill] sm:$0xff]  ;;  %v21633_v10 = vld [vmem:[#allocation29_spill] sm:$0xff]  ;;  %v10209_v3 = vld [vmem:[%s21106_s4 + $0x1c0] sm:$0xff] }
 0x600   :  { %12271 = vmatmul.mubr.f32.gmra.mrb[10].mxu1 %v3474_v43  ;;  %v21629_v43 = vld [vmem:[#allocation25_spill] sm:$0xff]  ;;  %v10217_v38 = vld [vmem:[%s21106_s4 + $0x200] sm:$0xff]  ;;  %v10220_v61 = vld [vmem:[%s21106_s4 + $0x218] sm:$0xff] }
 0x601   :  { %12273 = vmatprep.mubr.f32.mxu1 %v3475_v18  ;;  %v3422_v18 = vmul.f32 %v18148_v17, %v21629_v43  ;;  %v18170_v32 = vld [vmem:[#allocation2 + $0x57] sm:$0xff] }
 0x602   :  { %v3425_v35 = vmul.f32 %v18170_v32, %v21632_v0  ;;  %v18184_v56 = vld [vmem:[#allocation2 + $0x67] sm:$0xff]  ;;  %v10203_v0 = vld [vmem:[%s21106_s4 + $0x190] sm:$0xff] }
 0x603   :  { %v10207_v43 = vld [vmem:[%s21106_s4 + $0x1b0] sm:$0xff]  ;;  %v18285_v62 = vld [vmem:[#allocation2 + $0x61] sm:$0xff] }
 0x604   :  { %12274 = vmatmul.mubr.f32.gmra.mrb[12].mxu1 %v3476_v57  ;;  %v14103_v57 = vpack.c.bf16 %v10194_v54, %v10193_v11  ;;  %v18190_v54 = vld [vmem:[#allocation2 + $0x6f] sm:$0xff] }
 0x605   :  { %12276 = vmatprep.mubr.f32.mxu1 %v3477_v26  ;;  %v21630_v26 = vld [vmem:[#allocation28_spill] sm:$0xff]  ;;  %v18271_v37 = vld [vmem:[#allocation2 + $0x51] sm:$0xff] }
 0x606   :  { %v3423_v29 = vmul.f32 %v18156_v33, %v21630_v26  ;;  %v18243_v26 = vld [vmem:[#allocation2 + $0x31] sm:$0xff]  ;;  %v18313_v40 = vld [vmem:[#allocation2 + $0x81] sm:$0xff] }
 0x607   :  { %v18299_v7 = vld [vmem:[#allocation2 + $0x71] sm:$0xff] }
 0x608   :  { %12277 = vmatmul.mubr.f32.gmra.mrb[14].mxu1 %v3478_v13  ;;  %v18162_v13 = vld [vmem:[#allocation2 + $0x4f] sm:$0xff] }
 0x609   :  { %12311 = vmatprep.mubr.f32.mxu1 %v3415_v9  ;;  %v10195_v9 = vld [vmem:[%s21106_s4 + $0x150] sm:$0xff] }
 0x60c   :  { %12312 = vmatmul.mubr.f32.vlgmr.msra.gmra.mrb[0].mxu1 %v3416_v48  ;;  %v21631_v48 = vld [vmem:[#allocation27_spill] sm:$0xff] }
 0x60d   :  { %14090 = vmatpush3.bf16.msra.mxu1 %v17885_v51  ;;  %12314 = vmatprep.mubr.f32.mxu1 %v3417_v2  ;;  %v18142_v51 = vld [vmem:[#allocation2 + $0x37] sm:$0xff]  ;;  %v14107_v2 = vpack.c.bf16 %v10196_v12, %v10195_v9  ;;  %v21635_v9 = vld [vmem:[#allocation31_spill] sm:$0xff] }
 0x60e   :  { %14092 = vmatprep.subr.bf16.mxu1 %v14091_v25  ;;  %v3421_v19 = vmul.f32 %v18142_v51, %v21628_v27  ;;  %v3428_v12 = vmul.f32 %v18190_v54, %v21635_v9  ;;  %v18257_v27 = vld [vmem:[#allocation2 + $0x41] sm:$0xff] }
 0x610   :  { %12315 = vmatmul.mubr.f32.gmra.mrb[2].mxu1 %v3418_v24  ;;  %v18176_v24 = vld [vmem:[#allocation2 + $0x5f] sm:$0xff] }
 0x611   :  { %14094 = vmatpush3.bf16.msra.mxu1 %v14091_v25  ;;  %12317 = vmatprep.mubr.f32.mxu1 %v3419_v42  ;;  %v3424_v25 = vmul.f32 %v18162_v13, %v21631_v48  ;;  %v10198_v42 = vld [vmem:[%s21106_s4 + $0x168] sm:$0xff]  ;;  %v10205_v48 = vld [vmem:[%s21106_s4 + $0x1a0] sm:$0xff] }
 0x612   :  { %14096 = vmatprep.subr.bf16.mxu1 %v14095_v1 }
 0x614   :  { %12318 = vmatmul.mubr.f32.gmra.mrb[4].mxu1 %v3420_v50  ;;  %v3426_v50 = vmul.f32 %v18176_v24, %v21633_v10  ;;  %v18215_v10 = vld [vmem:[#allocation2 + $0x11] sm:$0xff] }
 0x615   :  { %14098 = vmatpush3.bf16.msra.mxu1 %v14095_v1  ;;  %12320 = vmatprep.mubr.f32.mxu1 %v3421_v19  ;;  %v10197_v1 = vld [vmem:[%s21106_s4 + $0x160] sm:$0xff]  ;;  %v21634_v19 = vld [vmem:[#allocation32_spill] sm:$0xff] }
 0x616   :  { %14100 = vmatprep.subr.bf16.mxu1 %v14099_v21  ;;  %v3427_v11 = vmul.f32 %v18184_v56, %v21634_v19  ;;  %v10201_v19 = vld [vmem:[%s21106_s4 + $0x180] sm:$0xff] }
 0x618   :  { %12321 = vmatmul.mubr.f32.gmra.mrb[6].mxu1 %v3422_v18  ;;  %v10199_v18 = vld [vmem:[%s21106_s4 + $0x170] sm:$0xff] }
 0x619   :  { %14102 = vmatpush3.bf16.msra.mxu1 %v14099_v21  ;;  %12323 = vmatprep.mubr.f32.mxu1 %v3423_v29  ;;  %v14111_v21 = vpack.c.bf16 %v10198_v42, %v10197_v1  ;;  %v10200_v29 = vld [vmem:[%s21106_s4 + $0x178] sm:$0xff] }
 0x61a   :  { %14104 = vmatprep.subr.bf16.mxu1 %v14103_v57  ;;  %v18204_v42 = vld [vmem:[#allocation2 + $0x7f] sm:$0xff] }
 0x61c   :  { %12324 = vmatmul.mubr.f32.gmra.mrb[8].mxu1 %v3424_v25  ;;  %v14115_v25 = vpack.c.bf16 %v10200_v29, %v10199_v18 }
 0x61d   :  { %14106 = vmatpush3.bf16.msra.mxu1 %v14103_v57  ;;  %12326 = vmatprep.mubr.f32.mxu1 %v3425_v35  ;;  %v18198_v57 = vld [vmem:[#allocation2 + $0x77] sm:$0xff] }
 0x61e   :  { %14108 = vmatprep.subr.bf16.mxu1 %v14107_v2  ;;  %v21636_v35 = vld [vmem:[#allocation34_spill] sm:$0xff] }
 0x61f   :  { %v3429_v1 = vmul.f32 %v18198_v57, %v21636_v35  ;;  %v21638_v35 = vld [vmem:[#allocation36_spill] sm:$0xff] }
 0x620   :  { %12327 = vmatmul.mubr.f32.gmra.mrb[10].mxu1 %v3426_v50  ;;  %v10202_v50 = vld [vmem:[%s21106_s4 + $0x188] sm:$0xff] }
 0x621   :  { %14110 = vmatpush3.bf16.msra.mxu1 %v14107_v2  ;;  %12329 = vmatprep.mubr.f32.mxu1 %v3427_v11  ;;  %v3786_v2 = vld [vmem:[#allocation2 + $0x9] sm:$0xff]  ;;  %v14119_v29 = vpack.c.bf16 %v10202_v50, %v10201_v19 }
 0x622   :  { %14112 = vmatprep.subr.bf16.mxu1 %v14111_v21  ;;  %v21637_v11 = vld [vmem:[#allocation33_spill] sm:$0xff]  ;;  %v3802_v9 = vmul.f32 %v3786_v2, %v21638_v35  ;;  %v21640_v2 = vld [vmem:[#allocation38_spill] sm:$0xff] }
 0x623   :  { %v3430_v18 = vmul.f32 %v18204_v42, %v21637_v11  ;;  %v18229_v11 = vld [vmem:[#allocation2 + $0x21] sm:$0xff] }
 0x624   :  { %12330 = vmatmul.mubr.f32.gmra.mrb[12].mxu1 %v3428_v12  ;;  %v10204_v12 = vld [vmem:[%s21106_s4 + $0x198] sm:$0xff] }
 0x625   :  { %14114 = vmatpush3.bf16.msra.mxu1 %v14111_v21  ;;  %12332 = vmatprep.mubr.f32.mxu1 %v3429_v1  ;;  %v18223_v21 = vld [vmem:[#allocation2 + $0x19] sm:$0xff]  ;;  %v14123_v50 = vpack.c.bf16 %v10204_v12, %v10203_v0  ;;  %v21641_v0 = vld [vmem:[#allocation37_spill] sm:$0xff] }
 0x626   :  { %14116 = vmatprep.subr.bf16.mxu1 %v14115_v25  ;;  %v21639_v1 = vld [vmem:[#allocation35_spill] sm:$0xff]  ;;  %v3804_v35 = vmul.f32 %v18223_v21, %v21640_v2  ;;  %v21642_v2 = vld [vmem:[#allocation42_spill] sm:$0xff] }
 0x627   :  { %v3803_v19 = vmul.f32 %v18215_v10, %v21639_v1 }
 0x628   :  { %12333 = vmatmul.mubr.f32.gmra.mrb[14].mxu1 %v3430_v18  ;;  %v10206_v18 = vld [vmem:[%s21106_s4 + $0x1a8] sm:$0xff] }
 0x629   :  { %14118 = vmatpush3.bf16.msra.mxu1 %v14115_v25  ;;  %12367 = vmatprep.mubr.f32.mxu1 %v3802_v9  ;;  %v18237_v9 = vld [vmem:[#allocation2 + $0x29] sm:$0xff]  ;;  %v3805_v25 = vmul.f32 %v18229_v11, %v21641_v0  ;;  %v14127_v12 = vpack.c.bf16 %v10206_v18, %v10205_v48 }
 0x62a   :  { %14120 = vmatprep.subr.bf16.mxu1 %v14119_v29  ;;  %v3806_v1 = vmul.f32 %v18237_v9, %v21642_v2  ;;  %v21643_v48 = vld [vmem:[#allocation41_spill] sm:$0xff]  ;;  %v21644_v2 = vld [vmem:[#allocation46_spill] sm:$0xff] }
 0x62c   :  { %12368 = vmatmul.mubr.f32.vlgmr.msra.gmra.mrb[0].mxu1 %v3803_v19  ;;  %v10208_v19 = vld [vmem:[%s21106_s4 + $0x1b8] sm:$0xff] }
 0x62d   :  { %14122 = vmatpush3.bf16.msra.mxu1 %v14119_v29  ;;  %12370 = vmatprep.mubr.f32.mxu1 %v3804_v35  ;;  %v18251_v35 = vld [vmem:[#allocation2 + $0x39] sm:$0xff]  ;;  %v3807_v29 = vmul.f32 %v18243_v26, %v21643_v48  ;;  %v14131_v18 = vpack.c.bf16 %v10208_v19, %v10207_v43  ;;  %v21645_v43 = vld [vmem:[#allocation45_spill] sm:$0xff] }
 0x62e   :  { %14124 = vmatprep.subr.bf16.mxu1 %v14123_v50  ;;  %v3808_v0 = vmul.f32 %v18251_v35, %v21644_v2  ;;  %v21646_v2 = vld [vmem:[#allocation50_spill] sm:$0xff] }
 0x630   :  { %12371 = vmatmul.mubr.f32.gmra.mrb[2].mxu1 %v3805_v25  ;;  %v10210_v25 = vld [vmem:[%s21106_s4 + $0x1c8] sm:$0xff] }
 0x631   :  { %14126 = vmatpush3.bf16.msra.mxu1 %v14123_v50  ;;  %12373 = vmatprep.mubr.f32.mxu1 %v3806_v1  ;;  %v18265_v1 = vld [vmem:[#allocation2 + $0x49] sm:$0xff]  ;;  %v3809_v50 = vmul.f32 %v18257_v27, %v21645_v43  ;;  %v14135_v19 = vpack.c.bf16 %v10210_v25, %v10209_v3 }
 0x632   :  { %14128 = vmatprep.subr.bf16.mxu1 %v14127_v12  ;;  %v3810_v48 = vmul.f32 %v18265_v1, %v21646_v2  ;;  %v21647_v3 = vld [vmem:[#allocation49_spill] sm:$0xff]  ;;  %v21648_v2 = vld [vmem:[#allocation54_spill] sm:$0xff] }
 0x634   :  { %12374 = vmatmul.mubr.f32.gmra.mrb[4].mxu1 %v3807_v29  ;;  %v10212_v29 = vld [vmem:[%s21106_s4 + $0x1d8] sm:$0xff] }
 0x635   :  { %14130 = vmatpush3.bf16.msra.mxu1 %v14127_v12  ;;  %12376 = vmatprep.mubr.f32.mxu1 %v3808_v0  ;;  %v18279_v0 = vld [vmem:[#allocation2 + $0x59] sm:$0xff]  ;;  %v3811_v12 = vmul.f32 %v18271_v37, %v21647_v3  ;;  %v14139_v25 = vpack.c.bf16 %v10212_v29, %v10211_v44  ;;  %v21649_v44 = vld [vmem:[#allocation53_spill] sm:$0xff] }
 0x636   :  { %14132 = vmatprep.subr.bf16.mxu1 %v14131_v18  ;;  %v3812_v43 = vmul.f32 %v18279_v0, %v21648_v2  ;;  %v21650_v2 = vld [vmem:[#allocation58_spill] sm:$0xff] }
 0x638   :  { %12377 = vmatmul.mubr.f32.gmra.mrb[6].mxu1 %v3809_v50  ;;  %v10214_v50 = vld [vmem:[%s21106_s4 + $0x1e8] sm:$0xff] }
 0x639   :  { %14134 = vmatpush3.bf16.msra.mxu1 %v14131_v18  ;;  %12379 = vmatprep.mubr.f32.mxu1 %v3810_v48  ;;  %v18293_v48 = vld [vmem:[#allocation2 + $0x69] sm:$0xff]  ;;  %v3813_v18 = vmul.f32 %v18285_v62, %v21649_v44  ;;  %v14143_v29 = vpack.c.bf16 %v10214_v50, %v10213_v30 }
 0x63a   :  { %14136 = vmatprep.subr.bf16.mxu1 %v14135_v19  ;;  %v3814_v3 = vmul.f32 %v18293_v48, %v21650_v2  ;;  %v21651_v30 = vld [vmem:[#allocation57_spill] sm:$0xff]  ;;  %v21652_v2 = vld [vmem:[#allocation60_spill] sm:$0xff] }
 0x63c   :  { %12380 = vmatmul.mubr.f32.gmra.mrb[8].mxu1 %v3811_v12  ;;  %v10216_v12 = vld [vmem:[%s21106_s4 + $0x1f8] sm:$0xff] }
 0x63d   :  { %14138 = vmatpush3.bf16.msra.mxu1 %v14135_v19  ;;  %12382 = vmatprep.mubr.f32.mxu1 %v3812_v43  ;;  %v18307_v43 = vld [vmem:[#allocation2 + $0x79] sm:$0xff]  ;;  %v3815_v19 = vmul.f32 %v18299_v7, %v21651_v30  ;;  %v14147_v50 = vpack.c.bf16 %v10216_v12, %v10215_v45  ;;  %v10219_v30 = vld [vmem:[%s21106_s4 + $0x210] sm:$0xff] }
 0x63e   :  { %14140 = vmatprep.subr.bf16.mxu1 %v14139_v25  ;;  %v3816_v44 = vmul.f32 %v18307_v43, %v21652_v2  ;;  %v21654_v12 = vld [vmem:[#allocation62_spill] sm:$0xff] }
 0x63f   :  { %v4012_v2 = vmul.f32 %v18105_v23, %v21654_v12  ;;  %v10221_v23 = vld [vmem:[%s21106_s4 + $0x220] sm:$0xff]  ;;  %v10222_v12 = vld [vmem:[%s21106_s4 + $0x228] sm:$0xff] }
 0x640   :  { %12383 = vmatmul.mubr.f32.gmra.mrb[10].mxu1 %v3813_v18  ;;  %v10218_v18 = vld [vmem:[%s21106_s4 + $0x208] sm:$0xff] }
 0x641   :  { %14142 = vmatpush3.bf16.msra.mxu1 %v14139_v25  ;;  %12385 = vmatprep.mubr.f32.mxu1 %v3814_v3  ;;  %v21653_v3 = vld [vmem:[#allocation59_spill] sm:$0xff]  ;;  %v14151_v25 = vpack.c.bf16 %v10218_v18, %v10217_v38  ;;  %v21656_v38 = vld [vmem:[#allocation64_spill] sm:$0xff] }
 0x642   :  { %14144 = vmatprep.subr.bf16.mxu1 %v14143_v29  ;;  %v3817_v45 = vmul.f32 %v18313_v40, %v21653_v3  ;;  %v4014_v18 = vmul.f32 %v18119_v6, %v21656_v38  ;;  %v10223_v38 = vld [vmem:[%s21106_s4 + $0x230] sm:$0xff] }
 0x644   :  { %12386 = vmatmul.mubr.f32.gmra.mrb[12].mxu1 %v3815_v19  ;;  %v14155_v19 = vpack.c.bf16 %v10220_v61, %v10219_v30  ;;  %v21658_v61 = vld [vmem:[#allocation66_spill] sm:$0xff] }
 0x645   :  { %14146 = vmatpush3.bf16.msra.mxu1 %v14143_v29  ;;  %12388 = vmatprep.mubr.f32.mxu1 %v3816_v44  ;;  %v21655_v44 = vld [vmem:[#allocation61_spill] sm:$0xff]  ;;  %v4016_v30 = vmul.f32 %v18134_v20, %v21658_v61  ;;  %v10225_v61 = vld [vmem:[%s21106_s4 + $0x240] sm:$0xff] }
 0x646   :  { %14148 = vmatprep.subr.bf16.mxu1 %v14147_v50  ;;  %v4013_v29 = vmul.f32 %v18113_v47, %v21655_v44  ;;  %v10224_v44 = vld [vmem:[%s21106_s4 + $0x238] sm:$0xff] }
 0x648   :  { %12389 = vmatmul.mubr.f32.gmra.mrb[14].mxu1 %v3817_v45  ;;  %v14159_v45 = vpack.c.bf16 %v10222_v12, %v10221_v23  ;;  %v21660_v12 = vld [vmem:[#allocation68_spill] sm:$0xff] }
 0x649   :  { %14150 = vmatpush3.bf16.msra.mxu1 %v14147_v50  ;;  %12423 = vmatprep.mubr.f32.mxu1 %v4012_v2  ;;  %v21657_v2 = vld [vmem:[#allocation63_spill] sm:$0xff]  ;;  %v4018_v23 = vmul.f32 %v18148_v17, %v21660_v12  ;;  %v10227_v12 = vld [vmem:[%s21106_s4 + $0x250] sm:$0xff] }
 0x64a   :  { %14152 = vmatprep.subr.bf16.mxu1 %v14151_v25  ;;  %v4015_v50 = vmul.f32 %v18127_v34, %v21657_v2  ;;  %v10226_v2 = vld [vmem:[%s21106_s4 + $0x248] sm:$0xff] }
 0x64c   :  { %12424 = vmatmul.mubr.f32.vlgmr.msra.gmra.mrb[0].mxu1 %v4013_v29 }
 0x64d   :  { %14154 = vmatpush3.bf16.msra.mxu1 %v14151_v25  ;;  %12426 = vmatprep.mubr.f32.mxu1 %v4014_v18  ;;  %v21659_v25 = vld [vmem:[#allocation65_spill] sm:$0xff]  ;;  %v14163_v18 = vpack.c.bf16 %v10224_v44, %v10223_v38  ;;  %v21662_v44 = vld [vmem:[#allocation70_spill] sm:$0xff] }
 0x64e   :  { %14156 = vmatprep.subr.bf16.mxu1 %v14155_v19  ;;  %v4017_v29 = vmul.f32 %v18142_v51, %v21659_v25  ;;  %v4020_v38 = vmul.f32 %v18162_v13, %v21662_v44  ;;  %v10228_v25 = vld [vmem:[%s21106_s4 + $0x258] sm:$0xff]  ;;  %v10229_v44 = vld [vmem:[%s21106_s4 + $0x260] sm:$0xff] }
 0x650   :  { %12427 = vmatmul.mubr.f32.gmra.mrb[2].mxu1 %v4015_v50 }
 0x651   :  { %14158 = vmatpush3.bf16.msra.mxu1 %v14155_v19  ;;  %12429 = vmatprep.mubr.f32.mxu1 %v4016_v30  ;;  %v21661_v19 = vld [vmem:[#allocation67_spill] sm:$0xff]  ;;  %v14167_v30 = vpack.c.bf16 %v10226_v2, %v10225_v61  ;;  %v21664_v2 = vld [vmem:[#allocation72_spill] sm:$0xff] }
 0x652   :  { %14160 = vmatprep.subr.bf16.mxu1 %v14159_v45  ;;  %v4019_v50 = vmul.f32 %v18156_v33, %v21661_v19  ;;  %v4022_v61 = vmul.f32 %v18176_v24, %v21664_v2  ;;  %v10230_v19 = vld [vmem:[%s21106_s4 + $0x268] sm:$0xff]  ;;  %v10231_v2 = vld [vmem:[%s21106_s4 + $0x270] sm:$0xff] }
 0x654   :  { %12430 = vmatmul.mubr.f32.gmra.mrb[4].mxu1 %v4017_v29 }
 0x655   :  { %14162 = vmatpush3.bf16.msra.mxu1 %v14159_v45  ;;  %12432 = vmatprep.mubr.f32.mxu1 %v4018_v23  ;;  %v21663_v45 = vld [vmem:[#allocation69_spill] sm:$0xff]  ;;  %v14171_v23 = vpack.c.bf16 %v10228_v25, %v10227_v12  ;;  %v21666_v25 = vld [vmem:[#allocation74_spill] sm:$0xff] }
 0x656   :  { %14164 = vmatprep.subr.bf16.mxu1 %v14163_v18  ;;  %v4021_v29 = vmul.f32 %v18170_v32, %v21663_v45  ;;  %v4024_v12 = vmul.f32 %v18190_v54, %v21666_v25  ;;  %v10232_v45 = vld [vmem:[%s21106_s4 + $0x278] sm:$0xff]  ;;  %v18395_v25 = vld [vmem:[#allocation2 + $0x87] sm:$0xff] }
 0x658   :  { %12433 = vmatmul.mubr.f32.gmra.mrb[6].mxu1 %v4019_v50 }
 0x659   :  { %14166 = vmatpush3.bf16.msra.mxu1 %v14163_v18  ;;  %12435 = vmatprep.mubr.f32.mxu1 %v4020_v38  ;;  %v21665_v18 = vld [vmem:[#allocation71_spill] sm:$0xff]  ;;  %v14175_v38 = vpack.c.bf16 %v10230_v19, %v10229_v44  ;;  %v21668_v19 = vld [vmem:[#allocation76_spill] sm:$0xff] }
 0x65a   :  { %14168 = vmatprep.subr.bf16.mxu1 %v14167_v30  ;;  %v4023_v50 = vmul.f32 %v18184_v56, %v21665_v18  ;;  %v4026_v44 = vmul.f32 %v18204_v42, %v21668_v19  ;;  %v10233_v18 = vld [vmem:[%s21106_s4 + $0x280] sm:$0xff]  ;;  %v10236_v19 = vld [vmem:[%s21106_s4 + $0x298] sm:$0xff] }
 0x65c   :  { %12436 = vmatmul.mubr.f32.gmra.mrb[8].mxu1 %v4021_v29 }
 0x65d   :  { %14170 = vmatpush3.bf16.msra.mxu1 %v14167_v30  ;;  %12438 = vmatprep.mubr.f32.mxu1 %v4022_v61  ;;  %v21667_v30 = vld [vmem:[#allocation73_spill] sm:$0xff]  ;;  %v14179_v61 = vpack.c.bf16 %v10232_v45, %v10231_v2 }
 0x65e   :  { %14172 = vmatprep.subr.bf16.mxu1 %v14171_v23  ;;  %v4025_v29 = vmul.f32 %v18198_v57, %v21667_v30  ;;  %v15614_v30 = vld [vmem:[#allocation2 + $0x10] sm:$0xff] }
 0x660   :  { %12439 = vmatmul.mubr.f32.gmra.mrb[10].mxu1 %v4023_v50  ;;  %v10234_v50 = vld [vmem:[%s21106_s4 + $0x288] sm:$0xff] }
 0x661   :  { %14174 = vmatpush3.bf16.msra.mxu1 %v14171_v23  ;;  %12441 = vmatprep.mubr.f32.mxu1 %v4024_v12  ;;  %v21669_v23 = vld [vmem:[#allocation75_spill] sm:$0xff]  ;;  %v14183_v2 = vpack.c.bf16 %v10234_v50, %v10233_v18  ;;  %v10235_v12 = vld [vmem:[%s21106_s4 + $0x290] sm:$0xff]  ;;  %v10238_v18 = vld [vmem:[%s21106_s4 + $0x2a8] sm:$0xff] }
 0x662   :  { %14176 = vmatprep.subr.bf16.mxu1 %v14175_v38  ;;  %v4027_v45 = vmul.f32 %v18395_v25, %v21669_v23  ;;  %v15616_v50 = vld [vmem:[#allocation2 + $0x20] sm:$0xff] }
 0x664   :  { %12442 = vmatmul.mubr.f32.gmra.mrb[12].mxu1 %v4025_v29  ;;  %v10237_v29 = vld [vmem:[%s21106_s4 + $0x2a0] sm:$0xff] }
 0x665   :  { %14178 = vmatpush3.bf16.msra.mxu1 %v14175_v38  ;;  %12444 = vmatprep.mubr.f32.mxu1 %v4026_v44  ;;  %v14187_v38 = vpack.c.bf16 %v10236_v19, %v10235_v12  ;;  %v15615_v44 = vld [vmem:[#allocation2 + $0x18] sm:$0xff]  ;;  %v15617_v19 = vld [vmem:[#allocation2 + $0x28] sm:$0xff]  ;;  %v15618_v12 = vld [vmem:[#allocation2 + $0x30] sm:$0xff] }
 0x666   :  { %14180 = vmatprep.subr.bf16.mxu1 %v14179_v61 }
 0x668   :  { %12445 = vmatmul.mubr.f32.gmra.mrb[14].mxu1 %v4027_v45  ;;  %v14191_v45 = vpack.c.bf16 %v10238_v18, %v10237_v29  ;;  %v10242_v29 = vld [vmem:[%s21106_s4 + $0x2c8] sm:$0xff]  ;;  %v15619_v18 = vld [vmem:[#allocation2 + $0x38] sm:$0xff] }
 0x669   :  { %14182 = vmatpush3.bf16.msra.mxu1 %v14179_v61  ;;  %12479 = vmatprep.mubr.f32.mxu1 %v15614_v30  ;;  %v10239_v30 = vld [vmem:[%s21106_s4 + $0x2b0] sm:$0xff]  ;;  %v10240_v61 = vld [vmem:[%s21106_s4 + $0x2b8] sm:$0xff] }
 0x66a   :  { %14184 = vmatprep.subr.bf16.mxu1 %v14183_v2 }
 0x66c   :  { %12480 = vmatmul.mubr.f32.vlgmr.msra.gmra.mrb[0].mxu1 %v15615_v44  ;;  %v14195_v44 = vpack.c.bf16 %v10240_v61, %v10239_v30  ;;  %v10244_v30 = vld [vmem:[%s21106_s4 + $0x2d8] sm:$0xff]  ;;  %v15621_v61 = vld [vmem:[#allocation2 + $0x48] sm:$0xff] }
 0x66d   :  { %14186 = vmatpush3.bf16.msra.mxu1 %v14183_v2  ;;  %12482 = vmatprep.mubr.f32.mxu1 %v15616_v50  ;;  %v10241_v2 = vld [vmem:[%s21106_s4 + $0x2c0] sm:$0xff] }
 0x66e   :  { %14188 = vmatprep.subr.bf16.mxu1 %v14187_v38  ;;  %v15620_v50 = vld [vmem:[#allocation2 + $0x40] sm:$0xff] }
 0x670   :  { %12483 = vmatmul.mubr.f32.gmra.mrb[2].mxu1 %v15617_v19  ;;  %v14199_v19 = vpack.c.bf16 %v10242_v29, %v10241_v2  ;;  %v10246_v2 = vld [vmem:[%s21106_s4 + $0x2e8] sm:$0xff] }
 0x671   :  { %14190 = vmatpush3.bf16.msra.mxu1 %v14187_v38  ;;  %12485 = vmatprep.mubr.f32.mxu1 %v15618_v12  ;;  %v10243_v38 = vld [vmem:[%s21106_s4 + $0x2d0] sm:$0xff] }
 0x672   :  { %14192 = vmatprep.subr.bf16.mxu1 %v14191_v45  ;;  %v14203_v12 = vpack.c.bf16 %v10244_v30, %v10243_v38  ;;  %v10252_v38 = vld [vmem:[%s21106_s4 + $0x318] sm:$0xff] }
 0x674   :  { %12486 = vmatmul.mubr.f32.gmra.mrb[4].mxu1 %v15619_v18  ;;  %v10250_v18 = vld [vmem:[%s21106_s4 + $0x308] sm:$0xff] }
 0x675   :  { %14194 = vmatpush3.bf16.msra.mxu1 %v14191_v45  ;;  %12488 = vmatprep.mubr.f32.mxu1 %v15620_v50  ;;  %v10245_v45 = vld [vmem:[%s21106_s4 + $0x2e0] sm:$0xff]  ;;  %v21670_v50 = vld [vmem:[#allocation78_spill] sm:$0xff] }
 0x676   :  { %14196 = vmatprep.subr.bf16.mxu1 %v14195_v44  ;;  %v14207_v29 = vpack.c.bf16 %v10246_v2, %v10245_v45  ;;  %v10254_v45 = vld [vmem:[%s21106_s4 + $0x328] sm:$0xff] }
 0x678   :  { %12489 = vmatmul.mubr.f32.gmra.mrb[6].mxu1 %v15621_v61  ;;  %v21672_v61 = vld [vmem:[#allocation80_spill] sm:$0xff] }
 0x679   :  { %14198 = vmatpush3.bf16.msra.mxu1 %v14195_v44  ;;  %12491 = vmatprep.mubr.f32.mxu1 %v18055_v28  ;;  %v10247_v28 = vld [vmem:[%s21106_s4 + $0x2f0] sm:$0xff]  ;;  %v10248_v44 = vld [vmem:[%s21106_s4 + $0x2f8] sm:$0xff] }
 0x67a   :  { %14200 = vmatprep.subr.bf16.mxu1 %v14199_v19 }
 0x67c   :  { %12492 = vmatmul.mubr.f32.gmra.mrb[8].mxu1 %v18060_v5  ;;  %v14211_v5 = vpack.c.bf16 %v10248_v44, %v10247_v28  ;;  %v21674_v28 = vld [vmem:[#allocation84_spill] sm:$0xff] }
 0x67d   :  { %14202 = vmatpush3.bf16.msra.mxu1 %v14199_v19  ;;  %12494 = vmatprep.mubr.f32.mxu1 %v18063_v46  ;;  %v10249_v46 = vld [vmem:[%s21106_s4 + $0x300] sm:$0xff]  ;;  %v10251_v19 = vld [vmem:[%s21106_s4 + $0x310] sm:$0xff]  ;;  %v4404_v44 = vmul.f32 %v18243_v26, %v21674_v28 }
 0x67e   :  { %14204 = vmatprep.subr.bf16.mxu1 %v14203_v12  ;;  %v14219_v30 = vpack.c.bf16 %v10252_v38, %v10251_v19  ;;  %v21676_v19 = vld [vmem:[#allocation88_spill] sm:$0xff] }
 0x67f   :  { %v4406_v38 = vmul.f32 %v18257_v27, %v21676_v19  ;;  %v10268_v19 = vld [vmem:[%s21106_s4 + $0x398] sm:$0xff] }
 0x680   :  { %12495 = vmatmul.mubr.f32.gmra.mrb[10].mxu1 %v18068_v58  ;;  %v14215_v58 = vpack.c.bf16 %v10250_v18, %v10249_v46  ;;  %v10256_v46 = vld [vmem:[%s21106_s4 + $0x338] sm:$0xff]  ;;  %v21675_v18 = vld [vmem:[#allocation83_spill] sm:$0xff] }
 0x681   :  { %14206 = vmatpush3.bf16.msra.mxu1 %v14203_v12  ;;  %12497 = vmatprep.mubr.f32.mxu1 %v18071_v31  ;;  %v4400_v31 = vmul.f32 %v18215_v10, %v21670_v50  ;;  %v4402_v10 = vmul.f32 %v18229_v11, %v21672_v61  ;;  %v10253_v12 = vld [vmem:[%s21106_s4 + $0x320] sm:$0xff] }
 0x682   :  { %14208 = vmatprep.subr.bf16.mxu1 %v14207_v29 }
 0x684   :  { %12498 = vmatmul.mubr.f32.gmra.mrb[12].mxu1 %v18075_v15  ;;  %v21671_v15 = vld [vmem:[#allocation77_spill] sm:$0xff] }
 0x685   :  { %14210 = vmatpush3.bf16.msra.mxu1 %v14207_v29  ;;  %12500 = vmatprep.mubr.f32.mxu1 %v18084_v14  ;;  %v4401_v14 = vmul.f32 %v18223_v21, %v21671_v15  ;;  %v14223_v29 = vpack.c.bf16 %v10254_v45, %v10253_v12 }
 0x686   :  { %14212 = vmatprep.subr.bf16.mxu1 %v14211_v5 }
 0x688   :  { %12501 = vmatmul.mubr.f32.gmra.mrb[14].mxu1 %v18089_v22  ;;  %v21673_v22 = vld [vmem:[#allocation79_spill] sm:$0xff] }
 0x689   :  { %14214 = vmatpush3.bf16.msra.mxu1 %v14211_v5  ;;  %12535 = vmatprep.mubr.f32.mxu1 %v4400_v31  ;;  %v4403_v2 = vmul.f32 %v18237_v9, %v21673_v22  ;;  %v10255_v5 = vld [vmem:[%s21106_s4 + $0x330] sm:$0xff] }
 0x68a   :  { %14216 = vmatprep.subr.bf16.mxu1 %v14215_v58  ;;  %v14227_v31 = vpack.c.bf16 %v10256_v46, %v10255_v5  ;;  %v10259_v5 = vld [vmem:[%s21106_s4 + $0x350] sm:$0xff]  ;;  %v10260_v46 = vld [vmem:[%s21106_s4 + $0x358] sm:$0xff] }
 0x68c   :  { %12536 = vmatmul.mubr.f32.vlgmr.msra.gmra.mrb[0].mxu1 %v4401_v14  ;;  %v10257_v14 = vld [vmem:[%s21106_s4 + $0x340] sm:$0xff] }
 0x68d   :  { %14218 = vmatpush3.bf16.msra.mxu1 %v14215_v58  ;;  %12538 = vmatprep.mubr.f32.mxu1 %v4402_v10  ;;  %v4405_v58 = vmul.f32 %v18251_v35, %v21675_v18  ;;  %v10258_v10 = vld [vmem:[%s21106_s4 + $0x348] sm:$0xff] }
 0x68e   :  { %14220 = vmatprep.subr.bf16.mxu1 %v14219_v30  ;;  %v14231_v45 = vpack.c.bf16 %v10258_v10, %v10257_v14  ;;  %v21680_v14 = vld [vmem:[#allocation96_spill] sm:$0xff] }
 0x68f   :  { %v4410_v10 = vmul.f32 %v18285_v62, %v21680_v14  ;;  %v10263_v14 = vld [vmem:[%s21106_s4 + $0x370] sm:$0xff] }
 0x690   :  { %12539 = vmatmul.mubr.f32.gmra.mrb[2].mxu1 %v4403_v2  ;;  %v21678_v2 = vld [vmem:[#allocation92_spill] sm:$0xff] }
 0x691   :  { %14222 = vmatpush3.bf16.msra.mxu1 %v14219_v30  ;;  %12541 = vmatprep.mubr.f32.mxu1 %v4404_v44  ;;  %v21677_v30 = vld [vmem:[#allocation87_spill] sm:$0xff]  ;;  %v4408_v44 = vmul.f32 %v18271_v37, %v21678_v2 }
 0x692   :  { %14224 = vmatprep.subr.bf16.mxu1 %v14223_v29  ;;  %v4407_v12 = vmul.f32 %v18265_v1, %v21677_v30  ;;  %v10261_v2 = vld [vmem:[%s21106_s4 + $0x360] sm:$0xff]  ;;  %v10262_v30 = vld [vmem:[%s21106_s4 + $0x368] sm:$0xff] }
 0x694   :  { %12542 = vmatmul.mubr.f32.gmra.mrb[4].mxu1 %v4405_v58 }
 0x695   :  { %14226 = vmatpush3.bf16.msra.mxu1 %v14223_v29  ;;  %12544 = vmatprep.mubr.f32.mxu1 %v4406_v38  ;;  %v21679_v29 = vld [vmem:[#allocation91_spill] sm:$0xff]  ;;  %v14235_v38 = vpack.c.bf16 %v10260_v46, %v10259_v5  ;;  %v21682_v5 = vld [vmem:[#allocation100_spill] sm:$0xff] }
 0x696   :  { %14228 = vmatprep.subr.bf16.mxu1 %v14227_v31  ;;  %v4409_v58 = vmul.f32 %v18279_v0, %v21679_v29  ;;  %v4412_v46 = vmul.f32 %v18299_v7, %v21682_v5  ;;  %v10264_v29 = vld [vmem:[%s21106_s4 + $0x378] sm:$0xff]  ;;  %v18533_v5 = vld [vmem:[#allocation2 + $0x89] sm:$0xff] }
 0x698   :  { %12545 = vmatmul.mubr.f32.gmra.mrb[6].mxu1 %v4407_v12 }
 0x699   :  { %14230 = vmatpush3.bf16.msra.mxu1 %v14227_v31  ;;  %12547 = vmatprep.mubr.f32.mxu1 %v4408_v44  ;;  %v21681_v31 = vld [vmem:[#allocation95_spill] sm:$0xff]  ;;  %v14239_v44 = vpack.c.bf16 %v10262_v30, %v10261_v2  ;;  %v21684_v30 = vld [vmem:[#allocation104_spill] sm:$0xff] }
 0x69a   :  { %14232 = vmatprep.subr.bf16.mxu1 %v14231_v45  ;;  %v4411_v12 = vmul.f32 %v18293_v48, %v21681_v31  ;;  %v4414_v2 = vmul.f32 %v18313_v40, %v21684_v30  ;;  %v10265_v31 = vld [vmem:[%s21106_s4 + $0x380] sm:$0xff] }
 0x69c   :  { %12548 = vmatmul.mubr.f32.gmra.mrb[8].mxu1 %v4409_v58 }
 0x69d   :  { %14234 = vmatpush3.bf16.msra.mxu1 %v14231_v45  ;;  %12550 = vmatprep.mubr.f32.mxu1 %v4410_v10  ;;  %v21683_v45 = vld [vmem:[#allocation99_spill] sm:$0xff]  ;;  %v14243_v10 = vpack.c.bf16 %v10264_v29, %v10263_v14 }
 0x69e   :  { %14236 = vmatprep.subr.bf16.mxu1 %v14235_v38  ;;  %v4413_v58 = vmul.f32 %v18307_v43, %v21683_v45  ;;  %v10267_v45 = vld [vmem:[%s21106_s4 + $0x390] sm:$0xff] }
 0x6a0   :  { %12551 = vmatmul.mubr.f32.gmra.mrb[10].mxu1 %v4411_v12  ;;  %v10266_v12 = vld [vmem:[%s21106_s4 + $0x388] sm:$0xff] }
 0x6a1   :  { %14238 = vmatpush3.bf16.msra.mxu1 %v14235_v38  ;;  %12553 = vmatprep.mubr.f32.mxu1 %v4412_v46  ;;  %v21685_v38 = vld [vmem:[#allocation103_spill] sm:$0xff]  ;;  %v14247_v14 = vpack.c.bf16 %v10266_v12, %v10265_v31  ;;  %v21686_v46 = vld [vmem:[#allocation108_spill] sm:$0xff] }
 0x6a2   :  { %14240 = vmatprep.subr.bf16.mxu1 %v14239_v44  ;;  %v4415_v29 = vmul.f32 %v18533_v5, %v21685_v38  ;;  %v4610_v30 = vmul.f32 %v18113_v47, %v21686_v46  ;;  %v21688_v31 = vld [vmem:[#allocation112_spill] sm:$0xff]  ;;  %v10269_v47 = vld [vmem:[%s21106_s4 + $0x3a0] sm:$0xff]  ;;  %v10344_v38 = vld [vmem:[%s21108_s5 + $0x1f0] sm:$0xff] }
 0x6a3   :  { %v4612_v12 = vmul.f32 %v18127_v34, %v21688_v31  ;;  %v10270_v46 = vld [vmem:[%s21106_s4 + $0x3a8] sm:$0xff]  ;;  %v10271_v34 = vld [vmem:[%s21106_s4 + $0x3b0] sm:$0xff]  ;;  %v10342_v31 = vld [vmem:[%s21108_s5 + $0x1e0] sm:$0xff] }
 0x6a4   :  { %12554 = vmatmul.mubr.f32.gmra.mrb[12].mxu1 %v4413_v58 }
 0x6a5   :  { %14242 = vmatpush3.bf16.msra.mxu1 %v14239_v44  ;;  %12556 = vmatprep.mubr.f32.mxu1 %v4414_v2  ;;  %v21687_v44 = vld [vmem:[#allocation107_spill] sm:$0xff]  ;;  %v14251_v2 = vpack.c.bf16 %v10268_v19, %v10267_v45  ;;  %v21690_v19 = vld [vmem:[#allocation113_spill] sm:$0xff] }
 0x6a6   :  { %14244 = vmatprep.subr.bf16.mxu1 %v14243_v10  ;;  %v4611_v58 = vmul.f32 %v18119_v6, %v21687_v44  ;;  %v14255_v6 = vpack.c.bf16 %v10270_v46, %v10269_v47  ;;  %v4614_v45 = vmul.f32 %v18142_v51, %v21690_v19  ;;  %v21692_v46 = vld [vmem:[#allocation43_spill] sm:$0xff]  ;;  %v10274_v47 = vld [vmem:[%s21106_s4 + $0x3c8] sm:$0xff]  ;;  %v10340_v19 = vld [vmem:[%s21108_s5 + $0x1d0] sm:$0xff] }
 0x6a7   :  { %v10273_v51 = vld [vmem:[%s21106_s4 + $0x3c0] sm:$0xff] }
 0x6a8   :  { %12557 = vmatmul.mubr.f32.gmra.mrb[14].mxu1 %v4415_v29  ;;  %v10272_v29 = vld [vmem:[%s21106_s4 + $0x3b8] sm:$0xff] }
 0x6a9   :  { %14246 = vmatpush3.bf16.msra.mxu1 %v14243_v10  ;;  %12591 = vmatprep.mubr.f32.mxu1 %v4610_v30  ;;  %v21689_v10 = vld [vmem:[#allocation111_spill] sm:$0xff] }
 0x6aa   :  { %14248 = vmatprep.subr.bf16.mxu1 %v14247_v14  ;;  %v4613_v30 = vmul.f32 %v18134_v20, %v21689_v10  ;;  %v14259_v20 = vpack.c.bf16 %v10272_v29, %v10271_v34  ;;  %v10276_v29 = vld [vmem:[%s21106_s4 + $0x3d8] sm:$0xff] }
 0x6ac   :  { %12592 = vmatmul.mubr.f32.vlgmr.msra.gmra.mrb[0].mxu1 %v4611_v58 }
 0x6ad   :  { %14250 = vmatpush3.bf16.msra.mxu1 %v14247_v14  ;;  %12594 = vmatprep.mubr.f32.mxu1 %v4612_v12  ;;  %v21691_v14 = vld [vmem:[#allocation39_spill] sm:$0xff]  ;;  %v4616_v12 = vmul.f32 %v18156_v33, %v21692_v46  ;;  %v10275_v33 = vld [vmem:[%s21106_s4 + $0x3d0] sm:$0xff] }
 0x6ae   :  { %14252 = vmatprep.subr.bf16.mxu1 %v14251_v2  ;;  %v4615_v58 = vmul.f32 %v18148_v17, %v21691_v14  ;;  %v14263_v17 = vpack.c.bf16 %v10274_v47, %v10273_v51  ;;  %v10278_v47 = vld [vmem:[%s21106_s4 + $0x3e8] sm:$0xff]  ;;  %v10338_v46 = vld [vmem:[%s21108_s5 + $0x1c0] sm:$0xff] }
 0x6b0   :  { %12595 = vmatmul.mubr.f32.gmra.mrb[2].mxu1 %v4613_v30 }
 0x6b1   :  { %14254 = vmatpush3.bf16.msra.mxu1 %v14251_v2  ;;  %12597 = vmatprep.mubr.f32.mxu1 %v4614_v45  ;;  %v21693_v2 = vld [vmem:[#allocation40_spill] sm:$0xff]  ;;  %v21694_v45 = vld [vmem:[#allocation47_spill] sm:$0xff] }
 0x6b2   :  { %14256 = vmatprep.subr.bf16.mxu1 %v14255_v6  ;;  %v4617_v30 = vmul.f32 %v18162_v13, %v21693_v2  ;;  %v4618_v34 = vmul.f32 %v18170_v32, %v21694_v45  ;;  %v14267_v13 = vpack.c.bf16 %v10276_v29, %v10275_v33  ;;  %v10277_v32 = vld [vmem:[%s21106_s4 + $0x3e0] sm:$0xff]  ;;  %v10280_v29 = vld [vmem:[%s21106_s4 + $0x3f8] sm:$0xff]  ;;  %v10336_v45 = vld [vmem:[%s21108_s5 + $0x1b0] sm:$0xff] }
 0x6b4   :  { %12598 = vmatmul.mubr.f32.gmra.mrb[4].mxu1 %v4615_v58 }
 0x6b5   :  { %14258 = vmatpush3.bf16.msra.mxu1 %v14255_v6  ;;  %12600 = vmatprep.mubr.f32.mxu1 %v4616_v12  ;;  %v21695_v6 = vld [vmem:[#allocation44_spill] sm:$0xff]  ;;  %v21696_v12 = vld [vmem:[#allocation51_spill] sm:$0xff] }
 0x6b6   :  { %14260 = vmatprep.subr.bf16.mxu1 %v14259_v20  ;;  %v4619_v58 = vmul.f32 %v18176_v24, %v21695_v6  ;;  %v4620_v51 = vmul.f32 %v18184_v56, %v21696_v12  ;;  %v14271_v24 = vpack.c.bf16 %v10278_v47, %v10277_v32  ;;  %v10279_v56 = vld [vmem:[%s21106_s4 + $0x3f0] sm:$0xff]  ;;  %v10281_v47 = vld [vmem:[%s21106_s4 + $0x400] sm:$0xff] }
 0x6b8   :  { %12601 = vmatmul.mubr.f32.gmra.mrb[6].mxu1 %v4617_v30 }
 0x6b9   :  { %14262 = vmatpush3.bf16.msra.mxu1 %v14259_v20  ;;  %12603 = vmatprep.mubr.f32.mxu1 %v4618_v34  ;;  %v21697_v20 = vld [vmem:[#allocation48_spill] sm:$0xff]  ;;  %v21698_v34 = vld [vmem:[#allocation55_spill] sm:$0xff] }
 0x6ba   :  { %14264 = vmatprep.subr.bf16.mxu1 %v14263_v17  ;;  %v4621_v30 = vmul.f32 %v18190_v54, %v21697_v20  ;;  %v4622_v33 = vmul.f32 %v18198_v57, %v21698_v34  ;;  %v14275_v54 = vpack.c.bf16 %v10280_v29, %v10279_v56  ;;  %v4609_v57 = vld [vmem:[#allocation2 + $0x8f] sm:$0xff]  ;;  %v21702_v56 = vld [vmem:[#allocation115_spill] sm:$0xff] }
 0x6bb   :  { %v10282_v34 = vld [vmem:[%s21106_s4 + $0x408] sm:$0xff]  ;;  %v21718_v20 = vld [vmem:[#allocation131_spill] sm:$0xff] }
 0x6bc   :  { %12604 = vmatmul.mubr.f32.gmra.mrb[8].mxu1 %v4619_v58  ;;  %v5030_v12 = vmul.f32 %v18223_v21, %v21718_v20  ;;  %v21723_v21 = vld [vmem:[#allocation136_spill] sm:$0xff] }
 0x6bd   :  { %14266 = vmatpush3.bf16.msra.mxu1 %v14263_v17  ;;  %12606 = vmatprep.mubr.f32.mxu1 %v4620_v51  ;;  %v21699_v17 = vld [vmem:[#allocation52_spill] sm:$0xff] }
 0x6be   :  { %14268 = vmatprep.subr.bf16.mxu1 %v14267_v13  ;;  %v4623_v58 = vmul.f32 %v18204_v42, %v21699_v17  ;;  %v21700_v51 = vld [vmem:[#allocation56_spill] sm:$0xff]  ;;  %v10284_v17 = vld [vmem:[%s21106_s4 + $0x418] sm:$0xff] }
 0x6bf   :  { %v4624_v32 = vmul.f32 %v18395_v25, %v21700_v51  ;;  %v4805_v25 = vld [vmem:[#allocation2 + $0x20] sm:$0xff]  ;;  %v10283_v51 = vld [vmem:[%s21106_s4 + $0x410] sm:$0xff] }
 0x6c0   :  { %12607 = vmatmul.mubr.f32.gmra.mrb[10].mxu1 %v4621_v30  ;;  %v21701_v30 = vld [vmem:[#allocation114_spill] sm:$0xff] }
 0x6c1   :  { %14270 = vmatpush3.bf16.msra.mxu1 %v14267_v13  ;;  %12609 = vmatprep.mubr.f32.mxu1 %v4622_v33  ;;  %v4804_v13 = vld [vmem:[#allocation2 + $0x18] sm:$0xff]  ;;  %v4625_v42 = vmul.f32 %v4609_v57, %v21701_v30  ;;  %v14279_v33 = vpack.c.bf16 %v10282_v34, %v10281_v47  ;;  %v14283_v57 = vpack.c.bf16 %v10284_v17, %v10283_v51  ;;  %v21704_v34 = vld [vmem:[#allocation117_spill] sm:$0xff]  ;;  %v10286_v30 = vld [vmem:[%s21106_s4 + $0x428] sm:$0xff] }
 0x6c2   :  { %14272 = vmatprep.subr.bf16.mxu1 %v14271_v24  ;;  %v4820_v29 = vmul.f32 %v4804_v13, %v21702_v56  ;;  %v4807_v13 = vld [vmem:[#allocation2 + $0x30] sm:$0xff]  ;;  %v10285_v56 = vld [vmem:[%s21106_s4 + $0x420] sm:$0xff] }
 0x6c3   :  { %v21706_v17 = vld [vmem:[#allocation119_spill] sm:$0xff] }
 0x6c4   :  { %12610 = vmatmul.mubr.f32.gmra.mrb[12].mxu1 %v4623_v58  ;;  %v4806_v58 = vld [vmem:[#allocation2 + $0x28] sm:$0xff] }
 0x6c5   :  { %14274 = vmatpush3.bf16.msra.mxu1 %v14271_v24  ;;  %12612 = vmatprep.mubr.f32.mxu1 %v4624_v32  ;;  %v21703_v24 = vld [vmem:[#allocation116_spill] sm:$0xff]  ;;  %v4822_v47 = vmul.f32 %v4806_v58, %v21704_v34  ;;  %v4809_v58 = vld [vmem:[#allocation2 + $0x40] sm:$0xff]  ;;  %v10287_v34 = vld [vmem:[%s21106_s4 + $0x430] sm:$0xff] }
 0x6c6   :  { %14276 = vmatprep.subr.bf16.mxu1 %v14275_v54  ;;  %v4821_v32 = vmul.f32 %v4805_v25, %v21703_v24  ;;  %v14287_v25 = vpack.c.bf16 %v10286_v30, %v10285_v56  ;;  %v10288_v24 = vld [vmem:[%s21106_s4 + $0x438] sm:$0xff]  ;;  %v21708_v30 = vld [vmem:[#allocation121_spill] sm:$0xff] }
 0x6c8   :  { %12613 = vmatmul.mubr.f32.gmra.mrb[14].mxu1 %v4625_v42  ;;  %v4808_v42 = vld [vmem:[#allocation2 + $0x38] sm:$0xff] }
 0x6c9   :  { %14278 = vmatpush3.bf16.msra.mxu1 %v14275_v54  ;;  %12647 = vmatprep.mubr.f32.mxu1 %v4820_v29  ;;  %v21705_v54 = vld [vmem:[#allocation118_spill] sm:$0xff]  ;;  %v4824_v51 = vmul.f32 %v4808_v42, %v21706_v17  ;;  %v4811_v42 = vld [vmem:[#allocation2 + $0x50] sm:$0xff]  ;;  %v10289_v17 = vld [vmem:[%s21106_s4 + $0x440] sm:$0xff] }
 0x6ca   :  { %14280 = vmatprep.subr.bf16.mxu1 %v14279_v33  ;;  %v4823_v29 = vmul.f32 %v4807_v13, %v21705_v54  ;;  %v14291_v13 = vpack.c.bf16 %v10288_v24, %v10287_v34  ;;  %v10290_v54 = vld [vmem:[%s21106_s4 + $0x448] sm:$0xff]  ;;  %v21710_v24 = vld [vmem:[#allocation123_spill] sm:$0xff] }
 0x6cc   :  { %12648 = vmatmul.mubr.f32.vlgmr.msra.gmra.mrb[0].mxu1 %v4821_v32  ;;  %v4810_v32 = vld [vmem:[#allocation2 + $0x48] sm:$0xff] }
 0x6cd   :  { %14282 = vmatpush3.bf16.msra.mxu1 %v14279_v33  ;;  %12650 = vmatprep.mubr.f32.mxu1 %v4822_v47  ;;  %v21707_v33 = vld [vmem:[#allocation120_spill] sm:$0xff]  ;;  %v4826_v56 = vmul.f32 %v4810_v32, %v21708_v30  ;;  %v4813_v32 = vld [vmem:[#allocation2 + $0x60] sm:$0xff]  ;;  %v10291_v30 = vld [vmem:[%s21106_s4 + $0x450] sm:$0xff] }
 0x6ce   :  { %14284 = vmatprep.subr.bf16.mxu1 %v14283_v57  ;;  %v4825_v47 = vmul.f32 %v4809_v58, %v21707_v33  ;;  %v14295_v58 = vpack.c.bf16 %v10290_v54, %v10289_v17  ;;  %v10292_v33 = vld [vmem:[%s21106_s4 + $0x458] sm:$0xff]  ;;  %v21712_v54 = vld [vmem:[#allocation125_spill] sm:$0xff] }
 0x6d0   :  { %12651 = vmatmul.mubr.f32.gmra.mrb[2].mxu1 %v4823_v29  ;;  %v4812_v29 = vld [vmem:[#allocation2 + $0x58] sm:$0xff] }
 0x6d1   :  { %14286 = vmatpush3.bf16.msra.mxu1 %v14283_v57  ;;  %12653 = vmatprep.mubr.f32.mxu1 %v4824_v51  ;;  %v21709_v57 = vld [vmem:[#allocation122_spill] sm:$0xff]  ;;  %v4828_v34 = vmul.f32 %v4812_v29, %v21710_v24  ;;  %v4815_v29 = vld [vmem:[#allocation2 + $0x70] sm:$0xff]  ;;  %v10293_v24 = vld [vmem:[%s21106_s4 + $0x460] sm:$0xff] }
 0x6d2   :  { %14288 = vmatprep.subr.bf16.mxu1 %v14287_v25  ;;  %v4827_v51 = vmul.f32 %v4811_v42, %v21709_v57  ;;  %v14299_v42 = vpack.c.bf16 %v10292_v33, %v10291_v30  ;;  %v10294_v57 = vld [vmem:[%s21106_s4 + $0x468] sm:$0xff]  ;;  %v21714_v33 = vld [vmem:[#allocation127_spill] sm:$0xff] }
 0x6d4   :  { %12654 = vmatmul.mubr.f32.gmra.mrb[4].mxu1 %v4825_v47  ;;  %v4814_v47 = vld [vmem:[#allocation2 + $0x68] sm:$0xff] }
 0x6d5   :  { %14290 = vmatpush3.bf16.msra.mxu1 %v14287_v25  ;;  %12656 = vmatprep.mubr.f32.mxu1 %v4826_v56  ;;  %v21711_v25 = vld [vmem:[#allocation124_spill] sm:$0xff]  ;;  %v4830_v17 = vmul.f32 %v4814_v47, %v21712_v54  ;;  %v4817_v47 = vld [vmem:[#allocation2 + $0x80] sm:$0xff]  ;;  %v10295_v54 = vld [vmem:[%s21106_s4 + $0x470] sm:$0xff] }
 0x6d6   :  { %14292 = vmatprep.subr.bf16.mxu1 %v14291_v13  ;;  %v4829_v56 = vmul.f32 %v4813_v32, %v21711_v25  ;;  %v14303_v32 = vpack.c.bf16 %v10294_v57, %v10293_v24  ;;  %v10296_v25 = vld [vmem:[%s21106_s4 + $0x478] sm:$0xff]  ;;  %v21716_v57 = vld [vmem:[#allocation129_spill] sm:$0xff] }
 0x6d8   :  { %12657 = vmatmul.mubr.f32.gmra.mrb[6].mxu1 %v4827_v51  ;;  %v4816_v51 = vld [vmem:[#allocation2 + $0x78] sm:$0xff] }
 0x6d9   :  { %14294 = vmatpush3.bf16.msra.mxu1 %v14291_v13  ;;  %12659 = vmatprep.mubr.f32.mxu1 %v4828_v34  ;;  %v21713_v13 = vld [vmem:[#allocation126_spill] sm:$0xff]  ;;  %v4832_v30 = vmul.f32 %v4816_v51, %v21714_v33  ;;  %v15622_v51 = vld [vmem:[#allocation2 + $0x8] sm:$0xff] }
 0x6da   :  { %14296 = vmatprep.subr.bf16.mxu1 %v14295_v58  ;;  %v4831_v34 = vmul.f32 %v4815_v29, %v21713_v13  ;;  %v14307_v29 = vpack.c.bf16 %v10296_v25, %v10295_v54  ;;  %v21717_v33 = vld [vmem:[#allocation130_spill] sm:$0xff] }
 0x6db   :  { %v4835_v13 = vmul.f32 %v15622_v51, %v21717_v33  ;;  %v21721_v54 = vld [vmem:[#allocation134_spill] sm:$0xff] }
 0x6dc   :  { %12660 = vmatmul.mubr.f32.gmra.mrb[8].mxu1 %v4829_v56  ;;  %v4818_v56 = vld [vmem:[#allocation2 + $0x88] sm:$0xff] }
 0x6dd   :  { %14298 = vmatpush3.bf16.msra.mxu1 %v14295_v58  ;;  %12662 = vmatprep.mubr.f32.mxu1 %v4830_v17  ;;  %v21715_v58 = vld [vmem:[#allocation128_spill] sm:$0xff]  ;;  %v4834_v24 = vmul.f32 %v4818_v56, %v21716_v57 }
 0x6de   :  { %14300 = vmatprep.subr.bf16.mxu1 %v14299_v42  ;;  %v4833_v17 = vmul.f32 %v4817_v47, %v21715_v58  ;;  %v21722_v47 = vld [vmem:[#allocation135_spill] sm:$0xff] }
 0x6df   :  { %v5034_v56 = vmul.f32 %v18251_v35, %v21722_v47 }
 0x6e0   :  { %12663 = vmatmul.mubr.f32.gmra.mrb[10].mxu1 %v4831_v34 }
 0x6e1   :  { %14302 = vmatpush3.bf16.msra.mxu1 %v14299_v42  ;;  %12665 = vmatprep.mubr.f32.mxu1 %v4832_v30  ;;  %v21719_v42 = vld [vmem:[#allocation132_spill] sm:$0xff]  ;;  %v21720_v30 = vld [vmem:[#allocation133_spill] sm:$0xff] }
 0x6e2   :  { %14304 = vmatprep.subr.bf16.mxu1 %v14303_v32  ;;  %v5031_v34 = vmul.f32 %v18229_v11, %v21719_v42  ;;  %v5032_v25 = vmul.f32 %v18237_v9, %v21720_v30  ;;  %v21725_v11 = vld [vmem:[#allocation138_spill] sm:$0xff] }
 0x6e3   :  { %v5037_v9 = vmul.f32 %v18271_v37, %v21725_v11  ;;  %v21731_v37 = vld [vmem:[#allocation144_spill] sm:$0xff] }
 0x6e4   :  { %12666 = vmatmul.mubr.f32.gmra.mrb[12].mxu1 %v4833_v17 }
 0x6e5   :  { %14306 = vmatpush3.bf16.msra.mxu1 %v14303_v32  ;;  %12668 = vmatprep.mubr.f32.mxu1 %v4834_v24  ;;  %v5033_v32 = vmul.f32 %v18243_v26, %v21721_v54  ;;  %v21727_v26 = vld [vmem:[#allocation140_spill] sm:$0xff] }
 0x6e6   :  { %14308 = vmatprep.subr.bf16.mxu1 %v14307_v29  ;;  %v5039_v35 = vmul.f32 %v18285_v62, %v21727_v26  ;;  %v5029_v62 = vld [vmem:[#allocation2 + $0x91] sm:$0xff] }
 0x6e8   :  { %12669 = vmatmul.mubr.f32.gmra.mrb[14].mxu1 %v4835_v13  ;;  %v5035_v13 = vmul.f32 %v18257_v27, %v21723_v21  ;;  %v21729_v27 = vld [vmem:[#allocation142_spill] sm:$0xff] }
 0x6e9   :  { %14310 = vmatpush3.bf16.msra.mxu1 %v14307_v29  ;;  %12703 = vmatprep.mubr.f32.mxu1 %v5030_v12  ;;  %v21724_v12 = vld [vmem:[#allocation137_spill] sm:$0xff]  ;;  %v21726_v29 = vld [vmem:[#allocation139_spill] sm:$0xff] }
 0x6ea   :  { %v5036_v17 = vmul.f32 %v18265_v1, %v21724_v12  ;;  %v5038_v24 = vmul.f32 %v18279_v0, %v21726_v29  ;;  %v5041_v1 = vmul.f32 %v18299_v7, %v21729_v27  ;;  %v5043_v0 = vmul.f32 %v18313_v40, %v21731_v37 }
 0x6ec   :  { %12704 = vmatmul.mubr.f32.vlgmr.msra.gmra.mrb[0].mxu1 %v5031_v34  ;;  %v21728_v34 = vld [vmem:[#allocation141_spill] sm:$0xff] }
 0x6ed   :  { %12706 = vmatprep.mubr.f32.mxu1 %v5032_v25  ;;  %v5040_v25 = vmul.f32 %v18293_v48, %v21728_v34  ;;  %v21733_v48 = vld [vmem:[#allocation146_spill] sm:$0xff] }
 0x6f0   :  { %12707 = vmatmul.mubr.f32.gmra.mrb[2].mxu1 %v5033_v32  ;;  %v21730_v32 = vld [vmem:[#allocation143_spill] sm:$0xff] }
 0x6f1   :  { %12709 = vmatprep.mubr.f32.mxu1 %v5034_v56  ;;  %v5042_v56 = vmul.f32 %v18307_v43, %v21730_v32 }
 0x6f4   :  { %12710 = vmatmul.mubr.f32.gmra.mrb[4].mxu1 %v5035_v13  ;;  %v21732_v13 = vld [vmem:[#allocation145_spill] sm:$0xff] }
 0x6f5   :  { %12712 = vmatprep.mubr.f32.mxu1 %v5036_v17  ;;  %v5044_v17 = vmul.f32 %v18533_v5, %v21732_v13 }
 0x6f8   :  { %12713 = vmatmul.mubr.f32.gmra.mrb[6].mxu1 %v5037_v9  ;;  %v5045_v9 = vmul.f32 %v5029_v62, %v21733_v48 }
 0x6f9   :  { %12715 = vmatprep.mubr.f32.mxu1 %v5038_v24  ;;  %v21734_v24 = vld [vmem:[#allocation4_spill] sm:$0xff] }
 0x6fc   :  { %12716 = vmatmul.mubr.f32.gmra.mrb[8].mxu1 %v5039_v35  ;;  %v7945_v35 = vmul.f32 %v15622_v51, %v21734_v24 }
 0x6fd   :  { %12718 = vmatprep.mubr.f32.mxu1 %v5040_v25 }
 0x700   :  { %12719 = vmatmul.mubr.f32.gmra.mrb[10].mxu1 %v5041_v1 }
 0x701   :  { %12721 = vmatprep.mubr.f32.mxu1 %v5042_v56 }
 0x704   :  { %12722 = vmatmul.mubr.f32.gmra.mrb[12].mxu1 %v5043_v0 }
 0x705   :  { %12724 = vmatprep.mubr.f32.mxu1 %v5044_v17 }
 0x708   :  { %12725 = vmatmul.mubr.f32.gmra.mrb[14].mxu1 %v5045_v9 }
 0x709   :  { %13263 = vmatprep.mubr.f32.mxu1 %v7945_v35 }
 0x7bf   :  { %v12705_v7 = vpop.f32.mrb[0].mxu1 }
 0x7c0   :  { %v5129_v25 = vpop.f32.mrb[1].mxu1 }
 0x7c1   :  { %v5226_v43 = vadd.f32 %v12705_v7, %v5129_v25 }
 0x7c3   :  { %v12708_v1 = vpop.f32.mrb[2].mxu1 }
 0x7c4   :  { %v5139_v56 = vpop.f32.mrb[3].mxu1 }
 0x7c5   :  { %v5227_v32 = vadd.f32 %v5226_v43, %v5139_v56 }
 0x7c7   :  { %v12711_v27 = vpop.f32.mrb[4].mxu1  ;;  %v5228_v40 = vadd.f32 %v12708_v1, %v5227_v32 }
 0x7c8   :  { %v5149_v37 = vpop.f32.mrb[5].mxu1 }
 0x7c9   :  { %v5229_v34 = vadd.f32 %v5228_v40, %v5149_v37 }
 0x7cb   :  { %v12714_v5 = vpop.f32.mrb[6].mxu1  ;;  %v5230_v13 = vadd.f32 %v12711_v27, %v5229_v34 }
 0x7cc   :  { %v5159_v0 = vpop.f32.mrb[7].mxu1 }
 0x7cd   :  { %v5231_v17 = vadd.f32 %v5230_v13, %v5159_v0 }
 0x7cf   :  { %v5232_v26 = vadd.f32 %v12714_v5, %v5231_v17  ;;  %v18712_v62 = vpop.f32.mrb[8].mxu1 }
 0x7d0   :  { %v18714_v51 = vpop.f32.mrb[9].mxu1 }
 0x7d1   :  { %v5315_v9 = vadd.f32 %v18712_v62, %v18714_v51  ;;  %5233 = vadd.xlane.f32.xlu1 %v5232_v26 }
 0x7d3   :  { %v18718_v24 = vpop.f32.mrb[10].mxu1 }
 0x7d4   :  { %v18720_v35 = vpop.f32.mrb[11].mxu1 }
 0x7d5   :  { %v5316_v32 = vadd.f32 %v5315_v9, %v18720_v35 }
 0x7d7   :  { %v18723_v43 = vpop.f32.mrb[12].mxu1  ;;  %v5317_v34 = vadd.f32 %v18718_v24, %v5316_v32 }
 0x7d8   :  { %v18726_v13 = vpop.f32.mrb[13].mxu1 }
 0x7d9   :  { %v5318_v40 = vadd.f32 %v5317_v34, %v18726_v13 }
 0x7db   :  { %v18729_v17 = vpop.f32.mrb[14].mxu1  ;;  %v5319_v48 = vadd.f32 %v18723_v43, %v5318_v40 }
 0x7dc   :  { %v18732_v29 = vpop.f32.mrb[15].mxu1 }
 0x7dd   :  { %v5320_v26 = vadd.f32 %v5319_v48, %v18732_v29 }
 0x7df   :  { %v5321_v11 = vadd.f32 %v18729_v17, %v5320_v26 }
 0x7e1   :  { %5322 = vadd.xlane.f32.xlu1 %v5321_v11 }
 0x85e   :  { %v5234_v9 = vpop.xlane.xlu1 %5233 }
 0x85f   :  { %v5235_v12 = vrot.slane %v5234_v9, 4 }
 0x861   :  { %v5236_v21 = vadd.f32 %v5235_v12, %v5234_v9 }
 0x863   :  { %v5237_v47 = vrot.slane %v5236_v21, 2 }
 0x865   :  { %v5238_v32 = vadd.f32 %v5237_v47, %v5236_v21 }
 0x867   :  { %v5239_v54 = vrot.slane %v5238_v32, 1 }
 0x869   :  { %v5240_v30 = vadd.f32 %v5239_v54, %v5238_v32 }
 0x86b   :  { %15411 = vpush %v5240_v30 }
 0x89c   :  { %s15412_s4 = spop %15411 }
 0x89d   :  { %s5242_s19 = smul.f32 0.00390625, %s15412_s4 }
 0x89f   :  { %v5243_v34 = vstv %s5242_s19 }
 0x8a0   :  { %v5244_v42 = vsub.f32 %v5129_v25, %v5243_v34  ;;  %v5245_v40 = vsub.f32 %v12705_v7, %v5243_v34  ;;  %v5246_v20 = vsub.f32 %v5139_v56, %v5243_v34  ;;  %v5247_v33 = vsub.f32 %v12708_v1, %v5243_v34 }
 0x8a1   :  { %v5248_v26 = vsub.f32 %v5149_v37, %v5243_v34  ;;  %v5249_v47 = vsub.f32 %v12711_v27, %v5243_v34  ;;  %v5250_v7 = vsub.f32 %v5159_v0, %v5243_v34 }
 0x8a2   :  { %v18737_v48 = vmul.f32 %v17480_v49, %v5244_v42  ;;  %v18740_v11 = vmul.f32 %v17480_v49, %v5245_v40  ;;  %v18743_v12 = vmul.f32 %v17480_v49, %v5246_v20  ;;  %v18746_v30 = vmul.f32 %v17480_v49, %v5247_v33 }
 0x8a3   :  { %v18753_v42 = vmul.f32 %v17480_v49, %v5248_v26  ;;  %v5251_v20 = vsub.f32 %v12714_v5, %v5243_v34  ;;  %v18758_v27 = vmul.f32 %v17480_v49, %v5249_v47  ;;  %v18763_v56 = vmul.f32 %v17480_v49, %v5250_v7  ;;  %v10298_v7 = vld [vmem:[%s21108_s5 + $0x80] sm:$0xff] }
 0x8a4   :  { %v5260_v54 = vmul.f32 %v18737_v48, %v18737_v48  ;;  %v5261_v21 = vmul.f32 %v18740_v11, %v18740_v11  ;;  %v5262_v37 = vmul.f32 %v18743_v12, %v18743_v12  ;;  %v5263_v33 = vmul.f32 %v18746_v30, %v18746_v30 }
 0x8a5   :  { %v5264_v0 = vmul.f32 %v18753_v42, %v18753_v42  ;;  %v18768_v32 = vmul.f32 %v17480_v49, %v5251_v20  ;;  %v5265_v5 = vmul.f32 %v18758_v27, %v18758_v27  ;;  %v5266_v40 = vmul.f32 %v18763_v56, %v18763_v56 }
 0x8a6   :  { %v5268_v25 = vadd.f32 %v5261_v21, %v5260_v54 }
 0x8a7   :  { %v5267_v47 = vmul.f32 %v18768_v32, %v18768_v32 }
 0x8a8   :  { %v5269_v1 = vadd.f32 %v5268_v25, %v5262_v37  ;;  %v10299_v37 = vld [vmem:[%s21108_s5 + $0x88] sm:$0xff]  ;;  %v10300_v25 = vld [vmem:[%s21108_s5 + $0x90] sm:$0xff] }
 0x8a9   :  { %v14311_v20 = vpack.c.bf16 %v10299_v37, %v10298_v7 }
 0x8aa   :  { %v5270_v9 = vadd.f32 %v5269_v1, %v5263_v33  ;;  %v10301_v33 = vld [vmem:[%s21108_s5 + $0x98] sm:$0xff] }
 0x8ab   :  { %v14315_v1 = vpack.c.bf16 %v10301_v33, %v10300_v25  ;;  %14312 = vmatprep.subr.bf16.mxu0 %v14311_v20  ;;  %v10307_v33 = vld [vmem:[%s21108_s5 + $0xc8] sm:$0xff] }
 0x8ac   :  { %v5271_v34 = vadd.f32 %v5270_v9, %v5264_v0  ;;  %v10302_v0 = vld [vmem:[%s21108_s5 + $0xa0] sm:$0xff]  ;;  %v10303_v9 = vld [vmem:[%s21108_s5 + $0xa8] sm:$0xff]  ;;  %14314 = vmatpush3.bf16.msra.mxu0 %v14311_v20 }
 0x8ad   :  { %14316 = vmatprep.subr.bf16.mxu0 %v14315_v1  ;;  %v10306_v20 = vld [vmem:[%s21108_s5 + $0xc0] sm:$0xff] }
 0x8ae   :  { %v5272_v26 = vadd.f32 %v5271_v34, %v5265_v5  ;;  %v14319_v5 = vpack.c.bf16 %v10303_v9, %v10302_v0  ;;  %v10308_v9 = vld [vmem:[%s21108_s5 + $0xd0] sm:$0xff] }
 0x8b0   :  { %v5273_v54 = vadd.f32 %v5272_v26, %v5266_v40  ;;  %14318 = vmatpush3.bf16.msra.mxu0 %v14315_v1  ;;  %v14327_v1 = vpack.c.bf16 %v10307_v33, %v10306_v20 }
 0x8b1   :  { %14320 = vmatprep.subr.bf16.mxu0 %v14319_v5 }
 0x8b2   :  { %v5274_v21 = vadd.f32 %v5273_v54, %v5267_v47  ;;  %v10304_v54 = vld [vmem:[%s21108_s5 + $0xb0] sm:$0xff] }
 0x8b4   :  { %5275 = vadd.xlane.f32.xlu0 %v5274_v21  ;;  %14322 = vmatpush3.bf16.msra.mxu0 %v14319_v5  ;;  %v10305_v21 = vld [vmem:[%s21108_s5 + $0xb8] sm:$0xff] }
 0x8b5   :  { %v14323_v7 = vpack.c.bf16 %v10305_v21, %v10304_v54  ;;  %v10309_v5 = vld [vmem:[%s21108_s5 + $0xd8] sm:$0xff]  ;;  %v10312_v54 = vld [vmem:[%s21108_s5 + $0xf0] sm:$0xff] }
 0x8b6   :  { %v10313_v21 = vld [vmem:[%s21108_s5 + $0xf8] sm:$0xff] }
 0x8b7   :  { %14324 = vmatprep.subr.bf16.mxu0 %v14323_v7 }
 0x8b8   :  { %14326 = vmatpush3.bf16.msra.mxu0 %v14323_v7  ;;  %v14339_v7 = vpack.c.bf16 %v10313_v21, %v10312_v54 }
 0x8b9   :  { %14328 = vmatprep.subr.bf16.mxu0 %v14327_v1 }
 0x8bc   :  { %14330 = vmatpush3.bf16.msra.mxu0 %v14327_v1 }
 0x941   :  { %v5276_v34 = vpop.xlane.xlu0 %5275 }
 0x942   :  { %v5277_v40 = vrot.slane %v5276_v34, 4 }
 0x944   :  { %v5278_v26 = vadd.f32 %v5277_v40, %v5276_v34  ;;  %v10310_v34 = vld [vmem:[%s21108_s5 + $0xe0] sm:$0xff]  ;;  %v14331_v40 = vpack.c.bf16 %v10309_v5, %v10308_v9 }
 0x946   :  { %v5279_v47 = vrot.slane %v5278_v26, 2  ;;  %14332 = vmatprep.subr.bf16.mxu0 %v14331_v40 }
 0x947   :  { %14334 = vmatpush3.bf16.msra.mxu0 %v14331_v40  ;;  %v18827_v40 = vld [vmem:[%s21107_s7 + $0x2] sm:$0x1] }
 0x948   :  { %v5280_v37 = vadd.f32 %v5279_v47, %v5278_v26  ;;  %v10311_v26 = vld [vmem:[%s21108_s5 + $0xe8] sm:$0xff] }
 0x949   :  { %v14335_v47 = vpack.c.bf16 %v10311_v26, %v10310_v34 }
 0x94a   :  { %v5281_v25 = vrot.slane %v5280_v37, 1 }
 0x94b   :  { %14336 = vmatprep.subr.bf16.mxu0 %v14335_v47 }
 0x94c   :  { %v5282_v0 = vadd.f32 %v5281_v25, %v5280_v37  ;;  %14338 = vmatpush3.bf16.msra.mxu0 %v14335_v47  ;;  %v5323_v37 = vpop.xlane.xlu1 %5322 }
 0x94d   :  { %14340 = vmatprep.subr.bf16.mxu0 %v14339_v7  ;;  %v5324_v25 = vrot.slane %v5323_v37, 4 }
 0x94e   :  { %15413 = vpush %v5282_v0 }
 0x94f   :  { %v5325_v20 = vadd.f32 %v5324_v25, %v5323_v37 }
 0x950   :  { %14342 = vmatpush3.bf16.msra.mxu0 %v14339_v7  ;;  %v18836_v7 = vld [vmem:[%s21107_s7 + $0x3] ss:$0 sm:$0xff] }
 0x951   :  { %v5326_v33 = vrot.slane %v5325_v20, 2 }
 0x953   :  { %v5327_v0 = vadd.f32 %v5326_v33, %v5325_v20 }
 0x955   :  { %v5328_v9 = vrot.slane %v5327_v0, 1 }
 0x957   :  { %v5329_v34 = vadd.f32 %v5328_v9, %v5327_v0 }
 0x97f   :  { %s15414_s3 = spop %15413 }
 0x980   :  { %s5284_s27 = smul.f32 0.00390625, %s15414_s3 }
 0x982   :  { %s5285_s28 = sadd.f32 1e-05, %s5284_s27 }
 0x984   :  { %v5286_v1 = vstv %s5285_s28 }
 0x985   :  { %15519 = vrsqrt.f32 %v5286_v1 }
 0x98f   :  { %v15520_v5 = vpop.eup %15519 }
 0x990   :  { %15415 = vpush %v15520_v5 }
 0x991   :  { %15417 = vpush %v5329_v34 }
 0x9c1   :  { %s15416_s10 = spop %15415 }
 0x9c2   :  { %v5289_v26 = vstv %s15416_s10  ;;  %s15418_s11 = spop %15417 }
 0x9c3   :  { %v5290_v47 = vmul.f32 %v5289_v26, %v18827_v40  ;;  %s5331_s12 = smul.f32 0.00390625, %s15418_s11 }
 0x9c5   :  { %v5294_v54 = vrot.slane %v5290_v47, %v17576_v52  ;;  %v18831_v21 = vstv %s5331_s12  ;;  %v21735_v47 = vld [vmem:[#allocation81_spill] sm:$0xff] }
 0x9c6   :  { %v5333_v37 = vsub.f32 %v18714_v51, %v18831_v21  ;;  %v5334_v25 = vsub.f32 %v18712_v62, %v18831_v21  ;;  %v5335_v20 = vsub.f32 %v18720_v35, %v18831_v21  ;;  %v5336_v33 = vsub.f32 %v18718_v24, %v18831_v21 }
 0x9c7   :  { %v5295_v1 = vmul.f32 %v5294_v54, %v18737_v48  ;;  %v5296_v0 = vmul.f32 %v5294_v54, %v18740_v11  ;;  %v5297_v9 = vmul.f32 %v5294_v54, %v18743_v12  ;;  %v5298_v5 = vmul.f32 %v5294_v54, %v18746_v30 }
 0x9c8   :  { %v5299_v34 = vmul.f32 %v5294_v54, %v18753_v42  ;;  %v5300_v51 = vmul.f32 %v5294_v54, %v18758_v27  ;;  %v5301_v62 = vmul.f32 %v5294_v54, %v18763_v56  ;;  %v5302_v26 = vmul.f32 %v5294_v54, %v18768_v32  ;;  %v21736_v32 = vld [vmem:[#allocation82_spill] sm:$0xff] }
 0x9c9   :  { %v5307_v35 = vadd.f32 %v18836_v7, %v5295_v1  ;;  %v5308_v24 = vadd.f32 %v18836_v7, %v5296_v0  ;;  %v5309_v48 = vadd.f32 %v18836_v7, %v5297_v9  ;;  %v5310_v11 = vadd.f32 %v18836_v7, %v5298_v5  ;;  %v21737_v1 = vld [vmem:[#allocation85_spill] sm:$0xff]  ;;  %v21738_v9 = vld [vmem:[#allocation86_spill] sm:$0xff] }
 0x9ca   :  { %v5311_v12 = vadd.f32 %v18836_v7, %v5299_v34  ;;  %v5312_v30 = vadd.f32 %v18836_v7, %v5300_v51  ;;  %v5313_v42 = vadd.f32 %v18836_v7, %v5301_v62  ;;  %v5314_v27 = vadd.f32 %v18836_v7, %v5302_v26  ;;  %v21739_v5 = vld [vmem:[#allocation89_spill] sm:$0xff]  ;;  %v21740_v51 = vld [vmem:[#allocation90_spill] sm:$0xff] }
 0x9cb   :  { %v18863_v56 = vadd.f32 %v21735_v47, %v5307_v35  ;;  %v18866_v54 = vadd.f32 %v21736_v32, %v5308_v24  ;;  %v18869_v0 = vadd.f32 %v21737_v1, %v5309_v48  ;;  %v18872_v57 = vadd.f32 %v21738_v9, %v5310_v11  ;;  %v21741_v62 = vld [vmem:[#allocation93_spill] sm:$0xff]  ;;  %v21742_v35 = vld [vmem:[#allocation94_spill] sm:$0xff] }
 0x9cc   :  { %v18875_v34 = vadd.f32 %v21739_v5, %v5311_v12  ;;  %v18878_v58 = vadd.f32 %v21740_v51, %v5312_v30  ;;  %v18881_v26 = vadd.f32 %v21741_v62, %v5313_v42  ;;  %v18884_v47 = vadd.f32 %v21742_v35, %v5314_v27 }
 0x9cd   :  { %5416 = vst [vmem:[#allocation2 + $0x10] sm:$0xff] %v18863_v56  ;;  %5417 = vst [vmem:[#allocation2 + $0x18] sm:$0xff] %v18866_v54  ;;  %v18891_v24 = vmul.f32 %v17480_v49, %v5333_v37  ;;  %v18894_v48 = vmul.f32 %v17480_v49, %v5334_v25  ;;  %v5497_v11 = vmul.f32 %v18863_v56, %v21603_v41  ;;  %v10332_v41 = vld [vmem:[%s21108_s5 + $0x190] sm:$0xff] }
 0x9ce   :  { %5418 = vst [vmem:[#allocation2 + $0x20] sm:$0xff] %v18869_v0  ;;  %5419 = vst [vmem:[#allocation2 + $0x28] sm:$0xff] %v18872_v57  ;;  %v5498_v12 = vmul.f32 %v18866_v54, %v21604_v36  ;;  %v5337_v37 = vsub.f32 %v18726_v13, %v18831_v21  ;;  %v5338_v25 = vsub.f32 %v18723_v43, %v18831_v21 }
 0x9cf   :  { %5420 = vst [vmem:[#allocation2 + $0x30] sm:$0xff] %v18875_v34  ;;  %5421 = vst [vmem:[#allocation2 + $0x38] sm:$0xff] %v18878_v58  ;;  %12760 = vmatmul.mubr.f32.vlgmr.msra.gmra.mrb[16].mxu0 %v5497_v11  ;;  %v18909_v30 = vmul.f32 %v17480_v49, %v5335_v20  ;;  %v18912_v42 = vmul.f32 %v17480_v49, %v5336_v33  ;;  %v5349_v27 = vmul.f32 %v18891_v24, %v18891_v24 }
 0x9d0   :  { %5422 = vst [vmem:[#allocation2 + $0x40] sm:$0xff] %v18881_v26  ;;  %5423 = vst [vmem:[#allocation2 + $0x48] sm:$0xff] %v18884_v47  ;;  %v5350_v32 = vmul.f32 %v18894_v48, %v18894_v48  ;;  %12762 = vmatprep.mubr.f32.mxu0 %v5498_v12  ;;  %v5339_v13 = vsub.f32 %v18732_v29, %v18831_v21  ;;  %v18921_v1 = vmul.f32 %v17480_v49, %v5337_v37 }
 0x9d1   :  { %v5351_v43 = vmul.f32 %v18909_v30, %v18909_v30  ;;  %v5499_v33 = vmul.f32 %v18869_v0, %v21606_v53  ;;  %v5340_v9 = vsub.f32 %v18729_v17, %v18831_v21  ;;  %v18930_v5 = vmul.f32 %v17480_v49, %v5338_v25  ;;  %v10330_v53 = vld [vmem:[%s21108_s5 + $0x180] sm:$0xff] }
 0x9d2   :  { %v5357_v20 = vadd.f32 %v5350_v32, %v5349_v27  ;;  %v5352_v51 = vmul.f32 %v18912_v42, %v18912_v42  ;;  %v5500_v62 = vmul.f32 %v18872_v57, %v21607_v16  ;;  %v18937_v35 = vmul.f32 %v17480_v49, %v5339_v13 }
 0x9d3   :  { %12763 = vmatmul.mubr.f32.gmra.mrb[18].mxu0 %v5499_v33  ;;  %v5353_v11 = vmul.f32 %v18921_v1, %v18921_v1  ;;  %v5501_v17 = vmul.f32 %v18875_v34, %v21608_v63  ;;  %v5502_v21 = vmul.f32 %v18878_v58, %v21609_v4  ;;  %v18946_v37 = vmul.f32 %v17480_v49, %v5340_v9  ;;  %v10328_v63 = vld [vmem:[%s21108_s5 + $0x170] sm:$0xff] }
 0x9d4   :  { %v5358_v29 = vadd.f32 %v5357_v20, %v5351_v43  ;;  %12765 = vmatprep.mubr.f32.mxu0 %v5500_v62  ;;  %v5354_v25 = vmul.f32 %v18930_v5, %v18930_v5  ;;  %v5355_v32 = vmul.f32 %v18937_v35, %v18937_v35  ;;  %v5503_v43 = vmul.f32 %v18881_v26, %v21610_v60  ;;  %v10326_v60 = vld [vmem:[%s21108_s5 + $0x160] sm:$0xff]  ;;  %v19190_v36 = vld [vmem:[#allocation2 + $0x11] sm:$0xff] }
 0x9d5   :  { %v5504_v20 = vmul.f32 %v18884_v47, %v21611_v39  ;;  %v5356_v49 = vmul.f32 %v18946_v37, %v18946_v37 }
 0x9d6   :  { %v5359_v12 = vadd.f32 %v5358_v29, %v5352_v51  ;;  %v19218_v6 = vld [vmem:[#allocation2 + $0x31] sm:$0xff] }
 0x9d7   :  { %12766 = vmatmul.mubr.f32.gmra.mrb[20].mxu0 %v5501_v17  ;;  %v19232_v2 = vld [vmem:[#allocation2 + $0x41] sm:$0xff] }
 0x9d8   :  { %v5360_v27 = vadd.f32 %v5359_v12, %v5353_v11  ;;  %12768 = vmatprep.mubr.f32.mxu0 %v5502_v21  ;;  %v5464_v11 = vld [vmem:[%s21108_s5] sm:$0xff]  ;;  %v5465_v12 = vld [vmem:[%s21108_s5 + $0x8] sm:$0xff] }
 0x9d9   :  { %v14343_v17 = vpack.c.bf16 %v5465_v12, %v5464_v11  ;;  %v5473_v12 = vld [vmem:[%s21108_s5 + $0x48] sm:$0xff] }
 0x9da   :  { %v5361_v13 = vadd.f32 %v5360_v27, %v5354_v25  ;;  %v5466_v27 = vld [vmem:[%s21108_s5 + $0x10] sm:$0xff] }
 0x9db   :  { %12769 = vmatmul.mubr.f32.gmra.mrb[22].mxu0 %v5503_v43  ;;  %14344 = vmatprep.subr.bf16.mxu0 %v14343_v17 }
 0x9dc   :  { %v5362_v33 = vadd.f32 %v5361_v13, %v5355_v32  ;;  %12771 = vmatprep.mubr.f32.mxu0 %v5504_v20  ;;  %14346 = vmatpush3.bf16.msra.mxu0 %v14343_v17  ;;  %v5467_v32 = vld [vmem:[%s21108_s5 + $0x18] sm:$0xff] }
 0x9dd   :  { %v14347_v13 = vpack.c.bf16 %v5467_v32, %v5466_v27  ;;  %v5476_v32 = vld [vmem:[%s21108_s5 + $0x60] sm:$0xff] }
 0x9de   :  { %v5363_v9 = vadd.f32 %v5362_v33, %v5356_v49  ;;  %v5468_v49 = vld [vmem:[%s21108_s5 + $0x20] sm:$0xff]  ;;  %v5469_v33 = vld [vmem:[%s21108_s5 + $0x28] sm:$0xff] }
 0x9df   :  { %14348 = vmatprep.subr.bf16.mxu0 %v14347_v13 }
 0x9e0   :  { %5364 = vadd.xlane.f32.xlu0 %v5363_v9  ;;  %14350 = vmatpush3.bf16.msra.mxu0 %v14347_v13  ;;  %v14351_v9 = vpack.c.bf16 %v5469_v33, %v5468_v49  ;;  %v5477_v13 = vld [vmem:[%s21108_s5 + $0x68] sm:$0xff]  ;;  %v5479_v49 = vld [vmem:[%s21108_s5 + $0x78] sm:$0xff] }
 0x9e2   :  { %14352 = vmatprep.subr.bf16.mxu0 %v14351_v9 }
 0x9e4   :  { %14354 = vmatpush3.bf16.msra.mxu0 %v14351_v9  ;;  %v10314_v9 = vld [vmem:[%s21108_s5 + $0x100] sm:$0xff] }
 0xa6d   :  { %v5365_v51 = vpop.xlane.xlu0 %5364 }
 0xa6e   :  { %v5366_v29 = vrot.slane %v5365_v51, 4 }
 0xa70   :  { %v5367_v62 = vadd.f32 %v5366_v29, %v5365_v51  ;;  %v5470_v51 = vld [vmem:[%s21108_s5 + $0x30] sm:$0xff]  ;;  %v5471_v29 = vld [vmem:[%s21108_s5 + $0x38] sm:$0xff] }
 0xa71   :  { %v14355_v11 = vpack.c.bf16 %v5471_v29, %v5470_v51  ;;  %v10315_v51 = vld [vmem:[%s21108_s5 + $0x108] sm:$0xff] }
 0xa72   :  { %v5368_v21 = vrot.slane %v5367_v62, 2  ;;  %v19012_v29 = vpack.c.bf16 %v10315_v51, %v10314_v9  ;;  %v21743_v51 = vld [vmem:[#allocation97_spill] sm:$0xff] }
 0xa73   :  { %14356 = vmatprep.subr.bf16.mxu0 %v14355_v11 }
 0xa74   :  { %v5369_v25 = vadd.f32 %v5368_v21, %v5367_v62  ;;  %v5472_v62 = vld [vmem:[%s21108_s5 + $0x40] sm:$0xff]  ;;  %v5474_v21 = vld [vmem:[%s21108_s5 + $0x50] sm:$0xff]  ;;  %14358 = vmatpush3.bf16.msra.mxu0 %v14355_v11 }
 0xa75   :  { %v14359_v17 = vpack.c.bf16 %v5473_v12, %v5472_v62 }
 0xa76   :  { %v5370_v43 = vrot.slane %v5369_v25, 1 }
 0xa77   :  { %14360 = vmatprep.subr.bf16.mxu0 %v14359_v17 }
 0xa78   :  { %v5371_v20 = vadd.f32 %v5370_v43, %v5369_v25  ;;  %v5475_v25 = vld [vmem:[%s21108_s5 + $0x58] sm:$0xff]  ;;  %14362 = vmatpush3.bf16.msra.mxu0 %v14359_v17  ;;  %v14367_v43 = vpack.c.bf16 %v5477_v13, %v5476_v32 }
 0xa79   :  { %v14363_v27 = vpack.c.bf16 %v5475_v25, %v5474_v21 }
 0xa7a   :  { %15419 = vpush %v5371_v20  ;;  %v5478_v20 = vld [vmem:[%s21108_s5 + $0x70] sm:$0xff] }
 0xa7b   :  { %14364 = vmatprep.subr.bf16.mxu0 %v14363_v27  ;;  %v14371_v33 = vpack.c.bf16 %v5479_v49, %v5478_v20 }
 0xa7c   :  { %14366 = vmatpush3.bf16.msra.mxu0 %v14363_v27 }
 0xa7d   :  { %14368 = vmatprep.subr.bf16.mxu0 %v14367_v43 }
 0xa80   :  { %14370 = vmatpush3.bf16.msra.mxu0 %v14367_v43 }
 0xa81   :  { %14372 = vmatprep.subr.bf16.mxu0 %v14371_v33 }
 0xa84   :  { %14374 = vmatpush3.bf16.msra.mxu0 %v14371_v33 }
 0xa85   :  { %14376 = vmatprep.subr.bf16.mxu0 %v19012_v29 }
 0xaab   :  { %s15420_s21 = spop %15419 }
 0xaac   :  { %s5373_s22 = smul.f32 0.00390625, %s15420_s21 }
 0xaae   :  { %s5374_s23 = sadd.f32 1e-05, %s5373_s22 }
 0xab0   :  { %v5375_v62 = vstv %s5374_s23 }
 0xab1   :  { %15521 = vrsqrt.f32 %v5375_v62 }
 0xabb   :  { %v15522_v11 = vpop.eup %15521 }
 0xabc   :  { %15421 = vpush %v15522_v11  ;;  %v21745_v11 = vld [vmem:[#allocation101_spill] sm:$0xff] }
 0xaed   :  { %s15422_s24 = spop %15421 }
 0xaee   :  { %v5378_v12 = vstv %s15422_s24 }
 0xaef   :  { %v5379_v17 = vmul.f32 %v5378_v12, %v18827_v40 }
 0xaf1   :  { %v5383_v21 = vrot.slane %v5379_v17, %v17576_v52  ;;  %v21746_v17 = vld [vmem:[#allocation102_spill] sm:$0xff]  ;;  %v10334_v52 = vld [vmem:[%s21108_s5 + $0x1a0] sm:$0xff] }
 0xaf3   :  { %v5384_v25 = vmul.f32 %v5383_v21, %v18891_v24  ;;  %v5385_v27 = vmul.f32 %v5383_v21, %v18894_v48  ;;  %v5386_v32 = vmul.f32 %v5383_v21, %v18909_v30  ;;  %v5387_v13 = vmul.f32 %v5383_v21, %v18912_v42 }
 0xaf4   :  { %v5388_v43 = vmul.f32 %v5383_v21, %v18921_v1  ;;  %v5389_v20 = vmul.f32 %v5383_v21, %v18930_v5  ;;  %v5390_v49 = vmul.f32 %v5383_v21, %v18937_v35  ;;  %v5391_v33 = vmul.f32 %v5383_v21, %v18946_v37  ;;  %v21744_v37 = vld [vmem:[#allocation98_spill] sm:$0xff] }
 0xaf5   :  { %v5392_v40 = vadd.f32 %v18836_v7, %v5384_v25  ;;  %v5393_v9 = vadd.f32 %v18836_v7, %v5385_v27  ;;  %v5394_v24 = vadd.f32 %v18836_v7, %v5386_v32  ;;  %v5395_v48 = vadd.f32 %v18836_v7, %v5387_v13  ;;  %v21747_v25 = vld [vmem:[#allocation105_spill] sm:$0xff]  ;;  %v21748_v32 = vld [vmem:[#allocation106_spill] sm:$0xff] }
 0xaf6   :  { %v5396_v30 = vadd.f32 %v18836_v7, %v5388_v43  ;;  %v5397_v42 = vadd.f32 %v18836_v7, %v5389_v20  ;;  %v5398_v1 = vadd.f32 %v18836_v7, %v5390_v49  ;;  %v5399_v5 = vadd.f32 %v18836_v7, %v5391_v33  ;;  %v21749_v43 = vld [vmem:[#allocation109_spill] sm:$0xff]  ;;  %v21750_v20 = vld [vmem:[#allocation110_spill] sm:$0xff] }
 0xaf7   :  { %v19034_v35 = vadd.f32 %v21743_v51, %v5392_v40  ;;  %v19037_v62 = vadd.f32 %v21744_v37, %v5393_v9  ;;  %v19040_v12 = vadd.f32 %v21745_v11, %v5394_v24  ;;  %v19043_v21 = vadd.f32 %v21746_v17, %v5395_v48  ;;  %v21751_v24 = vld [vmem:[#allocation16_spill] sm:$0xff]  ;;  %v21754_v37 = vld [vmem:[#allocation17_spill] sm:$0xff] }
 0xaf8   :  { %v19046_v27 = vadd.f32 %v21747_v25, %v5396_v30  ;;  %v19049_v13 = vadd.f32 %v21748_v32, %v5397_v42  ;;  %v19052_v7 = vadd.f32 %v21749_v43, %v5398_v1  ;;  %v19055_v49 = vadd.f32 %v21750_v20, %v5399_v5  ;;  %v21752_v30 = vld [vmem:[#allocation15_spill] sm:$0xff]  ;;  %v21753_v1 = vld [vmem:[#allocation18_spill] sm:$0xff]  ;;  %v21755_v17 = vld [vmem:[#allocation20_spill] sm:$0xff] }
 0xaf9   :  { %5424 = vst [vmem:[#allocation2 + $0x50] sm:$0xff] %v19034_v35  ;;  %5425 = vst [vmem:[#allocation2 + $0x58] sm:$0xff] %v19037_v62  ;;  %v5505_v33 = vmul.f32 %v19034_v35, %v21615_v59  ;;  %v5506_v40 = vmul.f32 %v19037_v62, %v21616_v8  ;;  %v5507_v9 = vmul.f32 %v19040_v12, %v21617_v55  ;;  %v5432_v51 = vld [vmem:[#allocation2 + $0x7] sm:$0xff]  ;;  %v19080_v32 = vld [vmem:[#allocation2 + $0xf] sm:$0xff] }
 0xafa   :  { %5426 = vst [vmem:[#allocation2 + $0x60] sm:$0xff] %v19040_v12  ;;  %5427 = vst [vmem:[#allocation2 + $0x68] sm:$0xff] %v19043_v21  ;;  %v5508_v48 = vmul.f32 %v19043_v21, %v21751_v24  ;;  %v5509_v42 = vmul.f32 %v19046_v27, %v21752_v30  ;;  %v5510_v5 = vmul.f32 %v19049_v13, %v21753_v1  ;;  %v10316_v43 = vld [vmem:[%s21108_s5 + $0x110] sm:$0xff]  ;;  %v10317_v20 = vld [vmem:[%s21108_s5 + $0x118] sm:$0xff] }
 0xafb   :  { %5428 = vst [vmem:[#allocation2 + $0x70] sm:$0xff] %v19046_v27  ;;  %5429 = vst [vmem:[#allocation2 + $0x78] sm:$0xff] %v19049_v13  ;;  %12772 = vmatmul.mubr.f32.gmra.mrb[24].mxu0 %v5505_v33  ;;  %v5511_v11 = vmul.f32 %v19052_v7, %v21754_v37  ;;  %v5448_v25 = vmul.f32 %v5432_v51, %v21755_v17  ;;  %v19088_v33 = vld [vmem:[#allocation2 + $0x17] sm:$0xff]  ;;  %v19094_v51 = vld [vmem:[#allocation2 + $0x1f] sm:$0xff] }
 0xafc   :  { %5430 = vst [vmem:[#allocation2 + $0x80] sm:$0xff] %v19052_v7  ;;  %5431 = vst [vmem:[#allocation2 + $0x88] sm:$0xff] %v19055_v49  ;;  %12774 = vmatprep.mubr.f32.mxu0 %v5506_v40  ;;  %v21756_v40 = vld [vmem:[#allocation19_spill] sm:$0xff]  ;;  %v19109_v1 = vld [vmem:[#allocation2 + $0x2f] sm:$0xff] }
 0xafd   :  { %v10318_v17 = vld [vmem:[%s21108_s5 + $0x120] sm:$0xff]  ;;  %v10320_v30 = vld [vmem:[%s21108_s5 + $0x130] sm:$0xff] }
 0xafe   :  { %v19102_v37 = vld [vmem:[#allocation2 + $0x27] sm:$0xff]  ;;  %v19123_v24 = vld [vmem:[#allocation2 + $0x3f] sm:$0xff]  ;;  %v10324_v59 = vld [vmem:[%s21108_s5 + $0x150] sm:$0xff] }
 0xaff   :  { %12775 = vmatmul.mubr.f32.gmra.mrb[26].mxu0 %v5507_v9  ;;  %v5449_v9 = vmul.f32 %v19080_v32, %v21756_v40  ;;  %v10322_v55 = vld [vmem:[%s21108_s5 + $0x140] sm:$0xff] }
 0xb00   :  { %12777 = vmatprep.mubr.f32.mxu0 %v5508_v48  ;;  %v14379_v48 = vpack.c.bf16 %v10317_v20, %v10316_v43  ;;  %v19137_v8 = vld [vmem:[#allocation2 + $0x4f] sm:$0xff] }
 0xb01   :  { %v19151_v39 = vld [vmem:[#allocation2 + $0x5f] sm:$0xff]  ;;  %v19246_v14 = vld [vmem:[#allocation2 + $0x51] sm:$0xff] }
 0xb02   :  { %v19165_v4 = vld [vmem:[#allocation2 + $0x6f] sm:$0xff]  ;;  %v19260_v10 = vld [vmem:[#allocation2 + $0x61] sm:$0xff] }
 0xb03   :  { %12778 = vmatmul.mubr.f32.gmra.mrb[28].mxu0 %v5509_v42  ;;  %v21757_v42 = vld [vmem:[#allocation22_spill] sm:$0xff]  ;;  %21782 = vst [vmem:[#allocation150_spill] sm:$0xff] %v19260_v10 }
 0xb04   :  { %12780 = vmatprep.mubr.f32.mxu0 %v5510_v5  ;;  %v5450_v5 = vmul.f32 %v19088_v33, %v21757_v42  ;;  %v21759_v42 = vld [vmem:[#allocation24_spill] sm:$0xff]  ;;  %v19179_v16 = vld [vmem:[#allocation2 + $0x7f] sm:$0xff]  ;;  %v19274_v44 = vld [vmem:[#allocation2 + $0x71] sm:$0xff] }
 0xb05   :  { %v5452_v40 = vmul.f32 %v19102_v37, %v21759_v42  ;;  %v21761_v42 = vld [vmem:[#allocation26_spill] sm:$0xff] }
 0xb07   :  { %12781 = vmatmul.mubr.f32.gmra.mrb[30].mxu0 %v5511_v11  ;;  %v10319_v11 = vld [vmem:[%s21108_s5 + $0x128] sm:$0xff] }
 0xb08   :  { %12815 = vmatprep.mubr.f32.mxu0 %v5448_v25  ;;  %v21758_v25 = vld [vmem:[#allocation21_spill] sm:$0xff]  ;;  %v14383_v20 = vpack.c.bf16 %v10319_v11, %v10318_v17  ;;  %v21760_v17 = vld [vmem:[#allocation23_spill] sm:$0xff] }
 0xb09   :  { %v5451_v43 = vmul.f32 %v19094_v51, %v21758_v25 }
 0xb0b   :  { %12816 = vmatmul.mubr.f32.vlgmr.msra.gmra.mrb[16].mxu0 %v5449_v9  ;;  %v10321_v9 = vld [vmem:[%s21108_s5 + $0x138] sm:$0xff] }
 0xb0c   :  { %14378 = vmatpush3.bf16.msra.mxu0 %v19012_v29  ;;  %12818 = vmatprep.mubr.f32.mxu0 %v5450_v5  ;;  %v19117_v29 = vld [vmem:[#allocation2 + $0x37] sm:$0xff]  ;;  %v5453_v5 = vmul.f32 %v19109_v1, %v21760_v17  ;;  %v14387_v11 = vpack.c.bf16 %v10321_v9, %v10320_v30 }
 0xb0d   :  { %14380 = vmatprep.subr.bf16.mxu0 %v14379_v48  ;;  %v5454_v25 = vmul.f32 %v19117_v29, %v21761_v42  ;;  %v21762_v30 = vld [vmem:[#allocation25_spill] sm:$0xff]  ;;  %v21763_v42 = vld [vmem:[#allocation28_spill] sm:$0xff] }
 0xb0f   :  { %12819 = vmatmul.mubr.f32.gmra.mrb[18].mxu0 %v5451_v43  ;;  %v10323_v43 = vld [vmem:[%s21108_s5 + $0x148] sm:$0xff] }
 0xb10   :  { %14382 = vmatpush3.bf16.msra.mxu0 %v14379_v48  ;;  %12821 = vmatprep.mubr.f32.mxu0 %v5452_v40  ;;  %v19131_v40 = vld [vmem:[#allocation2 + $0x47] sm:$0xff]  ;;  %v5455_v48 = vmul.f32 %v19123_v24, %v21762_v30  ;;  %v14391_v9 = vpack.c.bf16 %v10323_v43, %v10322_v55 }
 0xb11   :  { %14384 = vmatprep.subr.bf16.mxu0 %v14383_v20  ;;  %v5456_v17 = vmul.f32 %v19131_v40, %v21763_v42  ;;  %v21764_v55 = vld [vmem:[#allocation27_spill] sm:$0xff]  ;;  %v21765_v42 = vld [vmem:[#allocation30_spill] sm:$0xff] }
 0xb13   :  { %12822 = vmatmul.mubr.f32.gmra.mrb[20].mxu0 %v5453_v5  ;;  %v10325_v5 = vld [vmem:[%s21108_s5 + $0x158] sm:$0xff] }
 0xb14   :  { %14386 = vmatpush3.bf16.msra.mxu0 %v14383_v20  ;;  %12824 = vmatprep.mubr.f32.mxu0 %v5454_v25  ;;  %v19145_v25 = vld [vmem:[#allocation2 + $0x57] sm:$0xff]  ;;  %v5457_v20 = vmul.f32 %v19137_v8, %v21764_v55  ;;  %v14395_v43 = vpack.c.bf16 %v10325_v5, %v10324_v59 }
 0xb15   :  { %14388 = vmatprep.subr.bf16.mxu0 %v14387_v11  ;;  %v5458_v30 = vmul.f32 %v19145_v25, %v21765_v42  ;;  %v21766_v59 = vld [vmem:[#allocation29_spill] sm:$0xff]  ;;  %v21767_v42 = vld [vmem:[#allocation32_spill] sm:$0xff] }
 0xb17   :  { %12825 = vmatmul.mubr.f32.gmra.mrb[22].mxu0 %v5455_v48  ;;  %v10327_v48 = vld [vmem:[%s21108_s5 + $0x168] sm:$0xff] }
 0xb18   :  { %14390 = vmatpush3.bf16.msra.mxu0 %v14387_v11  ;;  %12827 = vmatprep.mubr.f32.mxu0 %v5456_v17  ;;  %v19159_v17 = vld [vmem:[#allocation2 + $0x67] sm:$0xff]  ;;  %v5459_v11 = vmul.f32 %v19151_v39, %v21766_v59  ;;  %v14399_v5 = vpack.c.bf16 %v10327_v48, %v10326_v60 }
 0xb19   :  { %14392 = vmatprep.subr.bf16.mxu0 %v14391_v9  ;;  %v5460_v55 = vmul.f32 %v19159_v17, %v21767_v42  ;;  %v21768_v60 = vld [vmem:[#allocation31_spill] sm:$0xff]  ;;  %v21769_v42 = vld [vmem:[#allocation34_spill] sm:$0xff] }
 0xb1b   :  { %12828 = vmatmul.mubr.f32.gmra.mrb[24].mxu0 %v5457_v20  ;;  %v10329_v20 = vld [vmem:[%s21108_s5 + $0x178] sm:$0xff] }
 0xb1c   :  { %14394 = vmatpush3.bf16.msra.mxu0 %v14391_v9  ;;  %12830 = vmatprep.mubr.f32.mxu0 %v5458_v30  ;;  %v19173_v30 = vld [vmem:[#allocation2 + $0x77] sm:$0xff]  ;;  %v5461_v9 = vmul.f32 %v19165_v4, %v21768_v60  ;;  %v14403_v48 = vpack.c.bf16 %v10329_v20, %v10328_v63 }
 0xb1d   :  { %14396 = vmatprep.subr.bf16.mxu0 %v14395_v43  ;;  %v5462_v59 = vmul.f32 %v19173_v30, %v21769_v42  ;;  %v21771_v42 = vld [vmem:[#allocation36_spill] sm:$0xff] }
 0xb1f   :  { %12831 = vmatmul.mubr.f32.gmra.mrb[26].mxu0 %v5459_v11  ;;  %v10331_v11 = vld [vmem:[%s21108_s5 + $0x188] sm:$0xff] }
 0xb20   :  { %14398 = vmatpush3.bf16.msra.mxu0 %v14395_v43  ;;  %12833 = vmatprep.mubr.f32.mxu0 %v5460_v55  ;;  %v5819_v55 = vld [vmem:[#allocation2 + $0x9] sm:$0xff]  ;;  %v14407_v20 = vpack.c.bf16 %v10331_v11, %v10330_v53 }
 0xb21   :  { %14400 = vmatprep.subr.bf16.mxu0 %v14399_v5  ;;  %v21770_v43 = vld [vmem:[#allocation33_spill] sm:$0xff]  ;;  %v5835_v60 = vmul.f32 %v5819_v55, %v21771_v42  ;;  %v21773_v55 = vld [vmem:[#allocation38_spill] sm:$0xff] }
 0xb22   :  { %v5463_v63 = vmul.f32 %v19179_v16, %v21770_v43  ;;  %v19204_v43 = vld [vmem:[#allocation2 + $0x21] sm:$0xff] }
 0xb23   :  { %12834 = vmatmul.mubr.f32.gmra.mrb[28].mxu0 %v5461_v9  ;;  %v10333_v9 = vld [vmem:[%s21108_s5 + $0x198] sm:$0xff] }
 0xb24   :  { %14402 = vmatpush3.bf16.msra.mxu0 %v14399_v5  ;;  %12836 = vmatprep.mubr.f32.mxu0 %v5462_v59  ;;  %v19198_v5 = vld [vmem:[#allocation2 + $0x19] sm:$0xff]  ;;  %v14411_v11 = vpack.c.bf16 %v10333_v9, %v10332_v41  ;;  %v21774_v41 = vld [vmem:[#allocation37_spill] sm:$0xff] }
 0xb25   :  { %14404 = vmatprep.subr.bf16.mxu0 %v14403_v48  ;;  %v21772_v59 = vld [vmem:[#allocation35_spill] sm:$0xff]  ;;  %v5837_v42 = vmul.f32 %v19198_v5, %v21773_v55  ;;  %v21775_v55 = vld [vmem:[#allocation42_spill] sm:$0xff] }
 0xb26   :  { %v5836_v53 = vmul.f32 %v19190_v36, %v21772_v59 }
 0xb27   :  { %12837 = vmatmul.mubr.f32.gmra.mrb[30].mxu0 %v5463_v63  ;;  %v10335_v63 = vld [vmem:[%s21108_s5 + $0x1a8] sm:$0xff] }
 0xb28   :  { %14406 = vmatpush3.bf16.msra.mxu0 %v14403_v48  ;;  %12871 = vmatprep.mubr.f32.mxu0 %v5835_v60  ;;  %v19212_v60 = vld [vmem:[#allocation2 + $0x29] sm:$0xff]  ;;  %v5838_v48 = vmul.f32 %v19204_v43, %v21774_v41  ;;  %v14415_v9 = vpack.c.bf16 %v10335_v63, %v10334_v52 }
 0xb29   :  { %14408 = vmatprep.subr.bf16.mxu0 %v14407_v20  ;;  %v5839_v59 = vmul.f32 %v19212_v60, %v21775_v55  ;;  %v21776_v52 = vld [vmem:[#allocation41_spill] sm:$0xff]  ;;  %v21777_v55 = vld [vmem:[#allocation46_spill] sm:$0xff] }
 0xb2b   :  { %12872 = vmatmul.mubr.f32.vlgmr.msra.gmra.mrb[16].mxu0 %v5836_v53  ;;  %v10337_v53 = vld [vmem:[%s21108_s5 + $0x1b8] sm:$0xff] }
 0xb2c   :  { %14410 = vmatpush3.bf16.msra.mxu0 %v14407_v20  ;;  %12874 = vmatprep.mubr.f32.mxu0 %v5837_v42  ;;  %v19226_v42 = vld [vmem:[#allocation2 + $0x39] sm:$0xff]  ;;  %v5840_v20 = vmul.f32 %v19218_v6, %v21776_v52  ;;  %v14419_v63 = vpack.c.bf16 %v10337_v53, %v10336_v45  ;;  %v21778_v45 = vld [vmem:[#allocation45_spill] sm:$0xff] }
 0xb2d   :  { %14412 = vmatprep.subr.bf16.mxu0 %v14411_v11  ;;  %v5841_v41 = vmul.f32 %v19226_v42, %v21777_v55  ;;  %v21779_v55 = vld [vmem:[#allocation50_spill] sm:$0xff] }
 0xb2f   :  { %12875 = vmatmul.mubr.f32.gmra.mrb[18].mxu0 %v5838_v48  ;;  %v10339_v48 = vld [vmem:[%s21108_s5 + $0x1c8] sm:$0xff] }
 0xb30   :  { %14414 = vmatpush3.bf16.msra.mxu0 %v14411_v11  ;;  %12877 = vmatprep.mubr.f32.mxu0 %v5839_v59  ;;  %v19240_v59 = vld [vmem:[#allocation2 + $0x49] sm:$0xff]  ;;  %v5842_v11 = vmul.f32 %v19232_v2, %v21778_v45  ;;  %v14423_v53 = vpack.c.bf16 %v10339_v48, %v10338_v46 }
 0xb31   :  { %14416 = vmatprep.subr.bf16.mxu0 %v14415_v9  ;;  %v5843_v52 = vmul.f32 %v19240_v59, %v21779_v55  ;;  %v21780_v46 = vld [vmem:[#allocation49_spill] sm:$0xff]  ;;  %v21781_v55 = vld [vmem:[#allocation54_spill] sm:$0xff] }
 0xb33   :  { %12878 = vmatmul.mubr.f32.gmra.mrb[20].mxu0 %v5840_v20  ;;  %v10341_v20 = vld [vmem:[%s21108_s5 + $0x1d8] sm:$0xff] }
 0xb34   :  { %14418 = vmatpush3.bf16.msra.mxu0 %v14415_v9  ;;  %12880 = vmatprep.mubr.f32.mxu0 %v5841_v41  ;;  %v19254_v41 = vld [vmem:[#allocation2 + $0x59] sm:$0xff]  ;;  %v5844_v9 = vmul.f32 %v19246_v14, %v21780_v46  ;;  %v14427_v48 = vpack.c.bf16 %v10341_v20, %v10340_v19  ;;  %v21784_v19 = vld [vmem:[#allocation53_spill] sm:$0xff] }
 0xb35   :  { %14420 = vmatprep.subr.bf16.mxu0 %v14419_v63  ;;  %v5845_v45 = vmul.f32 %v19254_v41, %v21781_v55  ;;  %v21785_v55 = vld [vmem:[#allocation58_spill] sm:$0xff] }
 0xb37   :  { %12881 = vmatmul.mubr.f32.gmra.mrb[22].mxu0 %v5842_v11  ;;  %v10343_v11 = vld [vmem:[%s21108_s5 + $0x1e8] sm:$0xff] }
 0xb38   :  { %14422 = vmatpush3.bf16.msra.mxu0 %v14419_v63  ;;  %12883 = vmatprep.mubr.f32.mxu0 %v5843_v52  ;;  %v19268_v52 = vld [vmem:[#allocation2 + $0x69] sm:$0xff]  ;;  %v5846_v63 = vmul.f32 %v19260_v10, %v21784_v19  ;;  %v14431_v20 = vpack.c.bf16 %v10343_v11, %v10342_v31  ;;  %v10346_v10 = vld [vmem:[%s21108_s5 + $0x200] sm:$0xff] }
 0xb39   :  { %14424 = vmatprep.subr.bf16.mxu0 %v14423_v53  ;;  %21783 = vst [vmem:[#allocation151_spill] sm:$0xff] %v19268_v52  ;;  %v5847_v46 = vmul.f32 %v19268_v52, %v21785_v55  ;;  %v21786_v31 = vld [vmem:[#allocation57_spill] sm:$0xff]  ;;  %v21787_v55 = vld [vmem:[#allocation60_spill] sm:$0xff] }
 0xb3a   :  { %v19288_v52 = vld [vmem:[#allocation2 + $0x81] sm:$0xff] }
 0xb3b   :  { %12884 = vmatmul.mubr.f32.gmra.mrb[24].mxu0 %v5844_v9  ;;  %v10345_v9 = vld [vmem:[%s21108_s5 + $0x1f8] sm:$0xff] }
 0xb3c   :  { %14426 = vmatpush3.bf16.msra.mxu0 %v14423_v53  ;;  %12886 = vmatprep.mubr.f32.mxu0 %v5845_v45  ;;  %v19282_v45 = vld [vmem:[#allocation2 + $0x79] sm:$0xff]  ;;  %v5848_v53 = vmul.f32 %v19274_v44, %v21786_v31  ;;  %v14435_v11 = vpack.c.bf16 %v10345_v9, %v10344_v38  ;;  %v5850_v38 = vmul.f32 %v19288_v52, %v21653_v3 }
 0xb3d   :  { %14428 = vmatprep.subr.bf16.mxu0 %v14427_v48  ;;  %v5849_v19 = vmul.f32 %v19282_v45, %v21787_v55  ;;  %v10348_v55 = vld [vmem:[%s21108_s5 + $0x210] sm:$0xff]  ;;  %v10349_v31 = vld [vmem:[%s21108_s5 + $0x218] sm:$0xff] }
 0xb3f   :  { %12887 = vmatmul.mubr.f32.gmra.mrb[26].mxu0 %v5846_v63  ;;  %v10347_v63 = vld [vmem:[%s21108_s5 + $0x208] sm:$0xff] }
 0xb40   :  { %14430 = vmatpush3.bf16.msra.mxu0 %v14427_v48  ;;  %12889 = vmatprep.mubr.f32.mxu0 %v5847_v46  ;;  %v14439_v46 = vpack.c.bf16 %v10347_v63, %v10346_v10  ;;  %v21788_v48 = vld [vmem:[#allocation62_spill] sm:$0xff]  ;;  %v21790_v10 = vld [vmem:[#allocation64_spill] sm:$0xff] }
 0xb41   :  { %14432 = vmatprep.subr.bf16.mxu0 %v14431_v20  ;;  %v6045_v9 = vmul.f32 %v19080_v32, %v21788_v48  ;;  %v6047_v63 = vmul.f32 %v19094_v51, %v21790_v10  ;;  %v10350_v32 = vld [vmem:[%s21108_s5 + $0x220] sm:$0xff]  ;;  %v10351_v48 = vld [vmem:[%s21108_s5 + $0x228] sm:$0xff]  ;;  %v10352_v10 = vld [vmem:[%s21108_s5 + $0x230] sm:$0xff] }
 0xb43   :  { %12890 = vmatmul.mubr.f32.gmra.mrb[28].mxu0 %v5848_v53  ;;  %v14443_v53 = vpack.c.bf16 %v10349_v31, %v10348_v55  ;;  %v21792_v55 = vld [vmem:[#allocation66_spill] sm:$0xff] }
 0xb44   :  { %14434 = vmatpush3.bf16.msra.mxu0 %v14431_v20  ;;  %12892 = vmatprep.mubr.f32.mxu0 %v5849_v19  ;;  %v21789_v19 = vld [vmem:[#allocation61_spill] sm:$0xff]  ;;  %v6049_v31 = vmul.f32 %v19109_v1, %v21792_v55  ;;  %v10354_v55 = vld [vmem:[%s21108_s5 + $0x240] sm:$0xff] }
 0xb45   :  { %14436 = vmatprep.subr.bf16.mxu0 %v14435_v11  ;;  %v6046_v20 = vmul.f32 %v19088_v33, %v21789_v19  ;;  %v10353_v19 = vld [vmem:[%s21108_s5 + $0x238] sm:$0xff] }
 0xb47   :  { %12893 = vmatmul.mubr.f32.gmra.mrb[30].mxu0 %v5850_v38 }
 0xb48   :  { %14438 = vmatpush3.bf16.msra.mxu0 %v14435_v11  ;;  %12927 = vmatprep.mubr.f32.mxu0 %v6045_v9  ;;  %v21791_v11 = vld [vmem:[#allocation63_spill] sm:$0xff]  ;;  %v14447_v9 = vpack.c.bf16 %v10351_v48, %v10350_v32  ;;  %v21794_v48 = vld [vmem:[#allocation68_spill] sm:$0xff] }
 0xb49   :  { %14440 = vmatprep.subr.bf16.mxu0 %v14439_v46  ;;  %v6048_v38 = vmul.f32 %v19102_v37, %v21791_v11  ;;  %v6051_v32 = vmul.f32 %v19123_v24, %v21794_v48  ;;  %v10355_v11 = vld [vmem:[%s21108_s5 + $0x248] sm:$0xff]  ;;  %v10356_v48 = vld [vmem:[%s21108_s5 + $0x250] sm:$0xff] }
 0xb4b   :  { %12928 = vmatmul.mubr.f32.vlgmr.msra.gmra.mrb[16].mxu0 %v6046_v20 }
 0xb4c   :  { %14442 = vmatpush3.bf16.msra.mxu0 %v14439_v46  ;;  %12930 = vmatprep.mubr.f32.mxu0 %v6047_v63  ;;  %v21793_v46 = vld [vmem:[#allocation65_spill] sm:$0xff]  ;;  %v14451_v63 = vpack.c.bf16 %v10353_v19, %v10352_v10  ;;  %v21796_v19 = vld [vmem:[#allocation70_spill] sm:$0xff] }
 0xb4d   :  { %14444 = vmatprep.subr.bf16.mxu0 %v14443_v53  ;;  %v6050_v20 = vmul.f32 %v19117_v29, %v21793_v46  ;;  %v6053_v10 = vmul.f32 %v19137_v8, %v21796_v19  ;;  %v10357_v46 = vld [vmem:[%s21108_s5 + $0x258] sm:$0xff]  ;;  %v10358_v19 = vld [vmem:[%s21108_s5 + $0x260] sm:$0xff] }
 0xb4f   :  { %12931 = vmatmul.mubr.f32.gmra.mrb[18].mxu0 %v6048_v38 }
 0xb50   :  { %14446 = vmatpush3.bf16.msra.mxu0 %v14443_v53  ;;  %12933 = vmatprep.mubr.f32.mxu0 %v6049_v31  ;;  %v21795_v53 = vld [vmem:[#allocation67_spill] sm:$0xff]  ;;  %v14455_v31 = vpack.c.bf16 %v10355_v11, %v10354_v55  ;;  %v21798_v11 = vld [vmem:[#allocation72_spill] sm:$0xff] }
 0xb51   :  { %14448 = vmatprep.subr.bf16.mxu0 %v14447_v9  ;;  %v6052_v38 = vmul.f32 %v19131_v40, %v21795_v53  ;;  %v6055_v55 = vmul.f32 %v19151_v39, %v21798_v11  ;;  %v10359_v53 = vld [vmem:[%s21108_s5 + $0x268] sm:$0xff]  ;;  %v10360_v11 = vld [vmem:[%s21108_s5 + $0x270] sm:$0xff] }
 0xb53   :  { %12934 = vmatmul.mubr.f32.gmra.mrb[20].mxu0 %v6050_v20 }
 0xb54   :  { %14450 = vmatpush3.bf16.msra.mxu0 %v14447_v9  ;;  %12936 = vmatprep.mubr.f32.mxu0 %v6051_v32  ;;  %v21797_v9 = vld [vmem:[#allocation69_spill] sm:$0xff]  ;;  %v14459_v32 = vpack.c.bf16 %v10357_v46, %v10356_v48  ;;  %v21800_v46 = vld [vmem:[#allocation74_spill] sm:$0xff] }
 0xb55   :  { %14452 = vmatprep.subr.bf16.mxu0 %v14451_v63  ;;  %v6054_v20 = vmul.f32 %v19145_v25, %v21797_v9  ;;  %v6057_v48 = vmul.f32 %v19165_v4, %v21800_v46  ;;  %v10361_v9 = vld [vmem:[%s21108_s5 + $0x278] sm:$0xff]  ;;  %v19370_v46 = vld [vmem:[#allocation2 + $0x87] sm:$0xff] }
 0xb57   :  { %12937 = vmatmul.mubr.f32.gmra.mrb[22].mxu0 %v6052_v38 }
 0xb58   :  { %14454 = vmatpush3.bf16.msra.mxu0 %v14451_v63  ;;  %12939 = vmatprep.mubr.f32.mxu0 %v6053_v10  ;;  %v21799_v63 = vld [vmem:[#allocation71_spill] sm:$0xff]  ;;  %v14463_v10 = vpack.c.bf16 %v10359_v53, %v10358_v19  ;;  %v21802_v53 = vld [vmem:[#allocation76_spill] sm:$0xff] }
 0xb59   :  { %14456 = vmatprep.subr.bf16.mxu0 %v14455_v31  ;;  %v6056_v38 = vmul.f32 %v19159_v17, %v21799_v63  ;;  %v6059_v19 = vmul.f32 %v19179_v16, %v21802_v53  ;;  %v10362_v63 = vld [vmem:[%s21108_s5 + $0x280] sm:$0xff] }
 0xb5b   :  { %12940 = vmatmul.mubr.f32.gmra.mrb[24].mxu0 %v6054_v20 }
 0xb5c   :  { %14458 = vmatpush3.bf16.msra.mxu0 %v14455_v31  ;;  %12942 = vmatprep.mubr.f32.mxu0 %v6055_v55  ;;  %v21801_v31 = vld [vmem:[#allocation73_spill] sm:$0xff]  ;;  %v14467_v55 = vpack.c.bf16 %v10361_v9, %v10360_v11  ;;  %v6060_v9 = vmul.f32 %v19370_v46, %v21669_v23 }
 0xb5d   :  { %14460 = vmatprep.subr.bf16.mxu0 %v14459_v32  ;;  %v6058_v20 = vmul.f32 %v19173_v30, %v21801_v31  ;;  %v10364_v11 = vld [vmem:[%s21108_s5 + $0x290] sm:$0xff] }
 0xb5f   :  { %12943 = vmatmul.mubr.f32.gmra.mrb[26].mxu0 %v6056_v38  ;;  %v10363_v38 = vld [vmem:[%s21108_s5 + $0x288] sm:$0xff] }
 0xb60   :  { %14462 = vmatpush3.bf16.msra.mxu0 %v14459_v32  ;;  %12945 = vmatprep.mubr.f32.mxu0 %v6057_v48  ;;  %v14471_v32 = vpack.c.bf16 %v10363_v38, %v10362_v63  ;;  %v10365_v48 = vld [vmem:[%s21108_s5 + $0x298] sm:$0xff]  ;;  %v10367_v63 = vld [vmem:[%s21108_s5 + $0x2a8] sm:$0xff] }
 0xb61   :  { %14464 = vmatprep.subr.bf16.mxu0 %v14463_v10  ;;  %v10371_v38 = vld [vmem:[%s21108_s5 + $0x2c8] sm:$0xff] }
 0xb63   :  { %12946 = vmatmul.mubr.f32.gmra.mrb[28].mxu0 %v6058_v20  ;;  %v10366_v20 = vld [vmem:[%s21108_s5 + $0x2a0] sm:$0xff] }
 0xb64   :  { %14466 = vmatpush3.bf16.msra.mxu0 %v14463_v10  ;;  %12948 = vmatprep.mubr.f32.mxu0 %v6059_v19  ;;  %v14475_v10 = vpack.c.bf16 %v10365_v48, %v10364_v11  ;;  %v14479_v19 = vpack.c.bf16 %v10367_v63, %v10366_v20  ;;  %v10377_v11 = vld [vmem:[%s21108_s5 + $0x2f8] sm:$0xff]  ;;  %v10379_v48 = vld [vmem:[%s21108_s5 + $0x308] sm:$0xff]  ;;  %v10382_v63 = vld [vmem:[%s21108_s5 + $0x320] sm:$0xff] }
 0xb65   :  { %14468 = vmatprep.subr.bf16.mxu0 %v14467_v55  ;;  %v10381_v20 = vld [vmem:[%s21108_s5 + $0x318] sm:$0xff] }
 0xb67   :  { %12949 = vmatmul.mubr.f32.gmra.mrb[30].mxu0 %v6060_v9  ;;  %v10373_v9 = vld [vmem:[%s21108_s5 + $0x2d8] sm:$0xff] }
 0xb68   :  { %14470 = vmatpush3.bf16.msra.mxu0 %v14467_v55  ;;  %12983 = vmatprep.mubr.f32.mxu0 %v18863_v56  ;;  %v10368_v56 = vld [vmem:[%s21108_s5 + $0x2b0] sm:$0xff]  ;;  %v10369_v55 = vld [vmem:[%s21108_s5 + $0x2b8] sm:$0xff] }
 0xb69   :  { %14472 = vmatprep.subr.bf16.mxu0 %v14471_v32 }
 0xb6b   :  { %12984 = vmatmul.mubr.f32.vlgmr.msra.gmra.mrb[16].mxu0 %v18866_v54  ;;  %v14483_v54 = vpack.c.bf16 %v10369_v55, %v10368_v56  ;;  %v6437_v55 = vmul.f32 %v19218_v6, %v21674_v28 }
 0xb6c   :  { %14474 = vmatpush3.bf16.msra.mxu0 %v14471_v32  ;;  %12986 = vmatprep.mubr.f32.mxu0 %v18869_v0  ;;  %v10370_v0 = vld [vmem:[%s21108_s5 + $0x2c0] sm:$0xff]  ;;  %v10375_v32 = vld [vmem:[%s21108_s5 + $0x2e8] sm:$0xff] }
 0xb6d   :  { %14476 = vmatprep.subr.bf16.mxu0 %v14475_v10 }
 0xb6f   :  { %12987 = vmatmul.mubr.f32.gmra.mrb[18].mxu0 %v18872_v57  ;;  %v14487_v57 = vpack.c.bf16 %v10371_v38, %v10370_v0  ;;  %v10385_v0 = vld [vmem:[%s21108_s5 + $0x338] sm:$0xff]  ;;  %v6438_v38 = vmul.f32 %v19226_v42, %v21675_v18 }
 0xb70   :  { %14478 = vmatpush3.bf16.msra.mxu0 %v14475_v10  ;;  %12989 = vmatprep.mubr.f32.mxu0 %v18875_v34  ;;  %v10372_v34 = vld [vmem:[%s21108_s5 + $0x2d0] sm:$0xff] }
 0xb71   :  { %14480 = vmatprep.subr.bf16.mxu0 %v14479_v19  ;;  %v10380_v10 = vld [vmem:[%s21108_s5 + $0x310] sm:$0xff] }
 0xb73   :  { %12990 = vmatmul.mubr.f32.gmra.mrb[20].mxu0 %v18878_v58  ;;  %v14491_v58 = vpack.c.bf16 %v10373_v9, %v10372_v34  ;;  %v21803_v34 = vld [vmem:[#allocation88_spill] sm:$0xff] }
 0xb74   :  { %14482 = vmatpush3.bf16.msra.mxu0 %v14479_v19  ;;  %12992 = vmatprep.mubr.f32.mxu0 %v18881_v26  ;;  %v10374_v26 = vld [vmem:[%s21108_s5 + $0x2e0] sm:$0xff]  ;;  %v10383_v19 = vld [vmem:[%s21108_s5 + $0x328] sm:$0xff]  ;;  %v6439_v9 = vmul.f32 %v19232_v2, %v21803_v34 }
 0xb75   :  { %14484 = vmatprep.subr.bf16.mxu0 %v14483_v54  ;;  %v14511_v56 = vpack.c.bf16 %v10383_v19, %v10382_v63  ;;  %v10391_v63 = vld [vmem:[%s21108_s5 + $0x368] sm:$0xff]  ;;  %v21809_v19 = vld [vmem:[#allocation95_spill] sm:$0xff] }
 0xb77   :  { %12993 = vmatmul.mubr.f32.gmra.mrb[22].mxu0 %v18884_v47  ;;  %v14495_v47 = vpack.c.bf16 %v10375_v32, %v10374_v26  ;;  %v10387_v26 = vld [vmem:[%s21108_s5 + $0x348] sm:$0xff]  ;;  %v21804_v32 = vld [vmem:[#allocation87_spill] sm:$0xff] }
 0xb78   :  { %14486 = vmatpush3.bf16.msra.mxu0 %v14483_v54  ;;  %12995 = vmatprep.mubr.f32.mxu0 %v19034_v35  ;;  %v10376_v35 = vld [vmem:[%s21108_s5 + $0x2f0] sm:$0xff] }
 0xb79   :  { %14488 = vmatprep.subr.bf16.mxu0 %v14487_v57  ;;  %v10384_v54 = vld [vmem:[%s21108_s5 + $0x330] sm:$0xff] }
 0xb7b   :  { %12996 = vmatmul.mubr.f32.gmra.mrb[24].mxu0 %v19037_v62  ;;  %v14499_v62 = vpack.c.bf16 %v10377_v11, %v10376_v35  ;;  %v21805_v11 = vld [vmem:[#allocation92_spill] sm:$0xff] }
 0xb7c   :  { %14490 = vmatpush3.bf16.msra.mxu0 %v14487_v57  ;;  %12998 = vmatprep.mubr.f32.mxu0 %v19040_v12  ;;  %v10378_v12 = vld [vmem:[%s21108_s5 + $0x300] sm:$0xff]  ;;  %v14515_v57 = vpack.c.bf16 %v10385_v0, %v10384_v54  ;;  %v21811_v54 = vld [vmem:[#allocation100_spill] sm:$0xff] }
 0xb7d   :  { %14492 = vmatprep.subr.bf16.mxu0 %v14491_v58  ;;  %v6445_v0 = vmul.f32 %v19274_v44, %v21811_v54 }
 0xb7f   :  { %12999 = vmatmul.mubr.f32.gmra.mrb[26].mxu0 %v19043_v21  ;;  %v14503_v21 = vpack.c.bf16 %v10379_v48, %v10378_v12  ;;  %v10388_v12 = vld [vmem:[%s21108_s5 + $0x350] sm:$0xff]  ;;  %v10389_v48 = vld [vmem:[%s21108_s5 + $0x358] sm:$0xff] }
 0xb80   :  { %14494 = vmatpush3.bf16.msra.mxu0 %v14491_v58  ;;  %13001 = vmatprep.mubr.f32.mxu0 %v19046_v27  ;;  %v6433_v27 = vmul.f32 %v19190_v36, %v21670_v50  ;;  %v6435_v36 = vmul.f32 %v19204_v43, %v21672_v61  ;;  %v10386_v58 = vld [vmem:[%s21108_s5 + $0x340] sm:$0xff] }
 0xb81   :  { %14496 = vmatprep.subr.bf16.mxu0 %v14495_v47  ;;  %v14519_v35 = vpack.c.bf16 %v10387_v26, %v10386_v58 }
 0xb83   :  { %13002 = vmatmul.mubr.f32.gmra.mrb[28].mxu0 %v19049_v13  ;;  %v6434_v13 = vmul.f32 %v19198_v5, %v21671_v15 }
 0xb84   :  { %14498 = vmatpush3.bf16.msra.mxu0 %v14495_v47  ;;  %13004 = vmatprep.mubr.f32.mxu0 %v19052_v7  ;;  %v14507_v7 = vpack.c.bf16 %v10381_v20, %v10380_v10  ;;  %v6440_v47 = vmul.f32 %v19240_v59, %v21804_v32  ;;  %v14523_v10 = vpack.c.bf16 %v10389_v48, %v10388_v12  ;;  %v21807_v20 = vld [vmem:[#allocation96_spill] sm:$0xff]  ;;  %v10394_v12 = vld [vmem:[%s21108_s5 + $0x380] sm:$0xff] }
 0xb85   :  { %14500 = vmatprep.subr.bf16.mxu0 %v14499_v62  ;;  %v10395_v48 = vld [vmem:[%s21108_s5 + $0x388] sm:$0xff] }
 0xb87   :  { %13005 = vmatmul.mubr.f32.gmra.mrb[30].mxu0 %v19055_v49  ;;  %v6436_v49 = vmul.f32 %v19212_v60, %v21673_v22 }
 0xb88   :  { %14502 = vmatpush3.bf16.msra.mxu0 %v14499_v62  ;;  %13039 = vmatprep.mubr.f32.mxu0 %v6433_v27  ;;  %v6441_v62 = vmul.f32 %v19246_v14, %v21805_v11 }
 0xb89   :  { %14504 = vmatprep.subr.bf16.mxu0 %v14503_v21 }
 0xb8b   :  { %13040 = vmatmul.mubr.f32.vlgmr.msra.gmra.mrb[16].mxu0 %v6434_v13  ;;  %v21808_v13 = vld [vmem:[#allocation150_spill] sm:$0xff] }
 0xb8c   :  { %14506 = vmatpush3.bf16.msra.mxu0 %v14503_v21  ;;  %13042 = vmatprep.mubr.f32.mxu0 %v6435_v36  ;;  %v21806_v21 = vld [vmem:[#allocation91_spill] sm:$0xff] }
 0xb8d   :  { %14508 = vmatprep.subr.bf16.mxu0 %v14507_v7  ;;  %v6442_v27 = vmul.f32 %v19254_v41, %v21806_v21  ;;  %v10390_v36 = vld [vmem:[%s21108_s5 + $0x360] sm:$0xff] }
 0xb8f   :  { %13043 = vmatmul.mubr.f32.gmra.mrb[18].mxu0 %v6436_v49  ;;  %v21810_v49 = vld [vmem:[#allocation151_spill] sm:$0xff] }
 0xb90   :  { %14510 = vmatpush3.bf16.msra.mxu0 %v14507_v7  ;;  %13045 = vmatprep.mubr.f32.mxu0 %v6437_v55  ;;  %v6443_v7 = vmul.f32 %v21808_v13, %v21807_v20  ;;  %v14527_v55 = vpack.c.bf16 %v10391_v63, %v10390_v36  ;;  %v21815_v36 = vld [vmem:[#allocation108_spill] sm:$0xff] }
 0xb91   :  { %14512 = vmatprep.subr.bf16.mxu0 %v14511_v56  ;;  %v6643_v63 = vmul.f32 %v19088_v33, %v21815_v36  ;;  %v10398_v33 = vld [vmem:[%s21108_s5 + $0x3a0] sm:$0xff] }
 0xb93   :  { %13046 = vmatmul.mubr.f32.gmra.mrb[20].mxu0 %v6438_v38  ;;  %v10392_v38 = vld [vmem:[%s21108_s5 + $0x370] sm:$0xff] }
 0xb94   :  { %14514 = vmatpush3.bf16.msra.mxu0 %v14511_v56  ;;  %13048 = vmatprep.mubr.f32.mxu0 %v6439_v9  ;;  %v6444_v56 = vmul.f32 %v21810_v49, %v21809_v19  ;;  %v21812_v9 = vld [vmem:[#allocation99_spill] sm:$0xff] }
 0xb95   :  { %14516 = vmatprep.subr.bf16.mxu0 %v14515_v57  ;;  %v6446_v58 = vmul.f32 %v19282_v45, %v21812_v9 }
 0xb97   :  { %13049 = vmatmul.mubr.f32.gmra.mrb[22].mxu0 %v6440_v47  ;;  %v21813_v47 = vld [vmem:[#allocation104_spill] sm:$0xff] }
 0xb98   :  { %14518 = vmatpush3.bf16.msra.mxu0 %v14515_v57  ;;  %13051 = vmatprep.mubr.f32.mxu0 %v6441_v62  ;;  %v10393_v57 = vld [vmem:[%s21108_s5 + $0x378] sm:$0xff]  ;;  %v19516_v62 = vld [vmem:[#allocation2 + $0x89] sm:$0xff] }
 0xb99   :  { %14520 = vmatprep.subr.bf16.mxu0 %v14519_v35  ;;  %v14531_v26 = vpack.c.bf16 %v10393_v57, %v10392_v38 }
 0xb9b   :  { %13052 = vmatmul.mubr.f32.gmra.mrb[24].mxu0 %v6442_v27  ;;  %v21814_v27 = vld [vmem:[#allocation103_spill] sm:$0xff] }
 0xb9c   :  { %14522 = vmatpush3.bf16.msra.mxu0 %v14519_v35  ;;  %13054 = vmatprep.mubr.f32.mxu0 %v6443_v7  ;;  %v6447_v35 = vmul.f32 %v19288_v52, %v21813_v47  ;;  %v14535_v7 = vpack.c.bf16 %v10395_v48, %v10394_v12  ;;  %v10399_v12 = vld [vmem:[%s21108_s5 + $0x3a8] sm:$0xff] }
 0xb9d   :  { %14524 = vmatprep.subr.bf16.mxu0 %v14523_v10 }
 0xb9f   :  { %13055 = vmatmul.mubr.f32.gmra.mrb[26].mxu0 %v6444_v56  ;;  %v10396_v56 = vld [vmem:[%s21108_s5 + $0x390] sm:$0xff] }
 0xba0   :  { %14526 = vmatpush3.bf16.msra.mxu0 %v14523_v10  ;;  %13057 = vmatprep.mubr.f32.mxu0 %v6445_v0  ;;  %v6448_v10 = vmul.f32 %v19516_v62, %v21814_v27  ;;  %v10397_v0 = vld [vmem:[%s21108_s5 + $0x398] sm:$0xff] }
 0xba1   :  { %14528 = vmatprep.subr.bf16.mxu0 %v14527_v55  ;;  %v14539_v57 = vpack.c.bf16 %v10397_v0, %v10396_v56  ;;  %v10401_v56 = vld [vmem:[%s21108_s5 + $0x3b8] sm:$0xff] }
 0xba3   :  { %13058 = vmatmul.mubr.f32.gmra.mrb[28].mxu0 %v6446_v58  ;;  %v21817_v58 = vld [vmem:[#allocation112_spill] sm:$0xff] }
 0xba4   :  { %14530 = vmatpush3.bf16.msra.mxu0 %v14527_v55  ;;  %13060 = vmatprep.mubr.f32.mxu0 %v6447_v35  ;;  %v21816_v55 = vld [vmem:[#allocation107_spill] sm:$0xff]  ;;  %v6645_v35 = vmul.f32 %v19102_v37, %v21817_v58  ;;  %v10400_v37 = vld [vmem:[%s21108_s5 + $0x3b0] sm:$0xff] }
 0xba5   :  { %14532 = vmatprep.subr.bf16.mxu0 %v14531_v26  ;;  %v6644_v38 = vmul.f32 %v19094_v51, %v21816_v55  ;;  %v14543_v51 = vpack.c.bf16 %v10399_v12, %v10398_v33  ;;  %v10403_v33 = vld [vmem:[%s21108_s5 + $0x3c8] sm:$0xff] }
 0xba7   :  { %13061 = vmatmul.mubr.f32.gmra.mrb[30].mxu0 %v6448_v10  ;;  %v21819_v10 = vld [vmem:[#allocation113_spill] sm:$0xff] }
 0xba8   :  { %14534 = vmatpush3.bf16.msra.mxu0 %v14531_v26  ;;  %13095 = vmatprep.mubr.f32.mxu0 %v6643_v63  ;;  %v21818_v26 = vld [vmem:[#allocation111_spill] sm:$0xff]  ;;  %v6647_v63 = vmul.f32 %v19117_v29, %v21819_v10 }
 0xba9   :  { %14536 = vmatprep.subr.bf16.mxu0 %v14535_v7  ;;  %v6646_v48 = vmul.f32 %v19109_v1, %v21818_v26  ;;  %v14547_v1 = vpack.c.bf16 %v10401_v56, %v10400_v37  ;;  %v10402_v29 = vld [vmem:[%s21108_s5 + $0x3c0] sm:$0xff]  ;;  %v10405_v37 = vld [vmem:[%s21108_s5 + $0x3d8] sm:$0xff] }
 0xbab   :  { %13096 = vmatmul.mubr.f32.vlgmr.msra.gmra.mrb[16].mxu0 %v6644_v38  ;;  %v21821_v38 = vld [vmem:[#allocation43_spill] sm:$0xff] }
 0xbac   :  { %14538 = vmatpush3.bf16.msra.mxu0 %v14535_v7  ;;  %13098 = vmatprep.mubr.f32.mxu0 %v6645_v35  ;;  %v21820_v7 = vld [vmem:[#allocation39_spill] sm:$0xff]  ;;  %v6649_v35 = vmul.f32 %v19131_v40, %v21821_v38  ;;  %v10404_v40 = vld [vmem:[%s21108_s5 + $0x3d0] sm:$0xff] }
 0xbad   :  { %14540 = vmatprep.subr.bf16.mxu0 %v14539_v57  ;;  %v6648_v0 = vmul.f32 %v19123_v24, %v21820_v7  ;;  %v14551_v24 = vpack.c.bf16 %v10403_v33, %v10402_v29  ;;  %v10407_v29 = vld [vmem:[%s21108_s5 + $0x3e8] sm:$0xff] }
 0xbaf   :  { %13099 = vmatmul.mubr.f32.gmra.mrb[18].mxu0 %v6646_v48  ;;  %v21823_v48 = vld [vmem:[#allocation47_spill] sm:$0xff] }
 0xbb0   :  { %14542 = vmatpush3.bf16.msra.mxu0 %v14539_v57  ;;  %13101 = vmatprep.mubr.f32.mxu0 %v6647_v63  ;;  %v21822_v57 = vld [vmem:[#allocation40_spill] sm:$0xff]  ;;  %v6651_v63 = vmul.f32 %v19145_v25, %v21823_v48  ;;  %v10406_v25 = vld [vmem:[%s21108_s5 + $0x3e0] sm:$0xff] }
 0xbb1   :  { %14544 = vmatprep.subr.bf16.mxu0 %v14543_v51  ;;  %v6650_v12 = vmul.f32 %v19137_v8, %v21822_v57  ;;  %v14555_v8 = vpack.c.bf16 %v10405_v37, %v10404_v40  ;;  %v10409_v40 = vld [vmem:[%s21108_s5 + $0x3f8] sm:$0xff] }
 0xbb3   :  { %13102 = vmatmul.mubr.f32.gmra.mrb[20].mxu0 %v6648_v0  ;;  %v21825_v0 = vld [vmem:[#allocation51_spill] sm:$0xff] }
 0xbb4   :  { %14546 = vmatpush3.bf16.msra.mxu0 %v14543_v51  ;;  %13104 = vmatprep.mubr.f32.mxu0 %v6649_v35  ;;  %v21824_v51 = vld [vmem:[#allocation44_spill] sm:$0xff]  ;;  %v6653_v35 = vmul.f32 %v19159_v17, %v21825_v0  ;;  %v10408_v17 = vld [vmem:[%s21108_s5 + $0x3f0] sm:$0xff] }
 0xbb5   :  { %14548 = vmatprep.subr.bf16.mxu0 %v14547_v1  ;;  %v6652_v56 = vmul.f32 %v19151_v39, %v21824_v51  ;;  %v14559_v39 = vpack.c.bf16 %v10407_v29, %v10406_v25  ;;  %v10410_v25 = vld [vmem:[%s21108_s5 + $0x400] sm:$0xff]  ;;  %v10411_v29 = vld [vmem:[%s21108_s5 + $0x408] sm:$0xff] }
 0xbb7   :  { %13105 = vmatmul.mubr.f32.gmra.mrb[22].mxu0 %v6650_v12  ;;  %v21827_v12 = vld [vmem:[#allocation55_spill] sm:$0xff] }
 0xbb8   :  { %14550 = vmatpush3.bf16.msra.mxu0 %v14547_v1  ;;  %13107 = vmatprep.mubr.f32.mxu0 %v6651_v63  ;;  %v21826_v1 = vld [vmem:[#allocation48_spill] sm:$0xff]  ;;  %v6655_v63 = vmul.f32 %v19173_v30, %v21827_v12  ;;  %v21847_v12 = vld [vmem:[#allocation131_spill] sm:$0xff] }
 0xbb9   :  { %14552 = vmatprep.subr.bf16.mxu0 %v14551_v24  ;;  %v6654_v33 = vmul.f32 %v19165_v4, %v21826_v1  ;;  %v14563_v4 = vpack.c.bf16 %v10409_v40, %v10408_v17  ;;  %v6642_v30 = vld [vmem:[#allocation2 + $0x8f] sm:$0xff]  ;;  %v21831_v17 = vld [vmem:[#allocation115_spill] sm:$0xff] }
 0xbbb   :  { %13108 = vmatmul.mubr.f32.gmra.mrb[24].mxu0 %v6652_v56  ;;  %v21829_v56 = vld [vmem:[#allocation56_spill] sm:$0xff] }
 0xbbc   :  { %14554 = vmatpush3.bf16.msra.mxu0 %v14551_v24  ;;  %13110 = vmatprep.mubr.f32.mxu0 %v6653_v35  ;;  %v21828_v24 = vld [vmem:[#allocation52_spill] sm:$0xff]  ;;  %v6657_v35 = vmul.f32 %v19370_v46, %v21829_v56  ;;  %v6838_v46 = vld [vmem:[#allocation2 + $0x20] sm:$0xff]  ;;  %v10412_v56 = vld [vmem:[%s21108_s5 + $0x410] sm:$0xff] }
 0xbbd   :  { %14556 = vmatprep.subr.bf16.mxu0 %v14555_v8  ;;  %v6656_v37 = vmul.f32 %v19179_v16, %v21828_v24  ;;  %v10413_v24 = vld [vmem:[%s21108_s5 + $0x418] sm:$0xff] }
 0xbbf   :  { %13111 = vmatmul.mubr.f32.gmra.mrb[26].mxu0 %v6654_v33  ;;  %v21830_v33 = vld [vmem:[#allocation114_spill] sm:$0xff] }
 0xbc0   :  { %14558 = vmatpush3.bf16.msra.mxu0 %v14555_v8  ;;  %13113 = vmatprep.mubr.f32.mxu0 %v6655_v63  ;;  %v6837_v8 = vld [vmem:[#allocation2 + $0x18] sm:$0xff]  ;;  %v6658_v16 = vmul.f32 %v6642_v30, %v21830_v33  ;;  %v14567_v63 = vpack.c.bf16 %v10411_v29, %v10410_v25  ;;  %v14571_v30 = vpack.c.bf16 %v10413_v24, %v10412_v56  ;;  %v21833_v25 = vld [vmem:[#allocation117_spill] sm:$0xff]  ;;  %v10415_v33 = vld [vmem:[%s21108_s5 + $0x428] sm:$0xff] }
 0xbc1   :  { %14560 = vmatprep.subr.bf16.mxu0 %v14559_v39  ;;  %v6853_v40 = vmul.f32 %v6837_v8, %v21831_v17  ;;  %v6840_v8 = vld [vmem:[#allocation2 + $0x30] sm:$0xff]  ;;  %v10414_v17 = vld [vmem:[%s21108_s5 + $0x420] sm:$0xff] }
 0xbc2   :  { %v21835_v24 = vld [vmem:[#allocation119_spill] sm:$0xff] }
 0xbc3   :  { %13114 = vmatmul.mubr.f32.gmra.mrb[28].mxu0 %v6656_v37  ;;  %v6839_v37 = vld [vmem:[#allocation2 + $0x28] sm:$0xff] }
 0xbc4   :  { %14562 = vmatpush3.bf16.msra.mxu0 %v14559_v39  ;;  %13116 = vmatprep.mubr.f32.mxu0 %v6657_v35  ;;  %v21832_v39 = vld [vmem:[#allocation116_spill] sm:$0xff]  ;;  %v6855_v29 = vmul.f32 %v6839_v37, %v21833_v25  ;;  %v6842_v37 = vld [vmem:[#allocation2 + $0x40] sm:$0xff]  ;;  %v10416_v25 = vld [vmem:[%s21108_s5 + $0x430] sm:$0xff] }
 0xbc5   :  { %14564 = vmatprep.subr.bf16.mxu0 %v14563_v4  ;;  %v6854_v35 = vmul.f32 %v6838_v46, %v21832_v39  ;;  %v14575_v46 = vpack.c.bf16 %v10415_v33, %v10414_v17  ;;  %v10417_v39 = vld [vmem:[%s21108_s5 + $0x438] sm:$0xff]  ;;  %v21837_v33 = vld [vmem:[#allocation121_spill] sm:$0xff] }
 0xbc7   :  { %13117 = vmatmul.mubr.f32.gmra.mrb[30].mxu0 %v6658_v16  ;;  %v6841_v16 = vld [vmem:[#allocation2 + $0x38] sm:$0xff] }
 0xbc8   :  { %14566 = vmatpush3.bf16.msra.mxu0 %v14563_v4  ;;  %13151 = vmatprep.mubr.f32.mxu0 %v6853_v40  ;;  %v21834_v4 = vld [vmem:[#allocation118_spill] sm:$0xff]  ;;  %v6857_v56 = vmul.f32 %v6841_v16, %v21835_v24  ;;  %v6844_v16 = vld [vmem:[#allocation2 + $0x50] sm:$0xff]  ;;  %v10418_v24 = vld [vmem:[%s21108_s5 + $0x440] sm:$0xff] }
 0xbc9   :  { %14568 = vmatprep.subr.bf16.mxu0 %v14567_v63  ;;  %v6856_v40 = vmul.f32 %v6840_v8, %v21834_v4  ;;  %v14579_v8 = vpack.c.bf16 %v10417_v39, %v10416_v25  ;;  %v10419_v4 = vld [vmem:[%s21108_s5 + $0x448] sm:$0xff]  ;;  %v21839_v39 = vld [vmem:[#allocation123_spill] sm:$0xff] }
 0xbcb   :  { %13152 = vmatmul.mubr.f32.vlgmr.msra.gmra.mrb[16].mxu0 %v6854_v35  ;;  %v6843_v35 = vld [vmem:[#allocation2 + $0x48] sm:$0xff] }
 0xbcc   :  { %14570 = vmatpush3.bf16.msra.mxu0 %v14567_v63  ;;  %13154 = vmatprep.mubr.f32.mxu0 %v6855_v29  ;;  %v21836_v63 = vld [vmem:[#allocation120_spill] sm:$0xff]  ;;  %v6859_v17 = vmul.f32 %v6843_v35, %v21837_v33  ;;  %v6846_v35 = vld [vmem:[#allocation2 + $0x60] sm:$0xff]  ;;  %v10420_v33 = vld [vmem:[%s21108_s5 + $0x450] sm:$0xff] }
 0xbcd   :  { %14572 = vmatprep.subr.bf16.mxu0 %v14571_v30  ;;  %v6858_v29 = vmul.f32 %v6842_v37, %v21836_v63  ;;  %v14583_v37 = vpack.c.bf16 %v10419_v4, %v10418_v24  ;;  %v10421_v63 = vld [vmem:[%s21108_s5 + $0x458] sm:$0xff]  ;;  %v21841_v4 = vld [vmem:[#allocation125_spill] sm:$0xff] }
 0xbcf   :  { %13155 = vmatmul.mubr.f32.gmra.mrb[18].mxu0 %v6856_v40  ;;  %v6845_v40 = vld [vmem:[#allocation2 + $0x58] sm:$0xff] }
 0xbd0   :  { %14574 = vmatpush3.bf16.msra.mxu0 %v14571_v30  ;;  %13157 = vmatprep.mubr.f32.mxu0 %v6857_v56  ;;  %v21838_v30 = vld [vmem:[#allocation122_spill] sm:$0xff]  ;;  %v6861_v25 = vmul.f32 %v6845_v40, %v21839_v39  ;;  %v6848_v40 = vld [vmem:[#allocation2 + $0x70] sm:$0xff]  ;;  %v10422_v39 = vld [vmem:[%s21108_s5 + $0x460] sm:$0xff] }
 0xbd1   :  { %14576 = vmatprep.subr.bf16.mxu0 %v14575_v46  ;;  %v6860_v56 = vmul.f32 %v6844_v16, %v21838_v30  ;;  %v14587_v16 = vpack.c.bf16 %v10421_v63, %v10420_v33  ;;  %v10423_v30 = vld [vmem:[%s21108_s5 + $0x468] sm:$0xff]  ;;  %v21843_v63 = vld [vmem:[#allocation127_spill] sm:$0xff] }
 0xbd3   :  { %13158 = vmatmul.mubr.f32.gmra.mrb[20].mxu0 %v6858_v29  ;;  %v6847_v29 = vld [vmem:[#allocation2 + $0x68] sm:$0xff] }
 0xbd4   :  { %14578 = vmatpush3.bf16.msra.mxu0 %v14575_v46  ;;  %13160 = vmatprep.mubr.f32.mxu0 %v6859_v17  ;;  %v21840_v46 = vld [vmem:[#allocation124_spill] sm:$0xff]  ;;  %v6863_v24 = vmul.f32 %v6847_v29, %v21841_v4  ;;  %v6850_v29 = vld [vmem:[#allocation2 + $0x80] sm:$0xff]  ;;  %v10424_v4 = vld [vmem:[%s21108_s5 + $0x470] sm:$0xff] }
 0xbd5   :  { %14580 = vmatprep.subr.bf16.mxu0 %v14579_v8  ;;  %v6862_v17 = vmul.f32 %v6846_v35, %v21840_v46  ;;  %v14591_v35 = vpack.c.bf16 %v10423_v30, %v10422_v39  ;;  %v10425_v46 = vld [vmem:[%s21108_s5 + $0x478] sm:$0xff]  ;;  %v21845_v30 = vld [vmem:[#allocation129_spill] sm:$0xff] }
 0xbd7   :  { %13161 = vmatmul.mubr.f32.gmra.mrb[22].mxu0 %v6860_v56  ;;  %v6849_v56 = vld [vmem:[#allocation2 + $0x78] sm:$0xff] }
 0xbd8   :  { %14582 = vmatpush3.bf16.msra.mxu0 %v14579_v8  ;;  %13163 = vmatprep.mubr.f32.mxu0 %v6861_v25  ;;  %v21842_v8 = vld [vmem:[#allocation126_spill] sm:$0xff]  ;;  %v6865_v33 = vmul.f32 %v6849_v56, %v21843_v63  ;;  %v19662_v56 = vld [vmem:[#allocation2 + $0x8] sm:$0xff] }
 0xbd9   :  { %14584 = vmatprep.subr.bf16.mxu0 %v14583_v37  ;;  %v6864_v25 = vmul.f32 %v6848_v40, %v21842_v8  ;;  %v14595_v40 = vpack.c.bf16 %v10425_v46, %v10424_v4  ;;  %v21846_v63 = vld [vmem:[#allocation130_spill] sm:$0xff]  ;;  %v21849_v4 = vld [vmem:[#allocation133_spill] sm:$0xff] }
 0xbda   :  { %v6868_v8 = vmul.f32 %v19662_v56, %v21846_v63 }
 0xbdb   :  { %13164 = vmatmul.mubr.f32.gmra.mrb[24].mxu0 %v6862_v17  ;;  %v6851_v17 = vld [vmem:[#allocation2 + $0x88] sm:$0xff] }
 0xbdc   :  { %14586 = vmatpush3.bf16.msra.mxu0 %v14583_v37  ;;  %13166 = vmatprep.mubr.f32.mxu0 %v6863_v24  ;;  %v21844_v37 = vld [vmem:[#allocation128_spill] sm:$0xff]  ;;  %v6867_v39 = vmul.f32 %v6851_v17, %v21845_v30  ;;  %v21851_v17 = vld [vmem:[#allocation135_spill] sm:$0xff] }
 0xbdd   :  { %14588 = vmatprep.subr.bf16.mxu0 %v14587_v16  ;;  %v6866_v24 = vmul.f32 %v6850_v29, %v21844_v37 }
 0xbdf   :  { %13167 = vmatmul.mubr.f32.gmra.mrb[26].mxu0 %v6864_v25  ;;  %v7063_v25 = vmul.f32 %v19198_v5, %v21847_v12  ;;  %v21852_v5 = vld [vmem:[#allocation136_spill] sm:$0xff] }
 0xbe0   :  { %14590 = vmatpush3.bf16.msra.mxu0 %v14587_v16  ;;  %13169 = vmatprep.mubr.f32.mxu0 %v6865_v33  ;;  %v21848_v16 = vld [vmem:[#allocation132_spill] sm:$0xff]  ;;  %v7065_v33 = vmul.f32 %v19212_v60, %v21849_v4 }
 0xbe1   :  { %14592 = vmatprep.subr.bf16.mxu0 %v14591_v35  ;;  %v7064_v46 = vmul.f32 %v19204_v43, %v21848_v16  ;;  %v21854_v43 = vld [vmem:[#allocation138_spill] sm:$0xff] }
 0xbe2   :  { %v7070_v60 = vmul.f32 %v19246_v14, %v21854_v43  ;;  %v21860_v14 = vld [vmem:[#allocation144_spill] sm:$0xff] }
 0xbe3   :  { %13170 = vmatmul.mubr.f32.gmra.mrb[28].mxu0 %v6866_v24  ;;  %v7067_v24 = vmul.f32 %v19226_v42, %v21851_v17 }
 0xbe4   :  { %14594 = vmatpush3.bf16.msra.mxu0 %v14591_v35  ;;  %13172 = vmatprep.mubr.f32.mxu0 %v6867_v39  ;;  %v21850_v35 = vld [vmem:[#allocation134_spill] sm:$0xff] }
 0xbe5   :  { %14596 = vmatprep.subr.bf16.mxu0 %v14595_v40  ;;  %v7066_v29 = vmul.f32 %v19218_v6, %v21850_v35  ;;  %v21856_v6 = vld [vmem:[#allocation140_spill] sm:$0xff] }
 0xbe6   :  { %v7072_v42 = vmul.f32 %v21808_v13, %v21856_v6  ;;  %v7062_v13 = vld [vmem:[#allocation2 + $0x91] sm:$0xff] }
 0xbe7   :  { %13173 = vmatmul.mubr.f32.gmra.mrb[30].mxu0 %v6868_v8  ;;  %v7068_v8 = vmul.f32 %v19232_v2, %v21852_v5  ;;  %v21858_v2 = vld [vmem:[#allocation142_spill] sm:$0xff] }
 0xbe8   :  { %14598 = vmatpush3.bf16.msra.mxu0 %v14595_v40  ;;  %13207 = vmatprep.mubr.f32.mxu0 %v7063_v25  ;;  %v21853_v40 = vld [vmem:[#allocation137_spill] sm:$0xff]  ;;  %v21855_v25 = vld [vmem:[#allocation139_spill] sm:$0xff] }
 0xbe9   :  { %v7069_v39 = vmul.f32 %v19240_v59, %v21853_v40  ;;  %v7074_v59 = vmul.f32 %v19274_v44, %v21858_v2 }
 0xbeb   :  { %13208 = vmatmul.mubr.f32.vlgmr.msra.gmra.mrb[16].mxu0 %v7064_v46  ;;  %v7071_v46 = vmul.f32 %v19254_v41, %v21855_v25  ;;  %v7076_v41 = vmul.f32 %v19288_v52, %v21860_v14 }
 0xbec   :  { %13210 = vmatprep.mubr.f32.mxu0 %v7065_v33  ;;  %v21857_v33 = vld [vmem:[#allocation141_spill] sm:$0xff] }
 0xbef   :  { %13211 = vmatmul.mubr.f32.gmra.mrb[18].mxu0 %v7066_v29  ;;  %v7073_v29 = vmul.f32 %v21810_v49, %v21857_v33  ;;  %v21862_v49 = vld [vmem:[#allocation146_spill] sm:$0xff] }
 0xbf0   :  { %13213 = vmatprep.mubr.f32.mxu0 %v7067_v24  ;;  %v21859_v24 = vld [vmem:[#allocation143_spill] sm:$0xff] }
 0xbf3   :  { %13214 = vmatmul.mubr.f32.gmra.mrb[20].mxu0 %v7068_v8  ;;  %v7075_v8 = vmul.f32 %v19282_v45, %v21859_v24 }
 0xbf4   :  { %13216 = vmatprep.mubr.f32.mxu0 %v7069_v39  ;;  %v21861_v39 = vld [vmem:[#allocation145_spill] sm:$0xff] }
 0xbf7   :  { %13217 = vmatmul.mubr.f32.gmra.mrb[22].mxu0 %v7070_v60  ;;  %v7077_v60 = vmul.f32 %v19516_v62, %v21861_v39 }
 0xbf8   :  { %13219 = vmatprep.mubr.f32.mxu0 %v7071_v46  ;;  %v7078_v46 = vmul.f32 %v7062_v13, %v21862_v49 }
 0xbfb   :  { %13220 = vmatmul.mubr.f32.gmra.mrb[24].mxu0 %v7072_v42 }
 0xbfc   :  { %13222 = vmatprep.mubr.f32.mxu0 %v7073_v29 }
 0xbff   :  { %13223 = vmatmul.mubr.f32.gmra.mrb[26].mxu0 %v7074_v59 }
 0xc00   :  { %13225 = vmatprep.mubr.f32.mxu0 %v7075_v8 }
 0xc03   :  { %13226 = vmatmul.mubr.f32.gmra.mrb[28].mxu0 %v7076_v41 }
 0xc04   :  { %13228 = vmatprep.mubr.f32.mxu0 %v7077_v60 }
 0xc07   :  { %13229 = vmatmul.mubr.f32.gmra.mrb[30].mxu0 %v7078_v46 }
 0xcbe   :  { %v13209_v42 = vpop.f32.mrb[16].mxu0 }
 0xcbf   :  { %v7162_v29 = vpop.f32.mrb[17].mxu0 }
 0xcc0   :  { %v7259_v44 = vadd.f32 %v13209_v42, %v7162_v29 }
 0xcc2   :  { %v13212_v2 = vpop.f32.mrb[18].mxu0 }
 0xcc3   :  { %v7172_v33 = vpop.f32.mrb[19].mxu0 }
 0xcc4   :  { %v7260_v45 = vadd.f32 %v7259_v44, %v7172_v33 }
 0xcc6   :  { %v13215_v59 = vpop.f32.mrb[20].mxu0  ;;  %v7261_v8 = vadd.f32 %v13212_v2, %v7260_v45 }
 0xcc7   :  { %v7182_v24 = vpop.f32.mrb[21].mxu0 }
 0xcc8   :  { %v7262_v6 = vadd.f32 %v7261_v8, %v7182_v24 }
 0xcca   :  { %v13218_v52 = vpop.f32.mrb[22].mxu0  ;;  %v7263_v14 = vadd.f32 %v13215_v59, %v7262_v6 }
 0xccb   :  { %v7192_v25 = vpop.f32.mrb[23].mxu0 }
 0xccc   :  { %v7264_v62 = vadd.f32 %v7263_v14, %v7192_v25 }
 0xcce   :  { %v7265_v39 = vadd.f32 %v13218_v52, %v7264_v62  ;;  %v19697_v41 = vpop.f32.mrb[24].mxu0 }
 0xccf   :  { %v19699_v60 = vpop.f32.mrb[25].mxu0 }
 0xcd0   :  { %v7348_v13 = vadd.f32 %v19697_v41, %v19699_v60  ;;  %7266 = vadd.xlane.f32.xlu1 %v7265_v39 }
 0xcd2   :  { %v19703_v46 = vpop.f32.mrb[26].mxu0 }
 0xcd3   :  { %v19705_v44 = vpop.f32.mrb[27].mxu0 }
 0xcd4   :  { %v7349_v45 = vadd.f32 %v7348_v13, %v19705_v44 }
 0xcd6   :  { %v19708_v8 = vpop.f32.mrb[28].mxu0  ;;  %v7350_v6 = vadd.f32 %v19703_v46, %v7349_v45 }
 0xcd7   :  { %v19711_v14 = vpop.f32.mrb[29].mxu0 }
 0xcd8   :  { %v7351_v62 = vadd.f32 %v7350_v6, %v19711_v14  ;;  %v21863_v6 = vld [vmem:[#allocation147_spill] sm:$0xff] }
 0xcd9   :  { %vm172_vm1 = vcmp.lt.s32.totalorder %v21863_v6, 8 }
 0xcda   :  { %v19714_v49 = vpop.f32.mrb[30].mxu0  ;;  %v7352_v43 = vadd.f32 %v19708_v8, %v7351_v62  ;;  %v19723_v62 = vsel %vm172_vm1, 1.0, %v19662_v56 }
 0xcdb   :  { %v19717_v40 = vpop.f32.mrb[31].mxu0 }
 0xcdc   :  { %v7353_v39 = vadd.f32 %v7352_v43, %v19717_v40 }
 0xcde   :  { %v7354_v5 = vadd.f32 %v19714_v49, %v7353_v39 }
 0xce0   :  { %7355 = vadd.xlane.f32.xlu1 %v7354_v5 }
 0xd5d   :  { %v7267_v13 = vpop.xlane.xlu1 %7266 }
 0xd5e   :  { %v7268_v17 = vrot.slane %v7267_v13, 4 }
 0xd60   :  { %v7269_v35 = vadd.f32 %v7268_v17, %v7267_v13 }
 0xd62   :  { %v7270_v4 = vrot.slane %v7269_v35, 2 }
 0xd64   :  { %v7271_v45 = vadd.f32 %v7270_v4, %v7269_v35 }
 0xd66   :  { %v7272_v16 = vrot.slane %v7271_v45, 1 }
 0xd68   :  { %v7273_v12 = vadd.f32 %v7272_v16, %v7271_v45 }
 0xd6a   :  { %15423 = vpush %v7273_v12 }
 0xd6d   :  { %v7356_v0 = vpop.xlane.xlu1 %7355 }
 0xd9b   :  { %s15424_s5 = spop %15423 }
 0xd9c   :  { %s7275_s7 = smul.f32 0.001953125, %s15424_s5 }
 0xd9e   :  { %v7276_v63 = vstv %s7275_s7 }
 0xd9f   :  { %v7277_v43 = vsub.f32 %v7162_v29, %v7276_v63  ;;  %v7278_v30 = vsub.f32 %v13209_v42, %v7276_v63  ;;  %v7279_v39 = vsub.f32 %v7172_v33, %v7276_v63  ;;  %v7280_v5 = vsub.f32 %v13212_v2, %v7276_v63 }
 0xda0   :  { %v7281_v16 = vsub.f32 %v7182_v24, %v7276_v63  ;;  %v7282_v35 = vsub.f32 %v13215_v59, %v7276_v63  ;;  %v7283_v2 = vsub.f32 %v7192_v25, %v7276_v63  ;;  %v7284_v29 = vsub.f32 %v13218_v52, %v7276_v63 }
 0xda1   :  { %v19726_v37 = vmul.f32 %v19723_v62, %v7277_v43  ;;  %v19729_v4 = vmul.f32 %v19723_v62, %v7278_v30  ;;  %v19732_v12 = vmul.f32 %v19723_v62, %v7279_v39  ;;  %v19735_v17 = vmul.f32 %v19723_v62, %v7280_v5 }
 0xda2   :  { %v19742_v42 = vmul.f32 %v19723_v62, %v7281_v16  ;;  %v19747_v59 = vmul.f32 %v19723_v62, %v7282_v35  ;;  %v19752_v6 = vmul.f32 %v19723_v62, %v7283_v2  ;;  %v19757_v39 = vmul.f32 %v19723_v62, %v7284_v29 }
 0xda3   :  { %v7293_v56 = vmul.f32 %v19726_v37, %v19726_v37  ;;  %v7294_v33 = vmul.f32 %v19729_v4, %v19729_v4  ;;  %v7295_v30 = vmul.f32 %v19732_v12, %v19732_v12  ;;  %v7296_v13 = vmul.f32 %v19735_v17, %v19735_v17 }
 0xda4   :  { %v7297_v25 = vmul.f32 %v19742_v42, %v19742_v42  ;;  %v7298_v63 = vmul.f32 %v19747_v59, %v19747_v59  ;;  %v7299_v5 = vmul.f32 %v19752_v6, %v19752_v6  ;;  %v7300_v35 = vmul.f32 %v19757_v39, %v19757_v39 }
 0xda5   :  { %v7301_v24 = vadd.f32 %v7294_v33, %v7293_v56 }
 0xda7   :  { %v7302_v45 = vadd.f32 %v7301_v24, %v7295_v30 }
 0xda9   :  { %v7303_v43 = vadd.f32 %v7302_v45, %v7296_v13 }
 0xdab   :  { %v7304_v52 = vadd.f32 %v7303_v43, %v7297_v25  ;;  %v7357_v25 = vrot.slane %v7356_v0, 4 }
 0xdad   :  { %v7305_v16 = vadd.f32 %v7304_v52, %v7298_v63  ;;  %v7358_v43 = vadd.f32 %v7357_v25, %v7356_v0  ;;  %v10428_v0 = vld [vmem:[%s21109_s6 + $0x88] sm:$0xff]  ;;  %v10433_v25 = vld [vmem:[%s21109_s6 + $0xb0] sm:$0xff] }
 0xdaf   :  { %v7306_v56 = vadd.f32 %v7305_v16, %v7299_v5  ;;  %v7359_v63 = vrot.slane %v7358_v43, 2 }
 0xdb1   :  { %v7307_v33 = vadd.f32 %v7306_v56, %v7300_v35  ;;  %v7360_v5 = vadd.f32 %v7359_v63, %v7358_v43  ;;  %v10434_v43 = vld [vmem:[%s21109_s6 + $0xb8] sm:$0xff] }
 0xdb2   :  { %v14611_v63 = vpack.c.bf16 %v10434_v43, %v10433_v25  ;;  %v21864_v43 = vld [vmem:[#allocation148_spill] sm:$0xff] }
 0xdb3   :  { %7308 = vadd.xlane.f32.xlu0 %v7307_v33  ;;  %v7361_v16 = vrot.slane %v7360_v5, 1  ;;  %v10427_v33 = vld [vmem:[%s21109_s6 + $0x80] sm:$0xff] }
 0xdb5   :  { %v7362_v56 = vadd.f32 %v7361_v16, %v7360_v5  ;;  %v10436_v5 = vld [vmem:[%s21109_s6 + $0xc8] sm:$0xff] }
 0xe40   :  { %v7309_v2 = vpop.xlane.xlu0 %7308 }
 0xe41   :  { %v7310_v30 = vrot.slane %v7309_v2, 4 }
 0xe43   :  { %v7311_v24 = vadd.f32 %v7310_v30, %v7309_v2  ;;  %v14599_v2 = vpack.c.bf16 %v10428_v0, %v10427_v33  ;;  %v10430_v30 = vld [vmem:[%s21109_s6 + $0x98] sm:$0xff]  ;;  %v10439_v0 = vld [vmem:[%s21109_s6 + $0xe0] sm:$0xff] }
 0xe45   :  { %v7312_v13 = vrot.slane %v7311_v24, 2  ;;  %14600 = vmatprep.subr.bf16.mxu1 %v14599_v2 }
 0xe46   :  { %14602 = vmatpush3.bf16.msra.mxu1 %v14599_v2 }
 0xe47   :  { %v7313_v29 = vadd.f32 %v7312_v13, %v7311_v24  ;;  %v10431_v13 = vld [vmem:[%s21109_s6 + $0xa0] sm:$0xff] }
 0xe49   :  { %v7314_v45 = vrot.slane %v7313_v29, 1 }
 0xe4b   :  { %v7315_v1 = vadd.f32 %v7314_v45, %v7313_v29  ;;  %v10432_v29 = vld [vmem:[%s21109_s6 + $0xa8] sm:$0xff] }
 0xe4c   :  { %v14607_v45 = vpack.c.bf16 %v10432_v29, %v10431_v13  ;;  %v19816_v29 = vld [vmem:[%s21110_s8] sm:$0x1] }
 0xe4d   :  { %15425 = vpush %v7315_v1  ;;  %v10429_v1 = vld [vmem:[%s21109_s6 + $0x90] sm:$0xff] }
 0xe4e   :  { %v14603_v24 = vpack.c.bf16 %v10430_v30, %v10429_v1  ;;  %v10440_v1 = vld [vmem:[%s21109_s6 + $0xe8] sm:$0xff]  ;;  %v10441_v30 = vld [vmem:[%s21109_s6 + $0xf0] sm:$0xff] }
 0xe4f   :  { %v14623_v2 = vpack.c.bf16 %v10440_v1, %v10439_v0 }
 0xe50   :  { %14604 = vmatprep.subr.bf16.mxu1 %v14603_v24 }
 0xe51   :  { %14606 = vmatpush3.bf16.msra.mxu1 %v14603_v24  ;;  %v10442_v24 = vld [vmem:[%s21109_s6 + $0xf8] sm:$0xff] }
 0xe52   :  { %14608 = vmatprep.subr.bf16.mxu1 %v14607_v45  ;;  %v14627_v13 = vpack.c.bf16 %v10442_v24, %v10441_v30 }
 0xe55   :  { %14610 = vmatpush3.bf16.msra.mxu1 %v14607_v45 }
 0xe56   :  { %14612 = vmatprep.subr.bf16.mxu1 %v14611_v63 }
 0xe59   :  { %14614 = vmatpush3.bf16.msra.mxu1 %v14611_v63 }
 0xe7e   :  { %s15426_s15 = spop %15425 }
 0xe7f   :  { %s7317_s16 = smul.f32 0.001953125, %s15426_s15 }
 0xe81   :  { %s7318_s2 = sadd.f32 1e-05, %s7317_s16 }
 0xe83   :  { %v7319_v52 = vstv %s7318_s2 }
 0xe84   :  { %15523 = vrsqrt.f32 %v7319_v52  ;;  %v10435_v52 = vld [vmem:[%s21109_s6 + $0xc0] sm:$0xff] }
 0xe85   :  { %v14615_v16 = vpack.c.bf16 %v10436_v5, %v10435_v52  ;;  %v19823_v52 = vld [vmem:[%s21110_s8 + $0x1] ss:$0 sm:$0xff] }
 0xe86   :  { %21865 = vst [vmem:[#allocation149_spill] sm:$0xff] %v19823_v52 }
 0xe87   :  { %14616 = vmatprep.subr.bf16.mxu1 %v14615_v16 }
 0xe88   :  { %14618 = vmatpush3.bf16.msra.mxu1 %v14615_v16 }
 0xe8e   :  { %v15524_v35 = vpop.eup %15523 }
 0xe8f   :  { %15427 = vpush %v15524_v35  ;;  %v10437_v35 = vld [vmem:[%s21109_s6 + $0xd0] sm:$0xff] }
 0xe90   :  { %15429 = vpush %v7362_v56  ;;  %v10438_v56 = vld [vmem:[%s21109_s6 + $0xd8] sm:$0xff] }
 0xe91   :  { %v14619_v33 = vpack.c.bf16 %v10438_v56, %v10437_v35 }
 0xe93   :  { %14620 = vmatprep.subr.bf16.mxu1 %v14619_v33 }
 0xe94   :  { %14622 = vmatpush3.bf16.msra.mxu1 %v14619_v33 }
 0xe95   :  { %14624 = vmatprep.subr.bf16.mxu1 %v14623_v2 }
 0xe98   :  { %14626 = vmatpush3.bf16.msra.mxu1 %v14623_v2 }
 0xe99   :  { %14628 = vmatprep.subr.bf16.mxu1 %v14627_v13 }
 0xe9c   :  { %14630 = vmatpush3.bf16.msra.mxu1 %v14627_v13 }
 0xec0   :  { %s15428_s22 = spop %15427 }
 0xec1   :  { %v7322_v45 = vstv %s15428_s22  ;;  %s15430_s25 = spop %15429 }
 0xec2   :  { %v7323_v25 = vmul.f32 %v7322_v45, %v19816_v29  ;;  %s7364_s26 = smul.f32 0.001953125, %s15430_s25 }
 0xec4   :  { %v7327_v63 = vrot.slane %v7323_v25, %v21864_v43 }
 0xec6   :  { %v7328_v5 = vmul.f32 %v7327_v63, %v19726_v37  ;;  %v7329_v16 = vmul.f32 %v7327_v63, %v19729_v4  ;;  %v7330_v35 = vmul.f32 %v7327_v63, %v19732_v12  ;;  %v7331_v56 = vmul.f32 %v7327_v63, %v19735_v17 }
 0xec7   :  { %v7332_v33 = vmul.f32 %v7327_v63, %v19742_v42  ;;  %v7333_v0 = vmul.f32 %v7327_v63, %v19747_v59  ;;  %v7334_v1 = vmul.f32 %v7327_v63, %v19752_v6  ;;  %v7335_v2 = vmul.f32 %v7327_v63, %v19757_v39 }
 0xec8   :  { %v7340_v30 = vadd.f32 %v19823_v52, %v7328_v5  ;;  %v7341_v24 = vadd.f32 %v19823_v52, %v7329_v16  ;;  %v19836_v37 = vadd.f32 %v19823_v52, %v7330_v35  ;;  %v19839_v4 = vadd.f32 %v19823_v52, %v7331_v56 }
 0xec9   :  { %v19842_v12 = vadd.f32 %v19823_v52, %v7332_v33  ;;  %v19845_v17 = vadd.f32 %v19823_v52, %v7333_v0  ;;  %v19848_v42 = vadd.f32 %v19823_v52, %v7334_v1  ;;  %v19851_v59 = vadd.f32 %v19823_v52, %v7335_v2 }
 0xeca   :  { %v19853_v6 = vmul.f32 0.70710677, %v7340_v30  ;;  %v19855_v39 = vmul.f32 0.70710677, %v7341_v24  ;;  %v19858_v13 = vmul.f32 0.70710677, %v19836_v37  ;;  %v19876_v56 = vstv %s7364_s26 }
 0xecb   :  { %v19861_v45 = vmul.f32 0.70710677, %v19839_v4  ;;  %v19864_v25 = vmul.f32 0.70710677, %v19842_v12  ;;  %v19867_v63 = vmul.f32 0.70710677, %v19845_v17  ;;  %v7366_v10 = vsub.f32 %v19699_v60, %v19876_v56 }
 0xecc   :  { %v19870_v5 = vmul.f32 0.70710677, %v19848_v42  ;;  %v19873_v16 = vmul.f32 0.70710677, %v19851_v59  ;;  %v7465_v35 = vand.u32 2147483647, %v19853_v6  ;;  %v7367_v36 = vsub.f32 %v19697_v41, %v19876_v56 }
 0xecd   :  { %v7466_v33 = vand.u32 2147483647, %v19855_v39  ;;  %v7467_v0 = vand.u32 2147483647, %v19858_v13  ;;  %v7468_v1 = vand.u32 2147483647, %v19861_v45  ;;  %v7368_v9 = vsub.f32 %v19705_v44, %v19876_v56 }
 0xece   :  { %v7469_v2 = vand.u32 2147483647, %v19864_v25  ;;  %v7470_v51 = vand.u32 2147483647, %v19867_v63  ;;  %v7471_v48 = vand.u32 2147483647, %v19870_v5 }
 0xecf   :  { %v7472_v57 = vand.u32 2147483647, %v19873_v16  ;;  %v7481_v38 = vmul.f32 0.3275911, %v7465_v35  ;;  %v7482_v7 = vmul.f32 0.3275911, %v7466_v33 }
 0xed0   :  { %v7483_v26 = vmul.f32 0.3275911, %v7467_v0  ;;  %v7484_v58 = vmul.f32 0.3275911, %v7468_v1  ;;  %v7485_v55 = vmul.f32 0.3275911, %v7469_v2 }
 0xed1   :  { %v7486_v27 = vmul.f32 0.3275911, %v7470_v51  ;;  %v7487_v47 = vmul.f32 0.3275911, %v7471_v48  ;;  %v7488_v19 = vmul.f32 0.3275911, %v7472_v57 }
 0xed2   :  { %v7497_v20 = vadd.f32 1.0, %v7481_v38  ;;  %v7498_v21 = vadd.f32 1.0, %v7482_v7  ;;  %v7499_v11 = vadd.f32 1.0, %v7483_v26  ;;  %v19893_v32 = vmul.f32 0.5, %v7340_v30 }
 0xed3   :  { %v7500_v60 = vadd.f32 1.0, %v7484_v58  ;;  %v7501_v34 = vadd.f32 1.0, %v7485_v55  ;;  %v7502_v18 = vadd.f32 1.0, %v7486_v27  ;;  %v7689_v28 = vsub.f32 0.0, %v7465_v35 }
 0xed4   :  { %15525 = vrcp.f32 %v7497_v20  ;;  %v7690_v41 = vsub.f32 0.0, %v7466_v33  ;;  %v7691_v22 = vsub.f32 0.0, %v7467_v0  ;;  %v7503_v61 = vadd.f32 1.0, %v7487_v47 }
 0xed5   :  { %15527 = vrcp.f32 %v7498_v21  ;;  %v7692_v15 = vsub.f32 0.0, %v7468_v1  ;;  %v7693_v44 = vsub.f32 0.0, %v7469_v2  ;;  %v7504_v50 = vadd.f32 1.0, %v7488_v19 }
 0xed6   :  { %15529 = vrcp.f32 %v7499_v11  ;;  %v7694_v54 = vsub.f32 0.0, %v7470_v51  ;;  %v7705_v23 = vmul.f32 %v7689_v28, %v7465_v35  ;;  %v7695_v7 = vsub.f32 0.0, %v7471_v48 }
 0xed7   :  { %15531 = vrcp.f32 %v7500_v60  ;;  %v7706_v26 = vmul.f32 %v7690_v41, %v7466_v33  ;;  %v7707_v38 = vmul.f32 %v7691_v22, %v7467_v0  ;;  %v19895_v30 = vmul.f32 0.5, %v7341_v24 }
 0xed8   :  { %15533 = vrcp.f32 %v7501_v34  ;;  %v7696_v27 = vsub.f32 0.0, %v7472_v57  ;;  %v7708_v20 = vmul.f32 %v7692_v15, %v7468_v1  ;;  %v19898_v55 = vmul.f32 0.5, %v19836_v37 }
 0xed9   :  { %15535 = vrcp.f32 %v7502_v18  ;;  %v7709_v21 = vmul.f32 %v7693_v44, %v7469_v2  ;;  %v7721_v47 = vmul.f32 1.442695, %v7705_v23  ;;  %v19901_v19 = vmul.f32 0.5, %v19839_v4 }
 0xeda   :  { %15537 = vrcp.f32 %v7503_v61  ;;  %v7710_v28 = vmul.f32 %v7694_v54, %v7470_v51  ;;  %v7723_v11 = vmul.f32 1.442695, %v7706_v26  ;;  %v19904_v58 = vmul.f32 0.5, %v19842_v12 }
 0xedb   :  { %15539 = vrcp.f32 %v7504_v50  ;;  %v7711_v22 = vmul.f32 %v7695_v7, %v7471_v48  ;;  %v7725_v34 = vmul.f32 1.442695, %v7707_v38  ;;  %v19907_v15 = vmul.f32 0.5, %v19845_v17 }
 0xedc   :  { %v19910_v24 = vmul.f32 0.5, %v19848_v42  ;;  %v7712_v18 = vmul.f32 %v7696_v27, %v7472_v57  ;;  %v7727_v23 = vmul.f32 1.442695, %v7708_v20  ;;  %15541 = vpow2.f32 %v7721_v47 }
 0xedd   :  { %v7729_v37 = vmul.f32 1.442695, %v7709_v21  ;;  %v19913_v61 = vmul.f32 %v19723_v62, %v7366_v10  ;;  %v19916_v54 = vmul.f32 %v19723_v62, %v7367_v36  ;;  %15543 = vpow2.f32 %v7723_v11 }
 0xede   :  { %v19918_v51 = vpop.eup %15525  ;;  %v7731_v50 = vmul.f32 1.442695, %v7710_v28  ;;  %15545 = vpow2.f32 %v7725_v34  ;;  %v7733_v10 = vmul.f32 1.442695, %v7711_v22  ;;  %v19928_v17 = vmul.f32 %v19723_v62, %v7368_v9 }
 0xedf   :  { %21866 = vst [vmem:[#allocation4_spill] sm:$0xff] %v19913_v61  ;;  %21867 = vst [vmem:[#allocation81_spill] sm:$0xff] %v19916_v54  ;;  %v19924_v57 = vpop.eup %15527  ;;  %v7545_v12 = vmul.f32 1.0614054, %v19918_v51  ;;  %15547 = vpow2.f32 %v7727_v23  ;;  %v7735_v35 = vmul.f32 1.442695, %v7712_v18  ;;  %v21868_v33 = vsub.f32 %v19703_v46, %v19876_v56 }
 0xee0   :  { %v19930_v36 = vpop.eup %15529  ;;  %v7546_v42 = vmul.f32 1.0614054, %v19924_v57  ;;  %15549 = vpow2.f32 %v7729_v37  ;;  %v19944_v9 = vmul.f32 %v19913_v61, %v19913_v61  ;;  %v19951_v46 = vmul.f32 %v19916_v54, %v19916_v54 }
 0xee1   :  { %v19937_v0 = vmul.f32 %v19723_v62, %v21868_v33  ;;  %v19939_v1 = vpop.eup %15531  ;;  %v7547_v2 = vmul.f32 1.0614054, %v19930_v36  ;;  %v7561_v60 = vadd.f32 -1.4531521, %v7545_v12  ;;  %15551 = vpow2.f32 %v7731_v50 }
 0xee2   :  { %v19946_v41 = vpop.eup %15533  ;;  %v7548_v44 = vmul.f32 1.0614054, %v19939_v1  ;;  %v7562_v7 = vadd.f32 -1.4531521, %v7546_v42  ;;  %15553 = vpow2.f32 %v7733_v10  ;;  %vm7785_vm2 = vcmp.ge.f32.partialorder %v19853_v6, 0.0 }
 0xee3   :  { %v19953_v26 = vpop.eup %15535  ;;  %v7549_v38 = vmul.f32 1.0614054, %v19946_v41  ;;  %v7563_v27 = vadd.f32 -1.4531521, %v7547_v2  ;;  %v7577_v20 = vmul.f32 %v19918_v51, %v7561_v60  ;;  %15555 = vpow2.f32 %v7735_v35 }
 0xee4   :  { %v19957_v21 = vpop.eup %15537  ;;  %v7550_v47 = vmul.f32 1.0614054, %v19953_v26  ;;  %v7564_v28 = vadd.f32 -1.4531521, %v7548_v44  ;;  %v7578_v11 = vmul.f32 %v19924_v57, %v7562_v7  ;;  %vm7786_vm3 = vcmp.ge.f32.partialorder %v19855_v39, 0.0 }
 0xee5   :  { %v19961_v22 = vpop.eup %15539  ;;  %v7551_v34 = vmul.f32 1.0614054, %v19957_v21  ;;  %v7565_v18 = vadd.f32 -1.4531521, %v7549_v38  ;;  %v7579_v23 = vmul.f32 %v19930_v36, %v7563_v27  ;;  %v7593_v37 = vadd.f32 1.4214138, %v7577_v20 }
 0xee6   :  { %v7552_v50 = vmul.f32 1.0614054, %v19961_v22  ;;  %v7566_v12 = vadd.f32 -1.4531521, %v7550_v47  ;;  %v7580_v10 = vmul.f32 %v19939_v1, %v7564_v28  ;;  %v7594_v42 = vadd.f32 1.4214138, %v7578_v11  ;;  %v15542_v33 = vpop.eup %15541 }
 0xee7   :  { %v7567_v2 = vadd.f32 -1.4531521, %v7551_v34  ;;  %v7581_v60 = vmul.f32 %v19946_v41, %v7565_v18  ;;  %v7595_v44 = vadd.f32 1.4214138, %v7579_v23  ;;  %v7609_v35 = vmul.f32 %v19918_v51, %v7593_v37  ;;  %v15544_v7 = vpop.eup %15543 }
 0xee8   :  { %v7568_v4 = vadd.f32 -1.4531521, %v7552_v50  ;;  %v7582_v38 = vmul.f32 %v19953_v26, %v7566_v12  ;;  %v7596_v48 = vadd.f32 1.4214138, %v7580_v10  ;;  %v7610_v27 = vmul.f32 %v19924_v57, %v7594_v42  ;;  %v15546_v20 = vpop.eup %15545 }
 0xee9   :  { %v7583_v47 = vmul.f32 %v19957_v21, %v7567_v2  ;;  %v7597_v53 = vadd.f32 1.4214138, %v7581_v60  ;;  %v7611_v28 = vmul.f32 %v19930_v36, %v7595_v44  ;;  %v7625_v11 = vadd.f32 -0.28449672, %v7609_v35  ;;  %v15548_v34 = vpop.eup %15547 }
 0xeea   :  { %v7584_v18 = vmul.f32 %v19961_v22, %v7568_v4  ;;  %v7598_v23 = vadd.f32 1.4214138, %v7582_v38  ;;  %v7612_v37 = vmul.f32 %v19939_v1, %v7596_v48  ;;  %v7626_v31 = vadd.f32 -0.28449672, %v7610_v27  ;;  %v15550_v50 = vpop.eup %15549 }
 0xeeb   :  { %v7599_v3 = vadd.f32 1.4214138, %v7583_v47  ;;  %v7613_v12 = vmul.f32 %v19946_v41, %v7597_v53  ;;  %v7627_v10 = vadd.f32 -0.28449672, %v7611_v28  ;;  %v7641_v42 = vmul.f32 %v19918_v51, %v7625_v11  ;;  %v15552_v52 = vpop.eup %15551 }
 0xeec   :  { %v7600_v2 = vadd.f32 1.4214138, %v7584_v18  ;;  %v7614_v60 = vmul.f32 %v19953_v26, %v7598_v23  ;;  %v7628_v44 = vadd.f32 -0.28449672, %v7612_v37  ;;  %v7642_v35 = vmul.f32 %v19924_v57, %v7626_v31  ;;  %v15554_v54 = vpop.eup %15553 }
 0xeed   :  { %v7615_v4 = vmul.f32 %v19957_v21, %v7599_v3  ;;  %v7629_v38 = vadd.f32 -0.28449672, %v7613_v12  ;;  %v7643_v48 = vmul.f32 %v19930_v36, %v7627_v10  ;;  %v7657_v27 = vadd.f32 0.2548296, %v7641_v42  ;;  %v15556_v47 = vpop.eup %15555 }
 0xeee   :  { %v7616_v53 = vmul.f32 %v19961_v22, %v7600_v2  ;;  %v7630_v28 = vadd.f32 -0.28449672, %v7614_v60  ;;  %v7644_v11 = vmul.f32 %v19939_v1, %v7628_v44  ;;  %v7658_v61 = vadd.f32 0.2548296, %v7642_v35 }
 0xeef   :  { %v7631_v18 = vadd.f32 -0.28449672, %v7615_v4  ;;  %v7645_v23 = vmul.f32 %v19946_v41, %v7629_v38  ;;  %v7659_v31 = vadd.f32 0.2548296, %v7643_v48  ;;  %v7673_v37 = vmul.f32 %v19918_v51, %v7657_v27 }
 0xef0   :  { %v7632_v3 = vadd.f32 -0.28449672, %v7616_v53  ;;  %v7646_v12 = vmul.f32 %v19953_v26, %v7630_v28  ;;  %v7660_v10 = vadd.f32 0.2548296, %v7644_v11  ;;  %v7674_v42 = vmul.f32 %v19924_v57, %v7658_v61 }
 0xef1   :  { %vm7787_vm4 = vcmp.ge.f32.partialorder %v19858_v13, 0.0  ;;  %v7647_v2 = vmul.f32 %v19957_v21, %v7631_v18  ;;  %v7661_v60 = vadd.f32 0.2548296, %v7645_v23  ;;  %v7675_v44 = vmul.f32 %v19930_v36, %v7659_v31 }
 0xef2   :  { %v7753_v35 = vmul.f32 %v15542_v33, %v7673_v37  ;;  %vm7788_vm5 = vcmp.ge.f32.partialorder %v19861_v45, 0.0  ;;  %v7648_v51 = vmul.f32 %v19961_v22, %v7632_v3  ;;  %v7662_v4 = vadd.f32 0.2548296, %v7646_v12 }
 0xef3   :  { %v7676_v38 = vmul.f32 %v19939_v1, %v7660_v10  ;;  %v7754_v48 = vmul.f32 %v15544_v7, %v7674_v42  ;;  %vm7789_vm6 = vcmp.ge.f32.partialorder %v19864_v25, 0.0  ;;  %v7663_v27 = vadd.f32 0.2548296, %v7647_v2 }
 0xef4   :  { %v7677_v61 = vmul.f32 %v19946_v41, %v7661_v60  ;;  %v7755_v57 = vmul.f32 %v15546_v20, %v7675_v44  ;;  %v7769_v53 = vsub.f32 1.0, %v7753_v35  ;;  %vm7790_vm7 = vcmp.ge.f32.partialorder %v19867_v63, 0.0 }
 0xef5   :  { %v7664_v28 = vadd.f32 0.2548296, %v7648_v51  ;;  %v7678_v36 = vmul.f32 %v19953_v26, %v7662_v4  ;;  %v7756_v33 = vmul.f32 %v15548_v34, %v7676_v38  ;;  %v7770_v11 = vsub.f32 1.0, %v7754_v48 }
 0xef6   :  { %vm7791_vm8 = vcmp.ge.f32.partialorder %v19870_v5, 0.0  ;;  %v7679_v18 = vmul.f32 %v19957_v21, %v7663_v27  ;;  %v7757_v1 = vmul.f32 %v15550_v50, %v7677_v61  ;;  %v7771_v7 = vsub.f32 1.0, %v7755_v57 }
 0xef7   :  { %vm7792_vm9 = vcmp.ge.f32.partialorder %v19873_v16, 0.0  ;;  %v7801_v23 = vsub.f32 0.0, %v7769_v53  ;;  %v7680_v41 = vmul.f32 %v19961_v22, %v7664_v28  ;;  %v7758_v20 = vmul.f32 %v15552_v52, %v7678_v36 }
 0xef8   :  { %v7772_v31 = vsub.f32 1.0, %v7756_v33  ;;  %v7802_v37 = vsub.f32 0.0, %v7770_v11  ;;  %v7759_v3 = vmul.f32 %v15554_v54, %v7679_v18  ;;  %v7773_v12 = vsub.f32 1.0, %v7757_v1  ;;  %v21871_v18 = vld [vmem:[#allocation3_spill] sm:$0xff] }
 0xef9   :  { %v7803_v10 = vsub.f32 0.0, %v7771_v7  ;;  %v7817_v26 = vsel %vm7785_vm2, %v7769_v53, %v7801_v23  ;;  %v7760_v34 = vmul.f32 %v15556_v47, %v7680_v41  ;;  %v7774_v42 = vsub.f32 1.0, %v7758_v20 }
 0xefa   :  { %v7804_v2 = vsub.f32 0.0, %v7772_v31  ;;  %v7818_v21 = vsel %vm7786_vm3, %v7770_v11, %v7802_v37  ;;  %v7775_v50 = vsub.f32 1.0, %v7759_v3  ;;  %v7805_v60 = vsub.f32 0.0, %v7773_v12  ;;  %v21870_v11 = vld [vmem:[#allocation6_spill] sm:$0xff]  ;;  %v21874_v3 = vld [vmem:[#allocation8_spill] sm:$0xff] }
 0xefb   :  { %v7819_v22 = vsel %vm7787_vm4, %v7771_v7, %v7803_v10  ;;  %v7833_v52 = vadd.f32 1.0, %v7817_v26  ;;  %v7776_v44 = vsub.f32 1.0, %v7760_v34  ;;  %v7806_v35 = vsub.f32 0.0, %v7774_v42  ;;  %v21875_v34 = vld [vmem:[#allocation7_spill] sm:$0xff] }
 0xefc   :  { %v7820_v54 = vsel %vm7788_vm5, %v7772_v31, %v7804_v2  ;;  %v7834_v51 = vadd.f32 1.0, %v7818_v21  ;;  %v7807_v6 = vsub.f32 0.0, %v7775_v50  ;;  %v7821_v47 = vsel %vm7789_vm6, %v7773_v12, %v7805_v60 }
 0xefd   :  { %v7835_v4 = vadd.f32 1.0, %v7819_v22  ;;  %v7836_v38 = vadd.f32 1.0, %v7820_v54  ;;  %v7808_v39 = vsub.f32 0.0, %v7776_v44  ;;  %v7822_v48 = vsel %vm7790_vm7, %v7774_v42, %v7806_v35  ;;  %v21878_v35 = vld [vmem:[#allocation12_spill] sm:$0xff] }
 0xefe   :  { %v7837_v27 = vadd.f32 1.0, %v7821_v47  ;;  %v7849_v13 = vmul.f32 %v7833_v52, %v19893_v32  ;;  %v7823_v61 = vsel %vm7791_vm8, %v7775_v50, %v7807_v6  ;;  %v7838_v57 = vadd.f32 1.0, %v7822_v48  ;;  %v21876_v50 = vld [vmem:[#allocation10_spill] sm:$0xff]  ;;  %v21877_v52 = vld [vmem:[#allocation9_spill] sm:$0xff] }
 0xeff   :  { %v7850_v45 = vmul.f32 %v7834_v51, %v19895_v30  ;;  %v7851_v53 = vmul.f32 %v7835_v4, %v19898_v55  ;;  %v7824_v25 = vsel %vm7792_vm9, %v7776_v44, %v7808_v39  ;;  %v7839_v28 = vadd.f32 1.0, %v7823_v61 }
 0xf00   :  { %v7852_v36 = vmul.f32 %v7836_v38, %v19901_v19  ;;  %v7853_v63 = vmul.f32 %v7837_v27, %v19904_v58  ;;  %7865 = vst [vmem:[#allocation2 + $0x10] sm:$0xff] %v7849_v13  ;;  %v7440_v33 = vmul.f32 0.5, %v19851_v59  ;;  %v7840_v32 = vadd.f32 1.0, %v7824_v25  ;;  %v7913_v27 = vld [vmem:[%s21109_s6] sm:$0xff] }
 0xf01   :  { %v7854_v5 = vmul.f32 %v7838_v57, %v19907_v15  ;;  %7866 = vst [vmem:[#allocation2 + $0x18] sm:$0xff] %v7850_v45  ;;  %7867 = vst [vmem:[#allocation2 + $0x20] sm:$0xff] %v7851_v53  ;;  %v7372_v30 = vsub.f32 %v19717_v40, %v19876_v56  ;;  %v7855_v55 = vmul.f32 %v7839_v28, %v19910_v24  ;;  %v7915_v57 = vld [vmem:[%s21109_s6 + $0x10] sm:$0xff]  ;;  %v7917_v28 = vld [vmem:[%s21109_s6 + $0x20] sm:$0xff] }
 0xf02   :  { %7868 = vst [vmem:[#allocation2 + $0x28] sm:$0xff] %v7852_v36  ;;  %7869 = vst [vmem:[#allocation2 + $0x30] sm:$0xff] %v7853_v63  ;;  %v21869_v16 = vsub.f32 %v19711_v14, %v19876_v56  ;;  %v7384_v59 = vmul.f32 %v19928_v17, %v19928_v17  ;;  %v7390_v58 = vadd.f32 %v19951_v46, %v19944_v9 }
 0xf03   :  { %v7856_v15 = vmul.f32 %v7840_v32, %v7440_v33  ;;  %7870 = vst [vmem:[#allocation2 + $0x38] sm:$0xff] %v7854_v5  ;;  %v7946_v40 = vmul.f32 %v7849_v13, %v21870_v11  ;;  %v7947_v24 = vmul.f32 %v7850_v45, %v21871_v18  ;;  %7871 = vst [vmem:[#allocation2 + $0x40] sm:$0xff] %v7855_v55  ;;  %v7914_v13 = vld [vmem:[%s21109_s6 + $0x8] sm:$0xff]  ;;  %v7916_v45 = vld [vmem:[%s21109_s6 + $0x18] sm:$0xff] }
 0xf04   :  { %v20033_v19 = vmul.f32 %v19723_v62, %v21869_v16  ;;  %v7373_v1 = vsub.f32 %v19714_v49, %v19876_v56  ;;  %v21872_v14 = vsub.f32 %v19708_v8, %v19876_v56  ;;  %v7385_v23 = vmul.f32 %v19937_v0, %v19937_v0  ;;  %v21873_v49 = vld [vmem:[#allocation5_spill] sm:$0xff]  ;;  %v7920_v32 = vld [vmem:[%s21109_s6 + $0x38] sm:$0xff]  ;;  %v7926_v18 = vld [vmem:[%s21109_s6 + $0x68] sm:$0xff] }
 0xf05   :  { %v7391_v9 = vadd.f32 %v7390_v58, %v7384_v59  ;;  %7872 = vst [vmem:[#allocation2 + $0x48] sm:$0xff] %v7856_v15  ;;  %13264 = vmatmul.mubr.f32.vlgmr.msra.gmra.mrb[16].mxu1 %v7946_v40  ;;  %v20052_v46 = vmul.f32 %v19723_v62, %v7372_v30  ;;  %v7948_v31 = vmul.f32 %v7851_v53, %v21873_v49  ;;  %v7921_v30 = vld [vmem:[%s21109_s6 + $0x40] sm:$0xff]  ;;  %v7923_v59 = vld [vmem:[%s21109_s6 + $0x50] sm:$0xff]  ;;  %v7924_v58 = vld [vmem:[%s21109_s6 + $0x58] sm:$0xff] }
 0xf06   :  { %v20047_v7 = vmul.f32 %v19723_v62, %v21872_v14  ;;  %v7386_v41 = vmul.f32 %v20033_v19, %v20033_v19  ;;  %13266 = vmatprep.mubr.f32.mxu1 %v7947_v24  ;;  %v20058_v8 = vmul.f32 %v19723_v62, %v7373_v1  ;;  %v7949_v12 = vmul.f32 %v7852_v36, %v21874_v3  ;;  %v7918_v36 = vld [vmem:[%s21109_s6 + $0x28] sm:$0xff]  ;;  %v7925_v40 = vld [vmem:[%s21109_s6 + $0x60] sm:$0xff]  ;;  %v7927_v1 = vld [vmem:[%s21109_s6 + $0x70] sm:$0xff] }
 0xf07   :  { %v7392_v20 = vadd.f32 %v7391_v9, %v7385_v23  ;;  %v7388_v10 = vmul.f32 %v20052_v46, %v20052_v46  ;;  %v7950_v42 = vmul.f32 %v7853_v63, %v21875_v34  ;;  %v7951_v60 = vmul.f32 %v7854_v5, %v21876_v50  ;;  %v7919_v63 = vld [vmem:[%s21109_s6 + $0x30] sm:$0xff]  ;;  %v7928_v14 = vld [vmem:[%s21109_s6 + $0x78] sm:$0xff]  ;;  %v10443_v9 = vld [vmem:[%s21109_s6 + $0x100] sm:$0xff] }
 0xf08   :  { %v7387_v56 = vmul.f32 %v20047_v7, %v20047_v7  ;;  %v7389_v2 = vmul.f32 %v20058_v8, %v20058_v8  ;;  %v7952_v44 = vmul.f32 %v7855_v55, %v21877_v52  ;;  %v7953_v54 = vmul.f32 %v7856_v15, %v21878_v35  ;;  %v7922_v55 = vld [vmem:[%s21109_s6 + $0x48] sm:$0xff] }
 0xf09   :  { %v7393_v37 = vadd.f32 %v7392_v20, %v7386_v41  ;;  %13267 = vmatmul.mubr.f32.gmra.mrb[18].mxu1 %v7948_v31  ;;  %v14631_v61 = vpack.c.bf16 %v7914_v13, %v7913_v27  ;;  %v14635_v53 = vpack.c.bf16 %v7916_v45, %v7915_v57  ;;  %v14639_v33 = vpack.c.bf16 %v7918_v36, %v7917_v28  ;;  %v10444_v41 = vld [vmem:[%s21109_s6 + $0x108] sm:$0xff] }
 0xf0a   :  { %13269 = vmatprep.mubr.f32.mxu1 %v7949_v12  ;;  %v14643_v5 = vpack.c.bf16 %v7920_v32, %v7919_v63  ;;  %v14647_v16 = vpack.c.bf16 %v7922_v55, %v7921_v30  ;;  %v14651_v11 = vpack.c.bf16 %v7924_v58, %v7923_v59  ;;  %v14655_v24 = vpack.c.bf16 %v7926_v18, %v7925_v40  ;;  %v21880_v12 = vld [vmem:[#allocation81_spill] sm:$0xff] }
 0xf0b   :  { %v7394_v26 = vadd.f32 %v7393_v37, %v7387_v56  ;;  %14632 = vmatprep.subr.bf16.mxu1 %v14631_v61  ;;  %v14659_v23 = vpack.c.bf16 %v7928_v14, %v7927_v1  ;;  %v20125_v20 = vpack.c.bf16 %v10444_v41, %v10443_v9  ;;  %v21879_v37 = vld [vmem:[#allocation4_spill] sm:$0xff] }
 0xf0c   :  { %14634 = vmatpush3.bf16.msra.mxu1 %v14631_v61 }
 0xf0d   :  { %v7395_v21 = vadd.f32 %v7394_v26, %v7388_v10  ;;  %13270 = vmatmul.mubr.f32.gmra.mrb[20].mxu1 %v7950_v42  ;;  %14636 = vmatprep.subr.bf16.mxu1 %v14635_v53 }
 0xf0e   :  { %13272 = vmatprep.mubr.f32.mxu1 %v7951_v60  ;;  %v21881_v60 = vld [vmem:[#allocation149_spill] sm:$0xff] }
 0xf0f   :  { %v7396_v22 = vadd.f32 %v7395_v21, %v7389_v2 }
 0xf10   :  { %14638 = vmatpush3.bf16.msra.mxu1 %v14635_v53 }
 0xf11   :  { %7397 = vadd.xlane.f32.xlu0 %v7396_v22  ;;  %13273 = vmatmul.mubr.f32.gmra.mrb[22].mxu1 %v7952_v44 }
 0xf12   :  { %13275 = vmatprep.mubr.f32.mxu1 %v7953_v54  ;;  %14640 = vmatprep.subr.bf16.mxu1 %v14639_v33 }
 0xf14   :  { %14642 = vmatpush3.bf16.msra.mxu1 %v14639_v33 }
 0xf15   :  { %14644 = vmatprep.subr.bf16.mxu1 %v14643_v5 }
 0xf18   :  { %14646 = vmatpush3.bf16.msra.mxu1 %v14643_v5 }
 0xf19   :  { %14648 = vmatprep.subr.bf16.mxu1 %v14647_v16 }
 0xf1c   :  { %14650 = vmatpush3.bf16.msra.mxu1 %v14647_v16 }
 0xf1d   :  { %14652 = vmatprep.subr.bf16.mxu1 %v14651_v11 }
 0xf20   :  { %14654 = vmatpush3.bf16.msra.mxu1 %v14651_v11 }
 0xf21   :  { %14656 = vmatprep.subr.bf16.mxu1 %v14655_v24 }
 0xf24   :  { %14658 = vmatpush3.bf16.msra.mxu1 %v14655_v24 }
 0xf25   :  { %14660 = vmatprep.subr.bf16.mxu1 %v14659_v23 }
 0xf28   :  { %14662 = vmatpush3.bf16.msra.mxu1 %v14659_v23 }
 0xf29   :  { %14664 = vmatprep.subr.bf16.mxu1 %v20125_v20 }
 0xf9e   :  { %v7398_v51 = vpop.xlane.xlu0 %7397 }
 0xf9f   :  { %v7399_v6 = vrot.slane %v7398_v51, 4 }
 0xfa1   :  { %v7400_v47 = vadd.f32 %v7399_v6, %v7398_v51 }
 0xfa3   :  { %v7401_v4 = vrot.slane %v7400_v47, 2 }
 0xfa5   :  { %v7402_v38 = vadd.f32 %v7401_v4, %v7400_v47 }
 0xfa7   :  { %v7403_v39 = vrot.slane %v7402_v38, 1 }
 0xfa9   :  { %v7404_v48 = vadd.f32 %v7403_v39, %v7402_v38 }
 0xfab   :  { %15431 = vpush %v7404_v48 }
 0xfdc   :  { %s15432_s30 = spop %15431 }
 0xfdd   :  { %s7406_s10 = smul.f32 0.001953125, %s15432_s30 }
 0xfdf   :  { %s7407_s11 = sadd.f32 1e-05, %s7406_s10 }
 0xfe1   :  { %v7408_v25 = vstv %s7407_s11 }
 0xfe2   :  { %15557 = vrsqrt.f32 %v7408_v25 }
 0xfec   :  { %v15558_v15 = vpop.eup %15557 }
 0xfed   :  { %15433 = vpush %v15558_v15 }
0x101e   :  { %s15434_s15 = spop %15433 }
0x101f   :  { %v7411_v49 = vstv %s15434_s15 }
0x1020   :  { %v7412_v31 = vmul.f32 %v7411_v49, %v19816_v29 }
0x1022   :  { %v7416_v56 = vrot.slane %v7412_v31, %v21864_v43 }
0x1024   :  { %v7417_v3 = vmul.f32 %v7416_v56, %v21879_v37  ;;  %v7418_v10 = vmul.f32 %v7416_v56, %v21880_v12  ;;  %v7419_v26 = vmul.f32 %v7416_v56, %v19928_v17  ;;  %v7420_v34 = vmul.f32 %v7416_v56, %v19937_v0 }
0x1025   :  { %v7421_v42 = vmul.f32 %v7416_v56, %v20033_v19  ;;  %v7422_v2 = vmul.f32 %v7416_v56, %v20047_v7  ;;  %v7423_v21 = vmul.f32 %v7416_v56, %v20052_v46  ;;  %v7424_v50 = vmul.f32 %v7416_v56, %v20058_v8 }
0x1026   :  { %v20139_v29 = vadd.f32 %v21881_v60, %v7417_v3  ;;  %v20142_v22 = vadd.f32 %v21881_v60, %v7418_v10  ;;  %v20145_v52 = vadd.f32 %v21881_v60, %v7419_v26  ;;  %v20148_v17 = vadd.f32 %v21881_v60, %v7420_v34 }
0x1027   :  { %v20151_v0 = vadd.f32 %v21881_v60, %v7421_v42  ;;  %v20154_v19 = vadd.f32 %v21881_v60, %v7422_v2  ;;  %v20157_v7 = vadd.f32 %v21881_v60, %v7423_v21  ;;  %v20160_v46 = vadd.f32 %v21881_v60, %v7424_v50 }
0x1028   :  { %v20163_v8 = vmul.f32 0.70710677, %v20139_v29  ;;  %v20166_v44 = vmul.f32 0.70710677, %v20142_v22  ;;  %v20169_v35 = vmul.f32 0.70710677, %v20145_v52 }
0x1029   :  { %v20172_v54 = vmul.f32 0.70710677, %v20148_v17  ;;  %v20175_v51 = vmul.f32 0.70710677, %v20151_v0  ;;  %v20178_v6 = vmul.f32 0.70710677, %v20154_v19 }
0x102a   :  { %v20181_v47 = vmul.f32 0.70710677, %v20157_v7  ;;  %v20184_v4 = vmul.f32 0.70710677, %v20160_v46  ;;  %v7473_v38 = vand.u32 2147483647, %v20163_v8 }
0x102b   :  { %v7474_v39 = vand.u32 2147483647, %v20166_v44  ;;  %v7475_v48 = vand.u32 2147483647, %v20169_v35  ;;  %v7476_v27 = vand.u32 2147483647, %v20172_v54 }
0x102c   :  { %v7477_v13 = vand.u32 2147483647, %v20175_v51  ;;  %v7478_v61 = vand.u32 2147483647, %v20178_v6  ;;  %v7479_v57 = vand.u32 2147483647, %v20181_v47 }
0x102d   :  { %v7480_v45 = vand.u32 2147483647, %v20184_v4  ;;  %v7489_v53 = vmul.f32 0.3275911, %v7473_v38  ;;  %v7490_v25 = vmul.f32 0.3275911, %v7474_v39 }
0x102e   :  { %v7491_v28 = vmul.f32 0.3275911, %v7475_v48  ;;  %v7492_v36 = vmul.f32 0.3275911, %v7476_v27  ;;  %v7493_v63 = vmul.f32 0.3275911, %v7477_v13 }
0x102f   :  { %v7494_v33 = vmul.f32 0.3275911, %v7478_v61  ;;  %v7495_v32 = vmul.f32 0.3275911, %v7479_v57  ;;  %v7496_v5 = vmul.f32 0.3275911, %v7480_v45 }
0x1030   :  { %v7505_v30 = vadd.f32 1.0, %v7489_v53  ;;  %v7506_v55 = vadd.f32 1.0, %v7490_v25  ;;  %v7507_v16 = vadd.f32 1.0, %v7491_v28  ;;  %v7508_v59 = vadd.f32 1.0, %v7492_v36 }
0x1031   :  { %v7509_v58 = vadd.f32 1.0, %v7493_v63  ;;  %v7510_v15 = vadd.f32 1.0, %v7494_v33  ;;  %v7697_v11 = vsub.f32 0.0, %v7473_v38  ;;  %v7698_v40 = vsub.f32 0.0, %v7474_v39 }
0x1032   :  { %15559 = vrcp.f32 %v7505_v30  ;;  %v7699_v18 = vsub.f32 0.0, %v7475_v48  ;;  %v7511_v24 = vadd.f32 1.0, %v7495_v32  ;;  %v7700_v1 = vsub.f32 0.0, %v7476_v27 }
0x1033   :  { %15561 = vrcp.f32 %v7506_v55  ;;  %v7701_v14 = vsub.f32 0.0, %v7477_v13  ;;  %v7512_v23 = vadd.f32 1.0, %v7496_v5  ;;  %v7702_v9 = vsub.f32 0.0, %v7478_v61 }
0x1034   :  { %15563 = vrcp.f32 %v7507_v16  ;;  %v7713_v41 = vmul.f32 %v7697_v11, %v7473_v38  ;;  %v7703_v49 = vsub.f32 0.0, %v7479_v57  ;;  %v7714_v31 = vmul.f32 %v7698_v40, %v7474_v39 }
0x1035   :  { %15565 = vrcp.f32 %v7508_v59  ;;  %v7715_v56 = vmul.f32 %v7699_v18, %v7475_v48  ;;  %v7704_v37 = vsub.f32 0.0, %v7480_v45  ;;  %v7716_v3 = vmul.f32 %v7700_v1, %v7476_v27 }
0x1036   :  { %15567 = vrcp.f32 %v7509_v58  ;;  %v7717_v12 = vmul.f32 %v7701_v14, %v7477_v13  ;;  %v7737_v10 = vmul.f32 1.442695, %v7713_v41  ;;  %v7718_v26 = vmul.f32 %v7702_v9, %v7478_v61 }
0x1037   :  { %15569 = vrcp.f32 %v7510_v15  ;;  %v7739_v34 = vmul.f32 1.442695, %v7714_v31  ;;  %v7719_v42 = vmul.f32 %v7703_v49, %v7479_v57  ;;  %v7741_v2 = vmul.f32 1.442695, %v7715_v56 }
0x1038   :  { %15571 = vrcp.f32 %v7511_v24  ;;  %v7720_v21 = vmul.f32 %v7704_v37, %v7480_v45  ;;  %v7743_v50 = vmul.f32 1.442695, %v7716_v3  ;;  %v20195_v60 = vmul.f32 0.5, %v20139_v29 }
0x1039   :  { %15573 = vrcp.f32 %v7512_v23  ;;  %v20198_v38 = vmul.f32 0.5, %v20142_v22  ;;  %v7745_v39 = vmul.f32 1.442695, %v7717_v12  ;;  %v20203_v27 = vmul.f32 0.5, %v20145_v52 }
0x103a   :  { %15575 = vpow2.f32 %v7737_v10  ;;  %v20206_v13 = vmul.f32 0.5, %v20148_v17  ;;  %v7747_v61 = vmul.f32 1.442695, %v7718_v26  ;;  %v20211_v29 = vmul.f32 0.5, %v20151_v0 }
0x103b   :  { %15577 = vpow2.f32 %v7739_v34  ;;  %v7749_v45 = vmul.f32 1.442695, %v7719_v42  ;;  %v20217_v25 = vmul.f32 0.5, %v20154_v19  ;;  %v7751_v17 = vmul.f32 1.442695, %v7720_v21 }
0x103c   :  { %v20200_v48 = vpop.eup %15559  ;;  %15579 = vpow2.f32 %v7741_v2  ;;  %v20223_v36 = vmul.f32 0.5, %v20157_v7  ;;  %v20229_v32 = vmul.f32 0.5, %v20160_v46  ;;  %vm7793_vm10 = vcmp.ge.f32.partialorder %v20163_v8, 0.0 }
0x103d   :  { %v20208_v57 = vpop.eup %15561  ;;  %v7553_v22 = vmul.f32 1.0614054, %v20200_v48  ;;  %15581 = vpow2.f32 %v7743_v50  ;;  %vm7794_vm11 = vcmp.ge.f32.partialorder %v20166_v44, 0.0  ;;  %vm7795_vm12 = vcmp.ge.f32.partialorder %v20169_v35, 0.0 }
0x103e   :  { %v20214_v53 = vpop.eup %15563  ;;  %v7554_v52 = vmul.f32 1.0614054, %v20208_v57  ;;  %15583 = vpow2.f32 %v7745_v39  ;;  %vm7796_vm13 = vcmp.ge.f32.partialorder %v20172_v54, 0.0  ;;  %vm7797_vm14 = vcmp.ge.f32.partialorder %v20175_v51, 0.0 }
0x103f   :  { %v20220_v28 = vpop.eup %15565  ;;  %v7555_v0 = vmul.f32 1.0614054, %v20214_v53  ;;  %v7569_v63 = vadd.f32 -1.4531521, %v7553_v22  ;;  %15585 = vpow2.f32 %v7747_v61  ;;  %vm7798_vm15 = vcmp.ge.f32.partialorder %v20178_v6, 0.0 }
0x1040   :  { %v20226_v33 = vpop.eup %15567  ;;  %v7556_v19 = vmul.f32 1.0614054, %v20220_v28  ;;  %v7570_v5 = vadd.f32 -1.4531521, %v7554_v52  ;;  %15587 = vpow2.f32 %v7749_v45  ;;  %vm7799_vm0 = vcmp.ge.f32.partialorder %v20181_v47, 0.0 }
0x1041   :  { %v20232_v30 = vpop.eup %15569  ;;  %v7557_v55 = vmul.f32 1.0614054, %v20226_v33  ;;  %v7571_v16 = vadd.f32 -1.4531521, %v7555_v0  ;;  %v7585_v7 = vmul.f32 %v20200_v48, %v7569_v63  ;;  %15589 = vpow2.f32 %v7751_v17 }
0x1042   :  { %v20236_v59 = vpop.eup %15571  ;;  %v7558_v58 = vmul.f32 1.0614054, %v20232_v30  ;;  %v7572_v15 = vadd.f32 -1.4531521, %v7556_v19  ;;  %v7586_v46 = vmul.f32 %v20208_v57, %v7570_v5  ;;  %vm7800_vm1 = vcmp.ge.f32.partialorder %v20184_v4, 0.0 }
0x1043   :  { %v20240_v11 = vpop.eup %15573  ;;  %v7559_v40 = vmul.f32 1.0614054, %v20236_v59  ;;  %v7573_v18 = vadd.f32 -1.4531521, %v7557_v55  ;;  %v7587_v24 = vmul.f32 %v20214_v53, %v7571_v16  ;;  %v7601_v1 = vadd.f32 1.4214138, %v7585_v7 }
0x1044   :  { %v7560_v14 = vmul.f32 1.0614054, %v20240_v11  ;;  %v7574_v23 = vadd.f32 -1.4531521, %v7558_v58  ;;  %v7588_v9 = vmul.f32 %v20220_v28, %v7572_v15  ;;  %v7602_v41 = vadd.f32 1.4214138, %v7586_v46  ;;  %v15576_v49 = vpop.eup %15575 }
0x1045   :  { %v7575_v31 = vadd.f32 -1.4531521, %v7559_v40  ;;  %v7589_v56 = vmul.f32 %v20226_v33, %v7573_v18  ;;  %v7603_v37 = vadd.f32 1.4214138, %v7587_v24  ;;  %v7617_v3 = vmul.f32 %v20200_v48, %v7601_v1  ;;  %v15578_v12 = vpop.eup %15577 }
0x1046   :  { %v7576_v10 = vadd.f32 -1.4531521, %v7560_v14  ;;  %v7590_v26 = vmul.f32 %v20232_v30, %v7574_v23  ;;  %v7604_v34 = vadd.f32 1.4214138, %v7588_v9  ;;  %v7618_v42 = vmul.f32 %v20208_v57, %v7602_v41  ;;  %v15580_v2 = vpop.eup %15579 }
0x1047   :  { %v7591_v21 = vmul.f32 %v20236_v59, %v7575_v31  ;;  %v7605_v50 = vadd.f32 1.4214138, %v7589_v56  ;;  %v7619_v39 = vmul.f32 %v20214_v53, %v7603_v37  ;;  %v7633_v61 = vadd.f32 -0.28449672, %v7617_v3  ;;  %v15582_v22 = vpop.eup %15581 }
0x1048   :  { %v7592_v45 = vmul.f32 %v20240_v11, %v7576_v10  ;;  %v7606_v52 = vadd.f32 1.4214138, %v7590_v26  ;;  %v7620_v17 = vmul.f32 %v20220_v28, %v7604_v34  ;;  %v7634_v0 = vadd.f32 -0.28449672, %v7618_v42  ;;  %v15584_v63 = vpop.eup %15583 }
0x1049   :  { %v7607_v19 = vadd.f32 1.4214138, %v7591_v21  ;;  %v7621_v5 = vmul.f32 %v20226_v33, %v7605_v50  ;;  %v7635_v55 = vadd.f32 -0.28449672, %v7619_v39  ;;  %v7649_v16 = vmul.f32 %v20200_v48, %v7633_v61  ;;  %v15586_v7 = vpop.eup %15585 }
0x104a   :  { %v7608_v58 = vadd.f32 1.4214138, %v7592_v45  ;;  %v7622_v15 = vmul.f32 %v20232_v30, %v7606_v52  ;;  %v7636_v46 = vadd.f32 -0.28449672, %v7620_v17  ;;  %v7650_v40 = vmul.f32 %v20208_v57, %v7634_v0  ;;  %v15588_v18 = vpop.eup %15587 }
0x104b   :  { %v7623_v24 = vmul.f32 %v20236_v59, %v7607_v19  ;;  %v7637_v1 = vadd.f32 -0.28449672, %v7621_v5  ;;  %v7651_v14 = vmul.f32 %v20214_v53, %v7635_v55  ;;  %v7665_v23 = vadd.f32 0.2548296, %v7649_v16  ;;  %v15590_v9 = vpop.eup %15589 }
0x104c   :  { %v7624_v41 = vmul.f32 %v20240_v11, %v7608_v58  ;;  %v7638_v31 = vadd.f32 -0.28449672, %v7622_v15  ;;  %v7652_v56 = vmul.f32 %v20220_v28, %v7636_v46  ;;  %v7666_v37 = vadd.f32 0.2548296, %v7650_v40 }
0x104d   :  { %v7639_v3 = vadd.f32 -0.28449672, %v7623_v24  ;;  %v7653_v10 = vmul.f32 %v20226_v33, %v7637_v1  ;;  %v7667_v26 = vadd.f32 0.2548296, %v7651_v14  ;;  %v7681_v34 = vmul.f32 %v20200_v48, %v7665_v23 }
0x104e   :  { %v7640_v42 = vadd.f32 -0.28449672, %v7624_v41  ;;  %v7654_v21 = vmul.f32 %v20232_v30, %v7638_v31  ;;  %v7668_v50 = vadd.f32 0.2548296, %v7652_v56  ;;  %v7682_v39 = vmul.f32 %v20208_v57, %v7666_v37 }
0x104f   :  { %v7655_v61 = vmul.f32 %v20236_v59, %v7639_v3  ;;  %v7669_v45 = vadd.f32 0.2548296, %v7653_v10  ;;  %v7683_v52 = vmul.f32 %v20214_v53, %v7667_v26  ;;  %v7761_v17 = vmul.f32 %v15576_v49, %v7681_v34 }
0x1050   :  { %v7656_v48 = vmul.f32 %v20240_v11, %v7640_v42  ;;  %v7670_v0 = vadd.f32 0.2548296, %v7654_v21  ;;  %v7684_v19 = vmul.f32 %v20220_v28, %v7668_v50  ;;  %v7762_v5 = vmul.f32 %v15578_v12, %v7682_v39 }
0x1051   :  { %v7671_v55 = vadd.f32 0.2548296, %v7655_v61  ;;  %v7685_v57 = vmul.f32 %v20226_v33, %v7669_v45  ;;  %v7763_v16 = vmul.f32 %v15580_v2, %v7683_v52  ;;  %v7777_v58 = vsub.f32 1.0, %v7761_v17 }
0x1052   :  { %v7672_v15 = vadd.f32 0.2548296, %v7656_v48  ;;  %v7686_v53 = vmul.f32 %v20232_v30, %v7670_v0  ;;  %v7764_v49 = vmul.f32 %v15582_v22, %v7684_v19  ;;  %v7778_v46 = vsub.f32 1.0, %v7762_v5 }
0x1053   :  { %v7687_v40 = vmul.f32 %v20236_v59, %v7671_v55  ;;  %v7765_v28 = vmul.f32 %v15584_v63, %v7685_v57  ;;  %v7779_v12 = vsub.f32 1.0, %v7763_v16  ;;  %v7809_v24 = vsub.f32 0.0, %v7777_v58  ;;  %v21886_v55 = vld [vmem:[#allocation15_spill] sm:$0xff]  ;;  %v21887_v57 = vld [vmem:[#allocation18_spill] sm:$0xff] }
0x1054   :  { %v7688_v33 = vmul.f32 %v20240_v11, %v7672_v15  ;;  %v7766_v2 = vmul.f32 %v15586_v7, %v7686_v53  ;;  %v7780_v1 = vsub.f32 1.0, %v7764_v49  ;;  %v7810_v14 = vsub.f32 0.0, %v7778_v46  ;;  %v21888_v15 = vld [vmem:[#allocation17_spill] sm:$0xff]  ;;  %v21889_v49 = vld [vmem:[#allocation20_spill] sm:$0xff] }
0x1055   :  { %v7767_v23 = vmul.f32 %v15588_v18, %v7687_v40  ;;  %v7781_v41 = vsub.f32 1.0, %v7765_v28  ;;  %v7811_v31 = vsub.f32 0.0, %v7779_v12  ;;  %v7825_v30 = vsel %vm7793_vm10, %v7777_v58, %v7809_v24  ;;  %v7881_v58 = vld [vmem:[#allocation2 + $0x7] sm:$0xff]  ;;  %v20345_v40 = vld [vmem:[#allocation2 + $0xf] sm:$0xff]  ;;  %v20353_v24 = vld [vmem:[#allocation2 + $0x17] sm:$0xff] }
0x1056   :  { %v7768_v22 = vmul.f32 %v15590_v9, %v7688_v33  ;;  %v7782_v56 = vsub.f32 1.0, %v7766_v2  ;;  %v7812_v37 = vsub.f32 0.0, %v7780_v1  ;;  %v7826_v59 = vsel %vm7794_vm11, %v7778_v46, %v7810_v14  ;;  %v10445_v28 = vld [vmem:[%s21109_s6 + $0x110] sm:$0xff]  ;;  %v21890_v33 = vld [vmem:[#allocation19_spill] sm:$0xff]  ;;  %v21891_v14 = vld [vmem:[#allocation22_spill] sm:$0xff] }
0x1057   :  { %v7783_v63 = vsub.f32 1.0, %v7767_v23  ;;  %v7813_v3 = vsub.f32 0.0, %v7781_v41  ;;  %v7827_v11 = vsel %vm7795_vm12, %v7779_v12, %v7811_v31  ;;  %v7841_v7 = vadd.f32 1.0, %v7825_v30  ;;  %v10446_v12 = vld [vmem:[%s21109_s6 + $0x118] sm:$0xff]  ;;  %v10447_v31 = vld [vmem:[%s21109_s6 + $0x120] sm:$0xff]  ;;  %v10448_v30 = vld [vmem:[%s21109_s6 + $0x128] sm:$0xff] }
0x1058   :  { %v7784_v10 = vsub.f32 1.0, %v7768_v22  ;;  %v7814_v26 = vsub.f32 0.0, %v7782_v56  ;;  %v7828_v18 = vsel %vm7796_vm13, %v7780_v1, %v7812_v37  ;;  %v7842_v34 = vadd.f32 1.0, %v7826_v59  ;;  %v20367_v22 = vld [vmem:[#allocation2 + $0x27] sm:$0xff] }
0x1059   :  { %v7815_v8 = vsub.f32 0.0, %v7783_v63  ;;  %v7829_v9 = vsel %vm7797_vm14, %v7781_v41, %v7813_v3  ;;  %v7843_v42 = vadd.f32 1.0, %v7827_v11  ;;  %v7844_v21 = vadd.f32 1.0, %v7828_v18  ;;  %v20359_v41 = vld [vmem:[#allocation2 + $0x1f] sm:$0xff]  ;;  %v20374_v11 = vld [vmem:[#allocation2 + $0x2f] sm:$0xff] }
0x105a   :  { %v7816_v44 = vsub.f32 0.0, %v7784_v10  ;;  %v7830_v50 = vsel %vm7798_vm15, %v7782_v56, %v7814_v26  ;;  %v7845_v39 = vadd.f32 1.0, %v7829_v9  ;;  %v20295_v35 = vmul.f32 %v7841_v7, %v20195_v60  ;;  %v21892_v56 = vld [vmem:[#allocation21_spill] sm:$0xff]  ;;  %v21894_v26 = vld [vmem:[#allocation23_spill] sm:$0xff] }
0x105b   :  { %v7831_v61 = vsel %vm7799_vm0, %v7783_v63, %v7815_v8  ;;  %v7846_v54 = vadd.f32 1.0, %v7830_v50  ;;  %v20300_v45 = vmul.f32 %v7842_v34, %v20198_v38  ;;  %v20303_v51 = vmul.f32 %v7843_v42, %v20203_v27  ;;  %v21882_v38 = vld [vmem:[#allocation11_spill] sm:$0xff]  ;;  %v21883_v27 = vld [vmem:[#allocation14_spill] sm:$0xff]  ;;  %v21893_v63 = vld [vmem:[#allocation24_spill] sm:$0xff] }
0x105c   :  { %v7832_v52 = vsel %vm7800_vm1, %v7784_v10, %v7816_v44  ;;  %v7847_v17 = vadd.f32 1.0, %v7831_v61  ;;  %v20308_v6 = vmul.f32 %v7844_v21, %v20206_v13  ;;  %v20311_v60 = vmul.f32 %v7845_v39, %v20211_v29  ;;  %7873 = vst [vmem:[#allocation2 + $0x50] sm:$0xff] %v20295_v35  ;;  %v10449_v7 = vld [vmem:[%s21109_s6 + $0x130] sm:$0xff]  ;;  %v10450_v10 = vld [vmem:[%s21109_s6 + $0x138] sm:$0xff]  ;;  %v10451_v21 = vld [vmem:[%s21109_s6 + $0x140] sm:$0xff] }
0x105d   :  { %v7848_v47 = vadd.f32 1.0, %v7832_v52  ;;  %v20315_v48 = vmul.f32 %v7846_v54, %v20217_v25  ;;  %7874 = vst [vmem:[#allocation2 + $0x58] sm:$0xff] %v20300_v45  ;;  %7875 = vst [vmem:[#allocation2 + $0x60] sm:$0xff] %v20303_v51  ;;  %v7954_v4 = vmul.f32 %v20295_v35, %v21882_v38  ;;  %v7955_v13 = vmul.f32 %v20300_v45, %v21883_v27  ;;  %v21884_v25 = vld [vmem:[#allocation13_spill] sm:$0xff]  ;;  %v21895_v8 = vld [vmem:[#allocation26_spill] sm:$0xff] }
0x105e   :  { %v20324_v0 = vmul.f32 %v7847_v17, %v20223_v36  ;;  %7876 = vst [vmem:[#allocation2 + $0x68] sm:$0xff] %v20308_v6  ;;  %7877 = vst [vmem:[#allocation2 + $0x70] sm:$0xff] %v20311_v60  ;;  %v7956_v19 = vmul.f32 %v20303_v51, %v21884_v25  ;;  %v21885_v36 = vld [vmem:[#allocation16_spill] sm:$0xff]  ;;  %v7897_v46 = vmul.f32 %v7881_v58, %v21889_v49  ;;  %v20388_v42 = vld [vmem:[#allocation2 + $0x3f] sm:$0xff] }
0x105f   :  { %v20329_v29 = vmul.f32 %v7848_v47, %v20229_v32  ;;  %7878 = vst [vmem:[#allocation2 + $0x78] sm:$0xff] %v20315_v48  ;;  %13276 = vmatmul.mubr.f32.gmra.mrb[24].mxu1 %v7954_v4  ;;  %v7957_v5 = vmul.f32 %v20308_v6, %v21885_v36  ;;  %v7958_v32 = vmul.f32 %v20311_v60, %v21886_v55  ;;  %v10452_v44 = vld [vmem:[%s21109_s6 + $0x148] sm:$0xff]  ;;  %v21896_v39 = vld [vmem:[#allocation25_spill] sm:$0xff]  ;;  %v10454_v4 = vld [vmem:[%s21109_s6 + $0x158] sm:$0xff] }
0x1060   :  { %7879 = vst [vmem:[#allocation2 + $0x80] sm:$0xff] %v20324_v0  ;;  %13278 = vmatprep.mubr.f32.mxu1 %v7955_v13  ;;  %v7959_v16 = vmul.f32 %v20315_v48, %v21887_v57  ;;  %v7960_v53 = vmul.f32 %v20324_v0, %v21888_v15  ;;  %v7898_v2 = vmul.f32 %v20345_v40, %v21890_v33  ;;  %v20396_v50 = vld [vmem:[#allocation2 + $0x47] sm:$0xff]  ;;  %v10453_v38 = vld [vmem:[%s21109_s6 + $0x150] sm:$0xff]  ;;  %v21899_v36 = vld [vmem:[#allocation30_spill] sm:$0xff] }
0x1061   :  { %7880 = vst [vmem:[#allocation2 + $0x88] sm:$0xff] %v20329_v29  ;;  %v14667_v1 = vpack.c.bf16 %v10446_v12, %v10445_v28  ;;  %v7899_v23 = vmul.f32 %v20353_v24, %v21891_v14  ;;  %v7900_v37 = vmul.f32 %v20359_v41, %v21892_v56  ;;  %v14671_v59 = vpack.c.bf16 %v10448_v30, %v10447_v31  ;;  %v21897_v52 = vld [vmem:[#allocation28_spill] sm:$0xff]  ;;  %v21898_v13 = vld [vmem:[#allocation27_spill] sm:$0xff]  ;;  %v21900_v58 = vld [vmem:[#allocation29_spill] sm:$0xff] }
0x1062   :  { %v7901_v3 = vmul.f32 %v20367_v22, %v21893_v63  ;;  %v7902_v18 = vmul.f32 %v20374_v11, %v21894_v26  ;;  %v14675_v34 = vpack.c.bf16 %v10450_v10, %v10449_v7  ;;  %v7904_v61 = vmul.f32 %v20388_v42, %v21896_v39  ;;  %v10456_v57 = vld [vmem:[%s21109_s6 + $0x168] sm:$0xff]  ;;  %v10457_v12 = vld [vmem:[%s21109_s6 + $0x170] sm:$0xff]  ;;  %v10458_v33 = vld [vmem:[%s21109_s6 + $0x178] sm:$0xff] }
0x1063   :  { %13279 = vmatmul.mubr.f32.gmra.mrb[26].mxu1 %v7956_v19  ;;  %v14679_v54 = vpack.c.bf16 %v10452_v44, %v10451_v21  ;;  %v7905_v17 = vmul.f32 %v20396_v50, %v21897_v52  ;;  %v20402_v47 = vld [vmem:[#allocation2 + $0x4f] sm:$0xff]  ;;  %v14683_v19 = vpack.c.bf16 %v10454_v4, %v10453_v38  ;;  %v21903_v31 = vld [vmem:[#allocation34_spill] sm:$0xff]  ;;  %v21906_v44 = vld [vmem:[#allocation35_spill] sm:$0xff] }
0x1064   :  { %13281 = vmatprep.mubr.f32.mxu1 %v7957_v5  ;;  %v20410_v27 = vld [vmem:[#allocation2 + $0x57] sm:$0xff]  ;;  %v7906_v25 = vmul.f32 %v20402_v47, %v21898_v13  ;;  %v20416_v55 = vld [vmem:[#allocation2 + $0x5f] sm:$0xff]  ;;  %v21901_v49 = vld [vmem:[#allocation32_spill] sm:$0xff] }
0x1065   :  { %v7907_v5 = vmul.f32 %v20410_v27, %v21899_v36  ;;  %v7908_v15 = vmul.f32 %v20416_v55, %v21900_v58  ;;  %v20430_v28 = vld [vmem:[#allocation2 + $0x6f] sm:$0xff]  ;;  %v20463_v21 = vld [vmem:[#allocation2 + $0x19] sm:$0xff] }
0x1066   :  { %v8268_v63 = vld [vmem:[#allocation2 + $0x9] sm:$0xff]  ;;  %v10463_v38 = vld [vmem:[%s21109_s6 + $0x1a0] sm:$0xff] }
0x1067   :  { %13282 = vmatmul.mubr.f32.gmra.mrb[28].mxu1 %v7958_v32  ;;  %v10455_v32 = vld [vmem:[%s21109_s6 + $0x160] sm:$0xff]  ;;  %v21905_v26 = vld [vmem:[#allocation36_spill] sm:$0xff]  ;;  %v10465_v58 = vld [vmem:[%s21109_s6 + $0x1b0] sm:$0xff] }
0x1068   :  { %13284 = vmatprep.mubr.f32.mxu1 %v7959_v16  ;;  %v20424_v16 = vld [vmem:[#allocation2 + $0x67] sm:$0xff]  ;;  %v20444_v56 = vld [vmem:[#allocation2 + $0x7f] sm:$0xff] }
0x1069   :  { %v10464_v4 = vld [vmem:[%s21109_s6 + $0x1a8] sm:$0xff] }
0x106a   :  { %v20477_v13 = vld [vmem:[#allocation2 + $0x29] sm:$0xff]  ;;  %v14703_v36 = vpack.c.bf16 %v10464_v4, %v10463_v38  ;;  %v10471_v38 = vld [vmem:[%s21109_s6 + $0x1e0] sm:$0xff] }
0x106b   :  { %13285 = vmatmul.mubr.f32.gmra.mrb[30].mxu1 %v7960_v53  ;;  %v14687_v53 = vpack.c.bf16 %v10456_v57, %v10455_v32  ;;  %v20483_v57 = vld [vmem:[#allocation2 + $0x31] sm:$0xff]  ;;  %v10472_v4 = vld [vmem:[%s21109_s6 + $0x1e8] sm:$0xff] }
0x106c   :  { %13319 = vmatprep.mubr.f32.mxu1 %v7897_v46  ;;  %v7909_v46 = vmul.f32 %v20424_v16, %v21901_v49  ;;  %v21910_v49 = vld [vmem:[#allocation41_spill] sm:$0xff] }
0x106f   :  { %13320 = vmatmul.mubr.f32.vlgmr.msra.gmra.mrb[16].mxu1 %v7898_v2  ;;  %v20438_v2 = vld [vmem:[#allocation2 + $0x77] sm:$0xff] }
0x1070   :  { %14666 = vmatpush3.bf16.msra.mxu1 %v20125_v20  ;;  %13322 = vmatprep.mubr.f32.mxu1 %v7899_v23  ;;  %v20382_v20 = vld [vmem:[#allocation2 + $0x37] sm:$0xff]  ;;  %v14691_v23 = vpack.c.bf16 %v10458_v33, %v10457_v12  ;;  %v7911_v30 = vmul.f32 %v20438_v2, %v21903_v31  ;;  %v10468_v31 = vld [vmem:[%s21109_s6 + $0x1c8] sm:$0xff] }
0x1071   :  { %14668 = vmatprep.subr.bf16.mxu1 %v14667_v1  ;;  %v7903_v9 = vmul.f32 %v20382_v20, %v21895_v8  ;;  %v10461_v8 = vld [vmem:[%s21109_s6 + $0x190] sm:$0xff]  ;;  %v21911_v33 = vld [vmem:[#allocation46_spill] sm:$0xff] }
0x1073   :  { %13323 = vmatmul.mubr.f32.gmra.mrb[18].mxu1 %v7900_v37  ;;  %v10459_v37 = vld [vmem:[%s21109_s6 + $0x180] sm:$0xff] }
0x1074   :  { %14670 = vmatpush3.bf16.msra.mxu1 %v14667_v1  ;;  %13325 = vmatprep.mubr.f32.mxu1 %v7901_v3  ;;  %v21902_v1 = vld [vmem:[#allocation31_spill] sm:$0xff]  ;;  %v21904_v3 = vld [vmem:[#allocation33_spill] sm:$0xff] }
0x1075   :  { %14672 = vmatprep.subr.bf16.mxu1 %v14671_v59  ;;  %v7910_v14 = vmul.f32 %v20430_v28, %v21902_v1  ;;  %v7912_v7 = vmul.f32 %v20444_v56, %v21904_v3  ;;  %v21913_v3 = vld [vmem:[#allocation50_spill] sm:$0xff] }
0x1077   :  { %13326 = vmatmul.mubr.f32.gmra.mrb[20].mxu1 %v7902_v18  ;;  %v8284_v18 = vmul.f32 %v8268_v63, %v21905_v26  ;;  %v10469_v26 = vld [vmem:[%s21109_s6 + $0x1d0] sm:$0xff] }
0x1078   :  { %14674 = vmatpush3.bf16.msra.mxu1 %v14671_v59  ;;  %13328 = vmatprep.mubr.f32.mxu1 %v7903_v9  ;;  %v10460_v59 = vld [vmem:[%s21109_s6 + $0x188] sm:$0xff]  ;;  %v10462_v9 = vld [vmem:[%s21109_s6 + $0x198] sm:$0xff] }
0x1079   :  { %14676 = vmatprep.subr.bf16.mxu1 %v14675_v34  ;;  %v14695_v10 = vpack.c.bf16 %v10460_v59, %v10459_v37  ;;  %v21912_v37 = vld [vmem:[#allocation45_spill] sm:$0xff] }
0x107b   :  { %13329 = vmatmul.mubr.f32.gmra.mrb[22].mxu1 %v7904_v61  ;;  %v14699_v61 = vpack.c.bf16 %v10462_v9, %v10461_v8  ;;  %v20519_v8 = vld [vmem:[#allocation2 + $0x59] sm:$0xff]  ;;  %v21914_v9 = vld [vmem:[#allocation49_spill] sm:$0xff] }
0x107c   :  { %14678 = vmatpush3.bf16.msra.mxu1 %v14675_v34  ;;  %13331 = vmatprep.mubr.f32.mxu1 %v7905_v17  ;;  %v20455_v34 = vld [vmem:[#allocation2 + $0x11] sm:$0xff]  ;;  %v20469_v17 = vld [vmem:[#allocation2 + $0x21] sm:$0xff] }
0x107d   :  { %14680 = vmatprep.subr.bf16.mxu1 %v14679_v54  ;;  %v8285_v39 = vmul.f32 %v20455_v34, %v21906_v44 }
0x107f   :  { %13332 = vmatmul.mubr.f32.gmra.mrb[24].mxu1 %v7906_v25  ;;  %v21908_v25 = vld [vmem:[#allocation37_spill] sm:$0xff] }
0x1080   :  { %14682 = vmatpush3.bf16.msra.mxu1 %v14679_v54  ;;  %13334 = vmatprep.mubr.f32.mxu1 %v7907_v5  ;;  %v21907_v54 = vld [vmem:[#allocation38_spill] sm:$0xff] }
0x1081   :  { %14684 = vmatprep.subr.bf16.mxu1 %v14683_v19  ;;  %v8286_v52 = vmul.f32 %v20463_v21, %v21907_v54  ;;  %v21909_v5 = vld [vmem:[#allocation42_spill] sm:$0xff] }
0x1082   :  { %v8288_v32 = vmul.f32 %v20477_v13, %v21909_v5  ;;  %v14719_v5 = vpack.c.bf16 %v10472_v4, %v10471_v38 }
0x1083   :  { %13335 = vmatmul.mubr.f32.gmra.mrb[26].mxu1 %v7908_v15  ;;  %v10466_v15 = vld [vmem:[%s21109_s6 + $0x1b8] sm:$0xff] }
0x1084   :  { %14686 = vmatpush3.bf16.msra.mxu1 %v14683_v19  ;;  %13337 = vmatprep.mubr.f32.mxu1 %v7909_v46  ;;  %v8287_v19 = vmul.f32 %v20469_v17, %v21908_v25  ;;  %v8289_v46 = vmul.f32 %v20483_v57, %v21910_v49  ;;  %v14707_v12 = vpack.c.bf16 %v10466_v15, %v10465_v58  ;;  %v20533_v25 = vld [vmem:[#allocation2 + $0x69] sm:$0xff]  ;;  %v20539_v15 = vld [vmem:[#allocation2 + $0x71] sm:$0xff] }
0x1085   :  { %14688 = vmatprep.subr.bf16.mxu1 %v14687_v53  ;;  %v10473_v49 = vld [vmem:[%s21109_s6 + $0x1f0] sm:$0xff] }
0x1087   :  { %13338 = vmatmul.mubr.f32.gmra.mrb[28].mxu1 %v7910_v14  ;;  %v20497_v14 = vld [vmem:[#allocation2 + $0x41] sm:$0xff] }
0x1088   :  { %14690 = vmatpush3.bf16.msra.mxu1 %v14687_v53  ;;  %13340 = vmatprep.mubr.f32.mxu1 %v7911_v30  ;;  %v20491_v53 = vld [vmem:[#allocation2 + $0x39] sm:$0xff]  ;;  %v20505_v30 = vld [vmem:[#allocation2 + $0x49] sm:$0xff]  ;;  %v8291_v59 = vmul.f32 %v20497_v14, %v21912_v37 }
0x1089   :  { %14692 = vmatprep.subr.bf16.mxu1 %v14691_v23  ;;  %v8290_v1 = vmul.f32 %v20491_v53, %v21911_v33  ;;  %v21918_v33 = vld [vmem:[#allocation57_spill] sm:$0xff] }
0x108b   :  { %13341 = vmatmul.mubr.f32.gmra.mrb[30].mxu1 %v7912_v7  ;;  %v8292_v7 = vmul.f32 %v20505_v30, %v21913_v3  ;;  %v10476_v3 = vld [vmem:[%s21109_s6 + $0x208] sm:$0xff] }
0x108c   :  { %14694 = vmatpush3.bf16.msra.mxu1 %v14691_v23  ;;  %13375 = vmatprep.mubr.f32.mxu1 %v8284_v18  ;;  %v10467_v23 = vld [vmem:[%s21109_s6 + $0x1c0] sm:$0xff]  ;;  %v10470_v18 = vld [vmem:[%s21109_s6 + $0x1d8] sm:$0xff] }
0x108d   :  { %14696 = vmatprep.subr.bf16.mxu1 %v14695_v10  ;;  %v14711_v63 = vpack.c.bf16 %v10468_v31, %v10467_v23  ;;  %v21919_v31 = vld [vmem:[#allocation60_spill] sm:$0xff] }
0x108f   :  { %13376 = vmatmul.mubr.f32.vlgmr.msra.gmra.mrb[16].mxu1 %v8285_v39  ;;  %v14715_v39 = vpack.c.bf16 %v10470_v18, %v10469_v26 }
0x1090   :  { %14698 = vmatpush3.bf16.msra.mxu1 %v14695_v10  ;;  %13378 = vmatprep.mubr.f32.mxu1 %v8286_v52  ;;  %v20511_v10 = vld [vmem:[#allocation2 + $0x51] sm:$0xff]  ;;  %v20525_v52 = vld [vmem:[#allocation2 + $0x61] sm:$0xff] }
0x1091   :  { %14700 = vmatprep.subr.bf16.mxu1 %v14699_v61  ;;  %v8293_v44 = vmul.f32 %v20511_v10, %v21914_v9  ;;  %v21921_v9 = vld [vmem:[#allocation62_spill] sm:$0xff] }
0x1093   :  { %13379 = vmatmul.mubr.f32.gmra.mrb[18].mxu1 %v8287_v19  ;;  %v21916_v19 = vld [vmem:[#allocation53_spill] sm:$0xff] }
0x1094   :  { %14702 = vmatpush3.bf16.msra.mxu1 %v14699_v61  ;;  %13381 = vmatprep.mubr.f32.mxu1 %v8288_v32  ;;  %v21915_v61 = vld [vmem:[#allocation54_spill] sm:$0xff] }
0x1095   :  { %14704 = vmatprep.subr.bf16.mxu1 %v14703_v36  ;;  %v8294_v54 = vmul.f32 %v20519_v8, %v21915_v61  ;;  %v21917_v32 = vld [vmem:[#allocation58_spill] sm:$0xff] }
0x1096   :  { %v8296_v58 = vmul.f32 %v20533_v25, %v21917_v32  ;;  %v10478_v61 = vld [vmem:[%s21109_s6 + $0x218] sm:$0xff]  ;;  %v21924_v32 = vld [vmem:[#allocation63_spill] sm:$0xff] }
0x1097   :  { %13382 = vmatmul.mubr.f32.gmra.mrb[20].mxu1 %v8289_v46  ;;  %v10474_v46 = vld [vmem:[%s21109_s6 + $0x1f8] sm:$0xff] }
0x1098   :  { %14706 = vmatpush3.bf16.msra.mxu1 %v14703_v36  ;;  %13384 = vmatprep.mubr.f32.mxu1 %v8290_v1  ;;  %v8295_v36 = vmul.f32 %v20525_v52, %v21916_v19  ;;  %v8297_v1 = vmul.f32 %v20539_v15, %v21918_v33  ;;  %v14723_v23 = vpack.c.bf16 %v10474_v46, %v10473_v49  ;;  %v21923_v19 = vld [vmem:[#allocation64_spill] sm:$0xff]  ;;  %v21925_v46 = vld [vmem:[#allocation66_spill] sm:$0xff] }
0x1099   :  { %14708 = vmatprep.subr.bf16.mxu1 %v14707_v12  ;;  %v8498_v33 = vmul.f32 %v20374_v11, %v21925_v46  ;;  %v21932_v46 = vld [vmem:[#allocation71_spill] sm:$0xff] }
0x109b   :  { %13385 = vmatmul.mubr.f32.gmra.mrb[22].mxu1 %v8291_v59  ;;  %v20553_v59 = vld [vmem:[#allocation2 + $0x81] sm:$0xff] }
0x109c   :  { %14710 = vmatpush3.bf16.msra.mxu1 %v14707_v12  ;;  %13387 = vmatprep.mubr.f32.mxu1 %v8292_v7  ;;  %v20547_v12 = vld [vmem:[#allocation2 + $0x79] sm:$0xff] }
0x109d   :  { %14712 = vmatprep.subr.bf16.mxu1 %v14711_v63  ;;  %v8298_v37 = vmul.f32 %v20547_v12, %v21919_v31  ;;  %v21920_v7 = vld [vmem:[#allocation59_spill] sm:$0xff]  ;;  %v21926_v31 = vld [vmem:[#allocation65_spill] sm:$0xff] }
0x109e   :  { %v8299_v26 = vmul.f32 %v20553_v59, %v21920_v7 }
0x109f   :  { %13388 = vmatmul.mubr.f32.gmra.mrb[24].mxu1 %v8293_v44  ;;  %v8494_v44 = vmul.f32 %v20345_v40, %v21921_v9  ;;  %v10479_v40 = vld [vmem:[%s21109_s6 + $0x220] sm:$0xff] }
0x10a0   :  { %14714 = vmatpush3.bf16.msra.mxu1 %v14711_v63  ;;  %13390 = vmatprep.mubr.f32.mxu1 %v8294_v54  ;;  %v10475_v63 = vld [vmem:[%s21109_s6 + $0x200] sm:$0xff]  ;;  %v21922_v54 = vld [vmem:[#allocation61_spill] sm:$0xff] }
0x10a1   :  { %14716 = vmatprep.subr.bf16.mxu1 %v14715_v39  ;;  %v14727_v18 = vpack.c.bf16 %v10476_v3, %v10475_v63  ;;  %v8495_v38 = vmul.f32 %v20353_v24, %v21922_v54  ;;  %v21927_v3 = vld [vmem:[#allocation68_spill] sm:$0xff]  ;;  %v21928_v9 = vld [vmem:[#allocation67_spill] sm:$0xff] }
0x10a2   :  { %v8500_v7 = vmul.f32 %v20388_v42, %v21927_v3  ;;  %v21934_v3 = vld [vmem:[#allocation73_spill] sm:$0xff] }
0x10a3   :  { %13391 = vmatmul.mubr.f32.gmra.mrb[26].mxu1 %v8295_v36  ;;  %v8496_v36 = vmul.f32 %v20359_v41, %v21923_v19  ;;  %v21930_v19 = vld [vmem:[#allocation69_spill] sm:$0xff] }
0x10a4   :  { %14718 = vmatpush3.bf16.msra.mxu1 %v14715_v39  ;;  %13393 = vmatprep.mubr.f32.mxu1 %v8296_v58  ;;  %v10477_v39 = vld [vmem:[%s21109_s6 + $0x210] sm:$0xff]  ;;  %v8497_v58 = vmul.f32 %v20367_v22, %v21924_v32 }
0x10a5   :  { %14720 = vmatprep.subr.bf16.mxu1 %v14719_v5  ;;  %v14731_v4 = vpack.c.bf16 %v10478_v61, %v10477_v39  ;;  %v21929_v61 = vld [vmem:[#allocation70_spill] sm:$0xff] }
0x10a6   :  { %v8502_v54 = vmul.f32 %v20402_v47, %v21929_v61  ;;  %v10492_v61 = vld [vmem:[%s21109_s6 + $0x288] sm:$0xff] }
0x10a7   :  { %13394 = vmatmul.mubr.f32.gmra.mrb[28].mxu1 %v8297_v1  ;;  %v10481_v1 = vld [vmem:[%s21109_s6 + $0x230] sm:$0xff] }
0x10a8   :  { %14722 = vmatpush3.bf16.msra.mxu1 %v14719_v5  ;;  %13396 = vmatprep.mubr.f32.mxu1 %v8298_v37  ;;  %v10480_v5 = vld [vmem:[%s21109_s6 + $0x228] sm:$0xff]  ;;  %v8499_v37 = vmul.f32 %v20382_v20, %v21926_v31 }
0x10a9   :  { %14724 = vmatprep.subr.bf16.mxu1 %v14723_v23  ;;  %v14735_v49 = vpack.c.bf16 %v10480_v5, %v10479_v40  ;;  %v21931_v5 = vld [vmem:[#allocation72_spill] sm:$0xff] }
0x10aa   :  { %v8504_v32 = vmul.f32 %v20416_v55, %v21931_v5 }
0x10ab   :  { %13397 = vmatmul.mubr.f32.gmra.mrb[30].mxu1 %v8299_v26  ;;  %v10483_v26 = vld [vmem:[%s21109_s6 + $0x240] sm:$0xff] }
0x10ac   :  { %14726 = vmatpush3.bf16.msra.mxu1 %v14723_v23  ;;  %13431 = vmatprep.mubr.f32.mxu1 %v8494_v44  ;;  %v10482_v23 = vld [vmem:[%s21109_s6 + $0x238] sm:$0xff]  ;;  %v8501_v44 = vmul.f32 %v20396_v50, %v21928_v9 }
0x10ad   :  { %14728 = vmatprep.subr.bf16.mxu1 %v14727_v18  ;;  %v14739_v63 = vpack.c.bf16 %v10482_v23, %v10481_v1  ;;  %v21933_v23 = vld [vmem:[#allocation74_spill] sm:$0xff] }
0x10ae   :  { %v8506_v31 = vmul.f32 %v20430_v28, %v21933_v23  ;;  %v10498_v23 = vld [vmem:[%s21109_s6 + $0x2b8] sm:$0xff] }
0x10af   :  { %13432 = vmatmul.mubr.f32.vlgmr.msra.gmra.mrb[16].mxu1 %v8495_v38  ;;  %v10485_v38 = vld [vmem:[%s21109_s6 + $0x250] sm:$0xff] }
0x10b0   :  { %14730 = vmatpush3.bf16.msra.mxu1 %v14727_v18  ;;  %13434 = vmatprep.mubr.f32.mxu1 %v8496_v36  ;;  %v10484_v18 = vld [vmem:[%s21109_s6 + $0x248] sm:$0xff]  ;;  %v8503_v36 = vmul.f32 %v20410_v27, %v21930_v19  ;;  %v10493_v19 = vld [vmem:[%s21109_s6 + $0x290] sm:$0xff] }
0x10b1   :  { %14732 = vmatprep.subr.bf16.mxu1 %v14731_v4  ;;  %v14743_v39 = vpack.c.bf16 %v10484_v18, %v10483_v26  ;;  %v21935_v18 = vld [vmem:[#allocation76_spill] sm:$0xff] }
0x10b2   :  { %v8508_v9 = vmul.f32 %v20444_v56, %v21935_v18  ;;  %v15630_v18 = vld [vmem:[#allocation2 + $0x40] sm:$0xff] }
0x10b3   :  { %13435 = vmatmul.mubr.f32.gmra.mrb[18].mxu1 %v8497_v58  ;;  %v10487_v58 = vld [vmem:[%s21109_s6 + $0x260] sm:$0xff] }
0x10b4   :  { %14734 = vmatpush3.bf16.msra.mxu1 %v14731_v4  ;;  %13437 = vmatprep.mubr.f32.mxu1 %v8498_v33  ;;  %v10486_v4 = vld [vmem:[%s21109_s6 + $0x258] sm:$0xff]  ;;  %v8505_v33 = vmul.f32 %v20424_v16, %v21932_v46  ;;  %v15626_v46 = vld [vmem:[#allocation2 + $0x20] sm:$0xff] }
0x10b5   :  { %14736 = vmatprep.subr.bf16.mxu1 %v14735_v49  ;;  %v14747_v40 = vpack.c.bf16 %v10486_v4, %v10485_v38 }
0x10b7   :  { %13438 = vmatmul.mubr.f32.gmra.mrb[20].mxu1 %v8499_v37  ;;  %v10489_v37 = vld [vmem:[%s21109_s6 + $0x270] sm:$0xff] }
0x10b8   :  { %14738 = vmatpush3.bf16.msra.mxu1 %v14735_v49  ;;  %13440 = vmatprep.mubr.f32.mxu1 %v8500_v7  ;;  %v10488_v49 = vld [vmem:[%s21109_s6 + $0x268] sm:$0xff]  ;;  %v8507_v7 = vmul.f32 %v20438_v2, %v21934_v3  ;;  %v10499_v3 = vld [vmem:[%s21109_s6 + $0x2c0] sm:$0xff] }
0x10b9   :  { %14740 = vmatprep.subr.bf16.mxu1 %v14739_v63  ;;  %v14751_v1 = vpack.c.bf16 %v10488_v49, %v10487_v58  ;;  %v10496_v58 = vld [vmem:[%s21109_s6 + $0x2a8] sm:$0xff]  ;;  %v15625_v49 = vld [vmem:[#allocation2 + $0x18] sm:$0xff] }
0x10bb   :  { %13441 = vmatmul.mubr.f32.gmra.mrb[22].mxu1 %v8501_v44  ;;  %v20635_v44 = vld [vmem:[#allocation2 + $0x87] sm:$0xff] }
0x10bc   :  { %14742 = vmatpush3.bf16.msra.mxu1 %v14739_v63  ;;  %13443 = vmatprep.mubr.f32.mxu1 %v8502_v54  ;;  %v10490_v63 = vld [vmem:[%s21109_s6 + $0x278] sm:$0xff]  ;;  %v21936_v54 = vld [vmem:[#allocation75_spill] sm:$0xff] }
0x10bd   :  { %14744 = vmatprep.subr.bf16.mxu1 %v14743_v39  ;;  %v14755_v26 = vpack.c.bf16 %v10490_v63, %v10489_v37  ;;  %v8509_v38 = vmul.f32 %v20635_v44, %v21936_v54  ;;  %v15628_v37 = vld [vmem:[#allocation2 + $0x30] sm:$0xff]  ;;  %v15631_v54 = vld [vmem:[#allocation2 + $0x48] sm:$0xff] }
0x10bf   :  { %13444 = vmatmul.mubr.f32.gmra.mrb[24].mxu1 %v8503_v36  ;;  %v10494_v36 = vld [vmem:[%s21109_s6 + $0x298] sm:$0xff] }
0x10c0   :  { %14746 = vmatpush3.bf16.msra.mxu1 %v14743_v39  ;;  %13446 = vmatprep.mubr.f32.mxu1 %v8504_v32  ;;  %v10491_v39 = vld [vmem:[%s21109_s6 + $0x280] sm:$0xff]  ;;  %v14763_v5 = vpack.c.bf16 %v10494_v36, %v10493_v19  ;;  %v10504_v19 = vld [vmem:[%s21109_s6 + $0x2e8] sm:$0xff] }
0x10c1   :  { %14748 = vmatprep.subr.bf16.mxu1 %v14747_v40  ;;  %v14759_v4 = vpack.c.bf16 %v10492_v61, %v10491_v39  ;;  %v10495_v32 = vld [vmem:[%s21109_s6 + $0x2a0] sm:$0xff]  ;;  %v10501_v39 = vld [vmem:[%s21109_s6 + $0x2d0] sm:$0xff]  ;;  %v10502_v61 = vld [vmem:[%s21109_s6 + $0x2d8] sm:$0xff] }
0x10c3   :  { %13447 = vmatmul.mubr.f32.gmra.mrb[26].mxu1 %v8505_v33  ;;  %v14767_v33 = vpack.c.bf16 %v10496_v58, %v10495_v32  ;;  %v21937_v32 = vld [vmem:[#allocation78_spill] sm:$0xff]  ;;  %v10509_v58 = vld [vmem:[%s21109_s6 + $0x310] sm:$0xff] }
0x10c4   :  { %14750 = vmatpush3.bf16.msra.mxu1 %v14747_v40  ;;  %13449 = vmatprep.mubr.f32.mxu1 %v8506_v31  ;;  %v15624_v40 = vld [vmem:[#allocation2 + $0x10] sm:$0xff]  ;;  %v15627_v31 = vld [vmem:[#allocation2 + $0x28] sm:$0xff] }
0x10c5   :  { %14752 = vmatprep.subr.bf16.mxu1 %v14751_v1 }
0x10c7   :  { %13450 = vmatmul.mubr.f32.gmra.mrb[28].mxu1 %v8507_v7  ;;  %v10500_v7 = vld [vmem:[%s21109_s6 + $0x2c8] sm:$0xff] }
0x10c8   :  { %14754 = vmatpush3.bf16.msra.mxu1 %v14751_v1  ;;  %13452 = vmatprep.mubr.f32.mxu1 %v8508_v9  ;;  %v10497_v1 = vld [vmem:[%s21109_s6 + $0x2b0] sm:$0xff]  ;;  %v14775_v9 = vpack.c.bf16 %v10500_v7, %v10499_v3 }
0x10c9   :  { %14756 = vmatprep.subr.bf16.mxu1 %v14755_v26  ;;  %v14771_v63 = vpack.c.bf16 %v10498_v23, %v10497_v1  ;;  %v10511_v1 = vld [vmem:[%s21109_s6 + $0x320] sm:$0xff]  ;;  %v10512_v23 = vld [vmem:[%s21109_s6 + $0x328] sm:$0xff]  ;;  %v10513_v7 = vld [vmem:[%s21109_s6 + $0x330] sm:$0xff] }
0x10cb   :  { %13453 = vmatmul.mubr.f32.gmra.mrb[30].mxu1 %v8509_v38  ;;  %v14779_v38 = vpack.c.bf16 %v10502_v61, %v10501_v39  ;;  %v21943_v61 = vld [vmem:[#allocation88_spill] sm:$0xff] }
0x10cc   :  { %14758 = vmatpush3.bf16.msra.mxu1 %v14755_v26  ;;  %13487 = vmatprep.mubr.f32.mxu1 %v15624_v40  ;;  %v15629_v26 = vld [vmem:[#allocation2 + $0x38] sm:$0xff] }
0x10cd   :  { %14760 = vmatprep.subr.bf16.mxu1 %v14759_v4  ;;  %v10506_v40 = vld [vmem:[%s21109_s6 + $0x2f8] sm:$0xff] }
0x10cf   :  { %13488 = vmatmul.mubr.f32.vlgmr.msra.gmra.mrb[16].mxu1 %v15625_v49  ;;  %v10510_v49 = vld [vmem:[%s21109_s6 + $0x318] sm:$0xff] }
0x10d0   :  { %14762 = vmatpush3.bf16.msra.mxu1 %v14759_v4  ;;  %13490 = vmatprep.mubr.f32.mxu1 %v15626_v46  ;;  %v10503_v4 = vld [vmem:[%s21109_s6 + $0x2e0] sm:$0xff]  ;;  %v14795_v46 = vpack.c.bf16 %v10510_v49, %v10509_v58  ;;  %v21947_v58 = vld [vmem:[#allocation96_spill] sm:$0xff] }
0x10d1   :  { %14764 = vmatprep.subr.bf16.mxu1 %v14763_v5  ;;  %v14783_v36 = vpack.c.bf16 %v10504_v19, %v10503_v4  ;;  %v10516_v4 = vld [vmem:[%s21109_s6 + $0x348] sm:$0xff]  ;;  %v21944_v19 = vld [vmem:[#allocation87_spill] sm:$0xff]  ;;  %v8892_v49 = vmul.f32 %v20525_v52, %v21947_v58 }
0x10d3   :  { %13491 = vmatmul.mubr.f32.gmra.mrb[18].mxu1 %v15627_v31 }
0x10d4   :  { %14766 = vmatpush3.bf16.msra.mxu1 %v14763_v5  ;;  %13493 = vmatprep.mubr.f32.mxu1 %v15628_v37  ;;  %v10508_v5 = vld [vmem:[%s21109_s6 + $0x308] sm:$0xff]  ;;  %v14799_v37 = vpack.c.bf16 %v10512_v23, %v10511_v1 }
0x10d5   :  { %14768 = vmatprep.subr.bf16.mxu1 %v14767_v33  ;;  %v21949_v1 = vld [vmem:[#allocation100_spill] sm:$0xff] }
0x10d6   :  { %v8894_v23 = vmul.f32 %v20539_v15, %v21949_v1 }
0x10d7   :  { %13494 = vmatmul.mubr.f32.gmra.mrb[20].mxu1 %v15629_v26  ;;  %v10514_v26 = vld [vmem:[%s21109_s6 + $0x338] sm:$0xff] }
0x10d8   :  { %14770 = vmatpush3.bf16.msra.mxu1 %v14767_v33  ;;  %13496 = vmatprep.mubr.f32.mxu1 %v15630_v18  ;;  %v21939_v33 = vld [vmem:[#allocation80_spill] sm:$0xff]  ;;  %v21942_v18 = vld [vmem:[#allocation83_spill] sm:$0xff]  ;;  %v14803_v39 = vpack.c.bf16 %v10514_v26, %v10513_v7 }
0x10d9   :  { %14772 = vmatprep.subr.bf16.mxu1 %v14771_v63  ;;  %v21951_v7 = vld [vmem:[#allocation104_spill] sm:$0xff] }
0x10da   :  { %v8896_v26 = vmul.f32 %v20553_v59, %v21951_v7  ;;  %v21962_v7 = vld [vmem:[#allocation44_spill] sm:$0xff] }
0x10db   :  { %13497 = vmatmul.mubr.f32.gmra.mrb[22].mxu1 %v15631_v54  ;;  %v8888_v54 = vmul.f32 %v20497_v14, %v21943_v61  ;;  %v21952_v61 = vld [vmem:[#allocation103_spill] sm:$0xff] }
0x10dc   :  { %14774 = vmatpush3.bf16.msra.mxu1 %v14771_v63  ;;  %13499 = vmatprep.mubr.f32.mxu1 %v20295_v35  ;;  %v10505_v35 = vld [vmem:[%s21109_s6 + $0x2f0] sm:$0xff]  ;;  %v21941_v63 = vld [vmem:[#allocation84_spill] sm:$0xff] }
0x10dd   :  { %14776 = vmatprep.subr.bf16.mxu1 %v14775_v9  ;;  %v8886_v3 = vmul.f32 %v20483_v57, %v21941_v63 }
0x10df   :  { %13500 = vmatmul.mubr.f32.gmra.mrb[24].mxu1 %v20300_v45  ;;  %v14787_v45 = vpack.c.bf16 %v10506_v40, %v10505_v35  ;;  %v21945_v40 = vld [vmem:[#allocation92_spill] sm:$0xff] }
0x10e0   :  { %14778 = vmatpush3.bf16.msra.mxu1 %v14775_v9  ;;  %13502 = vmatprep.mubr.f32.mxu1 %v20303_v51  ;;  %v10507_v51 = vld [vmem:[%s21109_s6 + $0x300] sm:$0xff]  ;;  %v8887_v9 = vmul.f32 %v20491_v53, %v21942_v18  ;;  %v20773_v18 = vld [vmem:[#allocation2 + $0x89] sm:$0xff] }
0x10e1   :  { %14780 = vmatprep.subr.bf16.mxu1 %v14779_v38 }
0x10e3   :  { %13503 = vmatmul.mubr.f32.gmra.mrb[26].mxu1 %v20308_v6  ;;  %v14791_v6 = vpack.c.bf16 %v10508_v5, %v10507_v51  ;;  %v10517_v51 = vld [vmem:[%s21109_s6 + $0x350] sm:$0xff]  ;;  %v10518_v5 = vld [vmem:[%s21109_s6 + $0x358] sm:$0xff] }
0x10e4   :  { %14782 = vmatpush3.bf16.msra.mxu1 %v14779_v38  ;;  %13505 = vmatprep.mubr.f32.mxu1 %v20311_v60  ;;  %v8882_v60 = vmul.f32 %v20455_v34, %v21937_v32  ;;  %v8884_v34 = vmul.f32 %v20469_v17, %v21939_v33  ;;  %v10515_v38 = vld [vmem:[%s21109_s6 + $0x340] sm:$0xff] }
0x10e5   :  { %14784 = vmatprep.subr.bf16.mxu1 %v14783_v36  ;;  %v14807_v35 = vpack.c.bf16 %v10516_v4, %v10515_v38  ;;  %v21953_v4 = vld [vmem:[#allocation108_spill] sm:$0xff] }
0x10e7   :  { %13506 = vmatmul.mubr.f32.gmra.mrb[28].mxu1 %v20315_v48  ;;  %v21938_v48 = vld [vmem:[#allocation77_spill] sm:$0xff] }
0x10e8   :  { %14786 = vmatpush3.bf16.msra.mxu1 %v14783_v36  ;;  %13508 = vmatprep.mubr.f32.mxu1 %v20324_v0  ;;  %v8883_v0 = vmul.f32 %v20463_v21, %v21938_v48  ;;  %v8889_v36 = vmul.f32 %v20505_v30, %v21944_v19  ;;  %v10519_v48 = vld [vmem:[%s21109_s6 + $0x360] sm:$0xff]  ;;  %v9092_v19 = vmul.f32 %v20353_v24, %v21953_v4 }
0x10e9   :  { %14788 = vmatprep.subr.bf16.mxu1 %v14787_v45  ;;  %v10527_v24 = vld [vmem:[%s21109_s6 + $0x3a0] sm:$0xff] }
0x10ea   :  { %v21965_v4 = vld [vmem:[#allocation55_spill] sm:$0xff] }
0x10eb   :  { %13509 = vmatmul.mubr.f32.gmra.mrb[30].mxu1 %v20329_v29  ;;  %v21940_v29 = vld [vmem:[#allocation79_spill] sm:$0xff] }
0x10ec   :  { %14790 = vmatpush3.bf16.msra.mxu1 %v14787_v45  ;;  %13543 = vmatprep.mubr.f32.mxu1 %v8882_v60  ;;  %v8885_v31 = vmul.f32 %v20477_v13, %v21940_v29  ;;  %v8890_v45 = vmul.f32 %v20511_v10, %v21945_v40  ;;  %v14811_v60 = vpack.c.bf16 %v10518_v5, %v10517_v51  ;;  %v10521_v29 = vld [vmem:[%s21109_s6 + $0x370] sm:$0xff]  ;;  %v21954_v40 = vld [vmem:[#allocation107_spill] sm:$0xff]  ;;  %v21955_v5 = vld [vmem:[#allocation112_spill] sm:$0xff] }
0x10ed   :  { %14792 = vmatprep.subr.bf16.mxu1 %v14791_v6 }
0x10ef   :  { %13544 = vmatmul.mubr.f32.vlgmr.msra.gmra.mrb[16].mxu1 %v8883_v0  ;;  %v10520_v0 = vld [vmem:[%s21109_s6 + $0x368] sm:$0xff] }
0x10f0   :  { %14794 = vmatpush3.bf16.msra.mxu1 %v14791_v6  ;;  %13546 = vmatprep.mubr.f32.mxu1 %v8884_v34  ;;  %v21946_v6 = vld [vmem:[#allocation91_spill] sm:$0xff]  ;;  %v14815_v34 = vpack.c.bf16 %v10520_v0, %v10519_v48  ;;  %v10530_v0 = vld [vmem:[%s21109_s6 + $0x3b8] sm:$0xff] }
0x10f1   :  { %14796 = vmatprep.subr.bf16.mxu1 %v14795_v46  ;;  %v8891_v32 = vmul.f32 %v20519_v8, %v21946_v6  ;;  %v9094_v6 = vmul.f32 %v20367_v22, %v21955_v5  ;;  %v10529_v22 = vld [vmem:[%s21109_s6 + $0x3b0] sm:$0xff]  ;;  %v10539_v5 = vld [vmem:[%s21109_s6 + $0x400] sm:$0xff] }
0x10f3   :  { %13547 = vmatmul.mubr.f32.gmra.mrb[18].mxu1 %v8885_v31  ;;  %v10522_v31 = vld [vmem:[%s21109_s6 + $0x378] sm:$0xff] }
0x10f4   :  { %14798 = vmatpush3.bf16.msra.mxu1 %v14795_v46  ;;  %13549 = vmatprep.mubr.f32.mxu1 %v8886_v3  ;;  %v21948_v46 = vld [vmem:[#allocation95_spill] sm:$0xff]  ;;  %v14819_v3 = vpack.c.bf16 %v10522_v31, %v10521_v29  ;;  %v21960_v29 = vld [vmem:[#allocation40_spill] sm:$0xff] }
0x10f5   :  { %14800 = vmatprep.subr.bf16.mxu1 %v14799_v37  ;;  %v8893_v33 = vmul.f32 %v20533_v25, %v21948_v46  ;;  %v21958_v46 = vld [vmem:[#allocation39_spill] sm:$0xff]  ;;  %v9099_v31 = vmul.f32 %v20402_v47, %v21960_v29  ;;  %v9290_v29 = vld [vmem:[#allocation2 + $0x38] sm:$0xff] }
0x10f7   :  { %13550 = vmatmul.mubr.f32.gmra.mrb[20].mxu1 %v8887_v9  ;;  %v10523_v9 = vld [vmem:[%s21109_s6 + $0x380] sm:$0xff] }
0x10f8   :  { %14802 = vmatpush3.bf16.msra.mxu1 %v14799_v37  ;;  %13552 = vmatprep.mubr.f32.mxu1 %v8888_v54  ;;  %v21950_v37 = vld [vmem:[#allocation99_spill] sm:$0xff]  ;;  %v8897_v54 = vmul.f32 %v20773_v18, %v21952_v61  ;;  %v10536_v61 = vld [vmem:[%s21109_s6 + $0x3e8] sm:$0xff] }
0x10f9   :  { %14804 = vmatprep.subr.bf16.mxu1 %v14803_v39  ;;  %v8895_v63 = vmul.f32 %v20547_v12, %v21950_v37  ;;  %v21961_v37 = vld [vmem:[#allocation47_spill] sm:$0xff] }
0x10fb   :  { %13553 = vmatmul.mubr.f32.gmra.mrb[22].mxu1 %v8889_v36  ;;  %v10525_v36 = vld [vmem:[%s21109_s6 + $0x390] sm:$0xff] }
0x10fc   :  { %14806 = vmatpush3.bf16.msra.mxu1 %v14803_v39  ;;  %13555 = vmatprep.mubr.f32.mxu1 %v8890_v45  ;;  %v10524_v39 = vld [vmem:[%s21109_s6 + $0x388] sm:$0xff]  ;;  %v9093_v45 = vmul.f32 %v20359_v41, %v21954_v40 }
0x10fd   :  { %14808 = vmatprep.subr.bf16.mxu1 %v14807_v35  ;;  %v14823_v38 = vpack.c.bf16 %v10524_v39, %v10523_v9  ;;  %v21963_v9 = vld [vmem:[#allocation51_spill] sm:$0xff] }
0x10fe   :  { %v9102_v39 = vmul.f32 %v20424_v16, %v21963_v9  ;;  %v10537_v16 = vld [vmem:[%s21109_s6 + $0x3f0] sm:$0xff]  ;;  %v21974_v9 = vld [vmem:[#allocation120_spill] sm:$0xff] }
0x10ff   :  { %13556 = vmatmul.mubr.f32.gmra.mrb[24].mxu1 %v8891_v32  ;;  %v10528_v32 = vld [vmem:[%s21109_s6 + $0x3a8] sm:$0xff] }
0x1100   :  { %14810 = vmatpush3.bf16.msra.mxu1 %v14807_v35  ;;  %13558 = vmatprep.mubr.f32.mxu1 %v8892_v49  ;;  %v10526_v35 = vld [vmem:[%s21109_s6 + $0x398] sm:$0xff]  ;;  %v14831_v41 = vpack.c.bf16 %v10528_v32, %v10527_v24  ;;  %v21957_v49 = vld [vmem:[#allocation113_spill] sm:$0xff] }
0x1101   :  { %14812 = vmatprep.subr.bf16.mxu1 %v14811_v60  ;;  %v14827_v51 = vpack.c.bf16 %v10526_v35, %v10525_v36  ;;  %v9096_v48 = vmul.f32 %v20382_v20, %v21957_v49  ;;  %v10531_v20 = vld [vmem:[%s21109_s6 + $0x3c0] sm:$0xff]  ;;  %v10538_v36 = vld [vmem:[%s21109_s6 + $0x3f8] sm:$0xff]  ;;  %v21966_v35 = vld [vmem:[#allocation52_spill] sm:$0xff] }
0x1102   :  { %v9105_v40 = vmul.f32 %v20444_v56, %v21966_v35  ;;  %v9286_v24 = vld [vmem:[#allocation2 + $0x18] sm:$0xff]  ;;  %v10541_v49 = vld [vmem:[%s21109_s6 + $0x410] sm:$0xff] }
0x1103   :  { %13559 = vmatmul.mubr.f32.gmra.mrb[26].mxu1 %v8893_v33  ;;  %v9097_v33 = vmul.f32 %v20388_v42, %v21958_v46  ;;  %v21968_v32 = vld [vmem:[#allocation114_spill] sm:$0xff] }
0x1104   :  { %14814 = vmatpush3.bf16.msra.mxu1 %v14811_v60  ;;  %13561 = vmatprep.mubr.f32.mxu1 %v8894_v23  ;;  %v21956_v60 = vld [vmem:[#allocation111_spill] sm:$0xff]  ;;  %v10532_v23 = vld [vmem:[%s21109_s6 + $0x3c8] sm:$0xff] }
0x1105   :  { %14816 = vmatprep.subr.bf16.mxu1 %v14815_v34  ;;  %v9095_v58 = vmul.f32 %v20374_v11, %v21956_v60  ;;  %v14835_v11 = vpack.c.bf16 %v10530_v0, %v10529_v22  ;;  %v14839_v42 = vpack.c.bf16 %v10532_v23, %v10531_v20  ;;  %v9288_v22 = vld [vmem:[#allocation2 + $0x28] sm:$0xff]  ;;  %v10543_v20 = vld [vmem:[%s21109_s6 + $0x420] sm:$0xff] }
0x1106   :  { %v21970_v0 = vld [vmem:[#allocation116_spill] sm:$0xff] }
0x1107   :  { %13562 = vmatmul.mubr.f32.gmra.mrb[28].mxu1 %v8895_v63  ;;  %v9100_v63 = vmul.f32 %v20410_v27, %v21961_v37  ;;  %v10535_v27 = vld [vmem:[%s21109_s6 + $0x3e0] sm:$0xff]  ;;  %v10544_v23 = vld [vmem:[%s21109_s6 + $0x428] sm:$0xff] }
0x1108   :  { %14818 = vmatpush3.bf16.msra.mxu1 %v14815_v34  ;;  %13564 = vmatprep.mubr.f32.mxu1 %v8896_v26  ;;  %v21959_v34 = vld [vmem:[#allocation43_spill] sm:$0xff]  ;;  %v9101_v26 = vmul.f32 %v20416_v55, %v21962_v7  ;;  %v14847_v55 = vpack.c.bf16 %v10536_v61, %v10535_v27  ;;  %v14863_v37 = vpack.c.bf16 %v10544_v23, %v10543_v20  ;;  %v10545_v7 = vld [vmem:[%s21109_s6 + $0x430] sm:$0xff]  ;;  %v9300_v20 = vld [vmem:[#allocation2 + $0x88] sm:$0xff] }
0x1109   :  { %14820 = vmatprep.subr.bf16.mxu1 %v14819_v3  ;;  %v9098_v1 = vmul.f32 %v20396_v50, %v21959_v34  ;;  %v10533_v50 = vld [vmem:[%s21109_s6 + $0x3d0] sm:$0xff]  ;;  %v21982_v23 = vld [vmem:[#allocation128_spill] sm:$0xff] }
0x110a   :  { %v21975_v61 = vld [vmem:[#allocation121_spill] sm:$0xff] }
0x110b   :  { %13565 = vmatmul.mubr.f32.gmra.mrb[30].mxu1 %v8897_v54  ;;  %v21964_v54 = vld [vmem:[#allocation48_spill] sm:$0xff] }
0x110c   :  { %14822 = vmatpush3.bf16.msra.mxu1 %v14819_v3  ;;  %13599 = vmatprep.mubr.f32.mxu1 %v9092_v19  ;;  %v10534_v3 = vld [vmem:[%s21109_s6 + $0x3d8] sm:$0xff]  ;;  %v9104_v19 = vmul.f32 %v20438_v2, %v21965_v4  ;;  %v9091_v2 = vld [vmem:[#allocation2 + $0x8f] sm:$0xff] }
0x110d   :  { %14824 = vmatprep.subr.bf16.mxu1 %v14823_v38  ;;  %v14843_v47 = vpack.c.bf16 %v10534_v3, %v10533_v50  ;;  %v9107_v56 = vmul.f32 %v9091_v2, %v21968_v32  ;;  %v9291_v3 = vld [vmem:[#allocation2 + $0x40] sm:$0xff]  ;;  %v10548_v4 = vld [vmem:[%s21109_s6 + $0x448] sm:$0xff]  ;;  %v10550_v2 = vld [vmem:[%s21109_s6 + $0x458] sm:$0xff] }
0x110f   :  { %13600 = vmatmul.mubr.f32.vlgmr.msra.gmra.mrb[16].mxu1 %v9093_v45  ;;  %v21967_v45 = vld [vmem:[#allocation56_spill] sm:$0xff] }
0x1110   :  { %14826 = vmatpush3.bf16.msra.mxu1 %v14823_v38  ;;  %13602 = vmatprep.mubr.f32.mxu1 %v9094_v6  ;;  %v9103_v38 = vmul.f32 %v20430_v28, %v21964_v54  ;;  %v14851_v28 = vpack.c.bf16 %v10538_v36, %v10537_v16  ;;  %v10540_v6 = vld [vmem:[%s21109_s6 + $0x408] sm:$0xff]  ;;  %v21976_v16 = vld [vmem:[#allocation122_spill] sm:$0xff] }
0x1111   :  { %14828 = vmatprep.subr.bf16.mxu1 %v14827_v51  ;;  %v14855_v60 = vpack.c.bf16 %v10540_v6, %v10539_v5  ;;  %v9296_v5 = vld [vmem:[#allocation2 + $0x68] sm:$0xff] }
0x1112   :  { %v21978_v6 = vld [vmem:[#allocation124_spill] sm:$0xff] }
0x1113   :  { %13603 = vmatmul.mubr.f32.gmra.mrb[18].mxu1 %v9095_v58  ;;  %v21969_v58 = vld [vmem:[#allocation115_spill] sm:$0xff] }
0x1114   :  { %14830 = vmatpush3.bf16.msra.mxu1 %v14827_v51  ;;  %13605 = vmatprep.mubr.f32.mxu1 %v9096_v48  ;;  %v9106_v51 = vmul.f32 %v20635_v44, %v21967_v45  ;;  %v9287_v44 = vld [vmem:[#allocation2 + $0x20] sm:$0xff]  ;;  %v10542_v48 = vld [vmem:[%s21109_s6 + $0x418] sm:$0xff] }
0x1115   :  { %14832 = vmatprep.subr.bf16.mxu1 %v14831_v41  ;;  %v9303_v46 = vmul.f32 %v9287_v44, %v21970_v0  ;;  %v9295_v45 = vld [vmem:[#allocation2 + $0x60] sm:$0xff]  ;;  %v10552_v44 = vld [vmem:[%s21109_s6 + $0x468] sm:$0xff] }
0x1117   :  { %13606 = vmatmul.mubr.f32.gmra.mrb[20].mxu1 %v9097_v33  ;;  %v14859_v33 = vpack.c.bf16 %v10542_v48, %v10541_v49  ;;  %v9298_v49 = vld [vmem:[#allocation2 + $0x78] sm:$0xff] }
0x1118   :  { %14834 = vmatpush3.bf16.msra.mxu1 %v14831_v41  ;;  %13608 = vmatprep.mubr.f32.mxu1 %v9098_v1  ;;  %v9302_v41 = vmul.f32 %v9286_v24, %v21969_v58  ;;  %v9289_v1 = vld [vmem:[#allocation2 + $0x30] sm:$0xff]  ;;  %v9311_v24 = vmul.f32 %v9295_v45, %v21978_v6  ;;  %v21980_v48 = vld [vmem:[#allocation126_spill] sm:$0xff]  ;;  %v21997_v45 = vld [vmem:[#allocation143_spill] sm:$0xff] }
0x1119   :  { %14836 = vmatprep.subr.bf16.mxu1 %v14835_v11  ;;  %v9297_v58 = vld [vmem:[#allocation2 + $0x70] sm:$0xff] }
0x111b   :  { %13609 = vmatmul.mubr.f32.gmra.mrb[22].mxu1 %v9099_v31  ;;  %v21972_v31 = vld [vmem:[#allocation118_spill] sm:$0xff] }
0x111c   :  { %14838 = vmatpush3.bf16.msra.mxu1 %v14835_v11  ;;  %13611 = vmatprep.mubr.f32.mxu1 %v9100_v63  ;;  %v21971_v11 = vld [vmem:[#allocation117_spill] sm:$0xff]  ;;  %v21973_v63 = vld [vmem:[#allocation119_spill] sm:$0xff] }
0x111d   :  { %14840 = vmatprep.subr.bf16.mxu1 %v14839_v42  ;;  %v9304_v34 = vmul.f32 %v9288_v22, %v21971_v11  ;;  %v9306_v50 = vmul.f32 %v9290_v29, %v21973_v63  ;;  %v9313_v22 = vmul.f32 %v9297_v58, %v21980_v48  ;;  %v9299_v11 = vld [vmem:[#allocation2 + $0x80] sm:$0xff]  ;;  %v15632_v63 = vld [vmem:[#allocation2 + $0x8] sm:$0xff] }
0x111e   :  { %v9315_v29 = vmul.f32 %v9299_v11, %v21982_v23 }
0x111f   :  { %13612 = vmatmul.mubr.f32.gmra.mrb[24].mxu1 %v9101_v26  ;;  %v10546_v26 = vld [vmem:[%s21109_s6 + $0x438] sm:$0xff] }
0x1120   :  { %14842 = vmatpush3.bf16.msra.mxu1 %v14839_v42  ;;  %13614 = vmatprep.mubr.f32.mxu1 %v9102_v39  ;;  %v9305_v42 = vmul.f32 %v9289_v1, %v21972_v31  ;;  %v9307_v39 = vmul.f32 %v9291_v3, %v21974_v9  ;;  %v14867_v27 = vpack.c.bf16 %v10546_v26, %v10545_v7  ;;  %v10554_v1 = vld [vmem:[%s21109_s6 + $0x478] sm:$0xff]  ;;  %v21985_v7 = vld [vmem:[#allocation131_spill] sm:$0xff] }
0x1121   :  { %14844 = vmatprep.subr.bf16.mxu1 %v14843_v47  ;;  %v9512_v26 = vmul.f32 %v20463_v21, %v21985_v7  ;;  %v21990_v21 = vld [vmem:[#allocation136_spill] sm:$0xff] }
0x1123   :  { %13615 = vmatmul.mubr.f32.gmra.mrb[26].mxu1 %v9103_v38  ;;  %v9293_v38 = vld [vmem:[#allocation2 + $0x50] sm:$0xff] }
0x1124   :  { %14846 = vmatpush3.bf16.msra.mxu1 %v14843_v47  ;;  %13617 = vmatprep.mubr.f32.mxu1 %v9104_v19  ;;  %v9292_v47 = vld [vmem:[#allocation2 + $0x48] sm:$0xff]  ;;  %v9294_v19 = vld [vmem:[#allocation2 + $0x58] sm:$0xff]  ;;  %v9309_v36 = vmul.f32 %v9293_v38, %v21976_v16  ;;  %v21989_v38 = vld [vmem:[#allocation135_spill] sm:$0xff] }
0x1125   :  { %14848 = vmatprep.subr.bf16.mxu1 %v14847_v55  ;;  %v9308_v54 = vmul.f32 %v9292_v47, %v21975_v61  ;;  %v21986_v47 = vld [vmem:[#allocation132_spill] sm:$0xff]  ;;  %v21988_v61 = vld [vmem:[#allocation134_spill] sm:$0xff] }
0x1126   :  { %v9513_v9 = vmul.f32 %v20469_v17, %v21986_v47  ;;  %v21992_v17 = vld [vmem:[#allocation138_spill] sm:$0xff] }
0x1127   :  { %13618 = vmatmul.mubr.f32.gmra.mrb[28].mxu1 %v9105_v40  ;;  %v21977_v40 = vld [vmem:[#allocation123_spill] sm:$0xff] }
0x1128   :  { %14850 = vmatpush3.bf16.msra.mxu1 %v14847_v55  ;;  %13620 = vmatprep.mubr.f32.mxu1 %v9106_v51  ;;  %v10547_v55 = vld [vmem:[%s21109_s6 + $0x440] sm:$0xff]  ;;  %v10549_v51 = vld [vmem:[%s21109_s6 + $0x450] sm:$0xff] }
0x1129   :  { %14852 = vmatprep.subr.bf16.mxu1 %v14851_v28  ;;  %v14871_v35 = vpack.c.bf16 %v10548_v4, %v10547_v55  ;;  %v14875_v32 = vpack.c.bf16 %v10550_v2, %v10549_v51  ;;  %v9516_v55 = vmul.f32 %v20491_v53, %v21989_v38  ;;  %v9517_v4 = vmul.f32 %v20497_v14, %v21990_v21  ;;  %v21996_v14 = vld [vmem:[#allocation142_spill] sm:$0xff]  ;;  %v21999_v2 = vld [vmem:[#allocation145_spill] sm:$0xff] }
0x112a   :  { %v9524_v51 = vmul.f32 %v20547_v12, %v21997_v45 }
0x112b   :  { %13621 = vmatmul.mubr.f32.gmra.mrb[30].mxu1 %v9107_v56  ;;  %v21979_v56 = vld [vmem:[#allocation125_spill] sm:$0xff] }
0x112c   :  { %14854 = vmatpush3.bf16.msra.mxu1 %v14851_v28  ;;  %13655 = vmatprep.mubr.f32.mxu1 %v9302_v41  ;;  %v9310_v28 = vmul.f32 %v9294_v19, %v21977_v40  ;;  %v10551_v41 = vld [vmem:[%s21109_s6 + $0x460] sm:$0xff]  ;;  %v21991_v19 = vld [vmem:[#allocation137_spill] sm:$0xff] }
0x112d   :  { %14856 = vmatprep.subr.bf16.mxu1 %v14855_v60  ;;  %v14879_v0 = vpack.c.bf16 %v10552_v44, %v10551_v41  ;;  %v9518_v16 = vmul.f32 %v20505_v30, %v21991_v19  ;;  %v21995_v40 = vld [vmem:[#allocation141_spill] sm:$0xff]  ;;  %v9523_v30 = vmul.f32 %v20539_v15, %v21996_v14 }
0x112f   :  { %13656 = vmatmul.mubr.f32.vlgmr.msra.gmra.mrb[16].mxu1 %v9303_v46  ;;  %v21981_v46 = vld [vmem:[#allocation127_spill] sm:$0xff] }
0x1130   :  { %14858 = vmatpush3.bf16.msra.mxu1 %v14855_v60  ;;  %13658 = vmatprep.mubr.f32.mxu1 %v9304_v34  ;;  %v9312_v60 = vmul.f32 %v9296_v5, %v21979_v56  ;;  %v10553_v34 = vld [vmem:[%s21109_s6 + $0x470] sm:$0xff]  ;;  %v9526_v5 = vmul.f32 %v20773_v18, %v21999_v2 }
0x1131   :  { %14860 = vmatprep.subr.bf16.mxu1 %v14859_v33  ;;  %v14883_v31 = vpack.c.bf16 %v10554_v1, %v10553_v34 }
0x1133   :  { %13659 = vmatmul.mubr.f32.gmra.mrb[18].mxu1 %v9305_v42  ;;  %v21983_v42 = vld [vmem:[#allocation129_spill] sm:$0xff] }
0x1134   :  { %14862 = vmatpush3.bf16.msra.mxu1 %v14859_v33  ;;  %13661 = vmatprep.mubr.f32.mxu1 %v9306_v50  ;;  %v9314_v33 = vmul.f32 %v9298_v49, %v21981_v46  ;;  %v21984_v50 = vld [vmem:[#allocation130_spill] sm:$0xff] }
0x1135   :  { %14864 = vmatprep.subr.bf16.mxu1 %v14863_v37  ;;  %v9317_v3 = vmul.f32 %v15632_v63, %v21984_v50 }
0x1137   :  { %13662 = vmatmul.mubr.f32.gmra.mrb[20].mxu1 %v9307_v39  ;;  %v21987_v39 = vld [vmem:[#allocation133_spill] sm:$0xff] }
0x1138   :  { %14866 = vmatpush3.bf16.msra.mxu1 %v14863_v37  ;;  %13664 = vmatprep.mubr.f32.mxu1 %v9308_v54  ;;  %v9316_v37 = vmul.f32 %v9300_v20, %v21983_v42  ;;  %v9515_v54 = vmul.f32 %v20483_v57, %v21988_v61  ;;  %v21994_v57 = vld [vmem:[#allocation140_spill] sm:$0xff] }
0x1139   :  { %14868 = vmatprep.subr.bf16.mxu1 %v14867_v27  ;;  %v9521_v53 = vmul.f32 %v20525_v52, %v21994_v57  ;;  %v9511_v52 = vld [vmem:[#allocation2 + $0x91] sm:$0xff] }
0x113b   :  { %13665 = vmatmul.mubr.f32.gmra.mrb[22].mxu1 %v9309_v36  ;;  %v21993_v36 = vld [vmem:[#allocation139_spill] sm:$0xff] }
0x113c   :  { %14870 = vmatpush3.bf16.msra.mxu1 %v14867_v27  ;;  %13667 = vmatprep.mubr.f32.mxu1 %v9310_v28  ;;  %v9514_v27 = vmul.f32 %v20477_v13, %v21987_v39  ;;  %v9519_v13 = vmul.f32 %v20511_v10, %v21992_v17  ;;  %v9522_v28 = vmul.f32 %v20533_v25, %v21995_v40  ;;  %v21998_v10 = vld [vmem:[#allocation144_spill] sm:$0xff]  ;;  %v22000_v25 = vld [vmem:[#allocation146_spill] sm:$0xff] }
0x113d   :  { %14872 = vmatprep.subr.bf16.mxu1 %v14871_v35  ;;  %v9527_v6 = vmul.f32 %v9511_v52, %v22000_v25 }
0x113f   :  { %13668 = vmatmul.mubr.f32.gmra.mrb[24].mxu1 %v9311_v24 }
0x1140   :  { %14874 = vmatpush3.bf16.msra.mxu1 %v14871_v35  ;;  %13670 = vmatprep.mubr.f32.mxu1 %v9312_v60  ;;  %v9520_v35 = vmul.f32 %v20519_v8, %v21993_v36  ;;  %v9525_v8 = vmul.f32 %v20553_v59, %v21998_v10 }
0x1141   :  { %14876 = vmatprep.subr.bf16.mxu1 %v14875_v32 }
0x1143   :  { %13671 = vmatmul.mubr.f32.gmra.mrb[26].mxu1 %v9313_v22 }
0x1144   :  { %14878 = vmatpush3.bf16.msra.mxu1 %v14875_v32  ;;  %13673 = vmatprep.mubr.f32.mxu1 %v9314_v33 }
0x1145   :  { %14880 = vmatprep.subr.bf16.mxu1 %v14879_v0 }
0x1147   :  { %13674 = vmatmul.mubr.f32.gmra.mrb[28].mxu1 %v9315_v29 }
0x1148   :  { %14882 = vmatpush3.bf16.msra.mxu1 %v14879_v0  ;;  %13676 = vmatprep.mubr.f32.mxu1 %v9316_v37 }
0x1149   :  { %14884 = vmatprep.subr.bf16.mxu1 %v14883_v31 }
0x114b   :  { %13677 = vmatmul.mubr.f32.gmra.mrb[30].mxu1 %v9317_v3 }
0x114c   :  { %14886 = vmatpush3.bf16.msra.mxu1 %v14883_v31  ;;  %13711 = vmatprep.mubr.f32.mxu1 %v9512_v26 }
0x114f   :  { %13712 = vmatmul.mubr.f32.vlgmr.msra.gmra.mrb[16].mxu1 %v9513_v9 }
0x1150   :  { %13714 = vmatprep.mubr.f32.mxu1 %v9514_v27 }
0x1153   :  { %13715 = vmatmul.mubr.f32.gmra.mrb[18].mxu1 %v9515_v54 }
0x1154   :  { %13717 = vmatprep.mubr.f32.mxu1 %v9516_v55 }
0x1157   :  { %13718 = vmatmul.mubr.f32.gmra.mrb[20].mxu1 %v9517_v4 }
0x1158   :  { %13720 = vmatprep.mubr.f32.mxu1 %v9518_v16 }
0x115b   :  { %13721 = vmatmul.mubr.f32.gmra.mrb[22].mxu1 %v9519_v13 }
0x115c   :  { %13723 = vmatprep.mubr.f32.mxu1 %v9520_v35 }
0x115f   :  { %13724 = vmatmul.mubr.f32.gmra.mrb[24].mxu1 %v9521_v53 }
0x1160   :  { %13726 = vmatprep.mubr.f32.mxu1 %v9522_v28 }
0x1163   :  { %13727 = vmatmul.mubr.f32.gmra.mrb[26].mxu1 %v9523_v30 }
0x1164   :  { %13729 = vmatprep.mubr.f32.mxu1 %v9524_v51 }
0x1167   :  { %13730 = vmatmul.mubr.f32.gmra.mrb[28].mxu1 %v9525_v8 }
0x1168   :  { %13732 = vmatprep.mubr.f32.mxu1 %v9526_v5 }
0x116b   :  { %13733 = vmatmul.mubr.f32.gmra.mrb[30].mxu1 %v9527_v6 }
0x1222   :  { %v13713_v24 = vpop.f32.mrb[16].mxu1 }
0x1223   :  { %v9611_v32 = vpop.f32.mrb[17].mxu1 }
0x1224   :  { %v9708_v15 = vadd.f32 %v13713_v24, %v9611_v32 }
0x1226   :  { %v13716_v56 = vpop.f32.mrb[18].mxu1 }
0x1227   :  { %v9621_v60 = vpop.f32.mrb[19].mxu1 }
0x1228   :  { %v9709_v12 = vadd.f32 %v9708_v15, %v9621_v60 }
0x122a   :  { %v13719_v58 = vpop.f32.mrb[20].mxu1  ;;  %v9710_v41 = vadd.f32 %v13716_v56, %v9709_v12 }
0x122b   :  { %v9631_v44 = vpop.f32.mrb[21].mxu1 }
0x122c   :  { %v9711_v49 = vadd.f32 %v9710_v41, %v9631_v44 }
0x122e   :  { %v13722_v59 = vpop.f32.mrb[22].mxu1  ;;  %v9712_v48 = vadd.f32 %v13719_v58, %v9711_v49 }
0x122f   :  { %v9641_v22 = vpop.f32.mrb[23].mxu1 }
0x1230   :  { %v9713_v18 = vadd.f32 %v9712_v48, %v9641_v22 }
0x1232   :  { %v9714_v0 = vadd.f32 %v13722_v59, %v9713_v18  ;;  %v20951_v46 = vpop.f32.mrb[24].mxu1 }
0x1233   :  { %v20953_v33 = vpop.f32.mrb[25].mxu1 }
0x1234   :  { %v9797_v11 = vadd.f32 %v20951_v46, %v20953_v33  ;;  %9715 = vadd.xlane.f32.xlu1 %v9714_v0 }
0x1236   :  { %v20957_v34 = vpop.f32.mrb[26].mxu1 }
0x1237   :  { %v20959_v1 = vpop.f32.mrb[27].mxu1 }
0x1238   :  { %v9798_v20 = vadd.f32 %v9797_v11, %v20959_v1 }
0x123a   :  { %v20962_v23 = vpop.f32.mrb[28].mxu1  ;;  %v9799_v29 = vadd.f32 %v20957_v34, %v9798_v20 }
0x123b   :  { %v20965_v31 = vpop.f32.mrb[29].mxu1 }
0x123c   :  { %v9800_v42 = vadd.f32 %v9799_v29, %v20965_v31 }
0x123e   :  { %v20968_v37 = vpop.f32.mrb[30].mxu1  ;;  %v9801_v63 = vadd.f32 %v20962_v23, %v9800_v42 }
0x123f   :  { %v20971_v50 = vpop.f32.mrb[31].mxu1 }
0x1240   :  { %v9802_v3 = vadd.f32 %v9801_v63, %v20971_v50 }
0x1242   :  { %v9803_v7 = vadd.f32 %v20968_v37, %v9802_v3 }
0x1244   :  { %9804 = vadd.xlane.f32.xlu1 %v9803_v7 }
0x12c1   :  { %v9716_v26 = vpop.xlane.xlu1 %9715 }
0x12c2   :  { %v9717_v47 = vrot.slane %v9716_v26, 4 }
0x12c4   :  { %v9718_v9 = vadd.f32 %v9717_v47, %v9716_v26  ;;  %v21002_v47 = vld [vmem:[%s21110_s8 + $0x2] sm:$0x1] }
0x12c6   :  { %v9719_v39 = vrot.slane %v9718_v9, 2 }
0x12c8   :  { %v9720_v27 = vadd.f32 %v9719_v39, %v9718_v9 }
0x12ca   :  { %v9721_v61 = vrot.slane %v9720_v27, 1 }
0x12cc   :  { %v9722_v54 = vadd.f32 %v9721_v61, %v9720_v27 }
0x12ce   :  { %15435 = vpush %v9722_v54  ;;  %v21009_v54 = vld [vmem:[%s21110_s8 + $0x3] ss:$0 sm:$0xff] }
0x12d1   :  { %v9805_v0 = vpop.xlane.xlu1 %9804 }
0x12d2   :  { %v9806_v11 = vrot.slane %v9805_v0, 4 }
0x12d4   :  { %v9807_v20 = vadd.f32 %v9806_v11, %v9805_v0 }
0x12d6   :  { %v9808_v29 = vrot.slane %v9807_v20, 2 }
0x12d8   :  { %v9809_v63 = vadd.f32 %v9808_v29, %v9807_v20 }
0x12da   :  { %v9810_v3 = vrot.slane %v9809_v63, 1 }
0x12dc   :  { %v9811_v26 = vadd.f32 %v9810_v3, %v9809_v63 }
0x12ff   :  { %s15436_s6 = spop %15435 }
0x1300   :  { %s9724_s18 = smul.f32 0.001953125, %s15436_s6 }
0x1302   :  { %v9725_v38 = vstv %s9724_s18 }
0x1303   :  { %v9726_v55 = vsub.f32 %v9611_v32, %v9725_v38  ;;  %v9727_v21 = vsub.f32 %v13713_v24, %v9725_v38  ;;  %v9728_v4 = vsub.f32 %v9621_v60, %v9725_v38  ;;  %v9729_v19 = vsub.f32 %v13716_v56, %v9725_v38 }
0x1304   :  { %v9730_v13 = vsub.f32 %v9631_v44, %v9725_v38  ;;  %v9731_v35 = vsub.f32 %v13719_v58, %v9725_v38  ;;  %v9732_v28 = vsub.f32 %v9641_v22, %v9725_v38  ;;  %v9733_v51 = vsub.f32 %v13722_v59, %v9725_v38 }
0x1305   :  { %v20976_v16 = vmul.f32 %v19723_v62, %v9726_v55  ;;  %v20979_v17 = vmul.f32 %v19723_v62, %v9727_v21  ;;  %v20982_v36 = vmul.f32 %v19723_v62, %v9728_v4  ;;  %v20985_v57 = vmul.f32 %v19723_v62, %v9729_v19 }
0x1306   :  { %v9738_v14 = vmul.f32 %v19723_v62, %v9730_v13  ;;  %v9739_v10 = vmul.f32 %v19723_v62, %v9731_v35  ;;  %v9740_v5 = vmul.f32 %v19723_v62, %v9732_v28  ;;  %v9741_v6 = vmul.f32 %v19723_v62, %v9733_v51 }
0x1307   :  { %v9742_v53 = vmul.f32 %v20976_v16, %v20976_v16  ;;  %v9743_v40 = vmul.f32 %v20979_v17, %v20979_v17  ;;  %v9744_v30 = vmul.f32 %v20982_v36, %v20982_v36  ;;  %v9745_v8 = vmul.f32 %v20985_v57, %v20985_v57 }
0x1308   :  { %v9746_v52 = vmul.f32 %v9738_v14, %v9738_v14  ;;  %v9747_v24 = vmul.f32 %v9739_v10, %v9739_v10  ;;  %v9748_v15 = vmul.f32 %v9740_v5, %v9740_v5  ;;  %v9749_v60 = vmul.f32 %v9741_v6, %v9741_v6 }
0x1309   :  { %v9750_v45 = vadd.f32 %v9743_v40, %v9742_v53 }
0x130b   :  { %v9751_v2 = vadd.f32 %v9750_v45, %v9744_v30 }
0x130d   :  { %v9752_v25 = vadd.f32 %v9751_v2, %v9745_v8 }
0x130f   :  { %v9753_v32 = vadd.f32 %v9752_v25, %v9746_v52 }
0x1311   :  { %v9754_v56 = vadd.f32 %v9753_v32, %v9747_v24 }
0x1313   :  { %v9755_v12 = vadd.f32 %v9754_v56, %v9748_v15 }
0x1315   :  { %v9756_v58 = vadd.f32 %v9755_v12, %v9749_v60 }
0x1317   :  { %9757 = vadd.xlane.f32.xlu0 %v9756_v58 }
0x13a4   :  { %v9758_v41 = vpop.xlane.xlu0 %9757 }
0x13a5   :  { %v9759_v44 = vrot.slane %v9758_v41, 4 }
0x13a7   :  { %v9760_v49 = vadd.f32 %v9759_v44, %v9758_v41 }
0x13a9   :  { %v9761_v59 = vrot.slane %v9760_v49, 2 }
0x13ab   :  { %v9762_v48 = vadd.f32 %v9761_v59, %v9760_v49 }
0x13ad   :  { %v9763_v22 = vrot.slane %v9762_v48, 1 }
0x13af   :  { %v9764_v18 = vadd.f32 %v9763_v22, %v9762_v48 }
0x13b1   :  { %15437 = vpush %v9764_v18 }
0x13e2   :  { %s15438_s4 = spop %15437 }
0x13e3   :  { %s9766_s19 = smul.f32 0.001953125, %s15438_s4 }
0x13e5   :  { %s9767_s20 = sadd.f32 1e-05, %s9766_s19 }
0x13e7   :  { %v9768_v42 = vstv %s9767_s20 }
0x13e8   :  { %15591 = vrsqrt.f32 %v9768_v42 }
0x13f2   :  { %v15592_v7 = vpop.eup %15591 }
0x13f3   :  { %15439 = vpush %v15592_v7 }
0x13f4   :  { %15441 = vpush %v9811_v26 }
0x1424   :  { %s15440_s23 = spop %15439 }
0x1425   :  { %v9771_v9 = vstv %s15440_s23  ;;  %s15442_s24 = spop %15441 }
0x1426   :  { %v9772_v39 = vmul.f32 %v9771_v9, %v21002_v47  ;;  %s9813_s25 = smul.f32 0.001953125, %s15442_s24 }
0x1428   :  { %v9776_v27 = vrot.slane %v9772_v39, %v21864_v43  ;;  %v9814_v61 = vstv %s9813_s25 }
0x1429   :  { %v9815_v38 = vsub.f32 %v20953_v33, %v9814_v61  ;;  %v9816_v55 = vsub.f32 %v20951_v46, %v9814_v61  ;;  %v9817_v21 = vsub.f32 %v20959_v1, %v9814_v61  ;;  %v9818_v4 = vsub.f32 %v20957_v34, %v9814_v61  ;;  %v10556_v46 = vld [vmem:[%s21111_s1] ss:$0 sm:$0xff] }
0x142a   :  { %v9777_v19 = vmul.f32 %v9776_v27, %v20976_v16  ;;  %v9778_v13 = vmul.f32 %v9776_v27, %v20979_v17  ;;  %v9779_v35 = vmul.f32 %v9776_v27, %v20982_v36  ;;  %v9780_v53 = vmul.f32 %v9776_v27, %v20985_v57 }
0x142b   :  { %v9781_v40 = vmul.f32 %v9776_v27, %v9738_v14  ;;  %v9782_v28 = vmul.f32 %v9776_v27, %v9739_v10  ;;  %v9783_v30 = vmul.f32 %v9776_v27, %v9740_v5  ;;  %v9784_v45 = vmul.f32 %v9776_v27, %v9741_v6 }
0x142c   :  { %v9789_v33 = vadd.f32 %v21009_v54, %v9777_v19  ;;  %v9790_v34 = vadd.f32 %v21009_v54, %v9778_v13  ;;  %v9791_v1 = vadd.f32 %v21009_v54, %v9779_v35  ;;  %v9792_v16 = vadd.f32 %v21009_v54, %v9780_v53 }
0x142d   :  { %v9793_v17 = vadd.f32 %v21009_v54, %v9781_v40  ;;  %v9794_v36 = vadd.f32 %v21009_v54, %v9782_v28  ;;  %v9795_v57 = vadd.f32 %v21009_v54, %v9783_v30  ;;  %v9796_v14 = vadd.f32 %v21009_v54, %v9784_v45 }
0x142e   :  { %v9889_v51 = vadd.f32 %v10556_v46, %v9789_v33  ;;  %v9890_v10 = vadd.f32 %v10556_v46, %v9790_v34  ;;  %v9891_v8 = vadd.f32 %v10556_v46, %v9791_v1  ;;  %v9892_v2 = vadd.f32 %v10556_v46, %v9792_v16  ;;  %v10558_v1 = vld [vmem:[%s21111_s1 + $0x1] ss:$0 sm:$0xff] }
0x142f   :  { %v9893_v5 = vadd.f32 %v10556_v46, %v9793_v17  ;;  %v9894_v52 = vadd.f32 %v10556_v46, %v9794_v36  ;;  %v9895_v25 = vadd.f32 %v10556_v46, %v9795_v57  ;;  %v9896_v6 = vadd.f32 %v10556_v46, %v9796_v14 }
0x1430   :  { %9897 = vst [vmem:[%s21112_s9] sm:$0xff] %v9889_v51  ;;  %9898 = vst [vmem:[%s21112_s9 + $0x8] sm:$0xff] %v9890_v10  ;;  %v9823_v24 = vmul.f32 %v19723_v62, %v9815_v38  ;;  %v9824_v32 = vmul.f32 %v19723_v62, %v9816_v55  ;;  %v9819_v15 = vsub.f32 %v20965_v31, %v9814_v61 }
0x1431   :  { %9899 = vst [vmem:[%s21112_s9 + $0x10] sm:$0xff] %v9891_v8  ;;  %9900 = vst [vmem:[%s21112_s9 + $0x18] sm:$0xff] %v9892_v2  ;;  %v9825_v56 = vmul.f32 %v19723_v62, %v9817_v21  ;;  %v9820_v31 = vsub.f32 %v20962_v23, %v9814_v61  ;;  %v9826_v60 = vmul.f32 %v19723_v62, %v9818_v4 }
0x1432   :  { %9901 = vst [vmem:[%s21112_s9 + $0x20] sm:$0xff] %v9893_v5  ;;  %9902 = vst [vmem:[%s21112_s9 + $0x28] sm:$0xff] %v9894_v52  ;;  %v9831_v12 = vmul.f32 %v9823_v24, %v9823_v24  ;;  %v9832_v58 = vmul.f32 %v9824_v32, %v9824_v32  ;;  %v9821_v41 = vsub.f32 %v20971_v50, %v9814_v61 }
0x1433   :  { %9903 = vst [vmem:[%s21112_s9 + $0x30] sm:$0xff] %v9895_v25  ;;  %9904 = vst [vmem:[%s21112_s9 + $0x38] sm:$0xff] %v9896_v6  ;;  %v9827_v44 = vmul.f32 %v19723_v62, %v9819_v15  ;;  %v9833_v49 = vmul.f32 %v9825_v56, %v9825_v56  ;;  %v9822_v48 = vsub.f32 %v20968_v37, %v9814_v61 }
0x1434   :  { %v9839_v59 = vadd.f32 %v9832_v58, %v9831_v12  ;;  %v9828_v22 = vmul.f32 %v19723_v62, %v9820_v31  ;;  %v9834_v18 = vmul.f32 %v9826_v60, %v9826_v60  ;;  %v9829_v11 = vmul.f32 %v19723_v62, %v9821_v41 }
0x1435   :  { %v9835_v20 = vmul.f32 %v9827_v44, %v9827_v44  ;;  %v9830_v29 = vmul.f32 %v19723_v62, %v9822_v48 }
0x1436   :  { %v9840_v0 = vadd.f32 %v9839_v59, %v9833_v49  ;;  %v9836_v42 = vmul.f32 %v9828_v22, %v9828_v22  ;;  %v9837_v3 = vmul.f32 %v9829_v11, %v9829_v11 }
0x1437   :  { %v9838_v7 = vmul.f32 %v9830_v29, %v9830_v29 }
0x1438   :  { %v9841_v23 = vadd.f32 %v9840_v0, %v9834_v18 }
0x143a   :  { %v9842_v63 = vadd.f32 %v9841_v23, %v9835_v20 }
0x143c   :  { %v9843_v50 = vadd.f32 %v9842_v63, %v9836_v42 }
0x143e   :  { %v9844_v26 = vadd.f32 %v9843_v50, %v9837_v3 }
0x1440   :  { %v9845_v9 = vadd.f32 %v9844_v26, %v9838_v7 }
0x1442   :  { %9846 = vadd.xlane.f32.xlu0 %v9845_v9 }
0x14cf   :  { %v9847_v39 = vpop.xlane.xlu0 %9846 }
0x14d0   :  { %v9848_v37 = vrot.slane %v9847_v39, 4 }
0x14d2   :  { %v9849_v27 = vadd.f32 %v9848_v37, %v9847_v39 }
0x14d4   :  { %v9850_v61 = vrot.slane %v9849_v27, 2 }
0x14d6   :  { %v9851_v38 = vadd.f32 %v9850_v61, %v9849_v27 }
0x14d8   :  { %v9852_v55 = vrot.slane %v9851_v38, 1 }
0x14da   :  { %v9853_v21 = vadd.f32 %v9852_v55, %v9851_v38 }
0x14dc   :  { %15443 = vpush %v9853_v21 }
0x150d   :  { %s15444_s18 = spop %15443 }
0x150e   :  { %s9855_s4 = smul.f32 0.001953125, %s15444_s18 }
0x1510   :  { %s9856_s19 = sadd.f32 1e-05, %s9855_s4 }
0x1512   :  { %v9857_v62 = vstv %s9856_s19 }
0x1513   :  { %15593 = vrsqrt.f32 %v9857_v62 }
0x151d   :  { %v15594_v4 = vpop.eup %15593 }
0x151e   :  { %15445 = vpush %v15594_v4 }
0x154f   :  { %s15446_s20 = spop %15445 }
0x1550   :  { %v9860_v19 = vstv %s15446_s20 }
0x1551   :  { %v9861_v13 = vmul.f32 %v9860_v19, %v21002_v47 }
0x1553   :  { %v9865_v35 = vrot.slane %v9861_v13, %v21864_v43 }
0x1555   :  { %v9866_v53 = vmul.f32 %v9865_v35, %v9823_v24  ;;  %v9867_v40 = vmul.f32 %v9865_v35, %v9824_v32  ;;  %v9868_v28 = vmul.f32 %v9865_v35, %v9825_v56  ;;  %v9869_v30 = vmul.f32 %v9865_v35, %v9826_v60 }
0x1556   :  { %v9870_v45 = vmul.f32 %v9865_v35, %v9827_v44  ;;  %v9871_v46 = vmul.f32 %v9865_v35, %v9828_v22  ;;  %v9872_v33 = vmul.f32 %v9865_v35, %v9829_v11  ;;  %v9873_v34 = vmul.f32 %v9865_v35, %v9830_v29 }
0x1557   :  { %v9874_v16 = vadd.f32 %v21009_v54, %v9866_v53  ;;  %v9875_v17 = vadd.f32 %v21009_v54, %v9867_v40  ;;  %v9876_v47 = vadd.f32 %v21009_v54, %v9868_v28  ;;  %v9877_v43 = vadd.f32 %v21009_v54, %v9869_v30 }
0x1558   :  { %v9878_v36 = vadd.f32 %v21009_v54, %v9870_v45  ;;  %v9879_v57 = vadd.f32 %v21009_v54, %v9871_v46  ;;  %v9880_v14 = vadd.f32 %v21009_v54, %v9872_v33  ;;  %v9881_v51 = vadd.f32 %v21009_v54, %v9873_v34 }
0x1559   :  { %v9913_v10 = vadd.f32 %v10558_v1, %v9874_v16  ;;  %v9914_v8 = vadd.f32 %v10558_v1, %v9875_v17  ;;  %v9915_v2 = vadd.f32 %v10558_v1, %v9876_v47  ;;  %v9916_v5 = vadd.f32 %v10558_v1, %v9877_v43 }
0x155a   :  { %v9917_v52 = vadd.f32 %v10558_v1, %v9878_v36  ;;  %v9918_v25 = vadd.f32 %v10558_v1, %v9879_v57  ;;  %v9919_v6 = vadd.f32 %v10558_v1, %v9880_v14  ;;  %v9920_v24 = vadd.f32 %v10558_v1, %v9881_v51 }
0x155b   :  { %10559 = vst [vmem:[%s21112_s9 + $0x40] sm:$0xff] %v9913_v10  ;;  %10560 = vst [vmem:[%s21112_s9 + $0x48] sm:$0xff] %v9914_v8 }
0x155c   :  { %10561 = vst [vmem:[%s21112_s9 + $0x50] sm:$0xff] %v9915_v2  ;;  %10562 = vst [vmem:[%s21112_s9 + $0x58] sm:$0xff] %v9916_v5 }
0x155d   :  { %10563 = vst [vmem:[%s21112_s9 + $0x60] sm:$0xff] %v9917_v52  ;;  %10564 = vst [vmem:[%s21112_s9 + $0x68] sm:$0xff] %v9918_v25 }
0x155e   :  { %10565 = vst [vmem:[%s21112_s9 + $0x70] sm:$0xff] %v9919_v6  ;;  %10566 = vst [vmem:[%s21112_s9 + $0x78] sm:$0xff] %v9920_v24 }

</bundles_post_ra>
